<compile_context>
chip_gen: v6e
topology: v6e:2x2x1
jax: 0.10.0
libtpu: 0.0.40
codegen_flags: <defaults>
</compile_context>

<pallas_src>
import numpy as np
import jax
import jax.numpy as jnp
from jax.experimental import pallas as pl
from jax.experimental.pallas import tpu as pltpu

# ---- module hyper-parameters (small, consistent with the torch module) ----
NUM_QUBITS = 4
NUM_LAYERS = 2
NUM_REUP   = 2
DIM   = 2 ** NUM_QUBITS
LQ3   = NUM_LAYERS * NUM_QUBITS * 3          # = weights_shape.prod() = 24
FEAT  = LQ3 // NUM_REUP                      # per-sample input features = 12

SUB, LANE = 8, 128                           # one f32 vreg = (8, 128)
CHUNK = SUB * LANE                           # 1024 samples per packed vreg tile
MAX_CPT   = 32                               # chunks per grid step (1.5 MiB block)
MIN_TILES = 4                                # keep both v7x TCs fed + pipelined


def _cdiv(a, b):
    return -(-a // b)


# ---------- trace-time sentinel arithmetic (exact-zero / exact-one skipping) ----------
def _is0(x): return isinstance(x, float) and x == 0.0
def _is1(x): return isinstance(x, float) and x == 1.0

def _m(x, y):
    if _is0(x) or _is0(y): return 0.0
    if _is1(x): return y
    if _is1(y): return x
    return x * y

def _a(x, y):
    if _is0(x): return y
    if _is0(y): return x
    return x + y

def _neg(x):
    if _is0(x): return 0.0
    return -x

def _s(x, y):
    if _is0(y): return x
    if _is0(x): return _neg(y)
    return x - y


def _signed_sum(pos_terms, neg_terms):
    """sum(a*b for pos) - sum(a*b for neg), with trace-time 0/1 elimination.
    Signs are folded into a single subtract; no standalone negation vregs."""
    p = 0.0
    for a, b in pos_terms:
        p = _a(p, _m(a, b))
    n = 0.0
    for a, b in neg_terms:
        n = _a(n, _m(a, b))
    return _s(p, n)


def _rot_update(pct, sct, cst, sst, v0, v1):
    """Apply Rot(phi,theta,omega) (PennyLane convention) to the amplitude pair
    (v0, v1).  Gate entries:
        U00 = ( pct, -sct)   U01 = (-cst, -sst)
        U10 = ( cst, -sst)   U11 = ( pct,  sct)
    with pct=cos(hs)cos(ht), sct=sin(hs)cos(ht), cst=cos(hd)sin(ht),
    sst=sin(hd)sin(ht);  hs=(phi+omega)/2, hd=(phi-omega)/2, ht=theta/2.
    All signs are folded into the add/sub pattern below."""
    v0r, v0i = v0
    v1r, v1i = v1
    n0r = _signed_sum([(pct, v0r), (sct, v0i), (sst, v1i)], [(cst, v1r)])
    n0i = _signed_sum([(pct, v0i)], [(sct, v0r), (cst, v1i), (sst, v1r)])
    n1r = _signed_sum([(cst, v0r), (sst, v0i), (pct, v1r)], [(sct, v1i)])
    n1i = _signed_sum([(cst, v0i), (pct, v1i), (sct, v1r)], [(sst, v0r)])
    return (n0r, n0i), (n1r, n1i)


def reup_kernel(x_ref, w_ref, b_ref, out_ref):
    # x_ref  : (CPT, FEAT, 8, 128) f32 VMEM  (batch packed into vreg tiles)
    # w_ref  : (LQ3,)              f32 SMEM
    # b_ref  : (LQ3,)              f32 SMEM
    # out_ref: (CPT, 8, 128)       f32 VMEM  (<Z0 Z_{Q-1}> per sample)
    cpt = x_ref.shape[0]

    # ---- hoist all SMEM scalar reads + 0.5 pre-folding out of the chunk loop
    #      (scalar-unit work, done once per grid step; stays in sregs) ----
    gate_consts = []
    for l in range(NUM_LAYERS):
        for q in range(NUM_QUBITS):
            base = (l * NUM_QUBITS + q) * 3
            w_p = w_ref[base]; w_t = w_ref[base + 1]; w_o = w_ref[base + 2]
            b_p = b_ref[base]; b_t = b_ref[base + 1]; b_o = b_ref[base + 2]
            gate_consts.append((
                0.5 * w_p, 0.5 * w_t, 0.5 * w_o,          # half weights
                0.5 * b_t, 0.5 * (b_p + b_o), 0.5 * (b_p - b_o),  # half biases
                base))

    @pl.loop(0, cpt)          # keep rolled: live set is ~46/64 vregs already
    def _chunk(c):
        # |0...0> statevector with trace-time sparsity (Python float sentinels)
        re = [0.0] * DIM
        im = [0.0] * DIM
        re[0] = 1.0

        for l in range(NUM_LAYERS):
            # --- single-qubit Rot gates on every wire ---
            for q in range(NUM_QUBITS):
                hw_p, hw_t, hw_o, hb_t, hb_s, hb_d, base = \
                    gate_consts[l * NUM_QUBITS + q]
                # data re-uploading: parameter row -> feature row % FEAT
                x_p = x_ref[c, base % FEAT]            # (8,128) full-vreg tiles
                x_t = x_ref[c, (base + 1) % FEAT]
                x_o = x_ref[c, (base + 2) % FEAT]

                u = hw_p * x_p                          # 0.5*phi   contribution
                v = hw_o * x_o                          # 0.5*omega contribution
                half_theta = hw_t * x_t + hb_t
                half_sum = (u + v) + hb_s               # (phi+omega)/2
                half_dif = (u - v) + hb_d               # (phi-omega)/2

                ct = jnp.cos(half_theta); st = jnp.sin(half_theta)   # EUP
                cp = jnp.cos(half_sum);   sp = jnp.sin(half_sum)
                cm = jnp.cos(half_dif);   sm = jnp.sin(half_dif)
                pct = cp * ct; sct = sp * ct
                cst = cm * st; sst = sm * st

                bit = 1 << (NUM_QUBITS - 1 - q)         # wire 0 = MSB
                for s in range(DIM):
                    if s & bit:
                        continue
                    t = s | bit
                    (n0r, n0i), (n1r, n1i) = _rot_update(
                        pct, sct, cst, sst,
                        (re[s], im[s]), (re[t], im[t]))
                    re[s], im[s] = n0r, n0i
                    re[t], im[t] = n1r, n1i

            # --- entangling CNOT ring (range = (l % (Q-1)) + 1) ---
            # CNOTs are basis-state permutations -> pure trace-time relabeling.
            if NUM_QUBITS > 1:
                rng = (l % (NUM_QUBITS - 1)) + 1
                for i in range(NUM_QUBITS):
                    cbit = 1 << (NUM_QUBITS - 1 - i)
                    tbit = 1 << (NUM_QUBITS - 1 - ((i + rng) % NUM_QUBITS))
                    for s in range(DIM):
                        if (s & cbit) and not (s & tbit):
                            t = s | tbit
                            re[s], re[t] = re[t], re[s]
                            im[s], im[t] = im[t], im[s]

        # --- <Z_0 Z_{Q-1}> = 1 - 2 * sum_{parity=-1} |amp|^2  (unitarity) ---
        neg = 0.0
        for s in range(DIM):
            b0 = bool(s & (1 << (NUM_QUBITS - 1)))   # wire 0 bit
            bq = bool(s & 1)                         # wire Q-1 bit
            if b0 != bq:                             # parity -1 states only
                mag = _a(_m(re[s], re[s]), _m(im[s], im[s]))
                neg = _a(neg, mag)
        if isinstance(neg, float):                   # safety (can't happen L>=1)
            ev = jnp.full((SUB, LANE), 1.0 - 2.0 * neg, jnp.float32)
        else:
            ev = 1.0 - 2.0 * neg
        out_ref[c, :, :] = ev


def init_params(key):
    """Deterministic stand-in for 0.1 * torch.rand(weights_shape)."""
    kw, kb = jax.random.split(key)
    weights = 0.1 * jax.random.uniform(kw, (NUM_LAYERS, NUM_QUBITS, 3), jnp.float32)
    bias    = 0.1 * jax.random.uniform(kb, (NUM_LAYERS, NUM_QUBITS, 3), jnp.float32)
    return weights, bias


@jax.jit
def reuploading_forward(x, weights, bias):
    B, F = x.shape
    assert F == FEAT, f"expected feature dim {FEAT}, got {F}"
    x = x.astype(jnp.float32)

    # --- choose chunks-per-tile: balanced, <= MAX_CPT, and >= MIN_TILES tiles
    #     (when the batch allows) so both v7x TensorCores get >= 2 steps ---
    n_chunks = _cdiv(B, CHUNK)
    n_tiles = max(min(n_chunks, MIN_TILES), _cdiv(n_chunks, MAX_CPT))
    cpt = _cdiv(n_chunks, n_tiles)
    n_tiles = _cdiv(n_chunks, cpt)
    n_chunks_pad = n_tiles * cpt
    b_pad = n_chunks_pad * CHUNK

    # --- pack batch into feature-major (chunk, FEAT, 8, 128) vreg tiles ---
    # allow_input_fusion lets XLA fuse this pad/reshape/transpose into the
    # pallas_call input DMA instead of a standalone HBM round-trip.
    xp = jnp.pad(x, ((0, b_pad - B), (0, 0)))                        # (b_pad, FEAT)
    xa = xp.reshape(n_chunks_pad, SUB, LANE, FEAT).transpose(0, 3, 1, 2)

    out = pl.pallas_call(
        reup_kernel,
        out_shape=jax.ShapeDtypeStruct((n_chunks_pad, SUB, LANE), jnp.float32),
        grid=(n_tiles,),
        in_specs=[
            pl.BlockSpec((cpt, FEAT, SUB, LANE), lambda i: (i, 0, 0, 0)),
            pl.BlockSpec(memory_space=pltpu.MemorySpace.SMEM),
            pl.BlockSpec(memory_space=pltpu.MemorySpace.SMEM),
        ],
        out_specs=pl.BlockSpec((cpt, SUB, LANE), lambda i: (i, 0, 0)),
        compiler_params=pltpu.CompilerParams(
            dimension_semantics=("parallel",),
            allow_input_fusion=[True, False, False]),
    )(xa, weights.reshape(-1), bias.reshape(-1))

    return out.reshape(-1)[:B]


def reference_forward(x, weights, bias):
    """Pure numpy complex128 statevector reference (per-sample, like TorchLayer)."""
    x = np.asarray(x, np.float64)
    w = np.asarray(weights, np.float64).reshape(-1)
    b = np.asarray(bias, np.float64).reshape(-1)
    out = np.zeros(x.shape[0])
    for n in range(x.shape[0]):
        xs = np.concatenate([x[n]] * NUM_REUP)
        ang = (w * xs + b).reshape(NUM_LAYERS, NUM_QUBITS, 3)
        state = np.zeros(DIM, np.complex128)
        state[0] = 1.0
        for l in range(NUM_LAYERS):
            for q in range(NUM_QUBITS):
                phi, theta, omega = ang[l, q]
                ct, st = np.cos(theta / 2), np.sin(theta / 2)
                U = np.array([[np.exp(-1j * (phi + omega) / 2) * ct,
                               -np.exp(1j * (phi - omega) / 2) * st],
                              [np.exp(-1j * (phi - omega) / 2) * st,
                               np.exp(1j * (phi + omega) / 2) * ct]])
                bit = 1 << (NUM_QUBITS - 1 - q)
                new = state.copy()
                for s in range(DIM):
                    if s & bit:
                        continue
                    t = s | bit
                    new[s], new[t] = U @ np.array([state[s], state[t]])
                state = new
            rng = (l % (NUM_QUBITS - 1)) + 1
            for i in range(NUM_QUBITS):
                ctrl, targ = i, (i + rng) % NUM_QUBITS
                cbit = 1 << (NUM_QUBITS - 1 - ctrl)
                tbit = 1 << (NUM_QUBITS - 1 - targ)
                new = state.copy()
                for s in range(DIM):
                    if (s & cbit) and not (s & tbit):
                        t = s | tbit
                        new[s], new[t] = state[t], state[s]
                state = new
        ev = 0.0
        for s in range(DIM):
            z = 1.0
            if s & (1 << (NUM_QUBITS - 1)):
                z = -z
            if s & 1:
                z = -z
            ev += z * abs(state[s]) ** 2
        out[n] = ev
    return out


if __name__ == "__main__":
    key = jax.random.PRNGKey(0)
    kp, kx = jax.random.split(key)
    weights, bias = init_params(kp)

    # --- small batch: full reference check (single grid tile, padded chunk) ---
    B = 8
    x = jax.random.normal(kx, (B, FEAT), dtype=jnp.float32)
    y = jax.block_until_ready(reuploading_forward(x, weights, bias))
    y_ref = reference_forward(np.asarray(x), np.asarray(weights), np.asarray(bias))
    np.testing.assert_allclose(np.asarray(y), y_ref, rtol=1e-4, atol=1e-4)

    # --- multi-tile batch (exercises megacore sharding + padding/unpadding);
    #     spot-check first/last samples against the reference ---
    B2 = 2053
    x2 = jax.random.normal(jax.random.PRNGKey(1), (B2, FEAT), dtype=jnp.float32)
    y2 = jax.block_until_ready(reuploading_forward(x2, weights, bias))
    x2_np = np.asarray(x2)
    head_ref = reference_forward(x2_np[:8], np.asarray(weights), np.asarray(bias))
    tail_ref = reference_forward(x2_np[-8:], np.asarray(weights), np.asarray(bias))
    np.testing.assert_allclose(np.asarray(y2[:8]),  head_ref, rtol=1e-4, atol=1e-4)
    np.testing.assert_allclose(np.asarray(y2[-8:]), tail_ref, rtol=1e-4, atol=1e-4)

    print("KERNEL_OK")
</pallas_src>

<mosaic_0001>
module attributes {stable_mosaic.version = 11 : i64} {
  func.func @reup_kernel(%arg0: i32, %arg1: memref<1x12x8x128xf32, #tpu.memory_space<vmem>>, %arg2: memref<24xf32, #tpu.memory_space<smem>>, %arg3: memref<24xf32, #tpu.memory_space<smem>>, %arg4: memref<1x8x128xf32, #tpu.memory_space<vmem>>) attributes {dimension_semantics = [#tpu.dimension_semantics<parallel>], iteration_bounds = array<i64: 1>, scalar_prefetch = 0 : i64, scratch_operands = 0 : i64, tpu.core_type = #tpu.core_type<tc>, window_params = [{transform_indices = @transform_0, window_bounds = array<i64: 1, 12, 8, 128>}, {transform_indices = @transform_1, window_bounds = array<i64: 24>}, {transform_indices = @transform_2, window_bounds = array<i64: 24>}, {transform_indices = @transform_3, window_bounds = array<i64: 1, 8, 128>}]} {
    %c0 = arith.constant 0 : index
    %0 = memref.load %arg2[%c0] : memref<24xf32, #tpu.memory_space<smem>>
    %c1 = arith.constant 1 : index
    %1 = memref.load %arg2[%c1] : memref<24xf32, #tpu.memory_space<smem>>
    %c2 = arith.constant 2 : index
    %2 = memref.load %arg2[%c2] : memref<24xf32, #tpu.memory_space<smem>>
    %c0_0 = arith.constant 0 : index
    %3 = memref.load %arg3[%c0_0] : memref<24xf32, #tpu.memory_space<smem>>
    %c1_1 = arith.constant 1 : index
    %4 = memref.load %arg3[%c1_1] : memref<24xf32, #tpu.memory_space<smem>>
    %c2_2 = arith.constant 2 : index
    %5 = memref.load %arg3[%c2_2] : memref<24xf32, #tpu.memory_space<smem>>
    %cst = arith.constant 5.000000e-01 : f32
    %6 = arith.mulf %cst, %0 : f32
    %cst_3 = arith.constant 5.000000e-01 : f32
    %7 = arith.mulf %cst_3, %1 : f32
    %cst_4 = arith.constant 5.000000e-01 : f32
    %8 = arith.mulf %cst_4, %2 : f32
    %cst_5 = arith.constant 5.000000e-01 : f32
    %9 = arith.mulf %cst_5, %4 : f32
    %10 = arith.addf %3, %5 : f32
    %cst_6 = arith.constant 5.000000e-01 : f32
    %11 = arith.mulf %cst_6, %10 : f32
    %12 = arith.subf %3, %5 : f32
    %cst_7 = arith.constant 5.000000e-01 : f32
    %13 = arith.mulf %cst_7, %12 : f32
    %c3 = arith.constant 3 : index
    %14 = memref.load %arg2[%c3] : memref<24xf32, #tpu.memory_space<smem>>
    %c4 = arith.constant 4 : index
    %15 = memref.load %arg2[%c4] : memref<24xf32, #tpu.memory_space<smem>>
    %c5 = arith.constant 5 : index
    %16 = memref.load %arg2[%c5] : memref<24xf32, #tpu.memory_space<smem>>
    %c3_8 = arith.constant 3 : index
    %17 = memref.load %arg3[%c3_8] : memref<24xf32, #tpu.memory_space<smem>>
    %c4_9 = arith.constant 4 : index
    %18 = memref.load %arg3[%c4_9] : memref<24xf32, #tpu.memory_space<smem>>
    %c5_10 = arith.constant 5 : index
    %19 = memref.load %arg3[%c5_10] : memref<24xf32, #tpu.memory_space<smem>>
    %cst_11 = arith.constant 5.000000e-01 : f32
    %20 = arith.mulf %cst_11, %14 : f32
    %cst_12 = arith.constant 5.000000e-01 : f32
    %21 = arith.mulf %cst_12, %15 : f32
    %cst_13 = arith.constant 5.000000e-01 : f32
    %22 = arith.mulf %cst_13, %16 : f32
    %cst_14 = arith.constant 5.000000e-01 : f32
    %23 = arith.mulf %cst_14, %18 : f32
    %24 = arith.addf %17, %19 : f32
    %cst_15 = arith.constant 5.000000e-01 : f32
    %25 = arith.mulf %cst_15, %24 : f32
    %26 = arith.subf %17, %19 : f32
    %cst_16 = arith.constant 5.000000e-01 : f32
    %27 = arith.mulf %cst_16, %26 : f32
    %c6 = arith.constant 6 : index
    %28 = memref.load %arg2[%c6] : memref<24xf32, #tpu.memory_space<smem>>
    %c7 = arith.constant 7 : index
    %29 = memref.load %arg2[%c7] : memref<24xf32, #tpu.memory_space<smem>>
    %c8 = arith.constant 8 : index
    %30 = memref.load %arg2[%c8] : memref<24xf32, #tpu.memory_space<smem>>
    %c6_17 = arith.constant 6 : index
    %31 = memref.load %arg3[%c6_17] : memref<24xf32, #tpu.memory_space<smem>>
    %c7_18 = arith.constant 7 : index
    %32 = memref.load %arg3[%c7_18] : memref<24xf32, #tpu.memory_space<smem>>
    %c8_19 = arith.constant 8 : index
    %33 = memref.load %arg3[%c8_19] : memref<24xf32, #tpu.memory_space<smem>>
    %cst_20 = arith.constant 5.000000e-01 : f32
    %34 = arith.mulf %cst_20, %28 : f32
    %cst_21 = arith.constant 5.000000e-01 : f32
    %35 = arith.mulf %cst_21, %29 : f32
    %cst_22 = arith.constant 5.000000e-01 : f32
    %36 = arith.mulf %cst_22, %30 : f32
    %cst_23 = arith.constant 5.000000e-01 : f32
    %37 = arith.mulf %cst_23, %32 : f32
    %38 = arith.addf %31, %33 : f32
    %cst_24 = arith.constant 5.000000e-01 : f32
    %39 = arith.mulf %cst_24, %38 : f32
    %40 = arith.subf %31, %33 : f32
    %cst_25 = arith.constant 5.000000e-01 : f32
    %41 = arith.mulf %cst_25, %40 : f32
    %c9 = arith.constant 9 : index
    %42 = memref.load %arg2[%c9] : memref<24xf32, #tpu.memory_space<smem>>
    %c10 = arith.constant 10 : index
    %43 = memref.load %arg2[%c10] : memref<24xf32, #tpu.memory_space<smem>>
    %c11 = arith.constant 11 : index
    %44 = memref.load %arg2[%c11] : memref<24xf32, #tpu.memory_space<smem>>
    %c9_26 = arith.constant 9 : index
    %45 = memref.load %arg3[%c9_26] : memref<24xf32, #tpu.memory_space<smem>>
    %c10_27 = arith.constant 10 : index
    %46 = memref.load %arg3[%c10_27] : memref<24xf32, #tpu.memory_space<smem>>
    %c11_28 = arith.constant 11 : index
    %47 = memref.load %arg3[%c11_28] : memref<24xf32, #tpu.memory_space<smem>>
    %cst_29 = arith.constant 5.000000e-01 : f32
    %48 = arith.mulf %cst_29, %42 : f32
    %cst_30 = arith.constant 5.000000e-01 : f32
    %49 = arith.mulf %cst_30, %43 : f32
    %cst_31 = arith.constant 5.000000e-01 : f32
    %50 = arith.mulf %cst_31, %44 : f32
    %cst_32 = arith.constant 5.000000e-01 : f32
    %51 = arith.mulf %cst_32, %46 : f32
    %52 = arith.addf %45, %47 : f32
    %cst_33 = arith.constant 5.000000e-01 : f32
    %53 = arith.mulf %cst_33, %52 : f32
    %54 = arith.subf %45, %47 : f32
    %cst_34 = arith.constant 5.000000e-01 : f32
    %55 = arith.mulf %cst_34, %54 : f32
    %c12 = arith.constant 12 : index
    %56 = memref.load %arg2[%c12] : memref<24xf32, #tpu.memory_space<smem>>
    %c13 = arith.constant 13 : index
    %57 = memref.load %arg2[%c13] : memref<24xf32, #tpu.memory_space<smem>>
    %c14 = arith.constant 14 : index
    %58 = memref.load %arg2[%c14] : memref<24xf32, #tpu.memory_space<smem>>
    %c12_35 = arith.constant 12 : index
    %59 = memref.load %arg3[%c12_35] : memref<24xf32, #tpu.memory_space<smem>>
    %c13_36 = arith.constant 13 : index
    %60 = memref.load %arg3[%c13_36] : memref<24xf32, #tpu.memory_space<smem>>
    %c14_37 = arith.constant 14 : index
    %61 = memref.load %arg3[%c14_37] : memref<24xf32, #tpu.memory_space<smem>>
    %cst_38 = arith.constant 5.000000e-01 : f32
    %62 = arith.mulf %cst_38, %56 : f32
    %cst_39 = arith.constant 5.000000e-01 : f32
    %63 = arith.mulf %cst_39, %57 : f32
    %cst_40 = arith.constant 5.000000e-01 : f32
    %64 = arith.mulf %cst_40, %58 : f32
    %cst_41 = arith.constant 5.000000e-01 : f32
    %65 = arith.mulf %cst_41, %60 : f32
    %66 = arith.addf %59, %61 : f32
    %cst_42 = arith.constant 5.000000e-01 : f32
    %67 = arith.mulf %cst_42, %66 : f32
    %68 = arith.subf %59, %61 : f32
    %cst_43 = arith.constant 5.000000e-01 : f32
    %69 = arith.mulf %cst_43, %68 : f32
    %c15 = arith.constant 15 : index
    %70 = memref.load %arg2[%c15] : memref<24xf32, #tpu.memory_space<smem>>
    %c16 = arith.constant 16 : index
    %71 = memref.load %arg2[%c16] : memref<24xf32, #tpu.memory_space<smem>>
    %c17 = arith.constant 17 : index
    %72 = memref.load %arg2[%c17] : memref<24xf32, #tpu.memory_space<smem>>
    %c15_44 = arith.constant 15 : index
    %73 = memref.load %arg3[%c15_44] : memref<24xf32, #tpu.memory_space<smem>>
    %c16_45 = arith.constant 16 : index
    %74 = memref.load %arg3[%c16_45] : memref<24xf32, #tpu.memory_space<smem>>
    %c17_46 = arith.constant 17 : index
    %75 = memref.load %arg3[%c17_46] : memref<24xf32, #tpu.memory_space<smem>>
    %cst_47 = arith.constant 5.000000e-01 : f32
    %76 = arith.mulf %cst_47, %70 : f32
    %cst_48 = arith.constant 5.000000e-01 : f32
    %77 = arith.mulf %cst_48, %71 : f32
    %cst_49 = arith.constant 5.000000e-01 : f32
    %78 = arith.mulf %cst_49, %72 : f32
    %cst_50 = arith.constant 5.000000e-01 : f32
    %79 = arith.mulf %cst_50, %74 : f32
    %80 = arith.addf %73, %75 : f32
    %cst_51 = arith.constant 5.000000e-01 : f32
    %81 = arith.mulf %cst_51, %80 : f32
    %82 = arith.subf %73, %75 : f32
    %cst_52 = arith.constant 5.000000e-01 : f32
    %83 = arith.mulf %cst_52, %82 : f32
    %c18 = arith.constant 18 : index
    %84 = memref.load %arg2[%c18] : memref<24xf32, #tpu.memory_space<smem>>
    %c19 = arith.constant 19 : index
    %85 = memref.load %arg2[%c19] : memref<24xf32, #tpu.memory_space<smem>>
    %c20 = arith.constant 20 : index
    %86 = memref.load %arg2[%c20] : memref<24xf32, #tpu.memory_space<smem>>
    %c18_53 = arith.constant 18 : index
    %87 = memref.load %arg3[%c18_53] : memref<24xf32, #tpu.memory_space<smem>>
    %c19_54 = arith.constant 19 : index
    %88 = memref.load %arg3[%c19_54] : memref<24xf32, #tpu.memory_space<smem>>
    %c20_55 = arith.constant 20 : index
    %89 = memref.load %arg3[%c20_55] : memref<24xf32, #tpu.memory_space<smem>>
    %cst_56 = arith.constant 5.000000e-01 : f32
    %90 = arith.mulf %cst_56, %84 : f32
    %cst_57 = arith.constant 5.000000e-01 : f32
    %91 = arith.mulf %cst_57, %85 : f32
    %cst_58 = arith.constant 5.000000e-01 : f32
    %92 = arith.mulf %cst_58, %86 : f32
    %cst_59 = arith.constant 5.000000e-01 : f32
    %93 = arith.mulf %cst_59, %88 : f32
    %94 = arith.addf %87, %89 : f32
    %cst_60 = arith.constant 5.000000e-01 : f32
    %95 = arith.mulf %cst_60, %94 : f32
    %96 = arith.subf %87, %89 : f32
    %cst_61 = arith.constant 5.000000e-01 : f32
    %97 = arith.mulf %cst_61, %96 : f32
    %c21 = arith.constant 21 : index
    %98 = memref.load %arg2[%c21] : memref<24xf32, #tpu.memory_space<smem>>
    %c22 = arith.constant 22 : index
    %99 = memref.load %arg2[%c22] : memref<24xf32, #tpu.memory_space<smem>>
    %c23 = arith.constant 23 : index
    %100 = memref.load %arg2[%c23] : memref<24xf32, #tpu.memory_space<smem>>
    %c21_62 = arith.constant 21 : index
    %101 = memref.load %arg3[%c21_62] : memref<24xf32, #tpu.memory_space<smem>>
    %c22_63 = arith.constant 22 : index
    %102 = memref.load %arg3[%c22_63] : memref<24xf32, #tpu.memory_space<smem>>
    %c23_64 = arith.constant 23 : index
    %103 = memref.load %arg3[%c23_64] : memref<24xf32, #tpu.memory_space<smem>>
    %cst_65 = arith.constant 5.000000e-01 : f32
    %104 = arith.mulf %cst_65, %98 : f32
    %cst_66 = arith.constant 5.000000e-01 : f32
    %105 = arith.mulf %cst_66, %99 : f32
    %cst_67 = arith.constant 5.000000e-01 : f32
    %106 = arith.mulf %cst_67, %100 : f32
    %cst_68 = arith.constant 5.000000e-01 : f32
    %107 = arith.mulf %cst_68, %102 : f32
    %108 = arith.addf %101, %103 : f32
    %cst_69 = arith.constant 5.000000e-01 : f32
    %109 = arith.mulf %cst_69, %108 : f32
    %110 = arith.subf %101, %103 : f32
    %cst_70 = arith.constant 5.000000e-01 : f32
    %111 = arith.mulf %cst_70, %110 : f32
    %c0_i32 = arith.constant 0 : i32
    %c1_i32 = arith.constant 1 : i32
    %112 = arith.muli %c0_i32, %c1_i32 : i32
    %c0_i32_71 = arith.constant 0 : i32
    %113 = arith.addi %c0_i32_71, %112 : i32
    %114 = arith.index_cast %113 : i32 to index
    %c0_72 = arith.constant 0 : index
    %c0_73 = arith.constant 0 : index
    %c0_74 = arith.constant 0 : index
    %115 = vector.load %arg1[%114, %c0_72, %c0_73, %c0_74] : memref<1x12x8x128xf32, #tpu.memory_space<vmem>>, vector<1x1x8x128xf32>
    %116 = vector.shape_cast %115 : vector<1x1x8x128xf32> to vector<8x128xf32>
    %117 = arith.index_cast %113 : i32 to index
    %c1_75 = arith.constant 1 : index
    %c0_76 = arith.constant 0 : index
    %c0_77 = arith.constant 0 : index
    %118 = vector.load %arg1[%117, %c1_75, %c0_76, %c0_77] : memref<1x12x8x128xf32, #tpu.memory_space<vmem>>, vector<1x1x8x128xf32>
    %119 = vector.shape_cast %118 : vector<1x1x8x128xf32> to vector<8x128xf32>
    %120 = arith.index_cast %113 : i32 to index
    %c2_78 = arith.constant 2 : index
    %c0_79 = arith.constant 0 : index
    %c0_80 = arith.constant 0 : index
    %121 = vector.load %arg1[%120, %c2_78, %c0_79, %c0_80] : memref<1x12x8x128xf32, #tpu.memory_space<vmem>>, vector<1x1x8x128xf32>
    %122 = vector.shape_cast %121 : vector<1x1x8x128xf32> to vector<8x128xf32>
    %123 = vector.broadcast %6 : f32 to vector<8x128xf32>
    %124 = arith.mulf %123, %116 : vector<8x128xf32>
    %125 = vector.broadcast %8 : f32 to vector<8x128xf32>
    %126 = arith.mulf %125, %122 : vector<8x128xf32>
    %127 = vector.broadcast %7 : f32 to vector<8x128xf32>
    %128 = arith.mulf %127, %119 : vector<8x128xf32>
    %129 = vector.broadcast %9 : f32 to vector<8x128xf32>
    %130 = arith.addf %128, %129 : vector<8x128xf32>
    %131 = arith.addf %124, %126 : vector<8x128xf32>
    %132 = vector.broadcast %11 : f32 to vector<8x128xf32>
    %133 = arith.addf %131, %132 : vector<8x128xf32>
    %134 = arith.subf %124, %126 : vector<8x128xf32>
    %135 = vector.broadcast %13 : f32 to vector<8x128xf32>
    %136 = arith.addf %134, %135 : vector<8x128xf32>
    %137 = math.cos %130 : vector<8x128xf32>
    %138 = math.sin %130 : vector<8x128xf32>
    %139 = math.cos %133 : vector<8x128xf32>
    %140 = math.sin %133 : vector<8x128xf32>
    %141 = math.cos %136 : vector<8x128xf32>
    %142 = math.sin %136 : vector<8x128xf32>
    %143 = arith.mulf %139, %137 : vector<8x128xf32>
    %144 = arith.mulf %140, %137 : vector<8x128xf32>
    %145 = arith.mulf %141, %138 : vector<8x128xf32>
    %146 = arith.mulf %142, %138 : vector<8x128xf32>
    %cst_81 = arith.constant 0.000000e+00 : f32
    %147 = vector.broadcast %cst_81 : f32 to vector<8x128xf32>
    %148 = arith.subf %147, %144 : vector<8x128xf32>
    %cst_82 = arith.constant 0.000000e+00 : f32
    %149 = vector.broadcast %cst_82 : f32 to vector<8x128xf32>
    %150 = arith.subf %149, %146 : vector<8x128xf32>
    %151 = arith.index_cast %113 : i32 to index
    %c3_83 = arith.constant 3 : index
    %c0_84 = arith.constant 0 : index
    %c0_85 = arith.constant 0 : index
    %152 = vector.load %arg1[%151, %c3_83, %c0_84, %c0_85] : memref<1x12x8x128xf32, #tpu.memory_space<vmem>>, vector<1x1x8x128xf32>
    %153 = vector.shape_cast %152 : vector<1x1x8x128xf32> to vector<8x128xf32>
    %154 = arith.index_cast %113 : i32 to index
    %c4_86 = arith.constant 4 : index
    %c0_87 = arith.constant 0 : index
    %c0_88 = arith.constant 0 : index
    %155 = vector.load %arg1[%154, %c4_86, %c0_87, %c0_88] : memref<1x12x8x128xf32, #tpu.memory_space<vmem>>, vector<1x1x8x128xf32>
    %156 = vector.shape_cast %155 : vector<1x1x8x128xf32> to vector<8x128xf32>
    %157 = arith.index_cast %113 : i32 to index
    %c5_89 = arith.constant 5 : index
    %c0_90 = arith.constant 0 : index
    %c0_91 = arith.constant 0 : index
    %158 = vector.load %arg1[%157, %c5_89, %c0_90, %c0_91] : memref<1x12x8x128xf32, #tpu.memory_space<vmem>>, vector<1x1x8x128xf32>
    %159 = vector.shape_cast %158 : vector<1x1x8x128xf32> to vector<8x128xf32>
    %160 = vector.broadcast %20 : f32 to vector<8x128xf32>
    %161 = arith.mulf %160, %153 : vector<8x128xf32>
    %162 = vector.broadcast %22 : f32 to vector<8x128xf32>
    %163 = arith.mulf %162, %159 : vector<8x128xf32>
    %164 = vector.broadcast %21 : f32 to vector<8x128xf32>
    %165 = arith.mulf %164, %156 : vector<8x128xf32>
    %166 = vector.broadcast %23 : f32 to vector<8x128xf32>
    %167 = arith.addf %165, %166 : vector<8x128xf32>
    %168 = arith.addf %161, %163 : vector<8x128xf32>
    %169 = vector.broadcast %25 : f32 to vector<8x128xf32>
    %170 = arith.addf %168, %169 : vector<8x128xf32>
    %171 = arith.subf %161, %163 : vector<8x128xf32>
    %172 = vector.broadcast %27 : f32 to vector<8x128xf32>
    %173 = arith.addf %171, %172 : vector<8x128xf32>
    %174 = math.cos %167 : vector<8x128xf32>
    %175 = math.sin %167 : vector<8x128xf32>
    %176 = math.cos %170 : vector<8x128xf32>
    %177 = math.sin %170 : vector<8x128xf32>
    %178 = math.cos %173 : vector<8x128xf32>
    %179 = math.sin %173 : vector<8x128xf32>
    %180 = arith.mulf %176, %174 : vector<8x128xf32>
    %181 = arith.mulf %177, %174 : vector<8x128xf32>
    %182 = arith.mulf %178, %175 : vector<8x128xf32>
    %183 = arith.mulf %179, %175 : vector<8x128xf32>
    %184 = arith.mulf %180, %143 : vector<8x128xf32>
    %185 = arith.mulf %181, %148 : vector<8x128xf32>
    %186 = arith.addf %184, %185 : vector<8x128xf32>
    %187 = arith.mulf %180, %148 : vector<8x128xf32>
    %188 = arith.mulf %181, %143 : vector<8x128xf32>
    %189 = arith.subf %187, %188 : vector<8x128xf32>
    %190 = arith.mulf %182, %143 : vector<8x128xf32>
    %191 = arith.mulf %183, %148 : vector<8x128xf32>
    %192 = arith.addf %190, %191 : vector<8x128xf32>
    %193 = arith.mulf %182, %148 : vector<8x128xf32>
    %194 = arith.mulf %183, %143 : vector<8x128xf32>
    %195 = arith.subf %193, %194 : vector<8x128xf32>
    %196 = arith.mulf %180, %145 : vector<8x128xf32>
    %197 = arith.mulf %181, %150 : vector<8x128xf32>
    %198 = arith.addf %196, %197 : vector<8x128xf32>
    %199 = arith.mulf %180, %150 : vector<8x128xf32>
    %200 = arith.mulf %181, %145 : vector<8x128xf32>
    %201 = arith.subf %199, %200 : vector<8x128xf32>
    %202 = arith.mulf %182, %145 : vector<8x128xf32>
    %203 = arith.mulf %183, %150 : vector<8x128xf32>
    %204 = arith.addf %202, %203 : vector<8x128xf32>
    %205 = arith.mulf %182, %150 : vector<8x128xf32>
    %206 = arith.mulf %183, %145 : vector<8x128xf32>
    %207 = arith.subf %205, %206 : vector<8x128xf32>
    %208 = arith.index_cast %113 : i32 to index
    %c6_92 = arith.constant 6 : index
    %c0_93 = arith.constant 0 : index
    %c0_94 = arith.constant 0 : index
    %209 = vector.load %arg1[%208, %c6_92, %c0_93, %c0_94] : memref<1x12x8x128xf32, #tpu.memory_space<vmem>>, vector<1x1x8x128xf32>
    %210 = vector.shape_cast %209 : vector<1x1x8x128xf32> to vector<8x128xf32>
    %211 = arith.index_cast %113 : i32 to index
    %c7_95 = arith.constant 7 : index
    %c0_96 = arith.constant 0 : index
    %c0_97 = arith.constant 0 : index
    %212 = vector.load %arg1[%211, %c7_95, %c0_96, %c0_97] : memref<1x12x8x128xf32, #tpu.memory_space<vmem>>, vector<1x1x8x128xf32>
    %213 = vector.shape_cast %212 : vector<1x1x8x128xf32> to vector<8x128xf32>
    %214 = arith.index_cast %113 : i32 to index
    %c8_98 = arith.constant 8 : index
    %c0_99 = arith.constant 0 : index
    %c0_100 = arith.constant 0 : index
    %215 = vector.load %arg1[%214, %c8_98, %c0_99, %c0_100] : memref<1x12x8x128xf32, #tpu.memory_space<vmem>>, vector<1x1x8x128xf32>
    %216 = vector.shape_cast %215 : vector<1x1x8x128xf32> to vector<8x128xf32>
    %217 = vector.broadcast %34 : f32 to vector<8x128xf32>
    %218 = arith.mulf %217, %210 : vector<8x128xf32>
    %219 = vector.broadcast %36 : f32 to vector<8x128xf32>
    %220 = arith.mulf %219, %216 : vector<8x128xf32>
    %221 = vector.broadcast %35 : f32 to vector<8x128xf32>
    %222 = arith.mulf %221, %213 : vector<8x128xf32>
    %223 = vector.broadcast %37 : f32 to vector<8x128xf32>
    %224 = arith.addf %222, %223 : vector<8x128xf32>
    %225 = arith.addf %218, %220 : vector<8x128xf32>
    %226 = vector.broadcast %39 : f32 to vector<8x128xf32>
    %227 = arith.addf %225, %226 : vector<8x128xf32>
    %228 = arith.subf %218, %220 : vector<8x128xf32>
    %229 = vector.broadcast %41 : f32 to vector<8x128xf32>
    %230 = arith.addf %228, %229 : vector<8x128xf32>
    %231 = math.cos %224 : vector<8x128xf32>
    %232 = math.sin %224 : vector<8x128xf32>
    %233 = math.cos %227 : vector<8x128xf32>
    %234 = math.sin %227 : vector<8x128xf32>
    %235 = math.cos %230 : vector<8x128xf32>
    %236 = math.sin %230 : vector<8x128xf32>
    %237 = arith.mulf %233, %231 : vector<8x128xf32>
    %238 = arith.mulf %234, %231 : vector<8x128xf32>
    %239 = arith.mulf %235, %232 : vector<8x128xf32>
    %240 = arith.mulf %236, %232 : vector<8x128xf32>
    %241 = arith.mulf %237, %186 : vector<8x128xf32>
    %242 = arith.mulf %238, %189 : vector<8x128xf32>
    %243 = arith.addf %241, %242 : vector<8x128xf32>
    %244 = arith.mulf %237, %189 : vector<8x128xf32>
    %245 = arith.mulf %238, %186 : vector<8x128xf32>
    %246 = arith.subf %244, %245 : vector<8x128xf32>
    %247 = arith.mulf %239, %186 : vector<8x128xf32>
    %248 = arith.mulf %240, %189 : vector<8x128xf32>
    %249 = arith.addf %247, %248 : vector<8x128xf32>
    %250 = arith.mulf %239, %189 : vector<8x128xf32>
    %251 = arith.mulf %240, %186 : vector<8x128xf32>
    %252 = arith.subf %250, %251 : vector<8x128xf32>
    %253 = arith.mulf %237, %192 : vector<8x128xf32>
    %254 = arith.mulf %238, %195 : vector<8x128xf32>
    %255 = arith.addf %253, %254 : vector<8x128xf32>
    %256 = arith.mulf %237, %195 : vector<8x128xf32>
    %257 = arith.mulf %238, %192 : vector<8x128xf32>
    %258 = arith.subf %256, %257 : vector<8x128xf32>
    %259 = arith.mulf %239, %192 : vector<8x128xf32>
    %260 = arith.mulf %240, %195 : vector<8x128xf32>
    %261 = arith.addf %259, %260 : vector<8x128xf32>
    %262 = arith.mulf %239, %195 : vector<8x128xf32>
    %263 = arith.mulf %240, %192 : vector<8x128xf32>
    %264 = arith.subf %262, %263 : vector<8x128xf32>
    %265 = arith.mulf %237, %198 : vector<8x128xf32>
    %266 = arith.mulf %238, %201 : vector<8x128xf32>
    %267 = arith.addf %265, %266 : vector<8x128xf32>
    %268 = arith.mulf %237, %201 : vector<8x128xf32>
    %269 = arith.mulf %238, %198 : vector<8x128xf32>
    %270 = arith.subf %268, %269 : vector<8x128xf32>
    %271 = arith.mulf %239, %198 : vector<8x128xf32>
    %272 = arith.mulf %240, %201 : vector<8x128xf32>
    %273 = arith.addf %271, %272 : vector<8x128xf32>
    %274 = arith.mulf %239, %201 : vector<8x128xf32>
    %275 = arith.mulf %240, %198 : vector<8x128xf32>
    %276 = arith.subf %274, %275 : vector<8x128xf32>
    %277 = arith.mulf %237, %204 : vector<8x128xf32>
    %278 = arith.mulf %238, %207 : vector<8x128xf32>
    %279 = arith.addf %277, %278 : vector<8x128xf32>
    %280 = arith.mulf %237, %207 : vector<8x128xf32>
    %281 = arith.mulf %238, %204 : vector<8x128xf32>
    %282 = arith.subf %280, %281 : vector<8x128xf32>
    %283 = arith.mulf %239, %204 : vector<8x128xf32>
    %284 = arith.mulf %240, %207 : vector<8x128xf32>
    %285 = arith.addf %283, %284 : vector<8x128xf32>
    %286 = arith.mulf %239, %207 : vector<8x128xf32>
    %287 = arith.mulf %240, %204 : vector<8x128xf32>
    %288 = arith.subf %286, %287 : vector<8x128xf32>
    %289 = arith.index_cast %113 : i32 to index
    %c9_101 = arith.constant 9 : index
    %c0_102 = arith.constant 0 : index
    %c0_103 = arith.constant 0 : index
    %290 = vector.load %arg1[%289, %c9_101, %c0_102, %c0_103] : memref<1x12x8x128xf32, #tpu.memory_space<vmem>>, vector<1x1x8x128xf32>
    %291 = vector.shape_cast %290 : vector<1x1x8x128xf32> to vector<8x128xf32>
    %292 = arith.index_cast %113 : i32 to index
    %c10_104 = arith.constant 10 : index
    %c0_105 = arith.constant 0 : index
    %c0_106 = arith.constant 0 : index
    %293 = vector.load %arg1[%292, %c10_104, %c0_105, %c0_106] : memref<1x12x8x128xf32, #tpu.memory_space<vmem>>, vector<1x1x8x128xf32>
    %294 = vector.shape_cast %293 : vector<1x1x8x128xf32> to vector<8x128xf32>
    %295 = arith.index_cast %113 : i32 to index
    %c11_107 = arith.constant 11 : index
    %c0_108 = arith.constant 0 : index
    %c0_109 = arith.constant 0 : index
    %296 = vector.load %arg1[%295, %c11_107, %c0_108, %c0_109] : memref<1x12x8x128xf32, #tpu.memory_space<vmem>>, vector<1x1x8x128xf32>
    %297 = vector.shape_cast %296 : vector<1x1x8x128xf32> to vector<8x128xf32>
    %298 = vector.broadcast %48 : f32 to vector<8x128xf32>
    %299 = arith.mulf %298, %291 : vector<8x128xf32>
    %300 = vector.broadcast %50 : f32 to vector<8x128xf32>
    %301 = arith.mulf %300, %297 : vector<8x128xf32>
    %302 = vector.broadcast %49 : f32 to vector<8x128xf32>
    %303 = arith.mulf %302, %294 : vector<8x128xf32>
    %304 = vector.broadcast %51 : f32 to vector<8x128xf32>
    %305 = arith.addf %303, %304 : vector<8x128xf32>
    %306 = arith.addf %299, %301 : vector<8x128xf32>
    %307 = vector.broadcast %53 : f32 to vector<8x128xf32>
    %308 = arith.addf %306, %307 : vector<8x128xf32>
    %309 = arith.subf %299, %301 : vector<8x128xf32>
    %310 = vector.broadcast %55 : f32 to vector<8x128xf32>
    %311 = arith.addf %309, %310 : vector<8x128xf32>
    %312 = math.cos %305 : vector<8x128xf32>
    %313 = math.sin %305 : vector<8x128xf32>
    %314 = math.cos %308 : vector<8x128xf32>
    %315 = math.sin %308 : vector<8x128xf32>
    %316 = math.cos %311 : vector<8x128xf32>
    %317 = math.sin %311 : vector<8x128xf32>
    %318 = arith.mulf %314, %312 : vector<8x128xf32>
    %319 = arith.mulf %315, %312 : vector<8x128xf32>
    %320 = arith.mulf %316, %313 : vector<8x128xf32>
    %321 = arith.mulf %317, %313 : vector<8x128xf32>
    %322 = arith.mulf %318, %243 : vector<8x128xf32>
    %323 = arith.mulf %319, %246 : vector<8x128xf32>
    %324 = arith.addf %322, %323 : vector<8x128xf32>
    %325 = arith.mulf %318, %246 : vector<8x128xf32>
    %326 = arith.mulf %319, %243 : vector<8x128xf32>
    %327 = arith.subf %325, %326 : vector<8x128xf32>
    %328 = arith.mulf %320, %243 : vector<8x128xf32>
    %329 = arith.mulf %321, %246 : vector<8x128xf32>
    %330 = arith.addf %328, %329 : vector<8x128xf32>
    %331 = arith.mulf %320, %246 : vector<8x128xf32>
    %332 = arith.mulf %321, %243 : vector<8x128xf32>
    %333 = arith.subf %331, %332 : vector<8x128xf32>
    %334 = arith.mulf %318, %249 : vector<8x128xf32>
    %335 = arith.mulf %319, %252 : vector<8x128xf32>
    %336 = arith.addf %334, %335 : vector<8x128xf32>
    %337 = arith.mulf %318, %252 : vector<8x128xf32>
    %338 = arith.mulf %319, %249 : vector<8x128xf32>
    %339 = arith.subf %337, %338 : vector<8x128xf32>
    %340 = arith.mulf %320, %249 : vector<8x128xf32>
    %341 = arith.mulf %321, %252 : vector<8x128xf32>
    %342 = arith.addf %340, %341 : vector<8x128xf32>
    %343 = arith.mulf %320, %252 : vector<8x128xf32>
    %344 = arith.mulf %321, %249 : vector<8x128xf32>
    %345 = arith.subf %343, %344 : vector<8x128xf32>
    %346 = arith.mulf %318, %255 : vector<8x128xf32>
    %347 = arith.mulf %319, %258 : vector<8x128xf32>
    %348 = arith.addf %346, %347 : vector<8x128xf32>
    %349 = arith.mulf %318, %258 : vector<8x128xf32>
    %350 = arith.mulf %319, %255 : vector<8x128xf32>
    %351 = arith.subf %349, %350 : vector<8x128xf32>
    %352 = arith.mulf %320, %255 : vector<8x128xf32>
    %353 = arith.mulf %321, %258 : vector<8x128xf32>
    %354 = arith.addf %352, %353 : vector<8x128xf32>
    %355 = arith.mulf %320, %258 : vector<8x128xf32>
    %356 = arith.mulf %321, %255 : vector<8x128xf32>
    %357 = arith.subf %355, %356 : vector<8x128xf32>
    %358 = arith.mulf %318, %261 : vector<8x128xf32>
    %359 = arith.mulf %319, %264 : vector<8x128xf32>
    %360 = arith.addf %358, %359 : vector<8x128xf32>
    %361 = arith.mulf %318, %264 : vector<8x128xf32>
    %362 = arith.mulf %319, %261 : vector<8x128xf32>
    %363 = arith.subf %361, %362 : vector<8x128xf32>
    %364 = arith.mulf %320, %261 : vector<8x128xf32>
    %365 = arith.mulf %321, %264 : vector<8x128xf32>
    %366 = arith.addf %364, %365 : vector<8x128xf32>
    %367 = arith.mulf %320, %264 : vector<8x128xf32>
    %368 = arith.mulf %321, %261 : vector<8x128xf32>
    %369 = arith.subf %367, %368 : vector<8x128xf32>
    %370 = arith.mulf %318, %267 : vector<8x128xf32>
    %371 = arith.mulf %319, %270 : vector<8x128xf32>
    %372 = arith.addf %370, %371 : vector<8x128xf32>
    %373 = arith.mulf %318, %270 : vector<8x128xf32>
    %374 = arith.mulf %319, %267 : vector<8x128xf32>
    %375 = arith.subf %373, %374 : vector<8x128xf32>
    %376 = arith.mulf %320, %267 : vector<8x128xf32>
    %377 = arith.mulf %321, %270 : vector<8x128xf32>
    %378 = arith.addf %376, %377 : vector<8x128xf32>
    %379 = arith.mulf %320, %270 : vector<8x128xf32>
    %380 = arith.mulf %321, %267 : vector<8x128xf32>
    %381 = arith.subf %379, %380 : vector<8x128xf32>
    %382 = arith.mulf %318, %273 : vector<8x128xf32>
    %383 = arith.mulf %319, %276 : vector<8x128xf32>
    %384 = arith.addf %382, %383 : vector<8x128xf32>
    %385 = arith.mulf %318, %276 : vector<8x128xf32>
    %386 = arith.mulf %319, %273 : vector<8x128xf32>
    %387 = arith.subf %385, %386 : vector<8x128xf32>
    %388 = arith.mulf %320, %273 : vector<8x128xf32>
    %389 = arith.mulf %321, %276 : vector<8x128xf32>
    %390 = arith.addf %388, %389 : vector<8x128xf32>
    %391 = arith.mulf %320, %276 : vector<8x128xf32>
    %392 = arith.mulf %321, %273 : vector<8x128xf32>
    %393 = arith.subf %391, %392 : vector<8x128xf32>
    %394 = arith.mulf %318, %279 : vector<8x128xf32>
    %395 = arith.mulf %319, %282 : vector<8x128xf32>
    %396 = arith.addf %394, %395 : vector<8x128xf32>
    %397 = arith.mulf %318, %282 : vector<8x128xf32>
    %398 = arith.mulf %319, %279 : vector<8x128xf32>
    %399 = arith.subf %397, %398 : vector<8x128xf32>
    %400 = arith.mulf %320, %279 : vector<8x128xf32>
    %401 = arith.mulf %321, %282 : vector<8x128xf32>
    %402 = arith.addf %400, %401 : vector<8x128xf32>
    %403 = arith.mulf %320, %282 : vector<8x128xf32>
    %404 = arith.mulf %321, %279 : vector<8x128xf32>
    %405 = arith.subf %403, %404 : vector<8x128xf32>
    %406 = arith.mulf %318, %285 : vector<8x128xf32>
    %407 = arith.mulf %319, %288 : vector<8x128xf32>
    %408 = arith.addf %406, %407 : vector<8x128xf32>
    %409 = arith.mulf %318, %288 : vector<8x128xf32>
    %410 = arith.mulf %319, %285 : vector<8x128xf32>
    %411 = arith.subf %409, %410 : vector<8x128xf32>
    %412 = arith.mulf %320, %285 : vector<8x128xf32>
    %413 = arith.mulf %321, %288 : vector<8x128xf32>
    %414 = arith.addf %412, %413 : vector<8x128xf32>
    %415 = arith.mulf %320, %288 : vector<8x128xf32>
    %416 = arith.mulf %321, %285 : vector<8x128xf32>
    %417 = arith.subf %415, %416 : vector<8x128xf32>
    %418 = arith.index_cast %113 : i32 to index
    %c0_110 = arith.constant 0 : index
    %c0_111 = arith.constant 0 : index
    %c0_112 = arith.constant 0 : index
    %419 = vector.load %arg1[%418, %c0_110, %c0_111, %c0_112] : memref<1x12x8x128xf32, #tpu.memory_space<vmem>>, vector<1x1x8x128xf32>
    %420 = vector.shape_cast %419 : vector<1x1x8x128xf32> to vector<8x128xf32>
    %421 = arith.index_cast %113 : i32 to index
    %c1_113 = arith.constant 1 : index
    %c0_114 = arith.constant 0 : index
    %c0_115 = arith.constant 0 : index
    %422 = vector.load %arg1[%421, %c1_113, %c0_114, %c0_115] : memref<1x12x8x128xf32, #tpu.memory_space<vmem>>, vector<1x1x8x128xf32>
    %423 = vector.shape_cast %422 : vector<1x1x8x128xf32> to vector<8x128xf32>
    %424 = arith.index_cast %113 : i32 to index
    %c2_116 = arith.constant 2 : index
    %c0_117 = arith.constant 0 : index
    %c0_118 = arith.constant 0 : index
    %425 = vector.load %arg1[%424, %c2_116, %c0_117, %c0_118] : memref<1x12x8x128xf32, #tpu.memory_space<vmem>>, vector<1x1x8x128xf32>
    %426 = vector.shape_cast %425 : vector<1x1x8x128xf32> to vector<8x128xf32>
    %427 = vector.broadcast %62 : f32 to vector<8x128xf32>
    %428 = arith.mulf %427, %420 : vector<8x128xf32>
    %429 = vector.broadcast %64 : f32 to vector<8x128xf32>
    %430 = arith.mulf %429, %426 : vector<8x128xf32>
    %431 = vector.broadcast %63 : f32 to vector<8x128xf32>
    %432 = arith.mulf %431, %423 : vector<8x128xf32>
    %433 = vector.broadcast %65 : f32 to vector<8x128xf32>
    %434 = arith.addf %432, %433 : vector<8x128xf32>
    %435 = arith.addf %428, %430 : vector<8x128xf32>
    %436 = vector.broadcast %67 : f32 to vector<8x128xf32>
    %437 = arith.addf %435, %436 : vector<8x128xf32>
    %438 = arith.subf %428, %430 : vector<8x128xf32>
    %439 = vector.broadcast %69 : f32 to vector<8x128xf32>
    %440 = arith.addf %438, %439 : vector<8x128xf32>
    %441 = math.cos %434 : vector<8x128xf32>
    %442 = math.sin %434 : vector<8x128xf32>
    %443 = math.cos %437 : vector<8x128xf32>
    %444 = math.sin %437 : vector<8x128xf32>
    %445 = math.cos %440 : vector<8x128xf32>
    %446 = math.sin %440 : vector<8x128xf32>
    %447 = arith.mulf %443, %441 : vector<8x128xf32>
    %448 = arith.mulf %444, %441 : vector<8x128xf32>
    %449 = arith.mulf %445, %442 : vector<8x128xf32>
    %450 = arith.mulf %446, %442 : vector<8x128xf32>
    %451 = arith.mulf %447, %324 : vector<8x128xf32>
    %452 = arith.mulf %448, %327 : vector<8x128xf32>
    %453 = arith.addf %451, %452 : vector<8x128xf32>
    %454 = arith.mulf %450, %399 : vector<8x128xf32>
    %455 = arith.addf %453, %454 : vector<8x128xf32>
    %456 = arith.mulf %449, %396 : vector<8x128xf32>
    %457 = arith.subf %455, %456 : vector<8x128xf32>
    %458 = arith.mulf %447, %327 : vector<8x128xf32>
    %459 = arith.mulf %448, %324 : vector<8x128xf32>
    %460 = arith.mulf %449, %399 : vector<8x128xf32>
    %461 = arith.addf %459, %460 : vector<8x128xf32>
    %462 = arith.mulf %450, %396 : vector<8x128xf32>
    %463 = arith.addf %461, %462 : vector<8x128xf32>
    %464 = arith.subf %458, %463 : vector<8x128xf32>
    %465 = arith.mulf %449, %324 : vector<8x128xf32>
    %466 = arith.mulf %450, %327 : vector<8x128xf32>
    %467 = arith.addf %465, %466 : vector<8x128xf32>
    %468 = arith.mulf %447, %396 : vector<8x128xf32>
    %469 = arith.addf %467, %468 : vector<8x128xf32>
    %470 = arith.mulf %448, %399 : vector<8x128xf32>
    %471 = arith.subf %469, %470 : vector<8x128xf32>
    %472 = arith.mulf %449, %327 : vector<8x128xf32>
    %473 = arith.mulf %447, %399 : vector<8x128xf32>
    %474 = arith.addf %472, %473 : vector<8x128xf32>
    %475 = arith.mulf %448, %396 : vector<8x128xf32>
    %476 = arith.addf %474, %475 : vector<8x128xf32>
    %477 = arith.mulf %450, %324 : vector<8x128xf32>
    %478 = arith.subf %476, %477 : vector<8x128xf32>
    %479 = arith.mulf %447, %402 : vector<8x128xf32>
    %480 = arith.mulf %448, %405 : vector<8x128xf32>
    %481 = arith.addf %479, %480 : vector<8x128xf32>
    %482 = arith.mulf %450, %333 : vector<8x128xf32>
    %483 = arith.addf %481, %482 : vector<8x128xf32>
    %484 = arith.mulf %449, %330 : vector<8x128xf32>
    %485 = arith.subf %483, %484 : vector<8x128xf32>
    %486 = arith.mulf %447, %405 : vector<8x128xf32>
    %487 = arith.mulf %448, %402 : vector<8x128xf32>
    %488 = arith.mulf %449, %333 : vector<8x128xf32>
    %489 = arith.addf %487, %488 : vector<8x128xf32>
    %490 = arith.mulf %450, %330 : vector<8x128xf32>
    %491 = arith.addf %489, %490 : vector<8x128xf32>
    %492 = arith.subf %486, %491 : vector<8x128xf32>
    %493 = arith.mulf %449, %402 : vector<8x128xf32>
    %494 = arith.mulf %450, %405 : vector<8x128xf32>
    %495 = arith.addf %493, %494 : vector<8x128xf32>
    %496 = arith.mulf %447, %330 : vector<8x128xf32>
    %497 = arith.addf %495, %496 : vector<8x128xf32>
    %498 = arith.mulf %448, %333 : vector<8x128xf32>
    %499 = arith.subf %497, %498 : vector<8x128xf32>
    %500 = arith.mulf %449, %405 : vector<8x128xf32>
    %501 = arith.mulf %447, %333 : vector<8x128xf32>
    %502 = arith.addf %500, %501 : vector<8x128xf32>
    %503 = arith.mulf %448, %330 : vector<8x128xf32>
    %504 = arith.addf %502, %503 : vector<8x128xf32>
    %505 = arith.mulf %450, %402 : vector<8x128xf32>
    %506 = arith.subf %504, %505 : vector<8x128xf32>
    %507 = arith.mulf %447, %342 : vector<8x128xf32>
    %508 = arith.mulf %448, %345 : vector<8x128xf32>
    %509 = arith.addf %507, %508 : vector<8x128xf32>
    %510 = arith.mulf %450, %417 : vector<8x128xf32>
    %511 = arith.addf %509, %510 : vector<8x128xf32>
    %512 = arith.mulf %449, %414 : vector<8x128xf32>
    %513 = arith.subf %511, %512 : vector<8x128xf32>
    %514 = arith.mulf %447, %345 : vector<8x128xf32>
    %515 = arith.mulf %448, %342 : vector<8x128xf32>
    %516 = arith.mulf %449, %417 : vector<8x128xf32>
    %517 = arith.addf %515, %516 : vector<8x128xf32>
    %518 = arith.mulf %450, %414 : vector<8x128xf32>
    %519 = arith.addf %517, %518 : vector<8x128xf32>
    %520 = arith.subf %514, %519 : vector<8x128xf32>
    %521 = arith.mulf %449, %342 : vector<8x128xf32>
    %522 = arith.mulf %450, %345 : vector<8x128xf32>
    %523 = arith.addf %521, %522 : vector<8x128xf32>
    %524 = arith.mulf %447, %414 : vector<8x128xf32>
    %525 = arith.addf %523, %524 : vector<8x128xf32>
    %526 = arith.mulf %448, %417 : vector<8x128xf32>
    %527 = arith.subf %525, %526 : vector<8x128xf32>
    %528 = arith.mulf %449, %345 : vector<8x128xf32>
    %529 = arith.mulf %447, %417 : vector<8x128xf32>
    %530 = arith.addf %528, %529 : vector<8x128xf32>
    %531 = arith.mulf %448, %414 : vector<8x128xf32>
    %532 = arith.addf %530, %531 : vector<8x128xf32>
    %533 = arith.mulf %450, %342 : vector<8x128xf32>
    %534 = arith.subf %532, %533 : vector<8x128xf32>
    %535 = arith.mulf %447, %408 : vector<8x128xf32>
    %536 = arith.mulf %448, %411 : vector<8x128xf32>
    %537 = arith.addf %535, %536 : vector<8x128xf32>
    %538 = arith.mulf %450, %339 : vector<8x128xf32>
    %539 = arith.addf %537, %538 : vector<8x128xf32>
    %540 = arith.mulf %449, %336 : vector<8x128xf32>
    %541 = arith.subf %539, %540 : vector<8x128xf32>
    %542 = arith.mulf %447, %411 : vector<8x128xf32>
    %543 = arith.mulf %448, %408 : vector<8x128xf32>
    %544 = arith.mulf %449, %339 : vector<8x128xf32>
    %545 = arith.addf %543, %544 : vector<8x128xf32>
    %546 = arith.mulf %450, %336 : vector<8x128xf32>
    %547 = arith.addf %545, %546 : vector<8x128xf32>
    %548 = arith.subf %542, %547 : vector<8x128xf32>
    %549 = arith.mulf %449, %408 : vector<8x128xf32>
    %550 = arith.mulf %450, %411 : vector<8x128xf32>
    %551 = arith.addf %549, %550 : vector<8x128xf32>
    %552 = arith.mulf %447, %336 : vector<8x128xf32>
    %553 = arith.addf %551, %552 : vector<8x128xf32>
    %554 = arith.mulf %448, %339 : vector<8x128xf32>
    %555 = arith.subf %553, %554 : vector<8x128xf32>
    %556 = arith.mulf %449, %411 : vector<8x128xf32>
    %557 = arith.mulf %447, %339 : vector<8x128xf32>
    %558 = arith.addf %556, %557 : vector<8x128xf32>
    %559 = arith.mulf %448, %336 : vector<8x128xf32>
    %560 = arith.addf %558, %559 : vector<8x128xf32>
    %561 = arith.mulf %450, %408 : vector<8x128xf32>
    %562 = arith.subf %560, %561 : vector<8x128xf32>
    %563 = arith.mulf %447, %360 : vector<8x128xf32>
    %564 = arith.mulf %448, %363 : vector<8x128xf32>
    %565 = arith.addf %563, %564 : vector<8x128xf32>
    %566 = arith.mulf %450, %387 : vector<8x128xf32>
    %567 = arith.addf %565, %566 : vector<8x128xf32>
    %568 = arith.mulf %449, %384 : vector<8x128xf32>
    %569 = arith.subf %567, %568 : vector<8x128xf32>
    %570 = arith.mulf %447, %363 : vector<8x128xf32>
    %571 = arith.mulf %448, %360 : vector<8x128xf32>
    %572 = arith.mulf %449, %387 : vector<8x128xf32>
    %573 = arith.addf %571, %572 : vector<8x128xf32>
    %574 = arith.mulf %450, %384 : vector<8x128xf32>
    %575 = arith.addf %573, %574 : vector<8x128xf32>
    %576 = arith.subf %570, %575 : vector<8x128xf32>
    %577 = arith.mulf %449, %360 : vector<8x128xf32>
    %578 = arith.mulf %450, %363 : vector<8x128xf32>
    %579 = arith.addf %577, %578 : vector<8x128xf32>
    %580 = arith.mulf %447, %384 : vector<8x128xf32>
    %581 = arith.addf %579, %580 : vector<8x128xf32>
    %582 = arith.mulf %448, %387 : vector<8x128xf32>
    %583 = arith.subf %581, %582 : vector<8x128xf32>
    %584 = arith.mulf %449, %363 : vector<8x128xf32>
    %585 = arith.mulf %447, %387 : vector<8x128xf32>
    %586 = arith.addf %584, %585 : vector<8x128xf32>
    %587 = arith.mulf %448, %384 : vector<8x128xf32>
    %588 = arith.addf %586, %587 : vector<8x128xf32>
    %589 = arith.mulf %450, %360 : vector<8x128xf32>
    %590 = arith.subf %588, %589 : vector<8x128xf32>
    %591 = arith.mulf %447, %390 : vector<8x128xf32>
    %592 = arith.mulf %448, %393 : vector<8x128xf32>
    %593 = arith.addf %591, %592 : vector<8x128xf32>
    %594 = arith.mulf %450, %369 : vector<8x128xf32>
    %595 = arith.addf %593, %594 : vector<8x128xf32>
    %596 = arith.mulf %449, %366 : vector<8x128xf32>
    %597 = arith.subf %595, %596 : vector<8x128xf32>
    %598 = arith.mulf %447, %393 : vector<8x128xf32>
    %599 = arith.mulf %448, %390 : vector<8x128xf32>
    %600 = arith.mulf %449, %369 : vector<8x128xf32>
    %601 = arith.addf %599, %600 : vector<8x128xf32>
    %602 = arith.mulf %450, %366 : vector<8x128xf32>
    %603 = arith.addf %601, %602 : vector<8x128xf32>
    %604 = arith.subf %598, %603 : vector<8x128xf32>
    %605 = arith.mulf %449, %390 : vector<8x128xf32>
    %606 = arith.mulf %450, %393 : vector<8x128xf32>
    %607 = arith.addf %605, %606 : vector<8x128xf32>
    %608 = arith.mulf %447, %366 : vector<8x128xf32>
    %609 = arith.addf %607, %608 : vector<8x128xf32>
    %610 = arith.mulf %448, %369 : vector<8x128xf32>
    %611 = arith.subf %609, %610 : vector<8x128xf32>
    %612 = arith.mulf %449, %393 : vector<8x128xf32>
    %613 = arith.mulf %447, %369 : vector<8x128xf32>
    %614 = arith.addf %612, %613 : vector<8x128xf32>
    %615 = arith.mulf %448, %366 : vector<8x128xf32>
    %616 = arith.addf %614, %615 : vector<8x128xf32>
    %617 = arith.mulf %450, %390 : vector<8x128xf32>
    %618 = arith.subf %616, %617 : vector<8x128xf32>
    %619 = arith.mulf %447, %354 : vector<8x128xf32>
    %620 = arith.mulf %448, %357 : vector<8x128xf32>
    %621 = arith.addf %619, %620 : vector<8x128xf32>
    %622 = arith.mulf %450, %381 : vector<8x128xf32>
    %623 = arith.addf %621, %622 : vector<8x128xf32>
    %624 = arith.mulf %449, %378 : vector<8x128xf32>
    %625 = arith.subf %623, %624 : vector<8x128xf32>
    %626 = arith.mulf %447, %357 : vector<8x128xf32>
    %627 = arith.mulf %448, %354 : vector<8x128xf32>
    %628 = arith.mulf %449, %381 : vector<8x128xf32>
    %629 = arith.addf %627, %628 : vector<8x128xf32>
    %630 = arith.mulf %450, %378 : vector<8x128xf32>
    %631 = arith.addf %629, %630 : vector<8x128xf32>
    %632 = arith.subf %626, %631 : vector<8x128xf32>
    %633 = arith.mulf %449, %354 : vector<8x128xf32>
    %634 = arith.mulf %450, %357 : vector<8x128xf32>
    %635 = arith.addf %633, %634 : vector<8x128xf32>
    %636 = arith.mulf %447, %378 : vector<8x128xf32>
    %637 = arith.addf %635, %636 : vector<8x128xf32>
    %638 = arith.mulf %448, %381 : vector<8x128xf32>
    %639 = arith.subf %637, %638 : vector<8x128xf32>
    %640 = arith.mulf %449, %357 : vector<8x128xf32>
    %641 = arith.mulf %447, %381 : vector<8x128xf32>
    %642 = arith.addf %640, %641 : vector<8x128xf32>
    %643 = arith.mulf %448, %378 : vector<8x128xf32>
    %644 = arith.addf %642, %643 : vector<8x128xf32>
    %645 = arith.mulf %450, %354 : vector<8x128xf32>
    %646 = arith.subf %644, %645 : vector<8x128xf32>
    %647 = arith.mulf %447, %372 : vector<8x128xf32>
    %648 = arith.mulf %448, %375 : vector<8x128xf32>
    %649 = arith.addf %647, %648 : vector<8x128xf32>
    %650 = arith.mulf %450, %351 : vector<8x128xf32>
    %651 = arith.addf %649, %650 : vector<8x128xf32>
    %652 = arith.mulf %449, %348 : vector<8x128xf32>
    %653 = arith.subf %651, %652 : vector<8x128xf32>
    %654 = arith.mulf %447, %375 : vector<8x128xf32>
    %655 = arith.mulf %448, %372 : vector<8x128xf32>
    %656 = arith.mulf %449, %351 : vector<8x128xf32>
    %657 = arith.addf %655, %656 : vector<8x128xf32>
    %658 = arith.mulf %450, %348 : vector<8x128xf32>
    %659 = arith.addf %657, %658 : vector<8x128xf32>
    %660 = arith.subf %654, %659 : vector<8x128xf32>
    %661 = arith.mulf %449, %372 : vector<8x128xf32>
    %662 = arith.mulf %450, %375 : vector<8x128xf32>
    %663 = arith.addf %661, %662 : vector<8x128xf32>
    %664 = arith.mulf %447, %348 : vector<8x128xf32>
    %665 = arith.addf %663, %664 : vector<8x128xf32>
    %666 = arith.mulf %448, %351 : vector<8x128xf32>
    %667 = arith.subf %665, %666 : vector<8x128xf32>
    %668 = arith.mulf %449, %375 : vector<8x128xf32>
    %669 = arith.mulf %447, %351 : vector<8x128xf32>
    %670 = arith.addf %668, %669 : vector<8x128xf32>
    %671 = arith.mulf %448, %348 : vector<8x128xf32>
    %672 = arith.addf %670, %671 : vector<8x128xf32>
    %673 = arith.mulf %450, %372 : vector<8x128xf32>
    %674 = arith.subf %672, %673 : vector<8x128xf32>
    %675 = arith.index_cast %113 : i32 to index
    %c3_119 = arith.constant 3 : index
    %c0_120 = arith.constant 0 : index
    %c0_121 = arith.constant 0 : index
    %676 = vector.load %arg1[%675, %c3_119, %c0_120, %c0_121] : memref<1x12x8x128xf32, #tpu.memory_space<vmem>>, vector<1x1x8x128xf32>
    %677 = vector.shape_cast %676 : vector<1x1x8x128xf32> to vector<8x128xf32>
    %678 = arith.index_cast %113 : i32 to index
    %c4_122 = arith.constant 4 : index
    %c0_123 = arith.constant 0 : index
    %c0_124 = arith.constant 0 : index
    %679 = vector.load %arg1[%678, %c4_122, %c0_123, %c0_124] : memref<1x12x8x128xf32, #tpu.memory_space<vmem>>, vector<1x1x8x128xf32>
    %680 = vector.shape_cast %679 : vector<1x1x8x128xf32> to vector<8x128xf32>
    %681 = arith.index_cast %113 : i32 to index
    %c5_125 = arith.constant 5 : index
    %c0_126 = arith.constant 0 : index
    %c0_127 = arith.constant 0 : index
    %682 = vector.load %arg1[%681, %c5_125, %c0_126, %c0_127] : memref<1x12x8x128xf32, #tpu.memory_space<vmem>>, vector<1x1x8x128xf32>
    %683 = vector.shape_cast %682 : vector<1x1x8x128xf32> to vector<8x128xf32>
    %684 = vector.broadcast %76 : f32 to vector<8x128xf32>
    %685 = arith.mulf %684, %677 : vector<8x128xf32>
    %686 = vector.broadcast %78 : f32 to vector<8x128xf32>
    %687 = arith.mulf %686, %683 : vector<8x128xf32>
    %688 = vector.broadcast %77 : f32 to vector<8x128xf32>
    %689 = arith.mulf %688, %680 : vector<8x128xf32>
    %690 = vector.broadcast %79 : f32 to vector<8x128xf32>
    %691 = arith.addf %689, %690 : vector<8x128xf32>
    %692 = arith.addf %685, %687 : vector<8x128xf32>
    %693 = vector.broadcast %81 : f32 to vector<8x128xf32>
    %694 = arith.addf %692, %693 : vector<8x128xf32>
    %695 = arith.subf %685, %687 : vector<8x128xf32>
    %696 = vector.broadcast %83 : f32 to vector<8x128xf32>
    %697 = arith.addf %695, %696 : vector<8x128xf32>
    %698 = math.cos %691 : vector<8x128xf32>
    %699 = math.sin %691 : vector<8x128xf32>
    %700 = math.cos %694 : vector<8x128xf32>
    %701 = math.sin %694 : vector<8x128xf32>
    %702 = math.cos %697 : vector<8x128xf32>
    %703 = math.sin %697 : vector<8x128xf32>
    %704 = arith.mulf %700, %698 : vector<8x128xf32>
    %705 = arith.mulf %701, %698 : vector<8x128xf32>
    %706 = arith.mulf %702, %699 : vector<8x128xf32>
    %707 = arith.mulf %703, %699 : vector<8x128xf32>
    %708 = arith.mulf %704, %457 : vector<8x128xf32>
    %709 = arith.mulf %705, %464 : vector<8x128xf32>
    %710 = arith.addf %708, %709 : vector<8x128xf32>
    %711 = arith.mulf %707, %576 : vector<8x128xf32>
    %712 = arith.addf %710, %711 : vector<8x128xf32>
    %713 = arith.mulf %706, %569 : vector<8x128xf32>
    %714 = arith.subf %712, %713 : vector<8x128xf32>
    %715 = arith.mulf %704, %464 : vector<8x128xf32>
    %716 = arith.mulf %705, %457 : vector<8x128xf32>
    %717 = arith.mulf %706, %576 : vector<8x128xf32>
    %718 = arith.addf %716, %717 : vector<8x128xf32>
    %719 = arith.mulf %707, %569 : vector<8x128xf32>
    %720 = arith.addf %718, %719 : vector<8x128xf32>
    %721 = arith.subf %715, %720 : vector<8x128xf32>
    %722 = arith.mulf %706, %457 : vector<8x128xf32>
    %723 = arith.mulf %707, %464 : vector<8x128xf32>
    %724 = arith.addf %722, %723 : vector<8x128xf32>
    %725 = arith.mulf %704, %569 : vector<8x128xf32>
    %726 = arith.addf %724, %725 : vector<8x128xf32>
    %727 = arith.mulf %705, %576 : vector<8x128xf32>
    %728 = arith.subf %726, %727 : vector<8x128xf32>
    %729 = arith.mulf %706, %464 : vector<8x128xf32>
    %730 = arith.mulf %704, %576 : vector<8x128xf32>
    %731 = arith.addf %729, %730 : vector<8x128xf32>
    %732 = arith.mulf %705, %569 : vector<8x128xf32>
    %733 = arith.addf %731, %732 : vector<8x128xf32>
    %734 = arith.mulf %707, %457 : vector<8x128xf32>
    %735 = arith.subf %733, %734 : vector<8x128xf32>
    %736 = arith.mulf %704, %485 : vector<8x128xf32>
    %737 = arith.mulf %705, %492 : vector<8x128xf32>
    %738 = arith.addf %736, %737 : vector<8x128xf32>
    %739 = arith.mulf %707, %604 : vector<8x128xf32>
    %740 = arith.addf %738, %739 : vector<8x128xf32>
    %741 = arith.mulf %706, %597 : vector<8x128xf32>
    %742 = arith.subf %740, %741 : vector<8x128xf32>
    %743 = arith.mulf %704, %492 : vector<8x128xf32>
    %744 = arith.mulf %705, %485 : vector<8x128xf32>
    %745 = arith.mulf %706, %604 : vector<8x128xf32>
    %746 = arith.addf %744, %745 : vector<8x128xf32>
    %747 = arith.mulf %707, %597 : vector<8x128xf32>
    %748 = arith.addf %746, %747 : vector<8x128xf32>
    %749 = arith.subf %743, %748 : vector<8x128xf32>
    %750 = arith.mulf %706, %485 : vector<8x128xf32>
    %751 = arith.mulf %707, %492 : vector<8x128xf32>
    %752 = arith.addf %750, %751 : vector<8x128xf32>
    %753 = arith.mulf %704, %597 : vector<8x128xf32>
    %754 = arith.addf %752, %753 : vector<8x128xf32>
    %755 = arith.mulf %705, %604 : vector<8x128xf32>
    %756 = arith.subf %754, %755 : vector<8x128xf32>
    %757 = arith.mulf %706, %492 : vector<8x128xf32>
    %758 = arith.mulf %704, %604 : vector<8x128xf32>
    %759 = arith.addf %757, %758 : vector<8x128xf32>
    %760 = arith.mulf %705, %597 : vector<8x128xf32>
    %761 = arith.addf %759, %760 : vector<8x128xf32>
    %762 = arith.mulf %707, %485 : vector<8x128xf32>
    %763 = arith.subf %761, %762 : vector<8x128xf32>
    %764 = arith.mulf %704, %513 : vector<8x128xf32>
    %765 = arith.mulf %705, %520 : vector<8x128xf32>
    %766 = arith.addf %764, %765 : vector<8x128xf32>
    %767 = arith.mulf %707, %632 : vector<8x128xf32>
    %768 = arith.addf %766, %767 : vector<8x128xf32>
    %769 = arith.mulf %706, %625 : vector<8x128xf32>
    %770 = arith.subf %768, %769 : vector<8x128xf32>
    %771 = arith.mulf %704, %520 : vector<8x128xf32>
    %772 = arith.mulf %705, %513 : vector<8x128xf32>
    %773 = arith.mulf %706, %632 : vector<8x128xf32>
    %774 = arith.addf %772, %773 : vector<8x128xf32>
    %775 = arith.mulf %707, %625 : vector<8x128xf32>
    %776 = arith.addf %774, %775 : vector<8x128xf32>
    %777 = arith.subf %771, %776 : vector<8x128xf32>
    %778 = arith.mulf %706, %513 : vector<8x128xf32>
    %779 = arith.mulf %707, %520 : vector<8x128xf32>
    %780 = arith.addf %778, %779 : vector<8x128xf32>
    %781 = arith.mulf %704, %625 : vector<8x128xf32>
    %782 = arith.addf %780, %781 : vector<8x128xf32>
    %783 = arith.mulf %705, %632 : vector<8x128xf32>
    %784 = arith.subf %782, %783 : vector<8x128xf32>
    %785 = arith.mulf %706, %520 : vector<8x128xf32>
    %786 = arith.mulf %704, %632 : vector<8x128xf32>
    %787 = arith.addf %785, %786 : vector<8x128xf32>
    %788 = arith.mulf %705, %625 : vector<8x128xf32>
    %789 = arith.addf %787, %788 : vector<8x128xf32>
    %790 = arith.mulf %707, %513 : vector<8x128xf32>
    %791 = arith.subf %789, %790 : vector<8x128xf32>
    %792 = arith.mulf %704, %541 : vector<8x128xf32>
    %793 = arith.mulf %705, %548 : vector<8x128xf32>
    %794 = arith.addf %792, %793 : vector<8x128xf32>
    %795 = arith.mulf %707, %660 : vector<8x128xf32>
    %796 = arith.addf %794, %795 : vector<8x128xf32>
    %797 = arith.mulf %706, %653 : vector<8x128xf32>
    %798 = arith.subf %796, %797 : vector<8x128xf32>
    %799 = arith.mulf %704, %548 : vector<8x128xf32>
    %800 = arith.mulf %705, %541 : vector<8x128xf32>
    %801 = arith.mulf %706, %660 : vector<8x128xf32>
    %802 = arith.addf %800, %801 : vector<8x128xf32>
    %803 = arith.mulf %707, %653 : vector<8x128xf32>
    %804 = arith.addf %802, %803 : vector<8x128xf32>
    %805 = arith.subf %799, %804 : vector<8x128xf32>
    %806 = arith.mulf %706, %541 : vector<8x128xf32>
    %807 = arith.mulf %707, %548 : vector<8x128xf32>
    %808 = arith.addf %806, %807 : vector<8x128xf32>
    %809 = arith.mulf %704, %653 : vector<8x128xf32>
    %810 = arith.addf %808, %809 : vector<8x128xf32>
    %811 = arith.mulf %705, %660 : vector<8x128xf32>
    %812 = arith.subf %810, %811 : vector<8x128xf32>
    %813 = arith.mulf %706, %548 : vector<8x128xf32>
    %814 = arith.mulf %704, %660 : vector<8x128xf32>
    %815 = arith.addf %813, %814 : vector<8x128xf32>
    %816 = arith.mulf %705, %653 : vector<8x128xf32>
    %817 = arith.addf %815, %816 : vector<8x128xf32>
    %818 = arith.mulf %707, %541 : vector<8x128xf32>
    %819 = arith.subf %817, %818 : vector<8x128xf32>
    %820 = arith.mulf %704, %471 : vector<8x128xf32>
    %821 = arith.mulf %705, %478 : vector<8x128xf32>
    %822 = arith.addf %820, %821 : vector<8x128xf32>
    %823 = arith.mulf %707, %590 : vector<8x128xf32>
    %824 = arith.addf %822, %823 : vector<8x128xf32>
    %825 = arith.mulf %706, %583 : vector<8x128xf32>
    %826 = arith.subf %824, %825 : vector<8x128xf32>
    %827 = arith.mulf %704, %478 : vector<8x128xf32>
    %828 = arith.mulf %705, %471 : vector<8x128xf32>
    %829 = arith.mulf %706, %590 : vector<8x128xf32>
    %830 = arith.addf %828, %829 : vector<8x128xf32>
    %831 = arith.mulf %707, %583 : vector<8x128xf32>
    %832 = arith.addf %830, %831 : vector<8x128xf32>
    %833 = arith.subf %827, %832 : vector<8x128xf32>
    %834 = arith.mulf %706, %471 : vector<8x128xf32>
    %835 = arith.mulf %707, %478 : vector<8x128xf32>
    %836 = arith.addf %834, %835 : vector<8x128xf32>
    %837 = arith.mulf %704, %583 : vector<8x128xf32>
    %838 = arith.addf %836, %837 : vector<8x128xf32>
    %839 = arith.mulf %705, %590 : vector<8x128xf32>
    %840 = arith.subf %838, %839 : vector<8x128xf32>
    %841 = arith.mulf %706, %478 : vector<8x128xf32>
    %842 = arith.mulf %704, %590 : vector<8x128xf32>
    %843 = arith.addf %841, %842 : vector<8x128xf32>
    %844 = arith.mulf %705, %583 : vector<8x128xf32>
    %845 = arith.addf %843, %844 : vector<8x128xf32>
    %846 = arith.mulf %707, %471 : vector<8x128xf32>
    %847 = arith.subf %845, %846 : vector<8x128xf32>
    %848 = arith.mulf %704, %499 : vector<8x128xf32>
    %849 = arith.mulf %705, %506 : vector<8x128xf32>
    %850 = arith.addf %848, %849 : vector<8x128xf32>
    %851 = arith.mulf %707, %618 : vector<8x128xf32>
    %852 = arith.addf %850, %851 : vector<8x128xf32>
    %853 = arith.mulf %706, %611 : vector<8x128xf32>
    %854 = arith.subf %852, %853 : vector<8x128xf32>
    %855 = arith.mulf %704, %506 : vector<8x128xf32>
    %856 = arith.mulf %705, %499 : vector<8x128xf32>
    %857 = arith.mulf %706, %618 : vector<8x128xf32>
    %858 = arith.addf %856, %857 : vector<8x128xf32>
    %859 = arith.mulf %707, %611 : vector<8x128xf32>
    %860 = arith.addf %858, %859 : vector<8x128xf32>
    %861 = arith.subf %855, %860 : vector<8x128xf32>
    %862 = arith.mulf %706, %499 : vector<8x128xf32>
    %863 = arith.mulf %707, %506 : vector<8x128xf32>
    %864 = arith.addf %862, %863 : vector<8x128xf32>
    %865 = arith.mulf %704, %611 : vector<8x128xf32>
    %866 = arith.addf %864, %865 : vector<8x128xf32>
    %867 = arith.mulf %705, %618 : vector<8x128xf32>
    %868 = arith.subf %866, %867 : vector<8x128xf32>
    %869 = arith.mulf %706, %506 : vector<8x128xf32>
    %870 = arith.mulf %704, %618 : vector<8x128xf32>
    %871 = arith.addf %869, %870 : vector<8x128xf32>
    %872 = arith.mulf %705, %611 : vector<8x128xf32>
    %873 = arith.addf %871, %872 : vector<8x128xf32>
    %874 = arith.mulf %707, %499 : vector<8x128xf32>
    %875 = arith.subf %873, %874 : vector<8x128xf32>
    %876 = arith.mulf %704, %527 : vector<8x128xf32>
    %877 = arith.mulf %705, %534 : vector<8x128xf32>
    %878 = arith.addf %876, %877 : vector<8x128xf32>
    %879 = arith.mulf %707, %646 : vector<8x128xf32>
    %880 = arith.addf %878, %879 : vector<8x128xf32>
    %881 = arith.mulf %706, %639 : vector<8x128xf32>
    %882 = arith.subf %880, %881 : vector<8x128xf32>
    %883 = arith.mulf %704, %534 : vector<8x128xf32>
    %884 = arith.mulf %705, %527 : vector<8x128xf32>
    %885 = arith.mulf %706, %646 : vector<8x128xf32>
    %886 = arith.addf %884, %885 : vector<8x128xf32>
    %887 = arith.mulf %707, %639 : vector<8x128xf32>
    %888 = arith.addf %886, %887 : vector<8x128xf32>
    %889 = arith.subf %883, %888 : vector<8x128xf32>
    %890 = arith.mulf %706, %527 : vector<8x128xf32>
    %891 = arith.mulf %707, %534 : vector<8x128xf32>
    %892 = arith.addf %890, %891 : vector<8x128xf32>
    %893 = arith.mulf %704, %639 : vector<8x128xf32>
    %894 = arith.addf %892, %893 : vector<8x128xf32>
    %895 = arith.mulf %705, %646 : vector<8x128xf32>
    %896 = arith.subf %894, %895 : vector<8x128xf32>
    %897 = arith.mulf %706, %534 : vector<8x128xf32>
    %898 = arith.mulf %704, %646 : vector<8x128xf32>
    %899 = arith.addf %897, %898 : vector<8x128xf32>
    %900 = arith.mulf %705, %639 : vector<8x128xf32>
    %901 = arith.addf %899, %900 : vector<8x128xf32>
    %902 = arith.mulf %707, %527 : vector<8x128xf32>
    %903 = arith.subf %901, %902 : vector<8x128xf32>
    %904 = arith.mulf %704, %555 : vector<8x128xf32>
    %905 = arith.mulf %705, %562 : vector<8x128xf32>
    %906 = arith.addf %904, %905 : vector<8x128xf32>
    %907 = arith.mulf %707, %674 : vector<8x128xf32>
    %908 = arith.addf %906, %907 : vector<8x128xf32>
    %909 = arith.mulf %706, %667 : vector<8x128xf32>
    %910 = arith.subf %908, %909 : vector<8x128xf32>
    %911 = arith.mulf %704, %562 : vector<8x128xf32>
    %912 = arith.mulf %705, %555 : vector<8x128xf32>
    %913 = arith.mulf %706, %674 : vector<8x128xf32>
    %914 = arith.addf %912, %913 : vector<8x128xf32>
    %915 = arith.mulf %707, %667 : vector<8x128xf32>
    %916 = arith.addf %914, %915 : vector<8x128xf32>
    %917 = arith.subf %911, %916 : vector<8x128xf32>
    %918 = arith.mulf %706, %555 : vector<8x128xf32>
    %919 = arith.mulf %707, %562 : vector<8x128xf32>
    %920 = arith.addf %918, %919 : vector<8x128xf32>
    %921 = arith.mulf %704, %667 : vector<8x128xf32>
    %922 = arith.addf %920, %921 : vector<8x128xf32>
    %923 = arith.mulf %705, %674 : vector<8x128xf32>
    %924 = arith.subf %922, %923 : vector<8x128xf32>
    %925 = arith.mulf %706, %562 : vector<8x128xf32>
    %926 = arith.mulf %704, %674 : vector<8x128xf32>
    %927 = arith.addf %925, %926 : vector<8x128xf32>
    %928 = arith.mulf %705, %667 : vector<8x128xf32>
    %929 = arith.addf %927, %928 : vector<8x128xf32>
    %930 = arith.mulf %707, %555 : vector<8x128xf32>
    %931 = arith.subf %929, %930 : vector<8x128xf32>
    %932 = arith.index_cast %113 : i32 to index
    %c6_128 = arith.constant 6 : index
    %c0_129 = arith.constant 0 : index
    %c0_130 = arith.constant 0 : index
    %933 = vector.load %arg1[%932, %c6_128, %c0_129, %c0_130] : memref<1x12x8x128xf32, #tpu.memory_space<vmem>>, vector<1x1x8x128xf32>
    %934 = vector.shape_cast %933 : vector<1x1x8x128xf32> to vector<8x128xf32>
    %935 = arith.index_cast %113 : i32 to index
    %c7_131 = arith.constant 7 : index
    %c0_132 = arith.constant 0 : index
    %c0_133 = arith.constant 0 : index
    %936 = vector.load %arg1[%935, %c7_131, %c0_132, %c0_133] : memref<1x12x8x128xf32, #tpu.memory_space<vmem>>, vector<1x1x8x128xf32>
    %937 = vector.shape_cast %936 : vector<1x1x8x128xf32> to vector<8x128xf32>
    %938 = arith.index_cast %113 : i32 to index
    %c8_134 = arith.constant 8 : index
    %c0_135 = arith.constant 0 : index
    %c0_136 = arith.constant 0 : index
    %939 = vector.load %arg1[%938, %c8_134, %c0_135, %c0_136] : memref<1x12x8x128xf32, #tpu.memory_space<vmem>>, vector<1x1x8x128xf32>
    %940 = vector.shape_cast %939 : vector<1x1x8x128xf32> to vector<8x128xf32>
    %941 = vector.broadcast %90 : f32 to vector<8x128xf32>
    %942 = arith.mulf %941, %934 : vector<8x128xf32>
    %943 = vector.broadcast %92 : f32 to vector<8x128xf32>
    %944 = arith.mulf %943, %940 : vector<8x128xf32>
    %945 = vector.broadcast %91 : f32 to vector<8x128xf32>
    %946 = arith.mulf %945, %937 : vector<8x128xf32>
    %947 = vector.broadcast %93 : f32 to vector<8x128xf32>
    %948 = arith.addf %946, %947 : vector<8x128xf32>
    %949 = arith.addf %942, %944 : vector<8x128xf32>
    %950 = vector.broadcast %95 : f32 to vector<8x128xf32>
    %951 = arith.addf %949, %950 : vector<8x128xf32>
    %952 = arith.subf %942, %944 : vector<8x128xf32>
    %953 = vector.broadcast %97 : f32 to vector<8x128xf32>
    %954 = arith.addf %952, %953 : vector<8x128xf32>
    %955 = math.cos %948 : vector<8x128xf32>
    %956 = math.sin %948 : vector<8x128xf32>
    %957 = math.cos %951 : vector<8x128xf32>
    %958 = math.sin %951 : vector<8x128xf32>
    %959 = math.cos %954 : vector<8x128xf32>
    %960 = math.sin %954 : vector<8x128xf32>
    %961 = arith.mulf %957, %955 : vector<8x128xf32>
    %962 = arith.mulf %958, %955 : vector<8x128xf32>
    %963 = arith.mulf %959, %956 : vector<8x128xf32>
    %964 = arith.mulf %960, %956 : vector<8x128xf32>
    %965 = arith.mulf %961, %714 : vector<8x128xf32>
    %966 = arith.mulf %962, %721 : vector<8x128xf32>
    %967 = arith.addf %965, %966 : vector<8x128xf32>
    %968 = arith.mulf %964, %777 : vector<8x128xf32>
    %969 = arith.addf %967, %968 : vector<8x128xf32>
    %970 = arith.mulf %963, %770 : vector<8x128xf32>
    %971 = arith.subf %969, %970 : vector<8x128xf32>
    %972 = arith.mulf %961, %721 : vector<8x128xf32>
    %973 = arith.mulf %962, %714 : vector<8x128xf32>
    %974 = arith.mulf %963, %777 : vector<8x128xf32>
    %975 = arith.addf %973, %974 : vector<8x128xf32>
    %976 = arith.mulf %964, %770 : vector<8x128xf32>
    %977 = arith.addf %975, %976 : vector<8x128xf32>
    %978 = arith.subf %972, %977 : vector<8x128xf32>
    %979 = arith.mulf %963, %714 : vector<8x128xf32>
    %980 = arith.mulf %964, %721 : vector<8x128xf32>
    %981 = arith.addf %979, %980 : vector<8x128xf32>
    %982 = arith.mulf %961, %770 : vector<8x128xf32>
    %983 = arith.addf %981, %982 : vector<8x128xf32>
    %984 = arith.mulf %962, %777 : vector<8x128xf32>
    %985 = arith.subf %983, %984 : vector<8x128xf32>
    %986 = arith.mulf %963, %721 : vector<8x128xf32>
    %987 = arith.mulf %961, %777 : vector<8x128xf32>
    %988 = arith.addf %986, %987 : vector<8x128xf32>
    %989 = arith.mulf %962, %770 : vector<8x128xf32>
    %990 = arith.addf %988, %989 : vector<8x128xf32>
    %991 = arith.mulf %964, %714 : vector<8x128xf32>
    %992 = arith.subf %990, %991 : vector<8x128xf32>
    %993 = arith.mulf %961, %742 : vector<8x128xf32>
    %994 = arith.mulf %962, %749 : vector<8x128xf32>
    %995 = arith.addf %993, %994 : vector<8x128xf32>
    %996 = arith.mulf %964, %805 : vector<8x128xf32>
    %997 = arith.addf %995, %996 : vector<8x128xf32>
    %998 = arith.mulf %963, %798 : vector<8x128xf32>
    %999 = arith.subf %997, %998 : vector<8x128xf32>
    %1000 = arith.mulf %961, %749 : vector<8x128xf32>
    %1001 = arith.mulf %962, %742 : vector<8x128xf32>
    %1002 = arith.mulf %963, %805 : vector<8x128xf32>
    %1003 = arith.addf %1001, %1002 : vector<8x128xf32>
    %1004 = arith.mulf %964, %798 : vector<8x128xf32>
    %1005 = arith.addf %1003, %1004 : vector<8x128xf32>
    %1006 = arith.subf %1000, %1005 : vector<8x128xf32>
    %1007 = arith.mulf %963, %742 : vector<8x128xf32>
    %1008 = arith.mulf %964, %749 : vector<8x128xf32>
    %1009 = arith.addf %1007, %1008 : vector<8x128xf32>
    %1010 = arith.mulf %961, %798 : vector<8x128xf32>
    %1011 = arith.addf %1009, %1010 : vector<8x128xf32>
    %1012 = arith.mulf %962, %805 : vector<8x128xf32>
    %1013 = arith.subf %1011, %1012 : vector<8x128xf32>
    %1014 = arith.mulf %963, %749 : vector<8x128xf32>
    %1015 = arith.mulf %961, %805 : vector<8x128xf32>
    %1016 = arith.addf %1014, %1015 : vector<8x128xf32>
    %1017 = arith.mulf %962, %798 : vector<8x128xf32>
    %1018 = arith.addf %1016, %1017 : vector<8x128xf32>
    %1019 = arith.mulf %964, %742 : vector<8x128xf32>
    %1020 = arith.subf %1018, %1019 : vector<8x128xf32>
    %1021 = arith.mulf %961, %728 : vector<8x128xf32>
    %1022 = arith.mulf %962, %735 : vector<8x128xf32>
    %1023 = arith.addf %1021, %1022 : vector<8x128xf32>
    %1024 = arith.mulf %964, %791 : vector<8x128xf32>
    %1025 = arith.addf %1023, %1024 : vector<8x128xf32>
    %1026 = arith.mulf %963, %784 : vector<8x128xf32>
    %1027 = arith.subf %1025, %1026 : vector<8x128xf32>
    %1028 = arith.mulf %961, %735 : vector<8x128xf32>
    %1029 = arith.mulf %962, %728 : vector<8x128xf32>
    %1030 = arith.mulf %963, %791 : vector<8x128xf32>
    %1031 = arith.addf %1029, %1030 : vector<8x128xf32>
    %1032 = arith.mulf %964, %784 : vector<8x128xf32>
    %1033 = arith.addf %1031, %1032 : vector<8x128xf32>
    %1034 = arith.subf %1028, %1033 : vector<8x128xf32>
    %1035 = arith.mulf %963, %728 : vector<8x128xf32>
    %1036 = arith.mulf %964, %735 : vector<8x128xf32>
    %1037 = arith.addf %1035, %1036 : vector<8x128xf32>
    %1038 = arith.mulf %961, %784 : vector<8x128xf32>
    %1039 = arith.addf %1037, %1038 : vector<8x128xf32>
    %1040 = arith.mulf %962, %791 : vector<8x128xf32>
    %1041 = arith.subf %1039, %1040 : vector<8x128xf32>
    %1042 = arith.mulf %963, %735 : vector<8x128xf32>
    %1043 = arith.mulf %961, %791 : vector<8x128xf32>
    %1044 = arith.addf %1042, %1043 : vector<8x128xf32>
    %1045 = arith.mulf %962, %784 : vector<8x128xf32>
    %1046 = arith.addf %1044, %1045 : vector<8x128xf32>
    %1047 = arith.mulf %964, %728 : vector<8x128xf32>
    %1048 = arith.subf %1046, %1047 : vector<8x128xf32>
    %1049 = arith.mulf %961, %756 : vector<8x128xf32>
    %1050 = arith.mulf %962, %763 : vector<8x128xf32>
    %1051 = arith.addf %1049, %1050 : vector<8x128xf32>
    %1052 = arith.mulf %964, %819 : vector<8x128xf32>
    %1053 = arith.addf %1051, %1052 : vector<8x128xf32>
    %1054 = arith.mulf %963, %812 : vector<8x128xf32>
    %1055 = arith.subf %1053, %1054 : vector<8x128xf32>
    %1056 = arith.mulf %961, %763 : vector<8x128xf32>
    %1057 = arith.mulf %962, %756 : vector<8x128xf32>
    %1058 = arith.mulf %963, %819 : vector<8x128xf32>
    %1059 = arith.addf %1057, %1058 : vector<8x128xf32>
    %1060 = arith.mulf %964, %812 : vector<8x128xf32>
    %1061 = arith.addf %1059, %1060 : vector<8x128xf32>
    %1062 = arith.subf %1056, %1061 : vector<8x128xf32>
    %1063 = arith.mulf %963, %756 : vector<8x128xf32>
    %1064 = arith.mulf %964, %763 : vector<8x128xf32>
    %1065 = arith.addf %1063, %1064 : vector<8x128xf32>
    %1066 = arith.mulf %961, %812 : vector<8x128xf32>
    %1067 = arith.addf %1065, %1066 : vector<8x128xf32>
    %1068 = arith.mulf %962, %819 : vector<8x128xf32>
    %1069 = arith.subf %1067, %1068 : vector<8x128xf32>
    %1070 = arith.mulf %963, %763 : vector<8x128xf32>
    %1071 = arith.mulf %961, %819 : vector<8x128xf32>
    %1072 = arith.addf %1070, %1071 : vector<8x128xf32>
    %1073 = arith.mulf %962, %812 : vector<8x128xf32>
    %1074 = arith.addf %1072, %1073 : vector<8x128xf32>
    %1075 = arith.mulf %964, %756 : vector<8x128xf32>
    %1076 = arith.subf %1074, %1075 : vector<8x128xf32>
    %1077 = arith.mulf %961, %826 : vector<8x128xf32>
    %1078 = arith.mulf %962, %833 : vector<8x128xf32>
    %1079 = arith.addf %1077, %1078 : vector<8x128xf32>
    %1080 = arith.mulf %964, %889 : vector<8x128xf32>
    %1081 = arith.addf %1079, %1080 : vector<8x128xf32>
    %1082 = arith.mulf %963, %882 : vector<8x128xf32>
    %1083 = arith.subf %1081, %1082 : vector<8x128xf32>
    %1084 = arith.mulf %961, %833 : vector<8x128xf32>
    %1085 = arith.mulf %962, %826 : vector<8x128xf32>
    %1086 = arith.mulf %963, %889 : vector<8x128xf32>
    %1087 = arith.addf %1085, %1086 : vector<8x128xf32>
    %1088 = arith.mulf %964, %882 : vector<8x128xf32>
    %1089 = arith.addf %1087, %1088 : vector<8x128xf32>
    %1090 = arith.subf %1084, %1089 : vector<8x128xf32>
    %1091 = arith.mulf %963, %826 : vector<8x128xf32>
    %1092 = arith.mulf %964, %833 : vector<8x128xf32>
    %1093 = arith.addf %1091, %1092 : vector<8x128xf32>
    %1094 = arith.mulf %961, %882 : vector<8x128xf32>
    %1095 = arith.addf %1093, %1094 : vector<8x128xf32>
    %1096 = arith.mulf %962, %889 : vector<8x128xf32>
    %1097 = arith.subf %1095, %1096 : vector<8x128xf32>
    %1098 = arith.mulf %963, %833 : vector<8x128xf32>
    %1099 = arith.mulf %961, %889 : vector<8x128xf32>
    %1100 = arith.addf %1098, %1099 : vector<8x128xf32>
    %1101 = arith.mulf %962, %882 : vector<8x128xf32>
    %1102 = arith.addf %1100, %1101 : vector<8x128xf32>
    %1103 = arith.mulf %964, %826 : vector<8x128xf32>
    %1104 = arith.subf %1102, %1103 : vector<8x128xf32>
    %1105 = arith.mulf %961, %854 : vector<8x128xf32>
    %1106 = arith.mulf %962, %861 : vector<8x128xf32>
    %1107 = arith.addf %1105, %1106 : vector<8x128xf32>
    %1108 = arith.mulf %964, %917 : vector<8x128xf32>
    %1109 = arith.addf %1107, %1108 : vector<8x128xf32>
    %1110 = arith.mulf %963, %910 : vector<8x128xf32>
    %1111 = arith.subf %1109, %1110 : vector<8x128xf32>
    %1112 = arith.mulf %961, %861 : vector<8x128xf32>
    %1113 = arith.mulf %962, %854 : vector<8x128xf32>
    %1114 = arith.mulf %963, %917 : vector<8x128xf32>
    %1115 = arith.addf %1113, %1114 : vector<8x128xf32>
    %1116 = arith.mulf %964, %910 : vector<8x128xf32>
    %1117 = arith.addf %1115, %1116 : vector<8x128xf32>
    %1118 = arith.subf %1112, %1117 : vector<8x128xf32>
    %1119 = arith.mulf %963, %854 : vector<8x128xf32>
    %1120 = arith.mulf %964, %861 : vector<8x128xf32>
    %1121 = arith.addf %1119, %1120 : vector<8x128xf32>
    %1122 = arith.mulf %961, %910 : vector<8x128xf32>
    %1123 = arith.addf %1121, %1122 : vector<8x128xf32>
    %1124 = arith.mulf %962, %917 : vector<8x128xf32>
    %1125 = arith.subf %1123, %1124 : vector<8x128xf32>
    %1126 = arith.mulf %963, %861 : vector<8x128xf32>
    %1127 = arith.mulf %961, %917 : vector<8x128xf32>
    %1128 = arith.addf %1126, %1127 : vector<8x128xf32>
    %1129 = arith.mulf %962, %910 : vector<8x128xf32>
    %1130 = arith.addf %1128, %1129 : vector<8x128xf32>
    %1131 = arith.mulf %964, %854 : vector<8x128xf32>
    %1132 = arith.subf %1130, %1131 : vector<8x128xf32>
    %1133 = arith.mulf %961, %840 : vector<8x128xf32>
    %1134 = arith.mulf %962, %847 : vector<8x128xf32>
    %1135 = arith.addf %1133, %1134 : vector<8x128xf32>
    %1136 = arith.mulf %964, %903 : vector<8x128xf32>
    %1137 = arith.addf %1135, %1136 : vector<8x128xf32>
    %1138 = arith.mulf %963, %896 : vector<8x128xf32>
    %1139 = arith.subf %1137, %1138 : vector<8x128xf32>
    %1140 = arith.mulf %961, %847 : vector<8x128xf32>
    %1141 = arith.mulf %962, %840 : vector<8x128xf32>
    %1142 = arith.mulf %963, %903 : vector<8x128xf32>
    %1143 = arith.addf %1141, %1142 : vector<8x128xf32>
    %1144 = arith.mulf %964, %896 : vector<8x128xf32>
    %1145 = arith.addf %1143, %1144 : vector<8x128xf32>
    %1146 = arith.subf %1140, %1145 : vector<8x128xf32>
    %1147 = arith.mulf %963, %840 : vector<8x128xf32>
    %1148 = arith.mulf %964, %847 : vector<8x128xf32>
    %1149 = arith.addf %1147, %1148 : vector<8x128xf32>
    %1150 = arith.mulf %961, %896 : vector<8x128xf32>
    %1151 = arith.addf %1149, %1150 : vector<8x128xf32>
    %1152 = arith.mulf %962, %903 : vector<8x128xf32>
    %1153 = arith.subf %1151, %1152 : vector<8x128xf32>
    %1154 = arith.mulf %963, %847 : vector<8x128xf32>
    %1155 = arith.mulf %961, %903 : vector<8x128xf32>
    %1156 = arith.addf %1154, %1155 : vector<8x128xf32>
    %1157 = arith.mulf %962, %896 : vector<8x128xf32>
    %1158 = arith.addf %1156, %1157 : vector<8x128xf32>
    %1159 = arith.mulf %964, %840 : vector<8x128xf32>
    %1160 = arith.subf %1158, %1159 : vector<8x128xf32>
    %1161 = arith.mulf %961, %868 : vector<8x128xf32>
    %1162 = arith.mulf %962, %875 : vector<8x128xf32>
    %1163 = arith.addf %1161, %1162 : vector<8x128xf32>
    %1164 = arith.mulf %964, %931 : vector<8x128xf32>
    %1165 = arith.addf %1163, %1164 : vector<8x128xf32>
    %1166 = arith.mulf %963, %924 : vector<8x128xf32>
    %1167 = arith.subf %1165, %1166 : vector<8x128xf32>
    %1168 = arith.mulf %961, %875 : vector<8x128xf32>
    %1169 = arith.mulf %962, %868 : vector<8x128xf32>
    %1170 = arith.mulf %963, %931 : vector<8x128xf32>
    %1171 = arith.addf %1169, %1170 : vector<8x128xf32>
    %1172 = arith.mulf %964, %924 : vector<8x128xf32>
    %1173 = arith.addf %1171, %1172 : vector<8x128xf32>
    %1174 = arith.subf %1168, %1173 : vector<8x128xf32>
    %1175 = arith.mulf %963, %868 : vector<8x128xf32>
    %1176 = arith.mulf %964, %875 : vector<8x128xf32>
    %1177 = arith.addf %1175, %1176 : vector<8x128xf32>
    %1178 = arith.mulf %961, %924 : vector<8x128xf32>
    %1179 = arith.addf %1177, %1178 : vector<8x128xf32>
    %1180 = arith.mulf %962, %931 : vector<8x128xf32>
    %1181 = arith.subf %1179, %1180 : vector<8x128xf32>
    %1182 = arith.mulf %963, %875 : vector<8x128xf32>
    %1183 = arith.mulf %961, %931 : vector<8x128xf32>
    %1184 = arith.addf %1182, %1183 : vector<8x128xf32>
    %1185 = arith.mulf %962, %924 : vector<8x128xf32>
    %1186 = arith.addf %1184, %1185 : vector<8x128xf32>
    %1187 = arith.mulf %964, %868 : vector<8x128xf32>
    %1188 = arith.subf %1186, %1187 : vector<8x128xf32>
    %1189 = arith.index_cast %113 : i32 to index
    %c9_137 = arith.constant 9 : index
    %c0_138 = arith.constant 0 : index
    %c0_139 = arith.constant 0 : index
    %1190 = vector.load %arg1[%1189, %c9_137, %c0_138, %c0_139] : memref<1x12x8x128xf32, #tpu.memory_space<vmem>>, vector<1x1x8x128xf32>
    %1191 = vector.shape_cast %1190 : vector<1x1x8x128xf32> to vector<8x128xf32>
    %1192 = arith.index_cast %113 : i32 to index
    %c10_140 = arith.constant 10 : index
    %c0_141 = arith.constant 0 : index
    %c0_142 = arith.constant 0 : index
    %1193 = vector.load %arg1[%1192, %c10_140, %c0_141, %c0_142] : memref<1x12x8x128xf32, #tpu.memory_space<vmem>>, vector<1x1x8x128xf32>
    %1194 = vector.shape_cast %1193 : vector<1x1x8x128xf32> to vector<8x128xf32>
    %1195 = arith.index_cast %113 : i32 to index
    %c11_143 = arith.constant 11 : index
    %c0_144 = arith.constant 0 : index
    %c0_145 = arith.constant 0 : index
    %1196 = vector.load %arg1[%1195, %c11_143, %c0_144, %c0_145] : memref<1x12x8x128xf32, #tpu.memory_space<vmem>>, vector<1x1x8x128xf32>
    %1197 = vector.shape_cast %1196 : vector<1x1x8x128xf32> to vector<8x128xf32>
    %1198 = vector.broadcast %104 : f32 to vector<8x128xf32>
    %1199 = arith.mulf %1198, %1191 : vector<8x128xf32>
    %1200 = vector.broadcast %106 : f32 to vector<8x128xf32>
    %1201 = arith.mulf %1200, %1197 : vector<8x128xf32>
    %1202 = vector.broadcast %105 : f32 to vector<8x128xf32>
    %1203 = arith.mulf %1202, %1194 : vector<8x128xf32>
    %1204 = vector.broadcast %107 : f32 to vector<8x128xf32>
    %1205 = arith.addf %1203, %1204 : vector<8x128xf32>
    %1206 = arith.addf %1199, %1201 : vector<8x128xf32>
    %1207 = vector.broadcast %109 : f32 to vector<8x128xf32>
    %1208 = arith.addf %1206, %1207 : vector<8x128xf32>
    %1209 = arith.subf %1199, %1201 : vector<8x128xf32>
    %1210 = vector.broadcast %111 : f32 to vector<8x128xf32>
    %1211 = arith.addf %1209, %1210 : vector<8x128xf32>
    %1212 = math.cos %1205 : vector<8x128xf32>
    %1213 = math.sin %1205 : vector<8x128xf32>
    %1214 = math.cos %1208 : vector<8x128xf32>
    %1215 = math.sin %1208 : vector<8x128xf32>
    %1216 = math.cos %1211 : vector<8x128xf32>
    %1217 = math.sin %1211 : vector<8x128xf32>
    %1218 = arith.mulf %1214, %1212 : vector<8x128xf32>
    %1219 = arith.mulf %1215, %1212 : vector<8x128xf32>
    %1220 = arith.mulf %1216, %1213 : vector<8x128xf32>
    %1221 = arith.mulf %1217, %1213 : vector<8x128xf32>
    %1222 = arith.mulf %1220, %971 : vector<8x128xf32>
    %1223 = arith.mulf %1221, %978 : vector<8x128xf32>
    %1224 = arith.addf %1222, %1223 : vector<8x128xf32>
    %1225 = arith.mulf %1218, %999 : vector<8x128xf32>
    %1226 = arith.addf %1224, %1225 : vector<8x128xf32>
    %1227 = arith.mulf %1219, %1006 : vector<8x128xf32>
    %1228 = arith.subf %1226, %1227 : vector<8x128xf32>
    %1229 = arith.mulf %1220, %978 : vector<8x128xf32>
    %1230 = arith.mulf %1218, %1006 : vector<8x128xf32>
    %1231 = arith.addf %1229, %1230 : vector<8x128xf32>
    %1232 = arith.mulf %1219, %999 : vector<8x128xf32>
    %1233 = arith.addf %1231, %1232 : vector<8x128xf32>
    %1234 = arith.mulf %1221, %971 : vector<8x128xf32>
    %1235 = arith.subf %1233, %1234 : vector<8x128xf32>
    %1236 = arith.mulf %1218, %985 : vector<8x128xf32>
    %1237 = arith.mulf %1219, %992 : vector<8x128xf32>
    %1238 = arith.addf %1236, %1237 : vector<8x128xf32>
    %1239 = arith.mulf %1221, %1020 : vector<8x128xf32>
    %1240 = arith.addf %1238, %1239 : vector<8x128xf32>
    %1241 = arith.mulf %1220, %1013 : vector<8x128xf32>
    %1242 = arith.subf %1240, %1241 : vector<8x128xf32>
    %1243 = arith.mulf %1218, %992 : vector<8x128xf32>
    %1244 = arith.mulf %1219, %985 : vector<8x128xf32>
    %1245 = arith.mulf %1220, %1020 : vector<8x128xf32>
    %1246 = arith.addf %1244, %1245 : vector<8x128xf32>
    %1247 = arith.mulf %1221, %1013 : vector<8x128xf32>
    %1248 = arith.addf %1246, %1247 : vector<8x128xf32>
    %1249 = arith.subf %1243, %1248 : vector<8x128xf32>
    %1250 = arith.mulf %1218, %1027 : vector<8x128xf32>
    %1251 = arith.mulf %1219, %1034 : vector<8x128xf32>
    %1252 = arith.addf %1250, %1251 : vector<8x128xf32>
    %1253 = arith.mulf %1221, %1062 : vector<8x128xf32>
    %1254 = arith.addf %1252, %1253 : vector<8x128xf32>
    %1255 = arith.mulf %1220, %1055 : vector<8x128xf32>
    %1256 = arith.subf %1254, %1255 : vector<8x128xf32>
    %1257 = arith.mulf %1218, %1034 : vector<8x128xf32>
    %1258 = arith.mulf %1219, %1027 : vector<8x128xf32>
    %1259 = arith.mulf %1220, %1062 : vector<8x128xf32>
    %1260 = arith.addf %1258, %1259 : vector<8x128xf32>
    %1261 = arith.mulf %1221, %1055 : vector<8x128xf32>
    %1262 = arith.addf %1260, %1261 : vector<8x128xf32>
    %1263 = arith.subf %1257, %1262 : vector<8x128xf32>
    %1264 = arith.mulf %1220, %1041 : vector<8x128xf32>
    %1265 = arith.mulf %1221, %1048 : vector<8x128xf32>
    %1266 = arith.addf %1264, %1265 : vector<8x128xf32>
    %1267 = arith.mulf %1218, %1069 : vector<8x128xf32>
    %1268 = arith.addf %1266, %1267 : vector<8x128xf32>
    %1269 = arith.mulf %1219, %1076 : vector<8x128xf32>
    %1270 = arith.subf %1268, %1269 : vector<8x128xf32>
    %1271 = arith.mulf %1220, %1048 : vector<8x128xf32>
    %1272 = arith.mulf %1218, %1076 : vector<8x128xf32>
    %1273 = arith.addf %1271, %1272 : vector<8x128xf32>
    %1274 = arith.mulf %1219, %1069 : vector<8x128xf32>
    %1275 = arith.addf %1273, %1274 : vector<8x128xf32>
    %1276 = arith.mulf %1221, %1041 : vector<8x128xf32>
    %1277 = arith.subf %1275, %1276 : vector<8x128xf32>
    %1278 = arith.mulf %1220, %1083 : vector<8x128xf32>
    %1279 = arith.mulf %1221, %1090 : vector<8x128xf32>
    %1280 = arith.addf %1278, %1279 : vector<8x128xf32>
    %1281 = arith.mulf %1218, %1111 : vector<8x128xf32>
    %1282 = arith.addf %1280, %1281 : vector<8x128xf32>
    %1283 = arith.mulf %1219, %1118 : vector<8x128xf32>
    %1284 = arith.subf %1282, %1283 : vector<8x128xf32>
    %1285 = arith.mulf %1220, %1090 : vector<8x128xf32>
    %1286 = arith.mulf %1218, %1118 : vector<8x128xf32>
    %1287 = arith.addf %1285, %1286 : vector<8x128xf32>
    %1288 = arith.mulf %1219, %1111 : vector<8x128xf32>
    %1289 = arith.addf %1287, %1288 : vector<8x128xf32>
    %1290 = arith.mulf %1221, %1083 : vector<8x128xf32>
    %1291 = arith.subf %1289, %1290 : vector<8x128xf32>
    %1292 = arith.mulf %1218, %1097 : vector<8x128xf32>
    %1293 = arith.mulf %1219, %1104 : vector<8x128xf32>
    %1294 = arith.addf %1292, %1293 : vector<8x128xf32>
    %1295 = arith.mulf %1221, %1132 : vector<8x128xf32>
    %1296 = arith.addf %1294, %1295 : vector<8x128xf32>
    %1297 = arith.mulf %1220, %1125 : vector<8x128xf32>
    %1298 = arith.subf %1296, %1297 : vector<8x128xf32>
    %1299 = arith.mulf %1218, %1104 : vector<8x128xf32>
    %1300 = arith.mulf %1219, %1097 : vector<8x128xf32>
    %1301 = arith.mulf %1220, %1132 : vector<8x128xf32>
    %1302 = arith.addf %1300, %1301 : vector<8x128xf32>
    %1303 = arith.mulf %1221, %1125 : vector<8x128xf32>
    %1304 = arith.addf %1302, %1303 : vector<8x128xf32>
    %1305 = arith.subf %1299, %1304 : vector<8x128xf32>
    %1306 = arith.mulf %1218, %1139 : vector<8x128xf32>
    %1307 = arith.mulf %1219, %1146 : vector<8x128xf32>
    %1308 = arith.addf %1306, %1307 : vector<8x128xf32>
    %1309 = arith.mulf %1221, %1174 : vector<8x128xf32>
    %1310 = arith.addf %1308, %1309 : vector<8x128xf32>
    %1311 = arith.mulf %1220, %1167 : vector<8x128xf32>
    %1312 = arith.subf %1310, %1311 : vector<8x128xf32>
    %1313 = arith.mulf %1218, %1146 : vector<8x128xf32>
    %1314 = arith.mulf %1219, %1139 : vector<8x128xf32>
    %1315 = arith.mulf %1220, %1174 : vector<8x128xf32>
    %1316 = arith.addf %1314, %1315 : vector<8x128xf32>
    %1317 = arith.mulf %1221, %1167 : vector<8x128xf32>
    %1318 = arith.addf %1316, %1317 : vector<8x128xf32>
    %1319 = arith.subf %1313, %1318 : vector<8x128xf32>
    %1320 = arith.mulf %1220, %1153 : vector<8x128xf32>
    %1321 = arith.mulf %1221, %1160 : vector<8x128xf32>
    %1322 = arith.addf %1320, %1321 : vector<8x128xf32>
    %1323 = arith.mulf %1218, %1181 : vector<8x128xf32>
    %1324 = arith.addf %1322, %1323 : vector<8x128xf32>
    %1325 = arith.mulf %1219, %1188 : vector<8x128xf32>
    %1326 = arith.subf %1324, %1325 : vector<8x128xf32>
    %1327 = arith.mulf %1220, %1160 : vector<8x128xf32>
    %1328 = arith.mulf %1218, %1188 : vector<8x128xf32>
    %1329 = arith.addf %1327, %1328 : vector<8x128xf32>
    %1330 = arith.mulf %1219, %1181 : vector<8x128xf32>
    %1331 = arith.addf %1329, %1330 : vector<8x128xf32>
    %1332 = arith.mulf %1221, %1153 : vector<8x128xf32>
    %1333 = arith.subf %1331, %1332 : vector<8x128xf32>
    %1334 = arith.mulf %1256, %1256 : vector<8x128xf32>
    %1335 = arith.mulf %1263, %1263 : vector<8x128xf32>
    %1336 = arith.addf %1334, %1335 : vector<8x128xf32>
    %1337 = arith.mulf %1312, %1312 : vector<8x128xf32>
    %1338 = arith.mulf %1319, %1319 : vector<8x128xf32>
    %1339 = arith.addf %1337, %1338 : vector<8x128xf32>
    %1340 = arith.addf %1336, %1339 : vector<8x128xf32>
    %1341 = arith.mulf %1228, %1228 : vector<8x128xf32>
    %1342 = arith.mulf %1235, %1235 : vector<8x128xf32>
    %1343 = arith.addf %1341, %1342 : vector<8x128xf32>
    %1344 = arith.addf %1340, %1343 : vector<8x128xf32>
    %1345 = arith.mulf %1284, %1284 : vector<8x128xf32>
    %1346 = arith.mulf %1291, %1291 : vector<8x128xf32>
    %1347 = arith.addf %1345, %1346 : vector<8x128xf32>
    %1348 = arith.addf %1344, %1347 : vector<8x128xf32>
    %1349 = arith.mulf %1298, %1298 : vector<8x128xf32>
    %1350 = arith.mulf %1305, %1305 : vector<8x128xf32>
    %1351 = arith.addf %1349, %1350 : vector<8x128xf32>
    %1352 = arith.addf %1348, %1351 : vector<8x128xf32>
    %1353 = arith.mulf %1242, %1242 : vector<8x128xf32>
    %1354 = arith.mulf %1249, %1249 : vector<8x128xf32>
    %1355 = arith.addf %1353, %1354 : vector<8x128xf32>
    %1356 = arith.addf %1352, %1355 : vector<8x128xf32>
    %1357 = arith.mulf %1326, %1326 : vector<8x128xf32>
    %1358 = arith.mulf %1333, %1333 : vector<8x128xf32>
    %1359 = arith.addf %1357, %1358 : vector<8x128xf32>
    %1360 = arith.addf %1356, %1359 : vector<8x128xf32>
    %1361 = arith.mulf %1270, %1270 : vector<8x128xf32>
    %1362 = arith.mulf %1277, %1277 : vector<8x128xf32>
    %1363 = arith.addf %1361, %1362 : vector<8x128xf32>
    %1364 = arith.addf %1360, %1363 : vector<8x128xf32>
    %cst_146 = arith.constant 2.000000e+00 : f32
    %1365 = vector.broadcast %cst_146 : f32 to vector<8x128xf32>
    %1366 = arith.mulf %1365, %1364 : vector<8x128xf32>
    %cst_147 = arith.constant 1.000000e+00 : f32
    %1367 = vector.broadcast %cst_147 : f32 to vector<8x128xf32>
    %1368 = arith.subf %1367, %1366 : vector<8x128xf32>
    %1369 = arith.index_cast %113 : i32 to index
    %c0_148 = arith.constant 0 : index
    %c0_149 = arith.constant 0 : index
    %1370 = vector.load %arg4[%1369, %c0_148, %c0_149] : memref<1x8x128xf32, #tpu.memory_space<vmem>>, vector<1x8x128xf32>
    %1371 = vector.shape_cast %1370 : vector<1x8x128xf32> to vector<8x128xf32>
    %1372 = vector.shape_cast %1368 : vector<8x128xf32> to vector<1x8x128xf32>
    tpu.vector_store %arg4[%1369, %c0_148, %c0_149], %1372 {strides = array<i32>} : memref<1x8x128xf32, #tpu.memory_space<vmem>>, vector<1x8x128xf32>,
    %c1_i32_150 = arith.constant 1 : i32
    return
  }
  func.func @transform_0(%arg0: i32) -> (i32, i32, i32, i32) {
    %c0_i32 = arith.constant 0 : i32
    %c0_i32_0 = arith.constant 0 : i32
    %c0_i32_1 = arith.constant 0 : i32
    %c0_i32_2 = arith.constant 0 : i32
    return %arg0, %c0_i32, %c0_i32_0, %c0_i32_1 : i32, i32, i32, i32
  }
  func.func @transform_1(%arg0: i32) -> i32 {
    %c0_i32 = arith.constant 0 : i32
    %c0_i32_0 = arith.constant 0 : i32
    return %c0_i32 : i32
  }
  func.func @transform_2(%arg0: i32) -> i32 {
    %c0_i32 = arith.constant 0 : i32
    %c0_i32_0 = arith.constant 0 : i32
    return %c0_i32 : i32
  }
  func.func @transform_3(%arg0: i32) -> (i32, i32, i32) {
    %c0_i32 = arith.constant 0 : i32
    %c0_i32_0 = arith.constant 0 : i32
    %c0_i32_1 = arith.constant 0 : i32
    return %arg0, %c0_i32, %c0_i32_0 : i32, i32, i32
  }
}

</mosaic_0001>

<bundles_post_ra>
// kernel: reuploading_forward.2
= control target key start
LH: loop header
LB: loop body
LE: loop exit
PB: predicated region body
PF: predicated region fallthrough
CT: control target
= control target key end

     0   :  { %8 = vsyncpa [#allocation3], 0  ;;  %s12604_s0 = inlined_call_operand.vmem [shape: f32[24], index: 0, kind: input, shape index: {}]   ;;  %s12605_s1 = inlined_call_operand.vmem [shape: f32[24], index: 1, kind: input, shape index: {}]   ;;  %s12606_s2 = inlined_call_operand.vmem [shape: f32[1,8,128,12], index: 2, kind: input, shape index: {}]   ;;  %s12607_s3 = inlined_call_operand.vmem [shape: f32[1,8,128], index: 3, kind: output, shape index: {}]  }
   0x1   :  { %s18_s14 = sshll.u32 %s12604_s0, 4  ;;  %s19_s14 = int_to_ptr.vmem [resolvable:$true] %s18_s14 }
   0x2   :  { %9 = vsyncpa [#allocation5], 0  ;;  %s28_s17 = sshll.u32 %s12605_s1, 4  ;;  %s6811_s18 = scalar_lea.vmem %s19_s14, 16  ;;  %s29_s17 = int_to_ptr.vmem [resolvable:$true] %s28_s17 }
   0x3   :  { %p6812_p0 = scmp.ne.s32.totalorder %s19_s14, %s6811_s18  ;;  %p6816_p1 = scmp.lt.s32.totalorder %s19_s14, %s19_s14 }
   0x4   :  { %p6817_p2 = scmp.lt.s32.totalorder %s6811_s18, %s6811_s18 }
   0x6   :  { %p6818_p3 = por %p6817_p2, %p6816_p1 }
   0x8   :  { %p6819_p4 = pnand %p6818_p3, %p6812_p0 }
   0xa   :  { %6822 = shalt.err (!%p6819_p4)
}
   0xb   :  { %s6839_s19 = smov [#allocation2]   ;;  %s6823_s20 = scalar_lea.vmem %s29_s17, 16 }
   0xc   :  { %21 = dma.vmem_to_smem %s19_s14, 16, %s6839_s19, [#allocation3]  }
   0xd   :  { %p6824_p5 = scmp.ne.s32.totalorder %s29_s17, %s6823_s20  ;;  %p6828_p6 = scmp.lt.s32.totalorder %s29_s17, %s29_s17 }
   0xe   :  { %p6829_p7 = scmp.lt.s32.totalorder %s6823_s20, %s6823_s20 }
  0x10   :  { %p6830_p8 = por %p6829_p7, %p6828_p6 }
  0x12   :  { %p6831_p9 = pnand %p6830_p8, %p6824_p5 }
  0x14   :  { %6834 = shalt.err (!%p6831_p9)
}
  0x15   :  { %s6840_s0 = smov [#allocation4]  }
  0x16   :  { %31 = dma.vmem_to_smem %s29_s17, 16, %s6840_s0, [#allocation5]  }
  0x17   :  { %6835 = dma.done.wait [#allocation3], 16  }
  0x18   :  { %6836 = vsyncadd [#allocation3], 4294967280 }
  0x19   :  { %6837 = dma.done.wait [#allocation5], 16  }
  0x1a   :  { %6838 = vsyncadd [#allocation5], 4294967280 }
  0x1b   :  { %38 = sfence }
  0x1c   :  { %s6361_s1 = sld [smem:[#allocation2 + $0x1]]  ;;  %v6350_v0 = vld [vmem:[%s12606_s2 + $0x8] sm:$0xff]  ;;  %v39_v6 = vld [vmem:[%s12606_s2] sm:$0xff]  ;;  %v6351_v7 = vld [vmem:[%s12606_s2 + $0x10] sm:$0xff]  ;;  %v12626_v25 = vmov 2102212464  }
  0x1d   :  { %s6363_s21 = sld [smem:[#allocation4 + $0x1]]  ;;  %v12614_v27 = vmov 920167782   ;;  %v12612_v31 = vmov 1326507024  }
  0x1e   :  { %s109_s26 = sld [smem:[#allocation2]]  ;;  %v12616_v34 = vmov 683565275   ;;  %v12620_v36 = vmov 2475754826  }
  0x1f   :  { %s6362_s27 = sld [smem:[#allocation2 + $0x2]]  ;;  %v12624_v39 = vmov 2131351028  }
  0x20   :  { %s6876_s28 = sld [smem:[#allocation4]] }
  0x21   :  { %s6878_s29 = sld [smem:[#allocation4 + $0x2]] }
  0x22   :  { %s116_s22 = smul.f32 0.5, %s6361_s1  ;;  %s6941_s13 = sld [smem:[#allocation2 + $0x4]] }
  0x23   :  { %s118_s25 = smul.f32 0.5, %s6363_s21  ;;  %s6964_s14 = sld [smem:[#allocation4 + $0x4]] }
  0x24   :  { %v230_v1 = vstv %s116_s22  ;;  %s115_s30 = smul.f32 0.5, %s109_s26  ;;  %s6991_s18 = sld [smem:[#allocation2 + $0x3]] }
  0x25   :  { %v231_v2 = vmul.f32 %v6350_v0, %v230_v1  ;;  %v232_v3 = vstv %s118_s25  ;;  %s117_s4 = smul.f32 0.5, %s6362_s27  ;;  %s6999_s20 = sld [smem:[#allocation2 + $0x5]] }
  0x26   :  { %v226_v8 = vstv %s115_s30  ;;  %s7007_s0 = sld [smem:[#allocation4 + $0x3]] }
  0x27   :  { %v6880_v4 = vadd.f32 %v232_v3, %v231_v2  ;;  %s119_s9 = sadd.f32 %s6878_s29, %s6876_s28  ;;  %v228_v9 = vstv %s117_s4  ;;  %v227_v11 = vmul.f32 %v226_v8, %v39_v6 }
  0x28   :  { %v229_v12 = vmul.f32 %v6351_v7, %v228_v9  ;;  %s121_s11 = ssub.f32 %s6876_s28, %s6878_s29  ;;  %s130_s15 = smul.f32 0.5, %s6941_s13 }
  0x29   :  { %v243_v5 = vand.u32 2139095040, %v6880_v4  ;;  %s120_s10 = smul.f32 0.5, %s119_s9  ;;  %v240_v24 = vand.u32 2147483647, %v6880_v4  ;;  %s7011_s1 = sld [smem:[#allocation4 + $0x5]] }
  0x2a   :  { %v234_v14 = vadd.f32 %v229_v12, %v227_v11  ;;  %s122_s12 = smul.f32 0.5, %s121_s11  ;;  %v237_v46 = vsub.f32 %v227_v11, %v229_v12  ;;  %s7251_s4 = sld [smem:[#allocation2 + $0x7]] }
  0x2b   :  { %v244_v10 = vshrl.u32 %v243_v5, 23  ;;  %v235_v15 = vstv %s120_s10  ;;  %v247_v44 = vand.u32 8388607, %v240_v24  ;;  %s132_s19 = smul.f32 0.5, %s6964_s14  ;;  %s7267_s5 = sld [smem:[#allocation4 + $0x7]] }
  0x2c   :  { %v6891_v17 = vadd.f32 %v235_v15, %v234_v14  ;;  %v238_v52 = vstv %s122_s12  ;;  %s129_s21 = smul.f32 0.5, %s6991_s18  ;;  %s7274_s6 = sld [smem:[#allocation2 + $0x6]] }
  0x2d   :  { %v6407_v13 = vadd.s32 4294967169, %v244_v10  ;;  %v248_v53 = vor.u32 8388608, %v247_v44  ;;  %v6923_v58 = vadd.f32 %v238_v52, %v237_v46  ;;  %s131_s22 = smul.f32 0.5, %s6999_s20  ;;  %s7276_s7 = sld [smem:[#allocation2 + $0x8]] }
  0x2e   :  { %v450_v19 = vand.u32 2139095040, %v6891_v17  ;;  %v447_v9 = vand.u32 2147483647, %v6891_v17  ;;  %s7288_s9 = sld [smem:[#allocation4 + $0x6]] }
  0x2f   :  { %v250_v16 = vadd.s32 1, %v6407_v13  ;;  %v288_v61 = vshll.u32 %v248_v53, 8  ;;  %v657_v1 = vand.u32 2139095040, %v6923_v58  ;;  %s133_s27 = sadd.f32 %s7011_s1, %s7007_s0 }
  0x30   :  { %v451_v21 = vshrl.u32 %v450_v19, 23  ;;  %s135_s29 = ssub.f32 %s7007_s0, %s7011_s1  ;;  %s144_s8 = smul.f32 0.5, %s7251_s4 }
  0x31   :  { %vm251_vm0 = vcmp.gt.s32.totalorder %v250_v16, 0  ;;  %v658_v15 = vshrl.u32 %v657_v1, 23  ;;  %s134_s28 = smul.f32 0.5, %s133_s27  ;;  %s7293_s12 = sld [smem:[#allocation4 + $0x8]] }
  0x32   :  { %v252_v18 = vsel %vm251_vm0, %v250_v16, 0  ;;  %v6415_v23 = vadd.s32 4294967169, %v451_v21  ;;  %s7143_s30 = smul.f32 0.5, %s135_s29  ;;  %s7774_s23 = sld [smem:[#allocation4 + $0xa]] }
  0x33   :  { %v254_v20 = vand.u32 31, %v252_v18  ;;  %v6899_v29 = vshrl.u32 %v252_v18, 5  ;;  %s146_s13 = smul.f32 0.5, %s7267_s5  ;;  %s7849_s29 = sld [smem:[#allocation2 + $0xb]] }
  0x34   :  { %v457_v33 = vadd.s32 1, %v6415_v23  ;;  %s143_s14 = smul.f32 0.5, %s7274_s6  ;;  %s7877_s4 = sld [smem:[#allocation4 + $0xb]] }
  0x35   :  { %v255_v22 = vsub.s32 32, %v254_v20  ;;  %v266_v26 = vshll.u32 %v12626_v25, %v254_v20  ;;  %v269_v30 = vshll.u32 %v12614_v27, %v254_v20  ;;  %v257_v35 = vshll.u32 %v12616_v34, %v254_v20  ;;  %s8403_s16 = sld [smem:[#allocation4 + $0xd]] }
  0x36   :  { %v260_v37 = vshll.u32 %v12620_v36, %v254_v20  ;;  %v263_v41 = vshll.u32 %v12624_v39, %v254_v20  ;;  %vm275_vm1 = vcmp.lt.s32.totalorder %v6899_v29, 4  ;;  %vm458_vm2 = vcmp.gt.s32.totalorder %v457_v33, 0  ;;  %s10173_s26 = sld [smem:[#allocation2 + $0x13]] }
  0x37   :  { %v267_v28 = vshrl.u32 %v12614_v27, %v255_v22  ;;  %v270_v32 = vshrl.u32 %v12612_v31, %v255_v22  ;;  %v258_v38 = vshrl.u32 %v12620_v36, %v255_v22  ;;  %v261_v40 = vshrl.u32 %v12624_v39, %v255_v22  ;;  %s147_s20 = sadd.f32 %s7293_s12, %s7288_s9 }
  0x38   :  { %v264_v42 = vshrl.u32 %v12626_v25, %v255_v22  ;;  %vm272_vm3 = vcmp.lt.s32.totalorder %v6899_v29, 1  ;;  %vm274_vm4 = vcmp.lt.s32.totalorder %v6899_v29, 3  ;;  %v459_v51 = vsel %vm458_vm2, %v457_v33, 0  ;;  %s149_s1 = ssub.f32 %s7288_s9, %s7293_s12  ;;  %s160_s27 = smul.f32 0.5, %s7774_s23 }
  0x39   :  { %v268_v43 = vor.u32 %v267_v28, %v266_v26  ;;  %v271_v45 = vor.u32 %v270_v32, %v269_v30  ;;  %v259_v47 = vor.u32 %v258_v38, %v257_v35  ;;  %v262_v48 = vor.u32 %v261_v40, %v260_v37  ;;  %s7368_s0 = smul.f32 0.5, %s147_s20 }
  0x3a   :  { %v265_v49 = vor.u32 %v264_v42, %v263_v41  ;;  %vm273_vm5 = vcmp.lt.s32.totalorder %v6899_v29, 2  ;;  %v461_v57 = vand.u32 31, %v459_v51  ;;  %v256_v2 = vshrl.u32 %v12616_v34, %v255_v22  ;;  %s159_s6 = smul.f32 0.5, %s7849_s29 }
  0x3b   :  { %v281_v50 = vsel %vm275_vm1, %v268_v43, 920167782  ;;  %v285_v54 = vsel %vm275_vm1, %v271_v45, 1326507024  ;;  %v280_v55 = vsel %vm272_vm3, %v259_v47, %v262_v48  ;;  %v6952_v12 = vshrl.u32 %v459_v51, 5  ;;  %s174_s18 = smul.f32 0.5, %s8403_s16 }
  0x3c   :  { %v282_v56 = vsel %vm274_vm4, %v265_v49, %v281_v50  ;;  %v284_v59 = vsel %vm272_vm3, %v262_v48, %v265_v49  ;;  %v286_v60 = vsel %vm274_vm4, %v268_v43, %v285_v54  ;;  %v6933_v0 = vsub.s32 32, %v461_v57 }
  0x3d   :  { %v283_v62 = vsel %vm273_vm5, %v280_v55, %v282_v56  ;;  %v287_v63 = vsel %vm273_vm5, %v284_v59, %v286_v60  ;;  %v277_v6 = vsel %vm275_vm1, %v265_v49, 2102212464  ;;  %v473_v10 = vshll.u32 %v12626_v25, %v461_v57 }
  0x3e   :  { %v6937_v3 = vmul.u32.u64.low %v288_v61, %v283_v62  ;;  %v6938_v5 = vmul.u32.u64.high %v288_v61, %v283_v62, %v6937_v3  ;;  %v6945_v7 = vmul.u32.u64.low %v288_v61, %v287_v63  ;;  %v6946_v8 = vmul.u32.u64.high %v288_v61, %v287_v63, %v6945_v7 }
  0x3f   :  { %v474_v11 = vshrl.u32 %v12614_v27, %v6933_v0  ;;  %v476_v13 = vshll.u32 %v12614_v27, %v461_v57  ;;  %v477_v14 = vshrl.u32 %v12612_v31, %v6933_v0  ;;  %v276_v16 = vsel %vm272_vm3, %v256_v2, %v259_v47  ;;  %v6353_v47 = vld [vmem:[%s12606_s2 + $0x20] sm:$0xff] }
  0x40   :  { %v278_v18 = vsel %vm274_vm4, %v262_v48, %v277_v6  ;;  %v464_v19 = vshll.u32 %v12616_v34, %v461_v57  ;;  %v465_v20 = vshrl.u32 %v12620_v36, %v6933_v0  ;;  %v467_v21 = vshll.u32 %v12620_v36, %v461_v57 }
  0x41   :  { %v468_v22 = vshrl.u32 %v12624_v39, %v6933_v0  ;;  %v470_v23 = vshll.u32 %v12624_v39, %v461_v57  ;;  %v471_v26 = vshrl.u32 %v12626_v25, %v6933_v0  ;;  %v475_v28 = vor.u32 %v474_v11, %v473_v10 }
  0x42   :  { %v454_v30 = vand.u32 8388607, %v447_v9  ;;  %v478_v32 = vor.u32 %v477_v14, %v476_v13  ;;  %vm482_vm6 = vcmp.lt.s32.totalorder %v6952_v12, 4  ;;  %v279_v33 = vsel %vm273_vm5, %v276_v16, %v278_v18  ;;  %v6354_v16 = vld [vmem:[%s12606_s2 + $0x28] sm:$0xff] }
  0x43   :  { %v298_v35 = vadd.s32 1, %v6938_v5  ;;  %v6423_v37 = vadd.s32 4294967169, %v658_v15  ;;  %vm297_vm7 = vc.u32 %v6946_v8, %v6937_v3  ;;  %v466_v38 = vor.u32 %v465_v20, %v464_v19  ;;  %v6352_v15 = vld [vmem:[%s12606_s2 + $0x18] sm:$0xff] }
  0x44   :  { %v469_v40 = vor.u32 %v468_v22, %v467_v21  ;;  %v472_v41 = vor.u32 %v471_v26, %v470_v23  ;;  %vm479_vm8 = vcmp.lt.s32.totalorder %v6952_v12, 1  ;;  %vm481_vm9 = vcmp.lt.s32.totalorder %v6952_v12, 3 }
  0x45   :  { %v488_v42 = vsel %vm482_vm6, %v475_v28, 920167782  ;;  %v295_v29 = vmul.u32 %v288_v61, %v279_v33  ;;  %v455_v43 = vor.u32 8388608, %v454_v30  ;;  %v492_v44 = vsel %vm482_vm6, %v478_v32, 1326507024 }
  0x46   :  { %v299_v45 = vsel %vm297_vm7, %v298_v35, %v6938_v5  ;;  %v664_v46 = vadd.s32 1, %v6423_v37  ;;  %vm480_vm10 = vcmp.lt.s32.totalorder %v6952_v12, 2  ;;  %v487_v48 = vsel %vm479_vm8, %v466_v38, %v469_v40 }
  0x47   :  { %v489_v49 = vsel %vm481_vm9, %v472_v41, %v488_v42  ;;  %v877_v50 = vstv %s130_s15  ;;  %v491_v51 = vsel %vm479_vm8, %v469_v40, %v472_v41  ;;  %v493_v52 = vsel %vm481_vm9, %v475_v28, %v492_v44  ;;  %s145_s15 = smul.f32 0.5, %s7276_s7  ;;  %s9124_s7 = sld [smem:[#allocation4 + $0x10]] }
  0x48   :  { %v300_v53 = vadd.s32 %v299_v45, %v295_v29  ;;  %v495_v54 = vshll.u32 %v455_v43, 8  ;;  %v490_v55 = vsel %vm480_vm10, %v487_v48, %v489_v49  ;;  %vm665_vm11 = vcmp.gt.s32.totalorder %v664_v46, 0 }
  0x49   :  { %v878_v56 = vmul.f32 %v6353_v47, %v877_v50  ;;  %v494_v57 = vsel %vm480_vm10, %v491_v51, %v493_v52  ;;  %v879_v59 = vstv %s132_s19  ;;  %v463_v60 = vshrl.u32 %v12616_v34, %v6933_v0 }
  0x4a   :  { %v301_v61 = vadd.s32 536870912, %v300_v53  ;;  %v7015_v62 = vmul.u32.u64.low %v495_v54, %v490_v55  ;;  %v7016_v63 = vmul.u32.u64.high %v495_v54, %v490_v55, %v7015_v62  ;;  %v666_v1 = vsel %vm665_vm11, %v664_v46, 0 }
  0x4b   :  { %v484_v2 = vsel %vm482_vm6, %v472_v41, 2102212464  ;;  %v7021_v5 = vmul.u32.u64.low %v495_v54, %v494_v57  ;;  %v7022_v6 = vmul.u32.u64.high %v495_v54, %v494_v57, %v7021_v5  ;;  %v7024_v7 = vadd.f32 %v879_v59, %v878_v56 }
  0x4c   :  { %v668_v10 = vand.u32 31, %v666_v1  ;;  %v7028_v0 = vshrl.u32 %v301_v61, 30  ;;  %v483_v11 = vsel %vm479_vm8, %v463_v60, %v466_v38  ;;  %v485_v13 = vsel %vm481_vm9, %v469_v40, %v484_v2 }
  0x4d   :  { %v890_v14 = vand.u32 2139095040, %v7024_v7  ;;  %v486_v18 = vsel %vm480_vm10, %v483_v11, %v485_v13  ;;  %v873_v20 = vstv %s129_s21  ;;  %v875_v21 = vstv %s131_s22  ;;  %s7571_s21 = smul.f32 0.5, %s149_s1  ;;  %s7736_s22 = sld [smem:[#allocation2 + $0xa]] }
  0x4e   :  { %v669_v19 = vsub.s32 32, %v668_v10  ;;  %v303_v22 = vshll.u32 %v7028_v0, 30  ;;  %v505_v23 = vadd.s32 1, %v7016_v63  ;;  %vm504_vm12 = vc.u32 %v7022_v6, %v7015_v62  ;;  %s8519_s1 = sld [smem:[#allocation2 + $0xe]]  ;;  %s188_s9 = smul.f32 0.5, %s9124_s7 }
  0x4f   :  { %v891_v26 = vshrl.u32 %v890_v14, 23  ;;  %v502_v28 = vmul.u32 %v495_v54, %v486_v18  ;;  %v654_v30 = vand.u32 2147483647, %v6923_v58  ;;  %v7050_v32 = vmul.f32 %v6352_v15, %v873_v20  ;;  %s10351_s7 = sld [smem:[#allocation4 + $0x14]] }
  0x50   :  { %v7052_v33 = vmul.f32 %v6354_v16, %v875_v21  ;;  %v680_v12 = vshll.u32 %v12626_v25, %v668_v10  ;;  %v681_v35 = vshrl.u32 %v12614_v27, %v669_v19  ;;  %v683_v37 = vshll.u32 %v12614_v27, %v668_v10 }
  0x51   :  { %v684_v38 = vshrl.u32 %v12612_v31, %v669_v19  ;;  %v7058_v40 = vsub.s32 %v300_v53, %v303_v22  ;;  %v506_v41 = vsel %vm504_vm12, %v505_v23, %v7016_v63  ;;  %v667_v42 = vshrl.u32 %v666_v1, 5 }
  0x52   :  { %v671_v29 = vshll.u32 %v12616_v34, %v668_v10  ;;  %v672_v43 = vshrl.u32 %v12620_v36, %v669_v19  ;;  %v674_v44 = vshll.u32 %v12620_v36, %v668_v10  ;;  %v675_v45 = vshrl.u32 %v12624_v39, %v669_v19 }
  0x53   :  { %v6431_v46 = vadd.s32 4294967169, %v891_v26  ;;  %v677_v47 = vshll.u32 %v12624_v39, %v668_v10  ;;  %v678_v48 = vshrl.u32 %v12626_v25, %v669_v19  ;;  %v881_v49 = vadd.f32 %v7052_v33, %v7050_v32  ;;  %s158_s24 = smul.f32 0.5, %s7736_s22  ;;  %s8544_s22 = sld [smem:[#allocation4 + $0xe]] }
  0x54   :  { %v507_v50 = vadd.s32 %v506_v41, %v502_v28  ;;  %v682_v51 = vor.u32 %v681_v35, %v680_v12  ;;  %v685_v52 = vor.u32 %v684_v38, %v683_v37  ;;  %v882_v53 = vstv %s134_s28  ;;  %s7838_s28 = sld [smem:[#allocation2 + $0x9]] }
  0x55   :  { %v661_v54 = vand.u32 8388607, %v654_v30  ;;  %vm689_vm13 = vcmp.lt.s32.totalorder %v667_v42, 4  ;;  %v306_v55 = vsub.s32 0, %v7058_v40  ;;  %v673_v56 = vor.u32 %v672_v43, %v671_v29 }
  0x56   :  { %v676_v57 = vor.u32 %v675_v45, %v674_v44  ;;  %v897_v59 = vadd.s32 1, %v6431_v46  ;;  %v679_v60 = vor.u32 %v678_v48, %v677_v47  ;;  %vm686_vm14 = vcmp.lt.s32.totalorder %v667_v42, 1 }
  0x57   :  { %v7072_v61 = vadd.f32 %v882_v53, %v881_v49  ;;  %v508_v63 = vadd.s32 536870912, %v507_v50  ;;  %vm688_vm15 = vcmp.lt.s32.totalorder %v667_v42, 3  ;;  %v695_v1 = vsel %vm689_vm13, %v682_v51, 920167782 }
  0x58   :  { %v699_v2 = vsel %vm689_vm13, %v685_v52, 1326507024  ;;  %v662_v5 = vor.u32 8388608, %v661_v54  ;;  %v6408_v10 = vmin.u32 %v306_v55, %v7058_v40  ;;  %vm687_vm0 = vcmp.lt.s32.totalorder %v667_v42, 2 }
  0x59   :  { %v694_v11 = vsel %vm686_vm14, %v673_v56, %v676_v57  ;;  %vm898_vm1 = vcmp.gt.s32.totalorder %v897_v59, 0  ;;  %v696_v13 = vsel %vm688_vm15, %v679_v60, %v695_v1  ;;  %v698_v14 = vsel %vm686_vm14, %v676_v57, %v679_v60 }
  0x5a   :  { %v700_v15 = vsel %vm688_vm15, %v682_v51, %v699_v2  ;;  %v1097_v16 = vand.u32 2139095040, %v7072_v61  ;;  %v7082_v18 = vshrl.u32 %v508_v63, 30  ;;  %v702_v20 = vshll.u32 %v662_v5, 8  ;;  %s157_s5 = smul.f32 0.5, %s7838_s28 }
  0x5b   :  { %v899_v21 = vsel %vm898_vm1, %v897_v59, 0  ;;  %v697_v22 = vsel %vm687_vm0, %v694_v11, %v696_v13  ;;  %v701_v23 = vsel %vm687_vm0, %v698_v14, %v700_v15  ;;  %v308_v26 = vclz %v6408_v10  ;;  %s200_s28 = smul.f32 0.5, %s10173_s26 }
  0x5c   :  { %v1098_v28 = vshrl.u32 %v1097_v16, 23  ;;  %v510_v12 = vshll.u32 %v7082_v18, 30  ;;  %v670_v35 = vshrl.u32 %v12616_v34, %v669_v19  ;;  %v901_v37 = vand.u32 31, %v899_v21 }
  0x5d   :  { %v7088_v38 = vmul.u32.u64.low %v702_v20, %v701_v23  ;;  %v7089_v41 = vmul.u32.u64.high %v702_v20, %v701_v23, %v7088_v38  ;;  %v7091_v29 = vmul.u32.u64.low %v702_v20, %v697_v22  ;;  %v7092_v43 = vmul.u32.u64.high %v702_v20, %v697_v22, %v7091_v29 }
  0x5e   :  { %v691_v44 = vsel %vm689_vm13, %v679_v60, 2102212464  ;;  %v6409_v45 = vadd.s32 4294967294, %v308_v26  ;;  %v6439_v46 = vadd.s32 4294967169, %v1098_v28  ;;  %v7096_v47 = vsub.s32 %v507_v50, %v510_v12 }
  0x5f   :  { %v7098_v48 = vsub.s32 32, %v901_v37  ;;  %v690_v49 = vsel %vm686_vm14, %v670_v35, %v673_v56  ;;  %v692_v19 = vsel %vm688_vm15, %v676_v57, %v691_v44  ;;  %v12611_v51 = vand.u32 2147483647, %v7024_v7 }
  0x60   :  { %vm6410_vm2 = vcmp.lt.s32.totalorder %v6409_v45, 0  ;;  %v1104_v52 = vadd.s32 1, %v6439_v46  ;;  %v513_v53 = vsub.s32 0, %v7096_v47  ;;  %v693_v54 = vsel %vm687_vm0, %v690_v49, %v692_v19 }
  0x61   :  { %v913_v55 = vshll.u32 %v12626_v25, %v901_v37  ;;  %v914_v50 = vshrl.u32 %v12614_v27, %v7098_v48  ;;  %vm711_vm3 = vc.u32 %v7089_v41, %v7091_v29  ;;  %v712_v56 = vadd.s32 1, %v7092_v43 }
  0x62   :  { %v7111_v59 = vshrl.u32 %v899_v21, 5  ;;  %v904_v57 = vshll.u32 %v12616_v34, %v901_v37  ;;  %v907_v60 = vshll.u32 %v12620_v36, %v901_v37  ;;  %v910_v42 = vshll.u32 %v12624_v39, %v901_v37 }
  0x63   :  { %v916_v63 = vshll.u32 %v12614_v27, %v901_v37  ;;  %v917_v1 = vshrl.u32 %v12612_v31, %v7098_v48  ;;  %v905_v2 = vshrl.u32 %v12620_v36, %v7098_v48  ;;  %v908_v5 = vshrl.u32 %v12624_v39, %v7098_v48 }
  0x64   :  { %v911_v10 = vshrl.u32 %v12626_v25, %v7098_v48  ;;  %vm1105_vm4 = vcmp.gt.s32.totalorder %v1104_v52, 0  ;;  %v709_v11 = vmul.u32 %v702_v20, %v693_v54  ;;  %v915_v13 = vor.u32 %v914_v50, %v913_v55 }
  0x65   :  { %v713_v14 = vsel %vm711_vm3, %v712_v56, %v7092_v43  ;;  %v894_v15 = vand.u32 8388607, %v12611_v51  ;;  %vm922_vm5 = vcmp.lt.s32.totalorder %v7111_v59, 4  ;;  %v7130_v16 = vsel %vm6410_vm2, 0, %v6409_v45 }
  0x66   :  { %v918_v21 = vor.u32 %v917_v1, %v916_v63  ;;  %v1106_v22 = vsel %vm1105_vm4, %v1104_v52, 0  ;;  %v6416_v23 = vmin.u32 %v513_v53, %v7096_v47  ;;  %v906_v26 = vor.u32 %v905_v2, %v904_v57 }
  0x67   :  { %v909_v28 = vor.u32 %v908_v5, %v907_v60  ;;  %v912_v12 = vor.u32 %v911_v10, %v910_v42  ;;  %v7135_v20 = vadd.s32 %v713_v14, %v709_v11  ;;  %vm919_vm6 = vcmp.lt.s32.totalorder %v7111_v59, 1 }
  0x68   :  { %vm921_vm7 = vcmp.lt.s32.totalorder %v7111_v59, 3  ;;  %v928_v35 = vsel %vm922_vm5, %v915_v13, 920167782  ;;  %v895_v37 = vor.u32 8388608, %v894_v15  ;;  %v1108_v38 = vand.u32 31, %v1106_v22 }
  0x69   :  { %v932_v43 = vsel %vm922_vm5, %v918_v21, 1326507024  ;;  %v316_v44 = vsub.s32 4294967266, %v7130_v16  ;;  %vm920_vm8 = vcmp.lt.s32.totalorder %v7111_v59, 2  ;;  %v927_v45 = vsel %vm919_vm6, %v906_v26, %v909_v28 }
  0x6a   :  { %v929_v46 = vsel %vm921_vm7, %v912_v12, %v928_v35  ;;  %v515_v49 = vclz %v6416_v23  ;;  %v715_v19 = vadd.s32 536870912, %v7135_v20  ;;  %v931_v52 = vsel %vm919_vm6, %v909_v28, %v912_v12 }
  0x6b   :  { %v933_v53 = vsel %vm921_vm7, %v915_v13, %v932_v43  ;;  %v7156_v54 = vshll.u32 %v895_v37, 8  ;;  %v7158_v55 = vsub.s32 32, %v1108_v38  ;;  %v884_v50 = vsub.f32 %v7050_v32, %v7052_v33 }
  0x6c   :  { %v930_v56 = vsel %vm920_vm8, %v927_v45, %v929_v46  ;;  %v296_v57 = vadd.s32 %v6937_v3, %v6946_v8  ;;  %v312_v60 = vsub.s32 32, %v7130_v16  ;;  %v317_v42 = vadd.s32 127, %v316_v44 }
  0x6d   :  { %v885_v63 = vstv %s7143_s30  ;;  %v6417_v1 = vadd.s32 4294967294, %v515_v49  ;;  %v7168_v2 = vshrl.u32 %v715_v19, 30  ;;  %v934_v5 = vsel %vm920_vm8, %v931_v52, %v933_v53  ;;  %s7870_s30 = sld [smem:[#allocation4 + $0x9]] }
  0x6e   :  { %v12608_v10 = vand.u32 2147483647, %v7072_v61  ;;  %v7174_v32 = vmul.u32.u64.low %v7156_v54, %v930_v56  ;;  %v7175_v33 = vmul.u32.u64.high %v7156_v54, %v930_v56, %v7174_v32  ;;  %v1120_v11 = vshll.u32 %v12626_v25, %v1108_v38 }
  0x6f   :  { %v1121_v3 = vshrl.u32 %v12614_v27, %v7158_v55  ;;  %v903_v8 = vshrl.u32 %v12616_v34, %v7098_v48  ;;  %v7183_v13 = vshrl.u32 %v1106_v22, 5  ;;  %v1123_v14 = vshll.u32 %v12614_v27, %v1108_v38 }
  0x70   :  { %v1124_v15 = vshrl.u32 %v12612_v31, %v7158_v55  ;;  %v7189_v21 = vmul.u32.u64.low %v7156_v54, %v934_v5  ;;  %v7190_v23 = vmul.u32.u64.high %v7156_v54, %v934_v5, %v7189_v21  ;;  %v1111_v35 = vshll.u32 %v12616_v34, %v1108_v38 }
  0x71   :  { %v1114_v37 = vshll.u32 %v12620_v36, %v1108_v38  ;;  %v1112_v43 = vshrl.u32 %v12620_v36, %v7158_v55  ;;  %v1115_v48 = vshrl.u32 %v12624_v39, %v7158_v55  ;;  %v1117_v22 = vshll.u32 %v12624_v39, %v1108_v38 }
  0x72   :  { %v1118_v44 = vshrl.u32 %v12626_v25, %v7158_v55  ;;  %v313_v45 = vshll.u32 %v7058_v40, %v7130_v16  ;;  %v7203_v46 = vadd.f32 %v885_v63, %v884_v50  ;;  %v924_v49 = vsel %vm922_vm5, %v912_v12, 2102212464 }
  0x73   :  { %v1122_v19 = vor.u32 %v1121_v3, %v1120_v11  ;;  %v314_v52 = vshrl.u32 %v296_v57, %v312_v60  ;;  %v1101_v53 = vand.u32 8388607, %v12608_v10  ;;  %v1125_v56 = vor.u32 %v1124_v15, %v1123_v14  ;;  %s161_s11 = sadd.f32 %s7877_s4, %s7870_s30 }
  0x74   :  { %12841 = vst [vmem:[#allocation9_spill] sm:$0xff] %v7203_v46  ;;  %vm1129_vm9 = vcmp.lt.s32.totalorder %v7183_v13, 4  ;;  %v318_v38 = vshll.u32 %v317_v42, 23  ;;  %vm6418_vm10 = vcmp.lt.s32.totalorder %v6417_v1, 0  ;;  %v717_v5 = vshll.u32 %v7168_v2, 30 }
  0x75   :  { %v923_v40 = vsel %vm919_vm6, %v903_v8, %v906_v26  ;;  %v925_v16 = vsel %vm921_vm7, %v909_v28, %v924_v49  ;;  %v1113_v50 = vor.u32 %v1112_v43, %v1111_v35  ;;  %v1116_v12 = vor.u32 %v1115_v48, %v1114_v37  ;;  %s7962_s12 = smul.f32 0.5, %s161_s11 }
  0x76   :  { %v1119_v63 = vor.u32 %v1118_v44, %v1117_v22  ;;  %vm1126_vm11 = vcmp.lt.s32.totalorder %v7183_v13, 1  ;;  %vm1128_vm12 = vcmp.lt.s32.totalorder %v7183_v13, 3  ;;  %v1135_v57 = vsel %vm1129_vm9, %v1122_v19, 920167782 }
  0x77   :  { %v1304_v60 = vand.u32 2139095040, %v7203_v46  ;;  %v315_v42 = vor.u32 %v314_v52, %v313_v45  ;;  %v1102_v11 = vor.u32 8388608, %v1101_v53  ;;  %v1139_v26 = vsel %vm1129_vm9, %v1125_v56, 1326507024 }
  0x78   :  { %v518_v3 = vsel %vm6418_vm10, 0, %v6417_v1  ;;  %v7224_v28 = vsub.s32 %v7135_v20, %v717_v5  ;;  %v926_v8 = vsel %vm920_vm8, %v923_v40, %v925_v16  ;;  %v945_v14 = vadd.s32 1, %v7175_v33 }
  0x79   :  { %vm944_vm13 = vc.u32 %v7190_v23, %v7174_v32  ;;  %vm1127_vm14 = vcmp.lt.s32.totalorder %v7183_v13, 2  ;;  %v1134_v15 = vsel %vm1126_vm11, %v1113_v50, %v1116_v12  ;;  %v1136_v21 = vsel %vm1128_vm12, %v1119_v63, %v1135_v57 }
  0x7a   :  { %v319_v1 = vor.u32 4788187, %v318_v38  ;;  %v1138_v20 = vsel %vm1126_vm11, %v1116_v12, %v1119_v63  ;;  %v1140_v59 = vsel %vm1128_vm12, %v1122_v19, %v1139_v26  ;;  %v1305_v35 = vshrl.u32 %v1304_v60, 23 }
  0x7b   :  { %v523_v37 = vsub.s32 4294967266, %v518_v3  ;;  %v942_v43 = vmul.u32 %v7156_v54, %v926_v8  ;;  %v7241_v48 = vshll.u32 %v1102_v11, 8  ;;  %v720_v22 = vsub.s32 0, %v7224_v28 }
  0x7c   :  { %v946_v44 = vsel %vm944_vm13, %v945_v14, %v7175_v33  ;;  %v1137_v45 = vsel %vm1127_vm14, %v1134_v15, %v1136_v21  ;;  %v503_v49 = vadd.s32 %v7015_v62, %v7022_v6  ;;  %v1141_v52 = vsel %vm1127_vm14, %v1138_v20, %v1140_v59 }
  0x7d   :  { %v320_v19 = vand.u32 2147483647, %v319_v1  ;;  %v322_v53 = vcvt.s32.f32 %v315_v42  ;;  %v519_v54 = vsub.s32 32, %v518_v3  ;;  %v6447_v56 = vadd.s32 4294967169, %v1305_v35 }
  0x7e   :  { %v524_v38 = vadd.s32 127, %v523_v37  ;;  %v947_v5 = vadd.s32 %v946_v44, %v942_v43  ;;  %v7254_v40 = vmul.u32.u64.low %v7241_v48, %v1137_v45  ;;  %v7255_v33 = vmul.u32.u64.high %v7241_v48, %v1137_v45, %v7254_v40  ;;  %v6356_v43 = vld [vmem:[%s12606_s2 + $0x38] sm:$0xff] }
  0x7f   :  { %v6424_v16 = vmin.u32 %v720_v22, %v7224_v28  ;;  %v1110_v62 = vshrl.u32 %v12616_v34, %v7158_v55  ;;  %v7262_v6 = vmul.u32.u64.low %v7241_v48, %v1141_v52  ;;  %v7263_v57 = vmul.u32.u64.high %v7241_v48, %v1141_v52, %v7262_v6 }
  0x80   :  { %v1131_v60 = vsel %vm1129_vm9, %v1119_v63, 2102212464  ;;  %v323_v42 = vmul.f32 %v322_v53, %v320_v19  ;;  %v520_v11 = vshll.u32 %v7096_v47, %v518_v3  ;;  %v521_v26 = vshrl.u32 %v503_v49, %v519_v54 }
  0x81   :  { %v1311_v8 = vadd.s32 1, %v6447_v56  ;;  %v525_v14 = vshll.u32 %v524_v38, 23  ;;  %v948_v15 = vadd.s32 536870912, %v947_v5  ;;  %v722_v21 = vclz %v6424_v16 }
  0x82   :  { %v1130_v55 = vsel %vm1126_vm11, %v1110_v62, %v1113_v50  ;;  %v1132_v1 = vsel %vm1128_vm12, %v1116_v12, %v1131_v60  ;;  %vm242_vm15 = vcmp.lt.s32.totalorder %v6880_v4, 0  ;;  %v324_v47 = vxor.u32 2147483648, %v323_v42 }
  0x83   :  { %v522_v63 = vor.u32 %v521_v26, %v520_v11  ;;  %vm1312_vm0 = vcmp.gt.s32.totalorder %v1311_v8, 0  ;;  %v526_v3 = vor.u32 4788187, %v525_v14  ;;  %v7280_v20 = vshrl.u32 %v948_v15, 30  ;;  %v6355_v26 = vld [vmem:[%s12606_s2 + $0x30] sm:$0xff]  ;;  %v6357_v15 = vld [vmem:[%s12606_s2 + $0x40] sm:$0xff] }
  0x84   :  { %v1133_v50 = vsel %vm1127_vm14, %v1130_v55, %v1132_v1  ;;  %v1152_v59 = vadd.s32 1, %v7255_v33  ;;  %v326_v12 = vsub.s32 4, %v7028_v0  ;;  %v6425_v35 = vadd.s32 4294967294, %v722_v21 }
  0x85   :  { %vm1151_vm1 = vc.u32 %v7263_v57, %v7254_v40  ;;  %v1313_v37 = vsel %vm1312_vm0, %v1311_v8, 0  ;;  %vm7298_vm2 = vcmp.le.f32.partialorder %v240_v24, 0.7853982  ;;  %v325_v22 = vsel %vm242_vm15, %v324_v47, %v323_v42 }
  0x86   :  { %v1149_v44 = vmul.u32 %v7241_v48, %v1133_v50  ;;  %v1546_v45 = vstv %s144_s8  ;;  %v527_v49 = vand.u32 2147483647, %v526_v3  ;;  %v529_v52 = vcvt.s32.f32 %v522_v63 }
  0x87   :  { %v950_v19 = vshll.u32 %v7280_v20, 30  ;;  %v1153_v53 = vsel %vm1151_vm1, %v1152_v59, %v7255_v33  ;;  %v327_v54 = vsel %vm242_vm15, %v326_v12, %v7028_v0  ;;  %vm6426_vm3 = vcmp.lt.s32.totalorder %v6425_v35, 0 }
  0x88   :  { %v1315_v24 = vand.u32 31, %v1313_v37  ;;  %v1547_v56 = vmul.f32 %v6356_v43, %v1546_v45  ;;  %v328_v48 = vsel %vm7298_vm2, %v6880_v4, %v325_v22  ;;  %v7315_v38 = vadd.s32 %v1153_v53, %v1149_v44 }
  0x89   :  { %v1548_v16 = vstv %s146_s13  ;;  %v7319_v33 = vsel %vm7298_vm2, 0, %v327_v54  ;;  %v530_v62 = vmul.f32 %v529_v52, %v527_v49  ;;  %v7321_v0 = vsel %vm6426_vm3, 0, %v6425_v35  ;;  %s163_s13 = ssub.f32 %s7870_s30, %s7877_s4 }
  0x8a   :  { %v7323_v6 = vsub.s32 %v947_v5, %v950_v19  ;;  %v7326_v60 = vand.u32 3, %v7319_v33  ;;  %vm449_vm4 = vcmp.lt.s32.totalorder %v6891_v17, 0  ;;  %v533_v42 = vsub.s32 4, %v7082_v18 }
  0x8b   :  { %v7330_v11 = vsub.s32 32, %v1315_v24  ;;  %6703 = vcosq.f32 %v328_v48  ;;  %v710_v8 = vadd.s32 %v7091_v29, %v7089_v41  ;;  %v1542_v14 = vstv %s143_s14  ;;  %s8119_s14 = smul.f32 0.5, %s163_s13  ;;  %s9343_s13 = sld [smem:[#allocation2 + $0x11]] }
  0x8c   :  { %v7337_v5 = vadd.f32 %v1548_v16, %v1547_v56  ;;  %6705 = vsinq.f32 %v328_v48  ;;  %v730_v21 = vsub.s32 4294967266, %v7321_v0  ;;  %v1155_v55 = vadd.s32 536870912, %v7315_v38 }
  0x8d   :  { %v1544_v1 = vstv %s145_s15  ;;  %vm7348_vm5 = vcmp.le.f32.partialorder %v447_v9, 0.7853982  ;;  %v531_v41 = vxor.u32 2147483648, %v530_v62  ;;  %v726_v29 = vsub.s32 32, %v7321_v0  ;;  %s8383_s15 = sld [smem:[#allocation2 + $0xd]] }
  0x8e   :  { %12844 = vst [vmem:[#allocation10_spill] sm:$0xff] %v7337_v5  ;;  %v953_v63 = vsub.s32 0, %v7323_v6  ;;  %v12610_v3 = vand.u32 2147483647, %v7203_v46  ;;  %v7355_v50 = vshrl.u32 %v1313_v37, 5  ;;  %v1327_v59 = vshll.u32 %v12626_v25, %v1315_v24 }
  0x8f   :  { %v1328_v12 = vshrl.u32 %v12614_v27, %v7330_v11  ;;  %v7360_v35 = vmul.f32 %v6355_v26, %v1542_v14  ;;  %v1330_v9 = vshll.u32 %v12614_v27, %v1315_v24  ;;  %v1331_v43 = vshrl.u32 %v12612_v31, %v7330_v11 }
  0x90   :  { %v7365_v13 = vmul.f32 %v6357_v15, %v1544_v1  ;;  %v1559_v22 = vand.u32 2139095040, %v7337_v5  ;;  %v731_v37 = vadd.s32 127, %v730_v21  ;;  %v7370_v44 = vshrl.u32 %v1155_v55, 30 }
  0x91   :  { %v1318_v45 = vshll.u32 %v12616_v34, %v1315_v24  ;;  %v1321_v49 = vshll.u32 %v12620_v36, %v1315_v24  ;;  %v1319_v52 = vshrl.u32 %v12620_v36, %v7330_v11  ;;  %v1322_v19 = vshrl.u32 %v12624_v39, %v7330_v11 }
  0x92   :  { %v1324_v53 = vshll.u32 %v12624_v39, %v1315_v24  ;;  %v1325_v54 = vshrl.u32 %v12626_v25, %v7330_v11  ;;  %v532_v56 = vsel %vm449_vm4, %v531_v41, %v530_v62  ;;  %v6432_v48 = vmin.u32 %v953_v63, %v7323_v6 }
  0x93   :  { %v1308_v16 = vand.u32 8388607, %v12610_v3  ;;  %v1329_v26 = vor.u32 %v1328_v12, %v1327_v59  ;;  %v1332_v14 = vor.u32 %v1331_v43, %v1330_v9  ;;  %vm1336_vm6 = vcmp.lt.s32.totalorder %v7355_v50, 4  ;;  %s172_s17 = smul.f32 0.5, %s8383_s15  ;;  %s9405_s15 = sld [smem:[#allocation4 + $0x11]] }
  0x94   :  { %v1550_v15 = vadd.f32 %v7365_v13, %v7360_v35  ;;  %v1560_v21 = vshrl.u32 %v1559_v22, 23  ;;  %v727_v24 = vshll.u32 %v7224_v28, %v7321_v0  ;;  %v728_v55 = vshrl.u32 %v710_v8, %v726_v29 }
  0x95   :  { %v1157_v1 = vshll.u32 %v7370_v44, 30  ;;  %v1551_v62 = vstv %s7368_s0  ;;  %v732_v41 = vshll.u32 %v731_v37, 23  ;;  %v7393_v63 = vor.u32 %v1319_v52, %v1318_v45  ;;  %s8510_s0 = sld [smem:[#allocation2 + $0xc]] }
  0x96   :  { %v7395_v10 = vor.u32 %v1322_v19, %v1321_v49  ;;  %v1326_v59 = vor.u32 %v1325_v54, %v1324_v53  ;;  %v955_v12 = vclz %v6432_v48  ;;  %vm1333_vm7 = vcmp.lt.s32.totalorder %v7355_v50, 1 }
  0x97   :  { %vm1335_vm8 = vcmp.lt.s32.totalorder %v7355_v50, 3  ;;  %v1342_v9 = vsel %vm1336_vm6, %v1329_v26, 920167782  ;;  %v1309_v43 = vor.u32 8388608, %v1308_v16  ;;  %v1346_v28 = vsel %vm1336_vm6, %v1332_v14, 1326507024 }
  0x98   :  { %v7403_v0 = vadd.f32 %v1551_v62, %v1550_v15  ;;  %v6455_v8 = vadd.s32 4294967169, %v1560_v21  ;;  %v7405_v29 = vpop.eup %6703  ;;  %v436_v22 = vadd.s32 3, %v7319_v33  ;;  %v535_v37 = vsel %vm7348_vm5, %v6891_v17, %v532_v56 }
  0x99   :  { %v729_v45 = vor.u32 %v728_v55, %v727_v24  ;;  %v7412_v49 = vsub.s32 %v7315_v38, %v1157_v1  ;;  %v7414_v52 = vpop.eup %6705  ;;  %v733_v19 = vor.u32 4788187, %v732_v41  ;;  %vm1334_vm9 = vcmp.lt.s32.totalorder %v7355_v50, 2 }
  0x9a   :  { %12847 = vst [vmem:[#allocation11_spill] sm:$0xff] %v7403_v0  ;;  %v1341_v53 = vsel %vm1333_vm7, %v7393_v63, %v7395_v10  ;;  %v1343_v33 = vsel %vm1335_vm8, %v1326_v59, %v1342_v9  ;;  %v740_v54 = vsub.s32 4, %v7168_v2  ;;  %v6433_v56 = vadd.s32 4294967294, %v955_v12 }
  0x9b   :  { %v1345_v38 = vsel %vm1333_vm7, %v7395_v10, %v1326_v59  ;;  %v1347_v48 = vsel %vm1335_vm8, %v1329_v26, %v1346_v28  ;;  %v534_v16 = vsel %vm449_vm4, %v533_v42, %v7082_v18  ;;  %v7434_v14 = vshll.u32 %v1309_v43, 8  ;;  %s171_s23 = smul.f32 0.5, %s8510_s0 }
  0x9c   :  { %v1566_v15 = vadd.s32 1, %v6455_v8  ;;  %v1766_v21 = vand.u32 2139095040, %v7403_v0  ;;  %6707 = vcosq.f32 %v535_v37  ;;  %vm656_vm10 = vcmp.lt.s32.totalorder %v6923_v58, 0 }
  0x9d   :  { %v1160_v24 = vsub.s32 0, %v7412_v49  ;;  %v1344_v55 = vsel %vm1334_vm9, %v1341_v53, %v1343_v33  ;;  %vm7443_vm11 = vcmp.le.f32.partialorder %v654_v30, 0.7853982  ;;  %v734_v18 = vand.u32 2147483647, %v733_v19 }
  0x9e   :  { %v736_v42 = vcvt.s32.f32 %v729_v45  ;;  %v1348_v1 = vsel %vm1334_vm9, %v1345_v38, %v1347_v48  ;;  %v7449_v62 = vand.u32 3, %v436_v22  ;;  %v536_v41 = vsel %vm7348_vm5, 0, %v534_v16 }
  0x9f   :  { %v741_v12 = vsel %vm656_vm10, %v740_v54, %v7168_v2  ;;  %vm6434_vm12 = vcmp.lt.s32.totalorder %v6433_v56, 0  ;;  %vm335_vm13 = vcmp.eq.s32.totalorder %v7326_v60, 0  ;;  %vm1567_vm14 = vcmp.gt.s32.totalorder %v1566_v15, 0 }
  0xa0   :  { %v7458_v30 = vmul.u32.u64.low %v7434_v14, %v1344_v55  ;;  %v7459_v9 = vmul.u32.u64.high %v7434_v14, %v1344_v55, %v7458_v30  ;;  %v1767_v43 = vshrl.u32 %v1766_v21, 23  ;;  %v6440_v28 = vmin.u32 %v1160_v24, %v7412_v49 }
  0xa1   :  { %v1317_v47 = vshrl.u32 %v12616_v34, %v7330_v11  ;;  %v7466_v8 = vmul.u32.u64.low %v7434_v14, %v1348_v1  ;;  %v7467_v22 = vmul.u32.u64.high %v7434_v14, %v1348_v1, %v7466_v8  ;;  %vm338_vm15 = vcmp.eq.s32.totalorder %v7326_v60, 2 }
  0xa2   :  { %6709 = vsinq.f32 %v535_v37  ;;  %v737_v2 = vmul.f32 %v736_v42, %v734_v18  ;;  %v1338_v45 = vsel %vm1336_vm6, %v1326_v59, 2102212464  ;;  %vm439_vm0 = vcmp.eq.s32.totalorder %v7449_v62, 0 }
  0xa3   :  { %v643_v19 = vadd.s32 3, %v536_v41  ;;  %v743_v53 = vsel %vm7443_vm11, 0, %v741_v12  ;;  %v1568_v33 = vsel %vm1567_vm14, %v1566_v15, 0  ;;  %vm442_vm1 = vcmp.eq.s32.totalorder %v7449_v62, 2 }
  0xa4   :  { %v943_v11 = vadd.s32 %v7174_v32, %v7190_v23  ;;  %v958_v54 = vsel %vm6434_vm12, 0, %v6433_v56  ;;  %v6463_v38 = vadd.s32 4294967169, %v1767_v43  ;;  %v1162_v48 = vclz %v6440_v28 }
  0xa5   :  { %v959_v37 = vsub.s32 32, %v958_v54  ;;  %v1337_v59 = vsel %vm1333_vm7, %v1317_v47, %v7393_v63  ;;  %v1339_v16 = vsel %vm1335_vm8, %v7395_v10, %v1338_v45  ;;  %v339_v15 = vxor.u32 2147483648, %v7405_v29 }
  0xa6   :  { %v738_v21 = vxor.u32 2147483648, %v737_v2  ;;  %v850_v24 = vadd.s32 3, %v743_v53  ;;  %v1570_v55 = vand.u32 31, %v1568_v33  ;;  %v336_v32 = vxor.u32 2147483648, %v7414_v52 }
  0xa7   :  { %v7487_v23 = vand.u32 3, %v536_v41  ;;  %v7489_v56 = vand.u32 3, %v643_v19  ;;  %v963_v18 = vsub.s32 4294967266, %v958_v54  ;;  %v7491_v42 = vand.u32 3, %v743_v53 }
  0xa8   :  { %v1340_v63 = vsel %vm1334_vm9, %v1337_v59, %v1339_v16  ;;  %v1359_v1 = vadd.s32 1, %v7459_v9  ;;  %v1773_v10 = vadd.s32 1, %v6463_v38  ;;  %v960_v12 = vshll.u32 %v7323_v6, %v958_v54 }
  0xa9   :  { %v961_v43 = vshrl.u32 %v943_v11, %v959_v37  ;;  %v6441_v28 = vadd.s32 4294967294, %v1162_v48  ;;  %vm1358_vm2 = vc.u32 %v7467_v22, %v7458_v30  ;;  %v7499_v41 = vpop.eup %6707  ;;  %v7504_v47 = vsel %vm338_vm15, %v339_v15, %v7414_v52 }
  0xaa   :  { %v739_v50 = vsel %vm656_vm10, %v738_v21, %v737_v2  ;;  %v7508_v8 = vand.u32 3, %v850_v24  ;;  %v7510_v45 = vsub.s32 32, %v1570_v55  ;;  %v7515_v6 = vsel %vm335_vm13, %v7405_v29, %v336_v32 }
  0xab   :  { %v7520_v19 = vsel %vm442_vm1, %v339_v15, %v7414_v52  ;;  %v964_v53 = vadd.s32 127, %v963_v18  ;;  %v1356_v11 = vmul.u32 %v7434_v14, %v1340_v63  ;;  %v7526_v2 = vsel %vm439_vm0, %v7405_v29, %v336_v32 }
  0xac   :  { %v1360_v54 = vsel %vm1358_vm2, %v1359_v1, %v7459_v9  ;;  %v12609_v38 = vand.u32 2147483647, %v7337_v5  ;;  %vm1774_vm3 = vcmp.gt.s32.totalorder %v1773_v10, 0  ;;  %v7534_v52 = vsel %vm7443_vm11, %v6923_v58, %v739_v50 }
  0xad   :  { %v7536_v14 = vor.u32 %v961_v43, %v960_v12  ;;  %vm6442_vm4 = vcmp.lt.s32.totalorder %v6441_v28, 0  ;;  %v1582_v29 = vshll.u32 %v12626_v25, %v1570_v55  ;;  %v1583_v9 = vshrl.u32 %v12614_v27, %v7510_v45 }
  0xae   :  { %v1585_v48 = vshll.u32 %v12614_v27, %v1570_v55  ;;  %v1586_v59 = vshrl.u32 %v12612_v31, %v7510_v45  ;;  %v965_v15 = vshll.u32 %v964_v53, 23  ;;  %v7546_v21 = vadd.s32 %v1360_v54, %v1356_v11 }
  0xaf   :  { %v7544_v16 = vpop.eup %6709  ;;  %v7548_v26 = vshrl.u32 %v1568_v33, 5  ;;  %v1775_v24 = vsel %vm1774_vm3, %v1773_v10, 0  ;;  %v7552_v32 = vsel %vm6442_vm4, 0, %v6441_v28  ;;  %v1563_v18 = vand.u32 8388607, %v12609_v38 }
  0xb0   :  { %v1573_v63 = vshll.u32 %v12616_v34, %v1570_v55  ;;  %v1576_v1 = vshll.u32 %v12620_v36, %v1570_v55  ;;  %v1574_v12 = vshrl.u32 %v12620_v36, %v7510_v45  ;;  %v1577_v43 = vshrl.u32 %v12624_v39, %v7510_v45 }
  0xb1   :  { %v1579_v33 = vshll.u32 %v12624_v39, %v1570_v55  ;;  %v1580_v10 = vshrl.u32 %v12626_v25, %v7510_v45  ;;  %v1584_v50 = vor.u32 %v1583_v9, %v1582_v29  ;;  %v1587_v53 = vor.u32 %v1586_v59, %v1585_v48 }
  0xb2   :  { %v1777_v11 = vand.u32 31, %v1775_v24  ;;  %6711 = vcosq.f32 %v7534_v52  ;;  %v7567_v54 = vor.u32 4788187, %v965_v15  ;;  %v1362_v38 = vadd.s32 536870912, %v7546_v21 }
  0xb3   :  { %vm1591_vm5 = vcmp.lt.s32.totalorder %v7548_v26, 4  ;;  %v969_v55 = vcvt.s32.f32 %v7536_v14  ;;  %v1150_v3 = vadd.s32 %v7254_v40, %v7263_v57  ;;  %v1170_v28 = vsub.s32 4294967266, %v7552_v32 }
  0xb4   :  { %v1564_v29 = vor.u32 8388608, %v1563_v18  ;;  %v7577_v9 = vor.u32 %v1574_v12, %v1573_v63  ;;  %v7579_v48 = vor.u32 %v1577_v43, %v1576_v1  ;;  %v1581_v59 = vor.u32 %v1580_v10, %v1579_v33 }
  0xb5   :  { %vm1588_vm6 = vcmp.lt.s32.totalorder %v7548_v26, 1  ;;  %vm1590_vm7 = vcmp.lt.s32.totalorder %v7548_v26, 3  ;;  %v1597_v15 = vsel %vm1591_vm5, %v1584_v50, 920167782  ;;  %v1601_v14 = vsel %vm1591_vm5, %v1587_v53, 1326507024 }
  0xb6   :  { %v7587_v40 = vsub.s32 32, %v1777_v11  ;;  %v967_v57 = vand.u32 2147483647, %v7567_v54  ;;  %v1166_v18 = vsub.s32 32, %v7552_v32  ;;  %v1167_v63 = vshll.u32 %v7412_v49, %v7552_v32 }
  0xb7   :  { %v7593_v1 = vshrl.u32 %v1362_v38, 30  ;;  %v7595_v12 = vadd.s32 127, %v1170_v28  ;;  %v1553_v43 = vsub.f32 %v7360_v35, %v7365_v13  ;;  %v1554_v33 = vstv %s7571_s21  ;;  %s8538_s21 = sld [smem:[#allocation4 + $0xc]] }
  0xb8   :  { %vm1589_vm8 = vcmp.lt.s32.totalorder %v7548_v26, 2  ;;  %v1596_v10 = vsel %vm1588_vm6, %v7577_v9, %v7579_v48  ;;  %v1598_v53 = vsel %vm1590_vm7, %v1581_v59, %v1597_v15  ;;  %v1600_v49 = vsel %vm1588_vm6, %v7579_v48, %v1581_v59 }
  0xb9   :  { %v1602_v38 = vsel %vm1590_vm7, %v1584_v50, %v1601_v14  ;;  %v7612_v32 = vshll.u32 %v1564_v29, 8  ;;  %v1789_v13 = vshll.u32 %v12626_v25, %v1777_v11  ;;  %v1790_v28 = vshrl.u32 %v12614_v27, %v7587_v40 }
  0xba   :  { %vm545_vm9 = vcmp.eq.s32.totalorder %v7487_v23, 2  ;;  %v1364_v54 = vshll.u32 %v7593_v1, 30  ;;  %v7620_v15 = vshrl.u32 %v1775_v24, 5  ;;  %v1792_v37 = vshll.u32 %v12614_v27, %v1777_v11 }
  0xbb   :  { %v1793_v50 = vshrl.u32 %v12612_v31, %v7587_v40  ;;  %vm542_vm10 = vcmp.eq.s32.totalorder %v7487_v23, 0  ;;  %v1599_v29 = vsel %vm1589_vm8, %v1596_v10, %v1598_v53  ;;  %v1603_v14 = vsel %vm1589_vm8, %v1600_v49, %v1602_v38 }
  0xbc   :  { %v1780_v51 = vshll.u32 %v12616_v34, %v1777_v11  ;;  %v1783_v35 = vshll.u32 %v12620_v36, %v1777_v11  ;;  %vm649_vm11 = vcmp.eq.s32.totalorder %v7489_v56, 2  ;;  %v1781_v24 = vshrl.u32 %v12620_v36, %v7587_v40 }
  0xbd   :  { %v1784_v31 = vshrl.u32 %v12624_v39, %v7587_v40  ;;  %v1786_v27 = vshll.u32 %v12624_v39, %v1777_v11  ;;  %v1787_v10 = vshrl.u32 %v12626_v25, %v7587_v40  ;;  %v1168_v53 = vshrl.u32 %v1150_v3, %v1166_v18  ;;  %s175_s25 = sadd.f32 %s8544_s22, %s8538_s21 }
  0xbe   :  { %v1172_v49 = vshll.u32 %v7595_v12, 23  ;;  %v12850_v38 = vand.u32 2147483647, %v7403_v0  ;;  %v1791_v5 = vor.u32 %v1790_v28, %v1789_v13  ;;  %vm541_vm12 = vcmp.lt.s32.totalorder %v7487_v23, 2  ;;  %s177_s4 = ssub.f32 %s8538_s21, %s8544_s22 }
  0xbf   :  { %vm646_vm13 = vcmp.eq.s32.totalorder %v7489_v56, 0  ;;  %vm889_vm14 = vcmp.lt.s32.totalorder %v7024_v7, 0  ;;  %v7647_v36 = vmul.u32.u64.low %v7612_v32, %v1599_v29  ;;  %v7648_v46 = vmul.u32.u64.high %v7612_v32, %v1599_v29, %v7647_v36  ;;  %v7652_v3 = vpop.eup %6711  ;;  %s8637_s30 = smul.f32 0.5, %s175_s25 }
  0xc0   :  { %v1770_v34 = vand.u32 8388607, %v12850_v38  ;;  %v1794_v11 = vor.u32 %v1793_v50, %v1792_v37  ;;  %vm1798_vm15 = vcmp.lt.s32.totalorder %v7620_v15, 4  ;;  %v7655_v18 = vsub.s32 %v7546_v21, %v1364_v54 }
  0xc1   :  { %v12851_v12 = vmov 683565275   ;;  %v7660_v28 = vmul.u32.u64.low %v7612_v32, %v1603_v14  ;;  %v7661_v38 = vmul.u32.u64.high %v7612_v32, %v1603_v14, %v7660_v28  ;;  %v1593_v29 = vsel %vm1591_vm5, %v1581_v59, 2102212464 }
  0xc2   :  { %v1572_v13 = vshrl.u32 %v12851_v12, %v7510_v45  ;;  %v7665_v39 = vor.u32 %v1781_v24, %v1780_v51  ;;  %v7667_v37 = vor.u32 %v1784_v31, %v1783_v35  ;;  %v1788_v50 = vor.u32 %v1787_v10, %v1786_v27 }
  0xc3   :  { %v12852_v25 = vand.u32 2147483647, %v7024_v7  ;;  %v970_v54 = vmul.f32 %v969_v55, %v967_v57  ;;  %vm1795_vm1 = vcmp.lt.s32.totalorder %v7620_v15, 1  ;;  %vm1797_vm2 = vcmp.lt.s32.totalorder %v7620_v15, 3 }
  0xc4   :  { %v1804_v45 = vsel %vm1798_vm15, %v1791_v5, 920167782  ;;  %6713 = vsinq.f32 %v7534_v52  ;;  %v7681_v31 = vadd.f32 %v1554_v33, %v1553_v43  ;;  %v1771_v27 = vor.u32 8388608, %v1770_v34 }
  0xc5   :  { %vm7671_vm0 = vcmp.le.f32.partialorder %v12852_v25, 0.7853982  ;;  %v1808_v25 = vsel %vm1798_vm15, %v1794_v11, 1326507024  ;;  %vm438_vm4 = vcmp.lt.s32.totalorder %v7449_v62, 2  ;;  %v1169_v51 = vor.u32 %v1168_v53, %v1167_v63 }
  0xc6   :  { %v1367_v55 = vsub.s32 0, %v7655_v18  ;;  %v1592_v59 = vsel %vm1588_vm6, %v1572_v13, %v7577_v9  ;;  %v1594_v52 = vsel %vm1590_vm7, %v7579_v48, %v1593_v29  ;;  %v1173_v57 = vor.u32 4788187, %v1172_v49 }
  0xc7   :  { %vm1796_vm3 = vcmp.lt.s32.totalorder %v7620_v15, 2  ;;  %v1803_v34 = vsel %vm1795_vm1, %v7665_v39, %v7667_v37  ;;  %v1805_v63 = vsel %vm1797_vm2, %v1788_v50, %v1804_v45  ;;  %vm539_vm5 = vweird.f32 %v6891_v17 }
  0xc8   :  { %v12855_v9 = vxor.u32 2147483648, %v7499_v41  ;;  %v971_v48 = vxor.u32 2147483648, %v970_v54  ;;  %v1807_v33 = vsel %vm1795_vm1, %v7667_v37, %v1788_v50  ;;  %v1809_v35 = vsel %vm1797_vm2, %v1791_v5, %v1808_v25 }
  0xc9   :  { %vm332_vm6 = vweird.f32 %v6880_v4  ;;  %v12856_v14 = vxor.u32 2147483648, %v7544_v16  ;;  %v1595_v10 = vsel %vm1589_vm8, %v1592_v59, %v1594_v52  ;;  %v1614_v53 = vadd.s32 1, %v7648_v46 }
  0xca   :  { %v547_v43 = vsel %vm545_vm9, %v12855_v9, %v7544_v16  ;;  %v7721_v49 = vshll.u32 %v1771_v27, 8  ;;  %v12857_v11 = vmov %v12855_v9  ;;  %v6448_v13 = vmin.u32 %v1367_v55, %v7655_v18 }
  0xcb   :  { %v544_v24 = vsel %vm542_vm10, %v7499_v41, %v12856_v14  ;;  %v651_v5 = vsel %vm649_vm11, %v12857_v11, %v7544_v16  ;;  %vm1613_vm7 = vc.u32 %v7661_v38, %v7647_v36  ;;  %v1806_v28 = vsel %vm1796_vm3, %v1803_v34, %v1805_v63 }
  0xcc   :  { %v1174_v26 = vand.u32 2147483647, %v1173_v57  ;;  %v1176_v29 = vcvt.s32.f32 %v1169_v51  ;;  %v1810_v45 = vsel %vm1796_vm3, %v1807_v33, %v1809_v35  ;;  %v1973_v27 = vand.u32 2139095040, %v7681_v31 }
  0xcd   :  { %v548_v25 = vsel %vm541_vm12, %v544_v24, %v547_v43  ;;  %v12858_v55 = vmov %v12856_v14  ;;  %v972_v52 = vsel %vm889_vm14, %v971_v48, %v970_v54  ;;  %vm1096_vm8 = vcmp.lt.s32.totalorder %v7072_v61, 0 }
  0xce   :  { %v648_v59 = vsel %vm646_vm13, %v7499_v41, %v12858_v55  ;;  %v1611_v51 = vmul.u32 %v7612_v32, %v1595_v10  ;;  %v973_v57 = vsub.s32 4, %v7280_v20  ;;  %v1615_v34 = vsel %vm1613_vm7, %v1614_v53, %v7648_v46 }
  0xcf   :  { %v7752_v23 = vmul.u32.u64.low %v7721_v49, %v1806_v28  ;;  %v7753_v63 = vmul.u32.u64.high %v7721_v49, %v1806_v28, %v7752_v23  ;;  %v1369_v16 = vclz %v6448_v13  ;;  %v1779_v41 = vshrl.u32 %v12851_v12, %v7587_v40 }
  0xd0   :  { %v7759_v9 = vmul.u32.u64.low %v7721_v49, %v1810_v45  ;;  %v7760_v54 = vmul.u32.u64.high %v7721_v49, %v1810_v45, %v7759_v9  ;;  %vm749_vm9 = vcmp.eq.s32.totalorder %v7491_v42, 0  ;;  %v975_v32 = vsel %vm7671_vm0, %v7024_v7, %v972_v52 }
  0xd1   :  { %v12859_v46 = vand.u32 2147483647, %v7072_v61  ;;  %v1177_v48 = vmul.f32 %v1176_v29, %v1174_v26  ;;  %v1800_v40 = vsel %vm1798_vm15, %v1788_v50, 2102212464  ;;  %v1974_v33 = vshrl.u32 %v1973_v27, 23  ;;  %v6359_v27 = vld [vmem:[%s12606_s2 + $0x50] sm:$0xff] }
  0xd2   :  { %vm12862_vm11 = vcmp.lt.s32.totalorder %v7326_v60, 2  ;;  %vm752_vm12 = vcmp.eq.s32.totalorder %v7491_v42, 2  ;;  %vm853_vm13 = vcmp.eq.s32.totalorder %v7508_v8, 0  ;;  %v7782_v14 = vadd.s32 %v1615_v34, %v1611_v51  ;;  %v6714_v60 = vpop.eup %6713 }
  0xd3   :  { %vm7768_vm10 = vcmp.le.f32.partialorder %v12859_v46, 0.7853982  ;;  %v341_v35 = vsel %vm12862_vm11, %v7515_v6, %v7504_v47  ;;  %v445_v50 = vsel %vm438_vm4, %v7526_v2, %v7520_v19  ;;  %v549_v24 = vsel %vm539_vm5, nan, %v548_v25 }
  0xd4   :  { %vm12863_vm15 = vcmp.lt.s32.totalorder %v7489_v56, 2  ;;  %vm856_vm7 = vcmp.eq.s32.totalorder %v7508_v8, 2  ;;  %6715 = vcosq.f32 %v975_v32  ;;  %v6449_v47 = vadd.s32 4294967294, %v1369_v16 }
  0xd5   :  { %v652_v10 = vsel %vm12863_vm15, %v648_v59, %v651_v5  ;;  %v1799_v6 = vsel %vm1795_vm1, %v1779_v41, %v7665_v39  ;;  %v1801_v62 = vsel %vm1797_vm2, %v7667_v37, %v1800_v40  ;;  %vm748_vm4 = vcmp.lt.s32.totalorder %v7491_v42, 2 }
  0xd6   :  { %v974_v56 = vsel %vm889_vm14, %v973_v57, %v7280_v20  ;;  %6717 = vsinq.f32 %v975_v32  ;;  %v1178_v19 = vxor.u32 2147483648, %v1177_v48  ;;  %v6471_v2 = vadd.s32 4294967169, %v1974_v33 }
  0xd7   :  { %v342_v53 = vsel %vm332_vm6, nan, %v341_v35  ;;  %v653_v39 = vsel %vm539_vm5, nan, %v652_v10  ;;  %vm852_vm1 = vcmp.lt.s32.totalorder %v7508_v8, 2  ;;  %v1180_v37 = vsub.s32 4, %v7370_v44 }
  0xd8   :  { %v1617_v11 = vadd.s32 536870912, %v7782_v14  ;;  %v7813_v20 = vsel %vm332_vm6, nan, %v445_v50  ;;  %v7815_v5 = vmul.f32 %v549_v24, %v342_v53  ;;  %v1802_v13 = vsel %vm1796_vm3, %v1799_v6, %v1801_v62 }
  0xd9   :  { %v1821_v28 = vadd.s32 1, %v7753_v63  ;;  %v753_v17 = vxor.u32 2147483648, %v7652_v3  ;;  %v976_v26 = vsel %vm7671_vm0, 0, %v974_v56  ;;  %vm6450_vm14 = vcmp.lt.s32.totalorder %v6449_v47, 0 }
  0xda   :  { %vm1820_vm2 = vc.u32 %v7760_v54, %v7752_v23  ;;  %vm746_vm5 = vweird.f32 %v6923_v58  ;;  %v750_v4 = vxor.u32 2147483648, %v6714_v60  ;;  %v862_v29 = vmul.f32 %v653_v39, %v342_v53 }
  0xdb   :  { %v1179_v45 = vsel %vm1096_vm8, %v1178_v19, %v1177_v48  ;;  %v1980_v15 = vadd.s32 1, %v6471_v2  ;;  %v1181_v21 = vsel %vm1096_vm8, %v1180_v37, %v7370_v44  ;;  %v7835_v25 = vshrl.u32 %v1617_v11, 30 }
  0xdc   :  { %v1818_v55 = vmul.u32 %v7721_v49, %v1802_v13  ;;  %v2239_v59 = vstv %s158_s24  ;;  %v7840_v52 = vand.u32 3, %v976_v26  ;;  %v1083_v51 = vadd.s32 3, %v976_v26  ;;  %s173_s24 = smul.f32 0.5, %s8519_s1 }
  0xdd   :  { %v7843_v57 = vsel %vm6450_vm14, 0, %v6449_v47  ;;  %v1822_v34 = vsel %vm1820_vm2, %v1821_v28, %v7753_v63  ;;  %v751_v44 = vsel %vm749_vm9, %v7652_v3, %v750_v4  ;;  %v754_v49 = vsel %vm752_vm12, %v753_v17, %v6714_v60 }
  0xde   :  { %v858_v16 = vsel %vm856_vm7, %v753_v17, %v6714_v60  ;;  %v1182_v41 = vsel %vm7768_vm10, %v7072_v61, %v1179_v45  ;;  %v855_v63 = vsel %vm853_vm13, %v7652_v3, %v750_v4  ;;  %v1183_v9 = vsel %vm7768_vm10, 0, %v1181_v21  ;;  %v6360_v21 = vld [vmem:[%s12606_s2 + $0x58] sm:$0xff] }
  0xdf   :  { %vm1981_vm0 = vcmp.gt.s32.totalorder %v1980_v15, 0  ;;  %v2240_v32 = vmul.f32 %v6359_v27, %v2239_v59  ;;  %v1377_v46 = vsub.s32 4294967266, %v7843_v57  ;;  %v1619_v48 = vshll.u32 %v7835_v25, 30 }
  0xe0   :  { %v7868_v40 = vadd.s32 %v1822_v34, %v1818_v55  ;;  %v2241_v33 = vstv %s160_s27  ;;  %v7872_v35 = vsub.f32 0.0, %v862_v29  ;;  %vm982_vm3 = vcmp.eq.s32.totalorder %v7840_v52, 0  ;;  %s10207_s27 = sld [smem:[#allocation4 + $0x13]] }
  0xe1   :  { %v7875_v50 = vand.u32 3, %v1083_v51  ;;  %6719 = vcosq.f32 %v1182_v41  ;;  %v755_v3 = vsel %vm748_vm4, %v751_v44, %v754_v49  ;;  %vm985_vm6 = vcmp.eq.s32.totalorder %v7840_v52, 2  ;;  %v6716_v10 = vpop.eup %6715 }
  0xe2   :  { %v1290_v43 = vadd.s32 3, %v1183_v9  ;;  %v1982_v24 = vsel %vm1981_vm0, %v1980_v15, 0  ;;  %v859_v60 = vsel %vm852_vm1, %v855_v63, %v858_v16  ;;  %6721 = vsinq.f32 %v1182_v41  ;;  %v12867_v15 = vld [vmem:[#allocation9_spill] sm:$0xff] }
  0xe3   :  { %v1357_v47 = vadd.s32 %v7458_v30, %v7467_v22  ;;  %v7886_v6 = vadd.f32 %v2241_v33, %v2240_v32  ;;  %v6718_v62 = vpop.eup %6717  ;;  %v1373_v56 = vsub.s32 32, %v7843_v57  ;;  %v1378_v42 = vadd.s32 127, %v1377_v46 }
  0xe4   :  { %v7890_v19 = vsub.s32 %v7782_v14, %v1619_v48  ;;  %v1824_v2 = vadd.s32 536870912, %v7868_v40  ;;  %v756_v8 = vsel %vm746_vm5, nan, %v755_v3  ;;  %vm1086_vm8 = vcmp.eq.s32.totalorder %v7875_v50, 0 }
  0xe5   :  { %12864 = vst [vmem:[#allocation12_spill] sm:$0xff] %v7886_v6  ;;  %vm1089_vm9 = vcmp.eq.s32.totalorder %v7875_v50, 2  ;;  %v1984_v30 = vand.u32 31, %v1982_v24  ;;  %v860_v22 = vsel %vm746_vm5, nan, %v859_v60  ;;  %v986_v53 = vxor.u32 2147483648, %v6716_v10 }
  0xe6   :  { %v7901_v39 = vand.u32 3, %v1183_v9  ;;  %v7903_v14 = vand.u32 3, %v1290_v43  ;;  %v983_v37 = vxor.u32 2147483648, %v6718_v62  ;;  %v1374_v11 = vshll.u32 %v7655_v18, %v7843_v57  ;;  %v6358_v18 = vld [vmem:[%s12606_s2 + $0x48] sm:$0xff]  ;;  %s202_s29 = smul.f32 0.5, %s10207_s27 }
  0xe7   :  { %v1387_v13 = vsub.s32 4, %v7593_v1  ;;  %v2252_v28 = vand.u32 2139095040, %v7886_v6  ;;  %v1375_v17 = vshrl.u32 %v1357_v47, %v1373_v56  ;;  %v1379_v26 = vshll.u32 %v1378_v42, 23 }
  0xe8   :  { %v1622_v58 = vsub.s32 0, %v7890_v19  ;;  %v7910_v4 = vshrl.u32 %v1824_v2, 30  ;;  %v7913_v29 = vmul.f32 %v756_v8, %v7813_v20  ;;  %v7916_v45 = vmul.f32 %v860_v22, %v7813_v20 }
  0xe9   :  { %vm12634_vm10 = vcmp.lt.s32.totalorder %v12867_v15, 0  ;;  %v7919_v27 = vsub.s32 32, %v1984_v30  ;;  %v7931_v55 = vsel %vm985_vm6, %v986_v53, %v6718_v62  ;;  %v7935_v20 = vsel %vm1089_vm9, %v986_v53, %v6718_v62 }
  0xea   :  { %12865 = vst [vmem:[#allocation13_spill] sm:$0xff] %v7910_v4  ;;  %12866 = vst [vmem:[#allocation14_spill] sm:$0xff] %v7913_v29  ;;  %v2235_v59 = vstv %s157_s5  ;;  %v2237_v51 = vstv %s159_s6  ;;  %v7939_v57 = vsel %vm982_vm3, %v6716_v10, %v983_v37  ;;  %v7943_v34 = vsel %vm1086_vm8, %v6716_v10, %v983_v37  ;;  %s8841_s5 = smul.f32 0.5, %s177_s4  ;;  %s9097_s6 = sld [smem:[#allocation2 + $0x10]] }
  0xeb   :  { %vm1192_vm11 = vcmp.eq.s32.totalorder %v7901_v39, 2  ;;  %v7949_v44 = vsel %vm12634_vm10, %v1387_v13, %v7593_v1  ;;  %v2253_v49 = vshrl.u32 %v2252_v28, 23  ;;  %vm1189_vm12 = vcmp.eq.s32.totalorder %v7901_v39, 0 }
  0xec   :  { %vm1296_vm13 = vcmp.eq.s32.totalorder %v7903_v14, 2  ;;  %v1376_v16 = vor.u32 %v1375_v17, %v1374_v11  ;;  %v1380_v41 = vor.u32 4788187, %v1379_v26  ;;  %v6456_v63 = vmin.u32 %v1622_v58, %v7890_v19 }
  0xed   :  { %v1826_v9 = vshll.u32 %v7910_v4, 30  ;;  %v12868_v32 = vmov 2102212464   ;;  %v12869_v48 = vmov 920167782   ;;  %v7958_v3 = vmul.f32 %v6358_v18, %v2235_v59 }
  0xee   :  { %v1996_v46 = vshll.u32 %v12868_v32, %v1984_v30  ;;  %v1997_v33 = vshrl.u32 %v12869_v48, %v7919_v27  ;;  %v7960_v1 = vmul.f32 %v6360_v21, %v2237_v51  ;;  %v6720_v43 = vpop.eup %6719  ;;  %vm1293_vm15 = vcmp.eq.s32.totalorder %v7903_v14, 0 }
  0xef   :  { %v12633_v10 = vand.u32 2147483647, %v7681_v31  ;;  %v7966_v60 = vshrl.u32 %v1982_v24, 5  ;;  %v1999_v47 = vshll.u32 %v12869_v48, %v1984_v30  ;;  %v12870_v62 = vmov 1326507024   ;;  %v6722_v11 = vpop.eup %6721 }
  0xf0   :  { %v2000_v56 = vshrl.u32 %v12870_v62, %v7919_v27  ;;  %vm981_vm7 = vcmp.lt.s32.totalorder %v7840_v52, 2  ;;  %v1987_v42 = vshll.u32 %v12851_v12, %v1984_v30  ;;  %v12871_v2 = vmov 2475754826   ;;  %s186_s8 = smul.f32 0.5, %s9097_s6  ;;  %s10349_s6 = sld [smem:[#allocation4 + $0x12]] }
  0xf1   :  { %v1990_v8 = vshll.u32 %v12871_v2, %v1984_v30  ;;  %v12872_v22 = vmov 2131351028   ;;  %v6479_v37 = vadd.s32 4294967169, %v2253_v49  ;;  %vm1085_vm4 = vcmp.lt.s32.totalorder %v7875_v50, 2 }
  0xf2   :  { %v1993_v53 = vshll.u32 %v12872_v22, %v1984_v30  ;;  %vm1188_vm1 = vcmp.lt.s32.totalorder %v7901_v39, 2  ;;  %v7978_v24 = vsub.s32 %v7868_v40, %v1826_v9  ;;  %v1988_v13 = vshrl.u32 %v12871_v2, %v7919_v27 }
  0xf3   :  { %v1991_v28 = vshrl.u32 %v12872_v22, %v7919_v27  ;;  %v1994_v17 = vshrl.u32 %v12868_v32, %v7919_v27  ;;  %v1193_v30 = vxor.u32 2147483648, %v6720_v43  ;;  %vm1292_vm14 = vcmp.lt.s32.totalorder %v7903_v14, 2 }
  0xf4   :  { %v1624_v26 = vclz %v6456_v63  ;;  %v1998_v58 = vor.u32 %v1997_v33, %v1996_v46  ;;  %v2243_v18 = vadd.f32 %v7960_v1, %v7958_v3  ;;  %v12873_v40 = vand.u32 2147483647, %v12867_v15 }
  0xf5   :  { %v1977_v59 = vand.u32 8388607, %v12633_v10  ;;  %v2001_v51 = vor.u32 %v2000_v56, %v1999_v47  ;;  %vm2005_vm5 = vcmp.lt.s32.totalorder %v7966_v60, 4  ;;  %v2244_v49 = vstv %s7962_s12  ;;  %s9339_s12 = sld [smem:[#allocation2 + $0xf]] }
  0xf6   :  { %vm7991_vm2 = vcmp.le.f32.partialorder %v12873_v40, 0.7853982  ;;  %v1190_v9 = vxor.u32 2147483648, %v6722_v11  ;;  %v1381_v4 = vand.u32 2147483647, %v1380_v41  ;;  %v1383_v63 = vcvt.s32.f32 %v1376_v16 }
  0xf7   :  { %v2259_v46 = vadd.s32 1, %v6479_v37  ;;  %vm979_vm0 = vweird.f32 %v7024_v7  ;;  %vm1186_vm3 = vweird.f32 %v7072_v61  ;;  %v1829_v33 = vsub.s32 0, %v7978_v24 }
  0xf8   :  { %v1989_v40 = vor.u32 %v1988_v13, %v1987_v42  ;;  %v1992_v29 = vor.u32 %v1991_v28, %v1990_v8  ;;  %v1995_v0 = vor.u32 %v1994_v17, %v1993_v53  ;;  %vm2002_vm6 = vcmp.lt.s32.totalorder %v7966_v60, 1 }
  0xf9   :  { %vm2004_vm8 = vcmp.lt.s32.totalorder %v7966_v60, 3  ;;  %v2011_v47 = vsel %vm2005_vm5, %v1998_v58, 920167782  ;;  %v8006_v56 = vadd.f32 %v2244_v49, %v2243_v18  ;;  %v1194_v16 = vsel %vm1192_vm11, %v1193_v30, %v6722_v11 }
  0xfa   :  { %v6457_v41 = vadd.s32 4294967294, %v1624_v26  ;;  %v1978_v37 = vor.u32 8388608, %v1977_v59  ;;  %v2015_v10 = vsel %vm2005_vm5, %v2001_v51, 1326507024  ;;  %v1191_v42 = vsel %vm1189_vm12, %v6720_v43, %v1190_v9 }
  0xfb   :  { %12876 = vst [vmem:[#allocation9_spill] sm:$0xff] %v8006_v56  ;;  %v1298_v8 = vsel %vm1296_vm13, %v1193_v30, %v6722_v11  ;;  %v1384_v53 = vmul.f32 %v1383_v63, %v1381_v4  ;;  %vm2260_vm9 = vcmp.gt.s32.totalorder %v2259_v46, 0  ;;  %v6464_v13 = vmin.u32 %v1829_v33, %v7978_v24  ;;  %s185_s16 = smul.f32 0.5, %s9339_s12 }
  0xfc   :  { %vm2003_vm10 = vcmp.lt.s32.totalorder %v7966_v60, 2  ;;  %v2010_v28 = vsel %vm2002_vm6, %v1989_v40, %v1992_v29  ;;  %v2012_v17 = vsel %vm2004_vm8, %v1995_v0, %v2011_v47  ;;  %v1295_v26 = vsel %vm1293_vm15, %v6720_v43, %v1190_v9 }
  0xfd   :  { %v2014_v18 = vsel %vm2002_vm6, %v1992_v29, %v1995_v0  ;;  %v2016_v4 = vsel %vm2004_vm8, %v1998_v58, %v2015_v10  ;;  %v2459_v11 = vand.u32 2139095040, %v8006_v56  ;;  %v988_v30 = vsel %vm981_vm7, %v7939_v57, %v7931_v55 }
  0xfe   :  { %vm6458_vm11 = vcmp.lt.s32.totalorder %v6457_v41, 0  ;;  %v8033_v59 = vshll.u32 %v1978_v37, 8  ;;  %v2261_v51 = vsel %vm2260_vm9, %v2259_v46, 0  ;;  %v1092_v43 = vsel %vm1085_vm4, %v7943_v34, %v7935_v20 }
  0xff   :  { %v1195_v49 = vsel %vm1188_vm1, %v1191_v42, %v1194_v16  ;;  %v1390_v10 = vsel %vm7991_vm2, 0, %v7949_v44  ;;  %v2013_v52 = vsel %vm2003_vm10, %v2010_v28, %v2012_v17  ;;  %v1299_v55 = vsel %vm1292_vm14, %v1295_v26, %v1298_v8 }
 0x100   :  { %v1385_v57 = vxor.u32 2147483648, %v1384_v53  ;;  %v1831_v58 = vclz %v6464_v13  ;;  %v2017_v9 = vsel %vm2003_vm10, %v2014_v18, %v2016_v4  ;;  %v8050_v50 = vsel %vm6458_vm11, 0, %v6457_v41 }
 0x101   :  { %v1986_v39 = vshrl.u32 %v12851_v12, %v7919_v27  ;;  %v2263_v20 = vand.u32 31, %v2261_v51  ;;  %v2460_v34 = vshrl.u32 %v2459_v11, 23  ;;  %v1497_v63 = vadd.s32 3, %v1390_v10 }
 0x102   :  { %v2007_v44 = vsel %vm2005_vm5, %v1995_v0, 2102212464  ;;  %v8057_v46 = vmul.u32.u64.low %v8033_v59, %v2013_v52  ;;  %v8058_v14 = vmul.u32.u64.high %v8033_v59, %v2013_v52, %v8057_v46  ;;  %v989_v33 = vsel %vm979_vm0, nan, %v988_v30 }
 0x103   :  { %v1196_v47 = vsel %vm1186_vm3, nan, %v1195_v49  ;;  %v8066_v27 = vmul.u32.u64.low %v8033_v59, %v2017_v9  ;;  %v8067_v16 = vmul.u32.u64.high %v8033_v59, %v2017_v9, %v8066_v27  ;;  %v1300_v0 = vsel %vm1186_vm3, nan, %v1299_v55 }
 0x104   :  { %vm12877_vm12 = vcmp.lt.s32.totalorder %v12867_v15, 0  ;;  %v1632_v37 = vsub.s32 4294967266, %v8050_v50  ;;  %v6465_v42 = vadd.s32 4294967294, %v1831_v58  ;;  %v2006_v8 = vsel %vm2002_vm6, %v1986_v39, %v1989_v40 }
 0x105   :  { %v1386_v41 = vsel %vm12877_vm12, %v1385_v57, %v1384_v53  ;;  %v2008_v13 = vsel %vm2004_vm8, %v1992_v29, %v2007_v44  ;;  %v8078_v28 = vsub.s32 32, %v2263_v20  ;;  %v6487_v17 = vadd.s32 4294967169, %v2460_v34 }
 0x106   :  { %v8081_v26 = vsub.f32 0.0, %v7916_v45  ;;  %v8085_v61 = vsel %vm979_vm0, nan, %v1092_v43  ;;  %v8087_v53 = vand.u32 3, %v1390_v10  ;;  %v8089_v18 = vand.u32 3, %v1497_v63 }
 0x107   :  { %v8096_v40 = vsel %vm7991_vm2, %v12867_v15, %v1386_v41  ;;  %v8098_v29 = vmul.f32 %v1196_v47, %v989_v33  ;;  %v8100_v4 = vmul.f32 %v1300_v0, %v989_v33  ;;  %v1612_v45 = vadd.s32 %v7647_v36, %v7661_v38 }
 0x108   :  { %v1628_v7 = vsub.s32 32, %v8050_v50  ;;  %v8105_v11 = vadd.s32 127, %v1632_v37  ;;  %vm6466_vm13 = vcmp.lt.s32.totalorder %v6465_v42, 0  ;;  %v2009_v30 = vsel %vm2003_vm10, %v2006_v8, %v2008_v13 }
 0x109   :  { %v12635_v43 = vand.u32 2147483647, %v7886_v6  ;;  %v2275_v21 = vshll.u32 %v12868_v32, %v2263_v20  ;;  %v2276_v49 = vshrl.u32 %v12869_v48, %v8078_v28  ;;  %v2466_v10 = vadd.s32 1, %v6487_v17 }
 0x10a   :  { %v2028_v52 = vadd.s32 1, %v8058_v14  ;;  %v8114_v55 = vshrl.u32 %v2261_v51, 5  ;;  %v2278_v36 = vshll.u32 %v12869_v48, %v2263_v20  ;;  %v2279_v38 = vshrl.u32 %v12870_v62, %v8078_v28 }
 0x10b   :  { %v1834_v60 = vsel %vm6466_vm13, 0, %v6465_v42  ;;  %vm2027_vm10 = vc.u32 %v8067_v16, %v8057_v46  ;;  %v2266_v57 = vshll.u32 %v12851_v12, %v2263_v20  ;;  %v2269_v58 = vshll.u32 %v12871_v2, %v2263_v20 }
 0x10c   :  { %v2267_v51 = vshrl.u32 %v12871_v2, %v8078_v28  ;;  %v2270_v9 = vshrl.u32 %v12872_v22, %v8078_v28  ;;  %v2272_v39 = vshll.u32 %v12872_v22, %v2263_v20  ;;  %v2273_v34 = vshrl.u32 %v12868_v32, %v8078_v28 }
 0x10d   :  { %v1819_v63 = vadd.s32 %v7752_v23, %v7760_v54  ;;  %v2025_v44 = vmul.u32 %v8033_v59, %v2009_v30  ;;  %v2277_v33 = vor.u32 %v2276_v49, %v2275_v21  ;;  %vm2467_vm15 = vcmp.gt.s32.totalorder %v2466_v10, 0 }
 0x10e   :  { %v2029_v47 = vsel %vm2027_vm10, %v2028_v52, %v8058_v14  ;;  %v2256_v27 = vand.u32 8388607, %v12635_v43  ;;  %v2280_v0 = vor.u32 %v2279_v38, %v2278_v36  ;;  %vm2284_vm7 = vcmp.lt.s32.totalorder %v8114_v55, 4 }
 0x10f   :  { %v1835_v41 = vsub.s32 32, %v1834_v60  ;;  %v1839_v20 = vsub.s32 4294967266, %v1834_v60  ;;  %v2246_v37 = vsub.f32 %v7958_v3, %v7960_v1  ;;  %v2247_v42 = vstv %s8119_s14  ;;  %s9399_s14 = sld [smem:[#allocation4 + $0xf]] }
 0x110   :  { %v2268_v8 = vor.u32 %v2267_v51, %v2266_v57  ;;  %v2271_v23 = vor.u32 %v2270_v9, %v2269_v58  ;;  %v2274_v54 = vor.u32 %v2273_v34, %v2272_v39  ;;  %v2468_v59 = vsel %vm2467_vm15, %v2466_v10, 0 }
 0x111   :  { %v8142_v13 = vadd.s32 %v2029_v47, %v2025_v44  ;;  %vm2281_vm4 = vcmp.lt.s32.totalorder %v8114_v55, 1  ;;  %vm2283_vm1 = vcmp.lt.s32.totalorder %v8114_v55, 3  ;;  %v2290_v14 = vsel %vm2284_vm7, %v2277_v33, 920167782 }
 0x112   :  { %v1629_v17 = vshll.u32 %v7890_v19, %v8050_v50  ;;  %v1630_v30 = vshrl.u32 %v1612_v45, %v1628_v7  ;;  %v2257_v21 = vor.u32 8388608, %v2256_v27  ;;  %v2294_v3 = vsel %vm2284_vm7, %v2280_v0, 1326507024 }
 0x113   :  { %v1634_v1 = vshll.u32 %v8105_v11, 23  ;;  %v1836_v49 = vshll.u32 %v7978_v24, %v1834_v60  ;;  %v1837_v10 = vshrl.u32 %v1819_v63, %v1835_v41  ;;  %v2470_v52 = vand.u32 31, %v2468_v59 }
 0x114   :  { %v8154_v36 = vadd.f32 %v2247_v42, %v2246_v37  ;;  %vm2282_vm14 = vcmp.lt.s32.totalorder %v8114_v55, 2  ;;  %v2289_v38 = vsel %vm2281_vm4, %v2268_v8, %v2271_v23  ;;  %v2291_v19 = vsel %vm2283_vm1, %v2274_v54, %v2290_v14 }
 0x115   :  { %v1840_v50 = vadd.s32 127, %v1839_v20  ;;  %v2031_v45 = vadd.s32 536870912, %v8142_v13  ;;  %v2293_v7 = vsel %vm2281_vm4, %v2271_v23, %v2274_v54  ;;  %v2295_v24 = vsel %vm2283_vm1, %v2277_v33, %v2294_v3  ;;  %s191_s22 = ssub.f32 %s9399_s14, %s9405_s15 }
 0x116   :  { %12878 = vst [vmem:[#allocation15_spill] sm:$0xff] %v8154_v36  ;;  %6723 = vcosq.f32 %v8096_v40  ;;  %v8169_v11 = vmul.f32 %v8098_v29, %v7815_v5  ;;  %v8173_v60 = vmul.f32 %v8100_v4, %v7872_v35  ;;  %v8175_v57 = vshll.u32 %v2257_v21, 8 }
 0x117   :  { %6725 = vsinq.f32 %v8096_v40  ;;  %v8180_v58 = vmul.f32 %v8098_v29, %v7872_v35  ;;  %v2292_v51 = vsel %vm2282_vm14, %v2289_v38, %v2291_v19  ;;  %v8184_v9 = vsub.s32 32, %v2470_v52 }
 0x118   :  { %v1631_v39 = vor.u32 %v1630_v30, %v1629_v17  ;;  %v1635_v34 = vor.u32 4788187, %v1634_v1  ;;  %v2296_v63 = vsel %vm2282_vm14, %v2293_v7, %v2295_v24  ;;  %v2666_v44 = vand.u32 2139095040, %v8154_v36 }
 0x119   :  { %v8189_v33 = vor.u32 %v1837_v10, %v1836_v49  ;;  %v1841_v47 = vshll.u32 %v1840_v50, 23  ;;  %v8191_v40 = vshrl.u32 %v2031_v45, 30  ;;  %v12636_v27 = vand.u32 2147483647, %v8006_v56 }
 0x11a   :  { %v2265_v0 = vshrl.u32 %v12851_v12, %v8078_v28  ;;  %v2286_v41 = vsel %vm2284_vm7, %v2274_v54, 2102212464  ;;  %v8199_v20 = vmul.u32.u64.low %v8175_v57, %v2292_v51  ;;  %v8200_v37 = vmul.u32.u64.high %v8175_v57, %v2292_v51, %v8199_v20 }
 0x11b   :  { %v8204_v42 = vmul.u32.u64.low %v8175_v57, %v2296_v63  ;;  %v8205_v14 = vmul.u32.u64.high %v8175_v57, %v2296_v63, %v8204_v42  ;;  %v2482_v17 = vshll.u32 %v12868_v32, %v2470_v52  ;;  %v2483_v30 = vshrl.u32 %v12869_v48, %v8184_v9 }
 0x11c   :  { %12879 = vst [vmem:[#allocation16_spill] sm:$0xff] %v8199_v20  ;;  %v8210_v21 = vshrl.u32 %v2468_v59, 5  ;;  %v2485_v28 = vshll.u32 %v12869_v48, %v2470_v52  ;;  %v2486_v54 = vshrl.u32 %v12870_v62, %v8184_v9  ;;  %v2667_v3 = vshrl.u32 %v2666_v44, 23 }
 0x11d   :  { %12880 = vst [vmem:[#allocation17_spill] sm:$0xff] %v8205_v14  ;;  %v1842_v1 = vor.u32 4788187, %v1841_v47  ;;  %v2033_v49 = vshll.u32 %v8191_v40, 30  ;;  %v2473_v10 = vshll.u32 %v12851_v12, %v2470_v52  ;;  %v2476_v38 = vshll.u32 %v12871_v2, %v2470_v52 }
 0x11e   :  { %v2474_v19 = vshrl.u32 %v12871_v2, %v8184_v9  ;;  %v2477_v59 = vshrl.u32 %v12872_v22, %v8184_v9  ;;  %v2479_v50 = vshll.u32 %v12872_v22, %v2470_v52  ;;  %v2480_v45 = vshrl.u32 %v12868_v32, %v8184_v9 }
 0x11f   :  { %v1638_v7 = vcvt.s32.f32 %v1631_v39  ;;  %v2285_v24 = vsel %vm2281_vm4, %v2265_v0, %v2268_v8  ;;  %v2287_v51 = vsel %vm2283_vm1, %v2271_v23, %v2286_v41  ;;  %v2484_v63 = vor.u32 %v2483_v30, %v2482_v17  ;;  %v12881_v23 = vld [vmem:[#allocation10_spill] sm:$0xff] }
 0x120   :  { %vm1399_vm2 = vcmp.eq.s32.totalorder %v8087_v53, 2  ;;  %v2463_v44 = vand.u32 8388607, %v12636_v27  ;;  %v2487_v47 = vor.u32 %v2486_v54, %v2485_v28  ;;  %vm2491_vm5 = vcmp.lt.s32.totalorder %v8210_v21, 4 }
 0x121   :  { %v6495_v52 = vadd.s32 4294967169, %v2667_v3  ;;  %vm1396_vm0 = vcmp.eq.s32.totalorder %v8087_v53, 0  ;;  %v1636_v42 = vand.u32 2147483647, %v1635_v34  ;;  %v1843_v39 = vand.u32 2147483647, %v1842_v1 }
 0x122   :  { %v1845_v43 = vcvt.s32.f32 %v8189_v33  ;;  %v8236_v8 = vsub.s32 %v8142_v13, %v2033_v49  ;;  %vm1558_vm3 = vcmp.lt.s32.totalorder %v12881_v23, 0  ;;  %v2288_v0 = vsel %vm2282_vm14, %v2285_v24, %v2287_v51 }
 0x123   :  { %v8241_v41 = vor.u32 %v2474_v19, %v2473_v10  ;;  %v8243_v17 = vor.u32 %v2477_v59, %v2476_v38  ;;  %v2481_v30 = vor.u32 %v2480_v45, %v2479_v50  ;;  %v8245_v28 = vpop.eup %6723  ;;  %v2307_v34 = vadd.s32 1, %v8200_v37  ;;  %v12882_v38 = vld [vmem:[#allocation11_spill] sm:$0xff] }
 0x124   :  { %vm2488_vm6 = vcmp.lt.s32.totalorder %v8210_v21, 1  ;;  %vm2490_vm8 = vcmp.lt.s32.totalorder %v8210_v21, 3  ;;  %v2497_v13 = vsel %vm2491_vm5, %v2484_v63, 920167782  ;;  %v6726_v33 = vpop.eup %6725  ;;  %vm2306_vm9 = vc.u32 %v8205_v14, %v8199_v20 }
 0x125   :  { %v2464_v55 = vor.u32 8388608, %v2463_v44  ;;  %v2501_v54 = vsel %vm2491_vm5, %v2487_v47, 1326507024  ;;  %v2673_v3 = vadd.s32 1, %v6495_v52  ;;  %vm1395_vm11 = vcmp.lt.s32.totalorder %v8087_v53, 2 }
 0x126   :  { %vm1500_vm12 = vcmp.eq.s32.totalorder %v8089_v18, 0  ;;  %vm1503_vm13 = vcmp.eq.s32.totalorder %v8089_v18, 2  ;;  %v1516_v1 = vmul.f32 %v8100_v4, %v7815_v5  ;;  %v1639_v49 = vmul.f32 %v1638_v7, %v1636_v42 }
 0x127   :  { %v1642_v10 = vsub.s32 4, %v7835_v25  ;;  %vm1765_vm10 = vcmp.lt.s32.totalorder %v12882_v38, 0  ;;  %v2036_v19 = vsub.s32 0, %v8236_v8  ;;  %v12883_v59 = vand.u32 2147483647, %v12881_v23 }
 0x128   :  { %v2304_v45 = vmul.u32 %v8175_v57, %v2288_v0  ;;  %vm2489_vm7 = vcmp.lt.s32.totalorder %v8210_v21, 2  ;;  %v2496_v7 = vsel %vm2488_vm6, %v8241_v41, %v8243_v17  ;;  %v2498_v24 = vsel %vm2490_vm8, %v2481_v30, %v2497_v13 }
 0x129   :  { %vm8266_vm15 = vcmp.le.f32.partialorder %v12883_v59, 0.7853982  ;;  %v1400_v51 = vxor.u32 2147483648, %v8245_v28  ;;  %v2308_v44 = vsel %vm2306_vm9, %v2307_v34, %v8200_v37  ;;  %v2500_v57 = vsel %vm2488_vm6, %v8243_v17, %v2481_v30  ;;  %v12889_v37 = vld [vmem:[#allocation14_spill] sm:$0xff] }
 0x12a   :  { %v2502_v47 = vsel %vm2490_vm8, %v2484_v63, %v2501_v54  ;;  %vm1393_vm4 = vweird.f32 %v12867_v15  ;;  %v1397_v52 = vxor.u32 2147483648, %v6726_v33  ;;  %v12886_v42 = vand.u32 2147483647, %v12882_v38 }
 0x12b   :  { %v1846_v13 = vmul.f32 %v1845_v43, %v1843_v39  ;;  %v8295_v59 = vshll.u32 %v2464_v55, 8  ;;  %vm2674_vm14 = vcmp.gt.s32.totalorder %v2673_v3, 0  ;;  %v1524_v34 = vmul.f32 %v8098_v29, %v12889_v37 }
 0x12c   :  { %vm8291_vm1 = vcmp.le.f32.partialorder %v12886_v42, 0.7853982  ;;  %v1525_v27 = vmul.f32 %v8100_v4, %v8081_v26  ;;  %v6472_v63 = vmin.u32 %v2036_v19, %v8236_v8  ;;  %v2499_v54 = vsel %vm2489_vm7, %v2496_v7, %v2498_v24 }
 0x12d   :  { %v1527_v42 = vmul.f32 %v8098_v29, %v8081_v26  ;;  %v1640_v56 = vxor.u32 2147483648, %v1639_v49  ;;  %v8306_v6 = vadd.s32 %v2308_v44, %v2304_v45  ;;  %v2503_v43 = vsel %vm2489_vm7, %v2500_v57, %v2502_v47 }
 0x12e   :  { %v1401_v39 = vsel %vm1399_vm2, %v1400_v51, %v6726_v33  ;;  %v1528_v55 = vmul.f32 %v8100_v4, %v12889_v37  ;;  %v1643_v19 = vsel %vm1558_vm3, %v1642_v10, %v7835_v25  ;;  %v2675_v7 = vsel %vm2674_vm14, %v2673_v3, 0 }
 0x12f   :  { %v1398_v29 = vsel %vm1396_vm0, %v8245_v28, %v1397_v52  ;;  %v1847_v45 = vxor.u32 2147483648, %v1846_v13  ;;  %v8321_v24 = vmul.u32.u64.low %v8295_v59, %v2499_v54  ;;  %v8322_v44 = vmul.u32.u64.high %v8295_v59, %v2499_v54, %v8321_v24 }
 0x130   :  { %v2038_v57 = vclz %v6472_v63  ;;  %v2472_v47 = vshrl.u32 %v12851_v12, %v8184_v9  ;;  %v8328_v4 = vmul.u32.u64.low %v8295_v59, %v2503_v43  ;;  %v8329_v20 = vmul.u32.u64.high %v8295_v59, %v2503_v43, %v8328_v4 }
 0x131   :  { %v1641_v25 = vsel %vm1558_vm3, %v1640_v56, %v1639_v49  ;;  %v2310_v3 = vadd.s32 536870912, %v8306_v6  ;;  %v2493_v10 = vsel %vm2491_vm5, %v2481_v30, 2102212464  ;;  %v2677_v14 = vand.u32 31, %v2675_v7 }
 0x132   :  { %vm1499_vm2 = vcmp.lt.s32.totalorder %v8089_v18, 2  ;;  %v8339_v63 = vadd.f32 %v8173_v60, %v8169_v11  ;;  %v8342_v9 = vsub.f32 %v8180_v58, %v1516_v1  ;;  %v1645_v54 = vsel %vm8266_vm15, 0, %v1643_v19 }
 0x133   :  { %v1402_v56 = vsel %vm1395_vm11, %v1398_v29, %v1401_v39  ;;  %v1502_v30 = vsel %vm1500_vm12, %v8245_v28, %v1397_v52  ;;  %v1505_v49 = vsel %vm1503_vm13, %v1400_v51, %v6726_v33  ;;  %v1848_v11 = vsel %vm1765_vm10, %v1847_v45, %v1846_v13 }
 0x134   :  { %v1644_v60 = vsel %vm8266_vm15, %v12881_v23, %v1641_v25  ;;  %v6473_v58 = vadd.s32 4294967294, %v2038_v57  ;;  %v2492_v53 = vsel %vm2488_vm6, %v2472_v47, %v8241_v41  ;;  %v2494_v1 = vsel %vm2490_vm8, %v8243_v17, %v2493_v10 }
 0x135   :  { %v8364_v28 = vadd.f32 %v1525_v27, %v1524_v34  ;;  %v8366_v52 = vsub.f32 %v1527_v42, %v1528_v55  ;;  %v8368_v33 = vshrl.u32 %v2310_v3, 30  ;;  %v8370_v51 = vsub.s32 32, %v2677_v14  ;;  %v12890_v27 = vld [vmem:[#allocation13_spill] sm:$0xff] }
 0x136   :  { %v1403_v50 = vsel %vm1393_vm4, nan, %v1402_v56  ;;  %v1506_v13 = vsel %vm1499_vm2, %v1502_v30, %v1505_v49  ;;  %v1752_v43 = vadd.s32 3, %v1645_v54  ;;  %v1851_v41 = vsel %vm8291_vm1, %v12882_v38, %v1848_v11 }
 0x137   :  { %6727 = vcosq.f32 %v1644_v60  ;;  %v1849_v17 = vsub.s32 4, %v12890_v27  ;;  %v2495_v34 = vsel %vm2489_vm7, %v2492_v53, %v2494_v1  ;;  %v2514_v42 = vadd.s32 1, %v8322_v44 }
 0x138   :  { %6729 = vsinq.f32 %v1644_v60  ;;  %vm6474_vm5 = vcmp.lt.s32.totalorder %v6473_v58, 0  ;;  %vm2513_vm0 = vc.u32 %v8329_v20, %v8321_v24  ;;  %v12643_v18 = vand.u32 2147483647, %v8154_v36 }
 0x139   :  { %6731 = vcosq.f32 %v1851_v41  ;;  %v2312_v39 = vshll.u32 %v8368_v33, 30  ;;  %v2689_v55 = vshll.u32 %v12868_v32, %v2677_v14  ;;  %v2690_v21 = vshrl.u32 %v12869_v48, %v8370_v51 }
 0x13a   :  { %v2511_v19 = vmul.u32 %v8295_v59, %v2495_v34  ;;  %v8393_v29 = vshrl.u32 %v2675_v7, 5  ;;  %v2692_v45 = vshll.u32 %v12869_v48, %v2677_v14  ;;  %v2693_v57 = vshrl.u32 %v12870_v62, %v8370_v51 }
 0x13b   :  { %v8398_v47 = vsel %vm6474_vm5, 0, %v6473_v58  ;;  %v2515_v4 = vsel %vm2513_vm0, %v2514_v42, %v8322_v44  ;;  %v2680_v25 = vshll.u32 %v12851_v12, %v2677_v14  ;;  %v2683_v3 = vshll.u32 %v12871_v2, %v2677_v14 }
 0x13c   :  { %v2681_v59 = vshrl.u32 %v12871_v2, %v8370_v51  ;;  %v2684_v7 = vshrl.u32 %v12872_v22, %v8370_v51  ;;  %v2686_v10 = vshll.u32 %v12872_v22, %v2677_v14  ;;  %v2687_v56 = vshrl.u32 %v12868_v32, %v8370_v51 }
 0x13d   :  { %v1850_v44 = vsel %vm1765_vm10, %v1849_v17, %v12890_v27  ;;  %6733 = vsinq.f32 %v1851_v41  ;;  %v2670_v30 = vand.u32 8388607, %v12643_v18  ;;  %v2691_v49 = vor.u32 %v2690_v21, %v2689_v55 }
 0x13e   :  { %v8418_v11 = vsub.s32 %v8306_v6, %v2312_v39  ;;  %v8420_v60 = vadd.s32 %v2515_v4, %v2511_v19  ;;  %v2694_v58 = vor.u32 %v2693_v57, %v2692_v45  ;;  %vm2698_vm3 = vcmp.lt.s32.totalorder %v8393_v29, 4 }
 0x13f   :  { %v1507_v14 = vsel %vm1393_vm4, nan, %v1506_v13  ;;  %v8425_v53 = vand.u32 3, %v1645_v54  ;;  %v8427_v1 = vand.u32 3, %v1752_v43  ;;  %v2046_v41 = vsub.s32 4294967266, %v8398_v47 }
 0x140   :  { %v8432_v27 = vmul.f32 %v1403_v50, %v8085_v61  ;;  %v8434_v6 = vor.u32 %v2681_v59, %v2680_v25  ;;  %v8436_v17 = vor.u32 %v2684_v7, %v2683_v3  ;;  %v2688_v34 = vor.u32 %v2687_v56, %v2686_v10 }
 0x141   :  { %v1852_v15 = vsel %vm8291_vm1, 0, %v1850_v44  ;;  %vm2695_vm6 = vcmp.lt.s32.totalorder %v8393_v29, 1  ;;  %vm2697_vm8 = vcmp.lt.s32.totalorder %v8393_v29, 3  ;;  %v2704_v54 = vsel %vm2698_vm3, %v2691_v49, 920167782 }
 0x142   :  { %v2315_v13 = vsub.s32 0, %v8418_v11  ;;  %v2517_v50 = vadd.s32 536870912, %v8420_v60  ;;  %v2671_v43 = vor.u32 8388608, %v2670_v30  ;;  %v2708_v42 = vsel %vm2698_vm3, %v2694_v58, 1326507024 }
 0x143   :  { %v8449_v39 = vmul.f32 %v1507_v14, %v8085_v61  ;;  %v2026_v0 = vadd.s32 %v8057_v46, %v8067_v16  ;;  %v2042_v55 = vsub.s32 32, %v8398_v47  ;;  %v2047_v21 = vadd.s32 127, %v2046_v41  ;;  %v6799_v14 = vld [vmem:[%s12606_s2 + $0x8] sm:$0xff] }
 0x144   :  { %v8454_v19 = vpop.eup %6727  ;;  %vm2696_vm9 = vcmp.lt.s32.totalorder %v8393_v29, 2  ;;  %v2703_v45 = vsel %vm2695_vm6, %v8434_v6, %v8436_v17  ;;  %v2705_v61 = vsel %vm2697_vm8, %v2688_v34, %v2704_v54  ;;  %v2974_v57 = vstv %s172_s17  ;;  %s187_s17 = smul.f32 0.5, %s9343_s13 }
 0x145   :  { %v8464_v4 = vpop.eup %6729  ;;  %v8468_v46 = vmul.f32 %v8432_v27, %v7815_v5  ;;  %vm1651_vm11 = vcmp.eq.s32.totalorder %v8425_v53, 0  ;;  %vm1654_vm12 = vcmp.eq.s32.totalorder %v8425_v53, 2  ;;  %v1959_v16 = vadd.s32 3, %v1852_v15 }
 0x146   :  { %v2707_v25 = vsel %vm2695_vm6, %v8436_v17, %v2688_v34  ;;  %v2709_v3 = vsel %vm2697_vm8, %v2691_v49, %v2708_v42  ;;  %v8477_v59 = vpop.eup %6731  ;;  %v8479_v7 = vand.u32 3, %v1852_v15  ;;  %v6480_v10 = vmin.u32 %v2315_v13, %v8418_v11 }
 0x147   :  { %v8482_v56 = vshrl.u32 %v2517_v50, 30  ;;  %v8484_v44 = vshll.u32 %v2671_v43, 8  ;;  %v8488_v30 = vmul.f32 %v8449_v39, %v7872_v35  ;;  %v2043_v58 = vshll.u32 %v8236_v8, %v8398_v47 }
 0x148   :  { %v2706_v49 = vsel %vm2696_vm9, %v2703_v45, %v2705_v61  ;;  %v2975_v41 = vmul.f32 %v6799_v14, %v2974_v57  ;;  %vm1650_vm13 = vcmp.lt.s32.totalorder %v8425_v53, 2  ;;  %v2044_v15 = vshrl.u32 %v2026_v0, %v2042_v55 }
 0x149   :  { %v2048_v54 = vshll.u32 %v2047_v21, 23  ;;  %v2710_v13 = vsel %vm2696_vm9, %v2707_v25, %v2709_v3  ;;  %v2976_v50 = vstv %s174_s18  ;;  %v8502_v43 = vmul.f32 %v8432_v27, %v7872_v35  ;;  %s189_s18 = sadd.f32 %s9405_s15, %s9399_s14 }
 0x14a   :  { %v8506_v8 = vmul.f32 %v8449_v39, %v7815_v5  ;;  %v1655_v47 = vxor.u32 2147483648, %v8454_v19  ;;  %vm1758_vm10 = vcmp.eq.s32.totalorder %v8427_v1, 2  ;;  %v1960_v42 = vand.u32 3, %v1959_v16  ;;  %v6734_v45 = vpop.eup %6733  ;;  %s205_s15 = ssub.f32 %s10349_s6, %s10351_s7 }
 0x14b   :  { %vm1857_vm15 = vcmp.lt.s32.totalorder %v8479_v7, 2  ;;  %v2317_v0 = vclz %v6480_v10  ;;  %v2519_v55 = vshll.u32 %v8482_v56, 30  ;;  %vm1648_vm7 = vweird.f32 %v12881_v23  ;;  %s9505_s21 = smul.f32 0.5, %s189_s18  ;;  %s11177_s18 = sld [smem:[#allocation4 + $0x16]] }
 0x14c   :  { %v8515_v35 = vmul.u32.u64.low %v8484_v44, %v2706_v49  ;;  %v8516_v21 = vmul.u32.u64.high %v8484_v44, %v2706_v49, %v8515_v35  ;;  %v2679_v5 = vshrl.u32 %v12851_v12, %v8370_v51  ;;  %v8529_v16 = vadd.f32 %v2976_v50, %v2975_v41 }
 0x14d   :  { %v8526_v61 = vmul.u32.u64.low %v8484_v44, %v2710_v13  ;;  %v8527_v57 = vmul.u32.u64.high %v8484_v44, %v2710_v13, %v8526_v61  ;;  %v1652_v25 = vxor.u32 2147483648, %v8464_v4  ;;  %v2045_v3 = vor.u32 %v2044_v15, %v2043_v58 }
 0x14e   :  { %12891 = vst [vmem:[#allocation10_spill] sm:$0xff] %v8515_v35  ;;  %v2049_v10 = vor.u32 4788187, %v2048_v54  ;;  %v2700_v49 = vsel %vm2698_vm3, %v2688_v34, 2102212464  ;;  %vm1858_vm14 = vcmp.eq.s32.totalorder %v8479_v7, 0  ;;  %v8542_v41 = vsub.s32 %v8420_v60, %v2519_v55 }
 0x14f   :  { %v1859_v14 = vxor.u32 2147483648, %v6734_v45  ;;  %vm1861_vm2 = vcmp.eq.s32.totalorder %v8479_v7, 2  ;;  %v1862_v51 = vxor.u32 2147483648, %v8477_v59  ;;  %vm1962_vm5 = vcmp.eq.s32.totalorder %v1960_v42, 0 }
 0x150   :  { %vm1965_vm0 = vcmp.eq.s32.totalorder %v1960_v42, 2  ;;  %vm1972_vm4 = vcmp.lt.s32.totalorder %v7681_v31, 0  ;;  %v6481_v58 = vadd.s32 4294967294, %v2317_v0  ;;  %vm1961_vm3 = vcmp.lt.s32.totalorder %v1960_v42, 2 }
 0x151   :  { %v2699_v34 = vsel %vm2695_vm6, %v2679_v5, %v8434_v6  ;;  %v2701_v15 = vsel %vm2697_vm8, %v8436_v17, %v2700_v49  ;;  %v2987_v54 = vand.u32 2139095040, %v8529_v16  ;;  %v1653_v60 = vsel %vm1651_vm11, %v8454_v19, %v1652_v25  ;;  %s216_s20 = smul.f32 0.5, %s11177_s18 }
 0x152   :  { %v1656_v13 = vsel %vm1654_vm12, %v1655_v47, %v8464_v4  ;;  %vm1754_vm1 = vcmp.lt.s32.totalorder %v8427_v1, 2  ;;  %v2050_v50 = vand.u32 2147483647, %v2049_v10  ;;  %v2052_v0 = vcvt.s32.f32 %v2045_v3 }
 0x153   :  { %v1860_v6 = vsel %vm1858_vm14, %v8477_v59, %v1859_v14  ;;  %v1863_v17 = vsel %vm1861_vm2, %v1862_v51, %v6734_v45  ;;  %v1964_v55 = vsel %vm1962_vm5, %v8477_v59, %v1859_v14  ;;  %v1967_v5 = vsel %vm1965_vm0, %v1862_v51, %v6734_v45 }
 0x154   :  { %v12892_v61 = vand.u32 2147483647, %v7681_v31  ;;  %vm6482_vm8 = vcmp.lt.s32.totalorder %v6481_v58, 0  ;;  %v2522_v3 = vsub.s32 0, %v8542_v41  ;;  %v2702_v10 = vsel %vm2696_vm9, %v2699_v34, %v2701_v15 }
 0x155   :  { %v2721_v18 = vadd.s32 1, %v8516_v21  ;;  %v1657_v59 = vsel %vm1650_vm13, %v1653_v60, %v1656_v13  ;;  %v2056_v45 = vsub.s32 4, %v8191_v40  ;;  %vm2720_vm11 = vc.u32 %v8527_v57, %v8515_v35 }
 0x156   :  { %vm8570_vm6 = vcmp.le.f32.partialorder %v12892_v61, 0.7853982  ;;  %v2988_v14 = vshrl.u32 %v2987_v54, 23  ;;  %v1530_v51 = vmul.f32 %v8432_v27, %v12889_v37  ;;  %v1531_v29 = vmul.f32 %v8449_v39, %v8081_v26 }
 0x157   :  { %v1760_v34 = vsel %vm1758_vm10, %v1655_v47, %v8464_v4  ;;  %v2053_v53 = vmul.f32 %v2052_v0, %v2050_v50  ;;  %v1864_v15 = vsel %vm1857_vm15, %v1860_v6, %v1863_v17  ;;  %v1968_v60 = vsel %vm1961_vm3, %v1964_v55, %v1967_v5  ;;  %v6800_v17 = vld [vmem:[%s12606_s2] sm:$0xff] }
 0x158   :  { %v8595_v13 = vsel %vm6482_vm8, 0, %v6481_v58  ;;  %v2718_v54 = vmul.u32 %v8484_v44, %v2702_v10  ;;  %v1658_v61 = vsel %vm1648_vm7, nan, %v1657_v59  ;;  %vm12895_vm9 = vcmp.eq.s32.totalorder %v8427_v1, 0  ;;  %v12898_v5 = vld [vmem:[#allocation17_spill] sm:$0xff] }
 0x159   :  { %v1757_v36 = vsel %vm12895_vm9, %v8454_v19, %v1652_v25  ;;  %v6488_v35 = vmin.u32 %v2522_v3, %v8542_v41  ;;  %v2722_v4 = vsel %vm2720_vm11, %v2721_v18, %v8516_v21  ;;  %v2057_v7 = vsel %vm1972_vm4, %v2056_v45, %v8191_v40  ;;  %v12899_v3 = vld [vmem:[#allocation16_spill] sm:$0xff] }
 0x15a   :  { %v2970_v47 = vstv %s171_s23  ;;  %v2972_v42 = vstv %s173_s24  ;;  %v6503_v58 = vadd.s32 4294967169, %v2988_v14  ;;  %vm12896_vm12 = vweird.f32 %v12882_v38  ;;  %s9643_s23 = sld [smem:[#allocation2 + $0x12]]  ;;  %s9650_s24 = smul.f32 0.5, %s191_s22 }
 0x15b   :  { %v1865_v44 = vsel %vm12896_vm12, nan, %v1864_v15  ;;  %vm12897_vm13 = vmmov %vm12896_vm12  ;;  %v2054_v0 = vxor.u32 2147483648, %v2053_v53  ;;  %v2325_v19 = vsub.s32 4294967266, %v8595_v13  ;;  %v8617_v18 = vadd.f32 %v8488_v30, %v8468_v46  ;;  %v6801_v46 = vld [vmem:[%s12606_s2 + $0x10] sm:$0xff]  ;;  %s11329_s22 = sld [smem:[#allocation2 + $0x17]] }
 0x15c   :  { %v1969_v50 = vsel %vm12897_vm13, nan, %v1968_v60  ;;  %v1533_v21 = vmul.f32 %v8432_v27, %v8081_v26  ;;  %v1534_v40 = vmul.f32 %v8449_v39, %v12889_v37  ;;  %v8623_v25 = vadd.s32 %v2722_v4, %v2718_v54 }
 0x15d   :  { %v2059_v6 = vsel %vm8570_vm6, 0, %v2057_v7  ;;  %v2524_v38 = vclz %v6488_v35  ;;  %v8630_v55 = vmul.f32 %v6800_v17, %v2970_v47  ;;  %v8635_v26 = vmul.f32 %v6801_v46, %v2972_v42 }
 0x15e   :  { %v1761_v37 = vsel %vm1754_vm1, %v1757_v36, %v1760_v34  ;;  %v8641_v27 = vmul.f32 %v1865_v44, %v1658_v61  ;;  %v8643_v39 = vmul.f32 %v1969_v50, %v1658_v61  ;;  %v2994_v30 = vadd.s32 1, %v6503_v58  ;;  %v12900_v61 = vld [vmem:[#allocation12_spill] sm:$0xff] }
 0x15f   :  { %v2055_v35 = vsel %vm1972_vm4, %v2054_v0, %v2053_v53  ;;  %v2305_v10 = vadd.s32 %v12899_v3, %v12898_v5  ;;  %v2321_v59 = vsub.s32 32, %v8595_v13  ;;  %v2326_v45 = vadd.s32 127, %v2325_v19 }
 0x160   :  { %v8652_v14 = vsub.f32 %v8502_v43, %v8506_v8  ;;  %v8654_v36 = vadd.f32 %v1531_v29, %v1530_v51  ;;  %v2166_v1 = vadd.s32 3, %v2059_v6  ;;  %v2724_v34 = vadd.s32 536870912, %v8623_v25  ;;  %s199_s25 = smul.f32 0.5, %s9643_s23  ;;  %s11349_s23 = sld [smem:[#allocation4 + $0x15]] }
 0x161   :  { %v8657_v15 = vsub.f32 %v1533_v21, %v1534_v40  ;;  %v8661_v53 = vsel %vm1648_vm7, nan, %v1761_v37  ;;  %v6489_v60 = vadd.s32 4294967294, %v2524_v38  ;;  %v2978_v54 = vadd.f32 %v8635_v26, %v8630_v55  ;;  %s215_s26 = smul.f32 0.5, %s11329_s22 }
 0x162   :  { %v2058_v43 = vsel %vm8570_vm6, %v7681_v31, %v2055_v35  ;;  %v2181_v8 = vmul.f32 %v8641_v27, %v8339_v63  ;;  %v2979_v51 = vstv %s8637_s30  ;;  %vm2995_vm10 = vcmp.gt.s32.totalorder %v2994_v30, 0 }
 0x163   :  { %v2182_v29 = vmul.f32 %v8643_v39, %v8342_v9  ;;  %vm2251_vm15 = vcmp.lt.s32.totalorder %v12900_v61, 0  ;;  %v2322_v23 = vshll.u32 %v8418_v11, %v8595_v13  ;;  %v2323_v4 = vshrl.u32 %v2305_v10, %v2321_v59 }
 0x164   :  { %v2327_v7 = vshll.u32 %v2326_v45, 23  ;;  %v8676_v47 = vand.u32 3, %v2059_v6  ;;  %v8678_v42 = vand.u32 3, %v2166_v1  ;;  %v2184_v49 = vmul.f32 %v8641_v27, %v8342_v9 }
 0x165   :  { %v8682_v58 = vshrl.u32 %v2724_v34, 30  ;;  %6735 = vcosq.f32 %v2058_v43  ;;  %vm6490_vm7 = vcmp.lt.s32.totalorder %v6489_v60, 0  ;;  %v8684_v44 = vadd.f32 %v2979_v51, %v2978_v54 }
 0x166   :  { %v2996_v50 = vsel %vm2995_vm10, %v2994_v30, 0  ;;  %6737 = vsinq.f32 %v2058_v43  ;;  %v2185_v11 = vmul.f32 %v8643_v39, %v8339_v63  ;;  %v2193_v13 = vmul.f32 %v8641_v27, %v8617_v18 }
 0x167   :  { %12901 = vst [vmem:[#allocation11_spill] sm:$0xff] %v8684_v44  ;;  %v2194_v0 = vmul.f32 %v8643_v39, %v8652_v14  ;;  %v12902_v19 = vand.u32 2147483647, %v12900_v61  ;;  %v8698_v40 = vadd.f32 %v2182_v29, %v2181_v8  ;;  %v2196_v6 = vmul.f32 %v8641_v27, %v8652_v14 }
 0x168   :  { %v2324_v38 = vor.u32 %v2323_v4, %v2322_v23  ;;  %v2328_v17 = vor.u32 4788187, %v2327_v7  ;;  %v2335_v46 = vsub.s32 4, %v8368_v33  ;;  %v8703_v37 = vsel %vm6490_vm7, 0, %v6489_v60 }
 0x169   :  { %vm8694_vm4 = vcmp.le.f32.partialorder %v12902_v19, 0.7853982  ;;  %v2726_v30 = vshll.u32 %v8682_v58, 30  ;;  %v2998_v35 = vand.u32 31, %v2996_v50  ;;  %v2197_v5 = vmul.f32 %v8643_v39, %v8617_v18 }
 0x16a   :  { %v2205_v3 = vmul.f32 %v8641_v27, %v8364_v28  ;;  %v2206_v10 = vmul.f32 %v8643_v39, %v8366_v52  ;;  %v3194_v59 = vand.u32 2139095040, %v8684_v44  ;;  %v8713_v45 = vsub.f32 %v2184_v49, %v2185_v11 }
 0x16b   :  { %v2208_v1 = vmul.f32 %v8641_v27, %v8366_v52  ;;  %v2209_v34 = vmul.f32 %v8643_v39, %v8364_v28  ;;  %v2217_v60 = vmul.f32 %v8641_v27, %v8654_v36  ;;  %v2218_v54 = vmul.f32 %v8643_v39, %v8657_v15 }
 0x16c   :  { %12905 = vst [vmem:[#allocation14_spill] sm:$0xff] %v8713_v45  ;;  %v2329_v43 = vand.u32 2147483647, %v2328_v17  ;;  %v2331_v8 = vcvt.s32.f32 %v2324_v38  ;;  %v2532_v51 = vsub.s32 4294967266, %v8703_v37  ;;  %v8724_v29 = vadd.f32 %v2194_v0, %v2193_v13 }
 0x16d   :  { %v2336_v23 = vsel %vm2251_vm15, %v2335_v46, %v8368_v33  ;;  %v8730_v4 = vsub.s32 %v8623_v25, %v2726_v30  ;;  %v8732_v7 = vsub.s32 32, %v2998_v35  ;;  %v8734_v49 = vsub.f32 %v2196_v6, %v2197_v5 }
 0x16e   :  { %12906 = vst [vmem:[#allocation13_spill] sm:$0xff] %v8724_v29  ;;  %v8736_v11 = vadd.f32 %v2206_v10, %v2205_v3  ;;  %v2220_v19 = vmul.f32 %v8641_v27, %v8657_v15  ;;  %v3195_v38 = vshrl.u32 %v3194_v59, 23  ;;  %v8740_v17 = vsub.f32 %v2208_v1, %v2209_v34 }
 0x16f   :  { %12907 = vst [vmem:[#allocation17_spill] sm:$0xff] %v8734_v49  ;;  %v2221_v13 = vmul.f32 %v8643_v39, %v8654_v36  ;;  %v2512_v33 = vadd.s32 %v8321_v24, %v8329_v20  ;;  %v2528_v25 = vsub.s32 32, %v8703_v37  ;;  %vm2065_vm1 = vcmp.eq.s32.totalorder %v8676_v47, 0 }
 0x170   :  { %12908 = vst [vmem:[#allocation16_spill] sm:$0xff] %v8736_v11  ;;  %12909 = vst [vmem:[#allocation12_spill] sm:$0xff] %v8740_v17  ;;  %vm2068_vm14 = vcmp.eq.s32.totalorder %v8676_v47, 2  ;;  %vm2169_vm2 = vcmp.eq.s32.totalorder %v8678_v42, 0  ;;  %vm2172_vm5 = vcmp.eq.s32.totalorder %v8678_v42, 2  ;;  %v8751_v27 = vadd.f32 %v2218_v54, %v2217_v60 }
 0x171   :  { %v2332_v0 = vmul.f32 %v2331_v8, %v2329_v43  ;;  %v8755_v6 = vsel %vm8694_vm4, 0, %v2336_v23  ;;  %v2533_v39 = vadd.s32 127, %v2532_v51  ;;  %v2729_v20 = vsub.s32 0, %v8730_v4 }
 0x172   :  { %12910 = vst [vmem:[#allocation18_spill] sm:$0xff] %v8751_v27  ;;  %v12655_v24 = vand.u32 2147483647, %v8529_v16  ;;  %v3010_v46 = vshll.u32 %v12868_v32, %v2998_v35  ;;  %v3011_v30 = vshrl.u32 %v12869_v48, %v8732_v7  ;;  %v8762_v5 = vshrl.u32 %v2996_v50, 5  ;;  %v6736_v1 = vpop.eup %6735 }
 0x173   :  { %v3013_v3 = vshll.u32 %v12869_v48, %v2998_v35  ;;  %v3014_v10 = vshrl.u32 %v12870_v62, %v8732_v7  ;;  %v6511_v59 = vadd.s32 4294967169, %v3195_v38  ;;  %vm2064_vm0 = vcmp.lt.s32.totalorder %v8676_v47, 2  ;;  %v6738_v8 = vpop.eup %6737 }
 0x174   :  { %v2529_v34 = vshll.u32 %v8542_v41, %v8703_v37  ;;  %v2530_v60 = vshrl.u32 %v2512_v33, %v2528_v25  ;;  %v3001_v54 = vshll.u32 %v12851_v12, %v2998_v35  ;;  %v3004_v43 = vshll.u32 %v12871_v2, %v2998_v35 }
 0x175   :  { %vm2168_vm3 = vcmp.lt.s32.totalorder %v8678_v42, 2  ;;  %v3002_v50 = vshrl.u32 %v12871_v2, %v8732_v7  ;;  %v3005_v51 = vshrl.u32 %v12872_v22, %v8732_v7  ;;  %v3007_v23 = vshll.u32 %v12872_v22, %v2998_v35 }
 0x176   :  { %v3008_v38 = vshrl.u32 %v12868_v32, %v8732_v7  ;;  %v8780_v41 = vsub.f32 %v2220_v19, %v2221_v13  ;;  %v2534_v37 = vshll.u32 %v2533_v39, 23  ;;  %v6496_v33 = vmin.u32 %v2729_v20, %v8730_v4 }
 0x177   :  { %v3012_v25 = vor.u32 %v3011_v30, %v3010_v46  ;;  %vm2062_vm6 = vweird.f32 %v7681_v31  ;;  %v2991_v27 = vand.u32 8388607, %v12655_v24  ;;  %v3015_v17 = vor.u32 %v3014_v10, %v3013_v3 }
 0x178   :  { %12911 = vst [vmem:[#allocation19_spill] sm:$0xff] %v8780_v41  ;;  %vm3019_vm8 = vcmp.lt.s32.totalorder %v8762_v5, 4  ;;  %v3201_v11 = vadd.s32 1, %v6511_v59  ;;  %v2066_v49 = vxor.u32 2147483648, %v6738_v8  ;;  %v2069_v35 = vxor.u32 2147483648, %v6736_v1 }
 0x179   :  { %v2333_v29 = vxor.u32 2147483648, %v2332_v0  ;;  %v2445_v45 = vadd.s32 3, %v8755_v6  ;;  %v2531_v19 = vor.u32 %v2530_v60, %v2529_v34  ;;  %v3003_v13 = vor.u32 %v3002_v50, %v3001_v54 }
 0x17a   :  { %v3006_v39 = vor.u32 %v3005_v51, %v3004_v43  ;;  %v3009_v41 = vor.u32 %v3008_v38, %v3007_v23  ;;  %v2731_v20 = vclz %v6496_v33  ;;  %vm3016_vm11 = vcmp.lt.s32.totalorder %v8762_v5, 1  ;;  %v12912_v43 = vld [vmem:[#allocation9_spill] sm:$0xff] }
 0x17b   :  { %vm3018_vm9 = vcmp.lt.s32.totalorder %v8762_v5, 3  ;;  %v3025_v46 = vsel %vm3019_vm8, %v3012_v25, 920167782  ;;  %v2535_v30 = vor.u32 4788187, %v2534_v37  ;;  %v2992_v3 = vor.u32 8388608, %v2991_v27 }
 0x17c   :  { %v3029_v10 = vsel %vm3019_vm8, %v3015_v17, 1326507024  ;;  %vm3202_vm12 = vcmp.gt.s32.totalorder %v3201_v11, 0  ;;  %v2067_v59 = vsel %vm2065_vm1, %v6736_v1, %v2066_v49  ;;  %v2070_v34 = vsel %vm2068_vm14, %v2069_v35, %v6738_v8 }
 0x17d   :  { %v2171_v60 = vsel %vm2169_vm2, %v6736_v1, %v2066_v49  ;;  %v2174_v54 = vsel %vm2172_vm5, %v2069_v35, %v6738_v8  ;;  %v2334_v27 = vsel %vm2251_vm15, %v2333_v29, %v2332_v0  ;;  %vm2458_vm13 = vcmp.lt.s32.totalorder %v12912_v43, 0 }
 0x17e   :  { %vm3017_vm10 = vcmp.lt.s32.totalorder %v8762_v5, 2  ;;  %v3024_v17 = vsel %vm3016_vm11, %v3003_v13, %v3006_v39  ;;  %v3026_v50 = vsel %vm3018_vm9, %v3009_v41, %v3025_v46  ;;  %v6497_v51 = vadd.s32 4294967294, %v2731_v20 }
 0x17f   :  { %v3028_v49 = vsel %vm3016_vm11, %v3006_v39, %v3009_v41  ;;  %v3030_v1 = vsel %vm3018_vm9, %v3012_v25, %v3029_v10  ;;  %v3203_v8 = vsel %vm3202_vm12, %v3201_v11, 0  ;;  %v2071_v29 = vsel %vm2064_vm0, %v2067_v59, %v2070_v34 }
 0x180   :  { %v2536_v0 = vand.u32 2147483647, %v2535_v30  ;;  %v2538_v23 = vcvt.s32.f32 %v2531_v19  ;;  %v8818_v38 = vshll.u32 %v2992_v3, 8  ;;  %v2175_v37 = vsel %vm2168_vm3, %v2171_v60, %v2174_v54 }
 0x181   :  { %v8823_v33 = vand.u32 3, %v8755_v6  ;;  %v8825_v35 = vand.u32 3, %v2445_v45  ;;  %v3027_v25 = vsel %vm3017_vm10, %v3024_v17, %v3026_v50  ;;  %v2337_v47 = vsel %vm8694_vm4, %v12900_v61, %v2334_v27 }
 0x182   :  { %v3000_v11 = vshrl.u32 %v12851_v12, %v8732_v7  ;;  %v3031_v19 = vsel %vm3017_vm10, %v3028_v49, %v3030_v1  ;;  %v3205_v42 = vand.u32 31, %v3203_v8  ;;  %v2072_v6 = vsel %vm2062_vm6, nan, %v2071_v29 }
 0x183   :  { %v2542_v45 = vsub.s32 4, %v8482_v56  ;;  %vm6498_vm15 = vcmp.lt.s32.totalorder %v6497_v51, 0  ;;  %v3021_v20 = vsel %vm3019_vm8, %v3009_v41, 2102212464  ;;  %v2176_v21 = vsel %vm2062_vm6, nan, %v2175_v37 }
 0x184   :  { %v2539_v46 = vmul.f32 %v2538_v23, %v2536_v0  ;;  %v8846_v7 = vmul.u32.u64.low %v8818_v38, %v3027_v25  ;;  %v8847_v30 = vmul.u32.u64.high %v8818_v38, %v3027_v25, %v8846_v7  ;;  %6739 = vcosq.f32 %v2337_v47 }
 0x185   :  { %v8851_v3 = vmul.u32.u64.low %v8818_v38, %v3031_v19  ;;  %v8852_v10 = vmul.u32.u64.high %v8818_v38, %v3031_v19, %v8851_v3  ;;  %v12654_v59 = vand.u32 2147483647, %v8684_v44  ;;  %v8855_v41 = vsel %vm6498_vm15, 0, %v6497_v51  ;;  %v12913_v51 = vld [vmem:[#allocation10_spill] sm:$0xff] }
 0x186   :  { %v3020_v31 = vsel %vm3016_vm11, %v3000_v11, %v3003_v13  ;;  %v3022_v34 = vsel %vm3018_vm9, %v3006_v39, %v3021_v20  ;;  %v3206_v60 = vsub.s32 32, %v3205_v42  ;;  %v8862_v54 = vmul.f32 %v2072_v6, %v8661_v53 }
 0x187   :  { %v8865_v27 = vmul.f32 %v2176_v21, %v8661_v53  ;;  %6741 = vsinq.f32 %v2337_v47  ;;  %v8870_v17 = vsel %vm2458_vm13, %v2542_v45, %v8482_v56  ;;  %v2540_v50 = vxor.u32 2147483648, %v2539_v46 }
 0x188   :  { %v2719_v13 = vadd.s32 %v12913_v51, %v8527_v57  ;;  %v2981_v39 = vsub.f32 %v8630_v55, %v8635_v26  ;;  %v2982_v49 = vstv %s8841_s5  ;;  %v2739_v1 = vsub.s32 4294967266, %v8855_v41  ;;  %s10334_s5 = sld [smem:[#allocation2 + $0x14]] }
 0x189   :  { %v3023_v53 = vsel %vm3017_vm10, %v3020_v31, %v3022_v34  ;;  %v3198_v29 = vand.u32 8388607, %v12654_v59  ;;  %v3204_v0 = vshrl.u32 %v3203_v8, 5  ;;  %v12914_v56 = vand.u32 2147483647, %v12912_v43 }
 0x18a   :  { %v3208_v57 = vshll.u32 %v12851_v12, %v3205_v42  ;;  %v3209_v55 = vshrl.u32 %v12871_v2, %v3206_v60  ;;  %v3211_v26 = vshll.u32 %v12871_v2, %v3205_v42  ;;  %v3212_v37 = vshrl.u32 %v12872_v22, %v3206_v60 }
 0x18b   :  { %vm8884_vm7 = vcmp.le.f32.partialorder %v12914_v56, 0.7853982  ;;  %v3214_v5 = vshll.u32 %v12872_v22, %v3205_v42  ;;  %v3215_v25 = vshrl.u32 %v12868_v32, %v3206_v60  ;;  %v3217_v8 = vshll.u32 %v12868_v32, %v3205_v42 }
 0x18c   :  { %v3218_v47 = vshrl.u32 %v12869_v48, %v3206_v60  ;;  %v8896_v11 = vadd.f32 %v2982_v49, %v2981_v39  ;;  %v3042_v19 = vadd.s32 1, %v8847_v30  ;;  %v3220_v6 = vshll.u32 %v12869_v48, %v3205_v42 }
 0x18d   :  { %v3221_v45 = vshrl.u32 %v12870_v62, %v3206_v60  ;;  %v2541_v20 = vsel %vm2458_vm13, %v2540_v50, %v2539_v46  ;;  %v2735_v21 = vsub.s32 32, %v8855_v41  ;;  %v2740_v3 = vadd.s32 127, %v2739_v1 }
 0x18e   :  { %12917 = vst [vmem:[#allocation9_spill] sm:$0xff] %v8896_v11  ;;  %vm3041_vm4 = vc.u32 %v8852_v10, %v8846_v7  ;;  %v3039_v31 = vmul.u32 %v8818_v38, %v3023_v53  ;;  %v3199_v34 = vor.u32 8388608, %v3198_v29  ;;  %v3210_v51 = vor.u32 %v3209_v55, %v3208_v57 }
 0x18f   :  { %v3213_v39 = vor.u32 %v3212_v37, %v3211_v26  ;;  %v3207_v49 = vshrl.u32 %v12851_v12, %v3206_v60  ;;  %v3216_v56 = vor.u32 %v3215_v25, %v3214_v5  ;;  %v3219_v42 = vor.u32 %v3218_v47, %v3217_v8 }
 0x190   :  { %vm3223_vm1 = vcmp.lt.s32.totalorder %v3204_v0, 1  ;;  %v2736_v59 = vshll.u32 %v8730_v4, %v8855_v41  ;;  %v3043_v46 = vsel %vm3041_vm4, %v3042_v19, %v8847_v30  ;;  %v3222_v50 = vor.u32 %v3221_v45, %v3220_v6 }
 0x191   :  { %v3401_v1 = vand.u32 2139095040, %v8896_v11  ;;  %v2737_v24 = vshrl.u32 %v2719_v13, %v2735_v21  ;;  %v2741_v44 = vshll.u32 %v2740_v3, 23  ;;  %vm3225_vm14 = vcmp.lt.s32.totalorder %v3204_v0, 3  ;;  %v8912_v38 = vpop.eup %6739 }
 0x192   :  { %vm3226_vm2 = vcmp.lt.s32.totalorder %v3204_v0, 4  ;;  %vm3224_vm5 = vcmp.lt.s32.totalorder %v3204_v0, 2  ;;  %v3231_v60 = vsel %vm3223_vm1, %v3210_v51, %v3213_v39  ;;  %v3239_v29 = vshll.u32 %v3199_v34, 8 }
 0x193   :  { %v3228_v53 = vsel %vm3226_vm2, %v3216_v56, 2102212464  ;;  %v8915_v57 = vadd.s32 %v3043_v46, %v3039_v31  ;;  %v3227_v4 = vsel %vm3223_vm1, %v3207_v49, %v3210_v51  ;;  %v3232_v41 = vsel %vm3226_vm2, %v3219_v42, 920167782 }
 0x194   :  { %v3235_v30 = vsel %vm3223_vm1, %v3213_v39, %v3216_v56  ;;  %v8919_v55 = vpop.eup %6741  ;;  %v3229_v13 = vsel %vm3225_vm14, %v3213_v39, %v3228_v53  ;;  %v3233_v26 = vsel %vm3225_vm14, %v3216_v56, %v3232_v41  ;;  %v3236_v37 = vsel %vm3226_vm2, %v3222_v50, 1326507024 }
 0x195   :  { %v3402_v5 = vshrl.u32 %v3401_v1, 23  ;;  %v2187_v25 = vmul.f32 %v8862_v54, %v8339_v63  ;;  %v2544_v8 = vsel %vm8884_vm7, %v12912_v43, %v2541_v20  ;;  %v3234_v47 = vsel %vm3224_vm5, %v3231_v60, %v3233_v26 }
 0x196   :  { %v3237_v19 = vsel %vm3225_vm14, %v3219_v42, %v3236_v37  ;;  %v2545_v6 = vsel %vm8884_vm7, 0, %v8870_v17  ;;  %v8934_v21 = vmul.u32.u64.low %v3239_v29, %v3234_v47  ;;  %v8935_v3 = vmul.u32.u64.high %v3239_v29, %v3234_v47, %v8934_v21  ;;  %v12918_v47 = vld [vmem:[#allocation15_spill] sm:$0xff] }
 0x197   :  { %v3238_v45 = vsel %vm3224_vm5, %v3235_v30, %v3237_v19  ;;  %v2738_v31 = vor.u32 %v2737_v24, %v2736_v59  ;;  %v2742_v34 = vor.u32 4788187, %v2741_v44  ;;  %v3230_v51 = vsel %vm3224_vm5, %v3227_v4, %v3229_v13 }
 0x198   :  { %v6519_v39 = vadd.s32 4294967169, %v3402_v5  ;;  %6743 = vcosq.f32 %v2544_v8  ;;  %v3045_v20 = vadd.s32 536870912, %v8915_v57  ;;  %v2188_v17 = vmul.f32 %v8865_v27, %v8342_v9 }
 0x199   :  { %v8940_v49 = vmul.u32.u64.low %v3239_v29, %v3238_v45  ;;  %v8941_v56 = vmul.u32.u64.high %v3239_v29, %v3238_v45, %v8940_v49  ;;  %v8947_v23 = vmul.f32 %v8862_v54, %v8342_v9  ;;  %v8951_v24 = vmul.f32 %v8865_v27, %v8339_v63 }
 0x19a   :  { %v3408_v44 = vadd.s32 1, %v6519_v39  ;;  %v8955_v59 = vmul.f32 %v8862_v54, %v8617_v18  ;;  %6745 = vsinq.f32 %v2544_v8  ;;  %v3246_v0 = vmul.u32 %v3239_v29, %v3230_v51 }
 0x19b   :  { %v3249_v42 = vadd.s32 1, %v8935_v3  ;;  %v2652_v46 = vadd.s32 3, %v2545_v6  ;;  %v2743_v50 = vand.u32 2147483647, %v2742_v34  ;;  %v2745_v1 = vcvt.s32.f32 %v2738_v31 }
 0x19c   :  { %vm3409_vm0 = vcmp.gt.s32.totalorder %v3408_v44, 0  ;;  %v8958_v53 = vshrl.u32 %v3045_v20, 30  ;;  %vm3248_vm3 = vc.u32 %v8941_v56, %v8934_v21  ;;  %v12658_v63 = vand.u32 2147483647, %v8896_v11 }
 0x19d   :  { %v3410_v9 = vsel %vm3409_vm0, %v3408_v44, 0  ;;  %v8965_v60 = vmul.f32 %v8865_v27, %v8652_v14  ;;  %v8969_v29 = vmul.f32 %v8862_v54, %v8652_v14  ;;  %v8973_v4 = vmul.f32 %v8865_v27, %v8617_v18 }
 0x19e   :  { %vm2344_vm6 = vcmp.eq.s32.totalorder %v8823_v33, 0  ;;  %vm2347_vm8 = vcmp.eq.s32.totalorder %v8823_v33, 2  ;;  %v3250_v41 = vsel %vm3248_vm3, %v3249_v42, %v8935_v3  ;;  %v8978_v30 = vadd.f32 %v2188_v17, %v2187_v25 }
 0x19f   :  { %v8982_v13 = vmul.f32 %v8862_v54, %v8364_v28  ;;  %v3251_v26 = vadd.s32 %v3250_v41, %v3246_v0  ;;  %v3412_v37 = vand.u32 31, %v3410_v9  ;;  %v8986_v14 = vmul.f32 %v8865_v27, %v8366_v52 }
 0x1a0   :  { %v8988_v18 = vand.u32 3, %v2545_v6  ;;  %v8990_v5 = vand.u32 3, %v2652_v46  ;;  %v2746_v8 = vmul.f32 %v2745_v1, %v2743_v50  ;;  %vm2665_vm11 = vcmp.lt.s32.totalorder %v12918_v47, 0 }
 0x1a1   :  { %v3047_v25 = vshll.u32 %v8958_v53, 30  ;;  %v3252_v19 = vadd.s32 536870912, %v3251_v26  ;;  %v3405_v45 = vand.u32 8388607, %v12658_v63  ;;  %v3413_v3 = vsub.s32 32, %v3412_v37 }
 0x1a2   :  { %v8996_v31 = vshrl.u32 %v3410_v9, 5  ;;  %v3415_v34 = vshll.u32 %v12851_v12, %v3412_v37  ;;  %v3418_v51 = vshll.u32 %v12871_v2, %v3412_v37  ;;  %v3424_v6 = vshll.u32 %v12868_v32, %v3412_v37 }
 0x1a3   :  { %v9001_v39 = vshrl.u32 %v3252_v19, 30  ;;  %v3416_v20 = vshrl.u32 %v12871_v2, %v3413_v3  ;;  %v3419_v49 = vshrl.u32 %v12872_v22, %v3413_v3  ;;  %v3421_v17 = vshll.u32 %v12872_v22, %v3412_v37 }
 0x1a4   :  { %vm2551_vm9 = vcmp.eq.s32.totalorder %v8988_v18, 0  ;;  %v12920_v44 = vand.u32 2147483647, %v12918_v47  ;;  %v3422_v42 = vshrl.u32 %v12868_v32, %v3413_v3  ;;  %v3425_v46 = vshrl.u32 %v12869_v48, %v3413_v3 }
 0x1a5   :  { %12919 = vst [vmem:[#allocation10_spill] sm:$0xff] %v9001_v39  ;;  %v3427_v50 = vshll.u32 %v12869_v48, %v3412_v37  ;;  %v3428_v1 = vshrl.u32 %v12870_v62, %v3413_v3  ;;  %v12664_v9 = vxor.u32 2147483648, %v8919_v55  ;;  %vm2554_vm13 = vcmp.eq.s32.totalorder %v8988_v18, 2  ;;  %v6744_v19 = vpop.eup %6743 }
 0x1a6   :  { %vm9009_vm12 = vcmp.le.f32.partialorder %v12920_v44, 0.7853982  ;;  %vm2655_vm10 = vcmp.eq.s32.totalorder %v8990_v5, 0  ;;  %v3254_v44 = vshll.u32 %v9001_v39, 30  ;;  %v3417_v63 = vor.u32 %v3416_v20, %v3415_v34 }
 0x1a7   :  { %v3420_v11 = vor.u32 %v3419_v49, %v3418_v51  ;;  %v3426_v22 = vor.u32 %v3425_v46, %v3424_v6  ;;  %v3406_v2 = vor.u32 8388608, %v3405_v45  ;;  %v3423_v32 = vor.u32 %v3422_v42, %v3421_v17  ;;  %v6746_v37 = vpop.eup %6745 }
 0x1a8   :  { %vm3430_vm15 = vcmp.lt.s32.totalorder %v8996_v31, 1  ;;  %vm3433_vm7 = vcmp.lt.s32.totalorder %v8996_v31, 4  ;;  %vm2343_vm4 = vcmp.lt.s32.totalorder %v8823_v33, 2  ;;  %vm2550_vm1 = vcmp.lt.s32.totalorder %v8988_v18, 2 }
 0x1a9   :  { %vm2658_vm2 = vcmp.eq.s32.totalorder %v8990_v5, 2  ;;  %v2747_v41 = vxor.u32 2147483648, %v2746_v8  ;;  %v9029_v34 = vsub.s32 %v8915_v57, %v3047_v25  ;;  %v3429_v51 = vor.u32 %v3428_v1, %v3427_v50 }
 0x1aa   :  { %v2346_v45 = vsel %vm2344_vm6, %v8912_v38, %v12664_v9  ;;  %v12923_v6 = vxor.u32 2147483648, %v8912_v38  ;;  %v2555_v49 = vxor.u32 2147483648, %v6744_v19  ;;  %vm3432_vm5 = vcmp.lt.s32.totalorder %v8996_v31, 3 }
 0x1ab   :  { %vm2448_vm0 = vcmp.eq.s32.totalorder %v8825_v35, 0  ;;  %vm2451_vm3 = vcmp.eq.s32.totalorder %v8825_v35, 2  ;;  %v9044_v57 = vsub.s32 %v3251_v26, %v3254_v44  ;;  %vm3431_vm14 = vcmp.lt.s32.totalorder %v8996_v31, 2 }
 0x1ac   :  { %v2349_v20 = vsel %vm2347_vm8, %v12923_v6, %v8919_v55  ;;  %v3438_v25 = vsel %vm3430_vm15, %v3417_v63, %v3420_v11  ;;  %v3439_v17 = vsel %vm3433_vm7, %v3426_v22, 920167782  ;;  %vm2341_vm6 = vweird.f32 %v12900_v61 }
 0x1ad   :  { %v2552_v42 = vxor.u32 2147483648, %v6746_v37  ;;  %v2749_v46 = vsub.s32 4, %v8682_v58  ;;  %v3442_v50 = vsel %vm3430_vm15, %v3420_v11, %v3423_v32  ;;  %v9056_v26 = vshll.u32 %v3406_v2, 8 }
 0x1ae   :  { %v2748_v1 = vsel %vm2665_vm11, %v2747_v41, %v2746_v8  ;;  %v3050_v44 = vsub.s32 0, %v9029_v34  ;;  %v3440_v6 = vsel %vm3432_vm5, %v3423_v32, %v3439_v17  ;;  %v3443_v9 = vsel %vm3433_vm7, %v3429_v51, 1326507024 }
 0x1af   :  { %v2556_v62 = vsel %vm2554_vm13, %v2555_v49, %v6746_v37  ;;  %v3414_v48 = vshrl.u32 %v12851_v12, %v3413_v3  ;;  %v3441_v2 = vsel %vm3431_vm14, %v3438_v25, %v3440_v6  ;;  %v3444_v39 = vsel %vm3432_vm5, %v3426_v22, %v3443_v9 }
 0x1b0   :  { %vm2447_vm8 = vcmp.lt.s32.totalorder %v8825_v35, 2  ;;  %v2660_v8 = vsel %vm2658_vm2, %v2555_v49, %v6746_v37  ;;  %v3257_v41 = vsub.s32 0, %v9044_v57  ;;  %v3435_v51 = vsel %vm3433_vm7, %v3423_v32, 2102212464 }
 0x1b1   :  { %v3445_v17 = vsel %vm3431_vm14, %v3442_v50, %v3444_v39  ;;  %v2553_v3 = vsel %vm2551_vm9, %v6744_v19, %v2552_v42  ;;  %v2751_v22 = vsel %vm9009_vm12, %v12918_v47, %v2748_v1  ;;  %v2657_v37 = vsel %vm2655_vm10, %v6744_v19, %v2552_v42 }
 0x1b2   :  { %v9086_v9 = vmul.u32.u64.low %v9056_v26, %v3445_v17  ;;  %v9087_v25 = vmul.u32.u64.high %v9056_v26, %v3445_v17, %v9086_v9  ;;  %v6504_v49 = vmin.u32 %v3050_v44, %v9029_v34  ;;  %v2214_v39 = vmul.f32 %v8862_v54, %v8366_v52 }
 0x1b3   :  { %v9093_v32 = vmul.u32.u64.low %v9056_v26, %v3441_v2  ;;  %v9094_v6 = vmul.u32.u64.high %v9056_v26, %v3441_v2, %v9093_v32  ;;  %v2750_v50 = vsel %vm2665_vm11, %v2749_v46, %v8682_v58  ;;  %v3434_v1 = vsel %vm3430_vm15, %v3414_v48, %v3417_v63 }
 0x1b4   :  { %v3436_v19 = vsel %vm3432_vm5, %v3420_v11, %v3435_v51  ;;  %v2215_v42 = vmul.f32 %v8865_v27, %v8364_v28  ;;  %v2223_v44 = vmul.f32 %v8862_v54, %v8654_v36  ;;  %6747 = vcosq.f32 %v2751_v22 }
 0x1b5   :  { %v6512_v2 = vmin.u32 %v3257_v41, %v9044_v57  ;;  %v2350_v52 = vsel %vm2343_vm4, %v2346_v45, %v2349_v20  ;;  %v2557_v58 = vsel %vm2550_vm1, %v2553_v3, %v2556_v62  ;;  %vm12924_vm11 = vcmp.lt.s32.totalorder %v8990_v5, 2 }
 0x1b6   :  { %v2661_v48 = vsel %vm12924_vm11, %v2657_v37, %v2660_v8  ;;  %6749 = vsinq.f32 %v2751_v22  ;;  %v2752_v11 = vsel %vm9009_vm12, 0, %v2750_v50  ;;  %v3052_v28 = vclz %v6504_v49 }
 0x1b7   :  { %v3437_v63 = vsel %vm3431_vm14, %v3434_v1, %v3436_v19  ;;  %v3456_v46 = vadd.s32 1, %v9094_v6  ;;  %v2224_v33 = vmul.f32 %v8865_v27, %v8657_v15  ;;  %v12925_v62 = vxor.u32 2147483648, %v8919_v55 }
 0x1b8   :  { %v12926_v5 = vxor.u32 2147483648, %v8912_v38  ;;  %vm3455_vm9 = vc.u32 %v9087_v25, %v9093_v32  ;;  %v2351_v0 = vsel %vm2341_vm6, nan, %v2350_v52  ;;  %vm12927_vm12 = vweird.f32 %v12912_v43 }
 0x1b9   :  { %v2450_v18 = vsel %vm2448_vm0, %v8912_v38, %v12925_v62  ;;  %v2558_v45 = vsel %vm12927_vm12, nan, %v2557_v58  ;;  %vm12928_vm13 = vmmov %vm12927_vm12  ;;  %v3259_v8 = vclz %v6512_v2  ;;  %v2226_v41 = vmul.f32 %v8862_v54, %v8657_v15  ;;  %v12930_v58 = vld [vmem:[#allocation13_spill] sm:$0xff] }
 0x1ba   :  { %v2453_v31 = vsel %vm2451_vm3, %v12926_v5, %v8919_v55  ;;  %v2662_v20 = vsel %vm12928_vm13, nan, %v2661_v48  ;;  %v2227_v38 = vmul.f32 %v8865_v27, %v8654_v36  ;;  %v2859_v55 = vadd.s32 3, %v2752_v11 }
 0x1bb   :  { %v3453_v51 = vmul.u32 %v9056_v26, %v3437_v63  ;;  %v9153_v17 = vsub.f32 %v8947_v23, %v8951_v24  ;;  %v9155_v3 = vand.u32 3, %v2752_v11  ;;  %v6505_v22 = vadd.s32 4294967294, %v3052_v28  ;;  %v12931_v11 = vld [vmem:[#allocation17_spill] sm:$0xff] }
 0x1bc   :  { %v3457_v43 = vsel %vm3455_vm9, %v3456_v46, %v9094_v6  ;;  %v9161_v9 = vadd.f32 %v8965_v60, %v8955_v59  ;;  %v2454_v36 = vsel %vm2447_vm8, %v2450_v18, %v2453_v31  ;;  %v9165_v15 = vmul.f32 %v2558_v45, %v2351_v0  ;;  %v6802_v63 = vld [vmem:[%s12606_s2 + $0x20] sm:$0xff] }
 0x1bd   :  { %v9167_v54 = vmul.f32 %v2662_v20, %v2351_v0  ;;  %v9171_v27 = vsub.f32 %v8969_v29, %v8973_v4  ;;  %v9175_v23 = vadd.f32 %v8986_v14, %v8982_v13  ;;  %v9177_v24 = vsub.f32 %v2214_v39, %v2215_v42  ;;  %v12929_v4 = vld [vmem:[#allocation14_spill] sm:$0xff] }
 0x1be   :  { %v6513_v59 = vadd.s32 4294967294, %v3259_v8  ;;  %v9179_v60 = vadd.f32 %v2224_v33, %v2223_v44  ;;  %v9181_v35 = vsub.f32 %v2226_v41, %v2227_v38  ;;  %v9183_v26 = vand.u32 3, %v2859_v55 }
 0x1bf   :  { %v9185_v37 = vadd.s32 %v3457_v43, %v3453_v51  ;;  %v9189_v49 = vsel %vm2341_vm6, nan, %v2454_v36  ;;  %vm2758_vm10 = vcmp.eq.s32.totalorder %v9155_v3, 0  ;;  %vm2761_vm15 = vcmp.eq.s32.totalorder %v9155_v3, 2 }
 0x1c0   :  { %vm6506_vm7 = vcmp.lt.s32.totalorder %v6505_v22, 0  ;;  %v2874_v29 = vmul.f32 %v9165_v15, %v8698_v40  ;;  %v2875_v13 = vmul.f32 %v9167_v54, %v12929_v4  ;;  %v2877_v14 = vmul.f32 %v9165_v15, %v12929_v4 }
 0x1c1   :  { %v3837_v6 = vstv %s186_s8  ;;  %v2878_v61 = vmul.f32 %v9167_v54, %v8698_v40  ;;  %v2886_v39 = vmul.f32 %v9165_v15, %v8978_v30  ;;  %v2887_v50 = vmul.f32 %v9167_v54, %v9153_v17  ;;  %v6748_v1 = vpop.eup %6747  ;;  %s201_s8 = smul.f32 0.5, %s10334_s5 }
 0x1c2   :  { %vm6514_vm4 = vcmp.lt.s32.totalorder %v6513_v59, 0  ;;  %vm2862_vm1 = vcmp.eq.s32.totalorder %v9183_v26, 0  ;;  %v2889_v19 = vmul.f32 %v9165_v15, %v9153_v17  ;;  %v2890_v42 = vmul.f32 %v9167_v54, %v8978_v30 }
 0x1c3   :  { %v9211_v44 = vsel %vm6506_vm7, 0, %v6505_v22  ;;  %v3459_v2 = vadd.s32 536870912, %v9185_v37  ;;  %v6750_v52 = vpop.eup %6749  ;;  %vm2757_vm14 = vcmp.lt.s32.totalorder %v9155_v3, 2  ;;  %vm2865_vm2 = vcmp.eq.s32.totalorder %v9183_v26, 2 }
 0x1c4   :  { %v2898_v48 = vmul.f32 %v9165_v15, %v12930_v58  ;;  %v2899_v28 = vmul.f32 %v9167_v54, %v12931_v11  ;;  %v3838_v46 = vmul.f32 %v6802_v63, %v3837_v6  ;;  %v2901_v33 = vmul.f32 %v9165_v15, %v12931_v11  ;;  %v12937_v6 = vld [vmem:[#allocation16_spill] sm:$0xff] }
 0x1c5   :  { %v2902_v62 = vmul.f32 %v9167_v54, %v12930_v58  ;;  %v9228_v18 = vsel %vm6514_vm4, 0, %v6513_v59  ;;  %v3839_v5 = vstv %s188_s9  ;;  %vm2861_vm5 = vcmp.lt.s32.totalorder %v9183_v26, 2  ;;  %s203_s9 = sadd.f32 %s10351_s7, %s10349_s6 }
 0x1c6   :  { %v9231_v31 = vadd.f32 %v2875_v13, %v2874_v29  ;;  %v9233_v0 = vsub.f32 %v2877_v14, %v2878_v61  ;;  %v9235_v45 = vadd.f32 %v2887_v50, %v2886_v39  ;;  %v3060_v20 = vsub.s32 4294967266, %v9211_v44 }
 0x1c7   :  { %v2759_v8 = vxor.u32 2147483648, %v6750_v52  ;;  %v2762_v41 = vxor.u32 2147483648, %v6748_v1  ;;  %v9238_v38 = vsub.f32 %v2889_v19, %v2890_v42  ;;  %v9240_v55 = vshrl.u32 %v3459_v2, 30  ;;  %s10440_s14 = smul.f32 0.5, %s203_s9 }
 0x1c8   :  { %12932 = vst [vmem:[#allocation15_spill] sm:$0xff] %v9235_v45  ;;  %vm2755_vm0 = vweird.f32 %v12918_v47  ;;  %v9243_v51 = vadd.f32 %v2899_v28, %v2898_v48  ;;  %v2910_v22 = vmul.f32 %v9165_v15, %v9161_v9  ;;  %v3267_v43 = vsub.s32 4294967266, %v9228_v18  ;;  %v12938_v48 = vld [vmem:[#allocation12_spill] sm:$0xff] }
 0x1c9   :  { %12933 = vst [vmem:[#allocation14_spill] sm:$0xff] %v9238_v38  ;;  %v9248_v36 = vadd.f32 %v3839_v5, %v3838_v46  ;;  %v9250_v59 = vsub.f32 %v2901_v33, %v2902_v62  ;;  %v2911_v29 = vmul.f32 %v9167_v54, %v9171_v27  ;;  %v2913_v13 = vmul.f32 %v9165_v15, %v9171_v27 }
 0x1ca   :  { %12934 = vst [vmem:[#allocation13_spill] sm:$0xff] %v9243_v51  ;;  %v2914_v14 = vmul.f32 %v9167_v54, %v9161_v9  ;;  %v2922_v61 = vmul.f32 %v9165_v15, %v12937_v6  ;;  %v3040_v39 = vadd.s32 %v8846_v7, %v8852_v10  ;;  %v3056_v50 = vsub.s32 32, %v9211_v44 }
 0x1cb   :  { %12935 = vst [vmem:[#allocation17_spill] sm:$0xff] %v9248_v36  ;;  %12936 = vst [vmem:[#allocation20_spill] sm:$0xff] %v9250_v59  ;;  %v3061_v19 = vadd.s32 127, %v3060_v20  ;;  %v2760_v42 = vsel %vm2758_vm10, %v6748_v1, %v2759_v8  ;;  %v2763_v2 = vsel %vm2761_vm15, %v2762_v41, %v6750_v52  ;;  %v2923_v28 = vmul.f32 %v9167_v54, %v12938_v48 }
 0x1cc   :  { %v3461_v63 = vshll.u32 %v9240_v55, 30  ;;  %v3247_v46 = vadd.s32 %v8934_v21, %v8941_v56  ;;  %v3263_v33 = vsub.s32 32, %v9228_v18  ;;  %v3268_v7 = vadd.s32 127, %v3267_v43 }
 0x1cd   :  { %v3850_v10 = vand.u32 2139095040, %v9248_v36  ;;  %v2867_v62 = vsel %vm2865_vm2, %v2762_v41, %v6750_v52  ;;  %v9276_v5 = vadd.f32 %v2911_v29, %v2910_v22  ;;  %v2925_v20 = vmul.f32 %v9165_v15, %v12938_v48 }
 0x1ce   :  { %v2926_v59 = vmul.f32 %v9167_v54, %v12937_v6  ;;  %v2864_v51 = vsel %vm2862_vm1, %v6748_v1, %v2759_v8  ;;  %v3057_v21 = vshll.u32 %v9029_v34, %v9211_v44  ;;  %v3058_v56 = vshrl.u32 %v3040_v39, %v3056_v50 }
 0x1cf   :  { %12939 = vst [vmem:[#allocation16_spill] sm:$0xff] %v9276_v5  ;;  %v3062_v43 = vshll.u32 %v3061_v19, 23  ;;  %v2764_v38 = vsel %vm2757_vm14, %v2760_v42, %v2763_v2  ;;  %v9288_v52 = vsub.f32 %v2913_v13, %v2914_v14  ;;  %v2934_v41 = vmul.f32 %v9165_v15, %v9175_v23 }
 0x1d0   :  { %v9293_v22 = vsub.s32 %v9185_v37, %v3461_v63  ;;  %v3264_v29 = vshll.u32 %v9044_v57, %v9228_v18  ;;  %v3265_v1 = vshrl.u32 %v3247_v46, %v3263_v33  ;;  %v3269_v8 = vshll.u32 %v3268_v7, 23  ;;  %v12942_v57 = vld [vmem:[#allocation18_spill] sm:$0xff] }
 0x1d1   :  { %12940 = vst [vmem:[#allocation12_spill] sm:$0xff] %v9288_v52  ;;  %v3851_v5 = vshrl.u32 %v3850_v10, 23  ;;  %v2868_v34 = vsel %vm2861_vm5, %v2864_v51, %v2867_v62  ;;  %v9299_v44 = vadd.f32 %v2923_v28, %v2922_v61  ;;  %v2935_v3 = vmul.f32 %v9167_v54, %v9177_v24  ;;  %v12943_v51 = vld [vmem:[#allocation19_spill] sm:$0xff] }
 0x1d2   :  { %v2937_v13 = vmul.f32 %v9165_v15, %v9177_v24  ;;  %vm2986_vm3 = vcmp.lt.s32.totalorder %v8529_v16, 0  ;;  %v2938_v37 = vmul.f32 %v9167_v54, %v9175_v23  ;;  %v2946_v18 = vmul.f32 %v9165_v15, %v12942_v57 }
 0x1d3   :  { %12941 = vst [vmem:[#allocation21_spill] sm:$0xff] %v9299_v44  ;;  %v3059_v14 = vor.u32 %v3058_v56, %v3057_v21  ;;  %v3063_v39 = vor.u32 4788187, %v3062_v43  ;;  %v2765_v26 = vsel %vm2755_vm0, nan, %v2764_v38  ;;  %v2947_v61 = vmul.f32 %v9167_v54, %v12943_v51 }
 0x1d4   :  { %v2949_v50 = vmul.f32 %v9165_v15, %v12943_v51  ;;  %v3464_v19 = vsub.s32 0, %v9293_v22  ;;  %v2869_v42 = vsel %vm2755_vm0, nan, %v2868_v34  ;;  %v3266_v2 = vor.u32 %v3265_v1, %v3264_v29 }
 0x1d5   :  { %v3270_v28 = vor.u32 4788187, %v3269_v8  ;;  %v6527_v63 = vadd.s32 4294967169, %v3851_v5  ;;  %v2950_v46 = vmul.f32 %v9167_v54, %v12942_v57  ;;  %v2958_v38 = vmul.f32 %v9165_v15, %v9179_v60 }
 0x1d6   :  { %v2959_v33 = vmul.f32 %v9167_v54, %v9181_v35  ;;  %v2961_v7 = vmul.f32 %v9165_v15, %v9181_v35  ;;  %v2962_v10 = vmul.f32 %v9167_v54, %v9179_v60  ;;  %v3064_v47 = vand.u32 2147483647, %v3063_v39 }
 0x1d7   :  { %v3066_v62 = vcvt.s32.f32 %v3059_v14  ;;  %v3070_v21 = vsub.s32 4, %v8958_v53  ;;  %v9331_v5 = vmul.f32 %v2765_v26, %v9189_v49  ;;  %v9334_v56 = vmul.f32 %v2869_v42, %v9189_v49 }
 0x1d8   :  { %v9336_v43 = vsub.f32 %v2925_v20, %v2926_v59  ;;  %v6520_v29 = vmin.u32 %v3464_v19, %v9293_v22  ;;  %v9341_v15 = vadd.f32 %v2935_v3, %v2934_v41  ;;  %v3271_v1 = vand.u32 2147483647, %v3270_v28  ;;  %v12948_v59 = vld [vmem:[#allocation11_spill] sm:$0xff] }
 0x1d9   :  { %v3273_v54 = vcvt.s32.f32 %v3266_v2  ;;  %v3857_v8 = vadd.s32 1, %v6527_v63  ;;  %v9345_v34 = vsub.f32 %v2937_v13, %v2938_v37  ;;  %v9347_v14 = vadd.f32 %v2947_v61, %v2946_v18 }
 0x1da   :  { %12944 = vst [vmem:[#allocation18_spill] sm:$0xff] %v9336_v43  ;;  %12945 = vst [vmem:[#allocation19_spill] sm:$0xff] %v9341_v15  ;;  %v9349_v39 = vsub.f32 %v2949_v50, %v2950_v46  ;;  %v9351_v49 = vadd.f32 %v2959_v33, %v2958_v38  ;;  %vm3193_vm6 = vcmp.lt.s32.totalorder %v12948_v59, 0  ;;  %v2880_v20 = vmul.f32 %v9331_v5, %v8698_v40 }
 0x1db   :  { %12946 = vst [vmem:[#allocation22_spill] sm:$0xff] %v9345_v34  ;;  %v9356_v41 = vsub.f32 %v2961_v7, %v2962_v10  ;;  %v12950_v3 = vand.u32 2147483647, %v8529_v16  ;;  %v3067_v13 = vmul.f32 %v3066_v62, %v3064_v47  ;;  %v9367_v37 = vsel %vm2986_vm3, %v3070_v21, %v8958_v53 }
 0x1dc   :  { %12947 = vst [vmem:[#allocation23_spill] sm:$0xff] %v9351_v49  ;;  %v2881_v18 = vmul.f32 %v9334_v56, %v12929_v4  ;;  %v2883_v61 = vmul.f32 %v9331_v5, %v12929_v4  ;;  %v2884_v50 = vmul.f32 %v9334_v56, %v8698_v40  ;;  %v3466_v19 = vclz %v6520_v29 }
 0x1dd   :  { %12949 = vst [vmem:[#allocation11_spill] sm:$0xff] %v9356_v41  ;;  %vm9360_vm8 = vcmp.le.f32.partialorder %v12950_v3, 0.7853982  ;;  %v2892_v42 = vmul.f32 %v9331_v5, %v8978_v30  ;;  %v2893_v2 = vmul.f32 %v9334_v56, %v9153_v17  ;;  %v12953_v28 = vand.u32 2147483647, %v12948_v59 }
 0x1de   :  { %v3274_v63 = vmul.f32 %v3273_v54, %v3271_v1  ;;  %vm3858_vm9 = vcmp.gt.s32.totalorder %v3857_v8, 0  ;;  %v2895_v4 = vmul.f32 %v9331_v5, %v9153_v17  ;;  %v2896_v40 = vmul.f32 %v9334_v56, %v8978_v30 }
 0x1df   :  { %vm9381_vm11 = vcmp.le.f32.partialorder %v12953_v28, 0.7853982  ;;  %v2904_v46 = vmul.f32 %v9331_v5, %v12930_v58  ;;  %v2905_v38 = vmul.f32 %v9334_v56, %v12931_v11  ;;  %v2907_v33 = vmul.f32 %v9331_v5, %v12931_v11 }
 0x1e0   :  { %v2908_v7 = vmul.f32 %v9334_v56, %v12930_v58  ;;  %v2916_v10 = vmul.f32 %v9331_v5, %v9161_v9  ;;  %v3068_v17 = vxor.u32 2147483648, %v3067_v13  ;;  %v2917_v30 = vmul.f32 %v9334_v56, %v9171_v27 }
 0x1e1   :  { %v2919_v47 = vmul.f32 %v9331_v5, %v9171_v27  ;;  %v6521_v62 = vadd.s32 4294967294, %v3466_v19  ;;  %v3859_v21 = vsel %vm3858_vm9, %v3857_v8, 0  ;;  %v2920_v58 = vmul.f32 %v9334_v56, %v9161_v9 }
 0x1e2   :  { %v2928_v11 = vmul.f32 %v9331_v5, %v12937_v6  ;;  %v2929_v29 = vmul.f32 %v9334_v56, %v12938_v48  ;;  %v3275_v1 = vxor.u32 2147483648, %v3274_v63  ;;  %v9415_v54 = vadd.f32 %v2881_v18, %v2880_v20 }
 0x1e3   :  { %v9417_v3 = vsub.f32 %v2883_v61, %v2884_v50  ;;  %v9419_v27 = vadd.f32 %v2893_v2, %v2892_v42  ;;  %v9421_v8 = vsub.f32 %v2895_v4, %v2896_v40  ;;  %v9423_v19 = vadd.f32 %v2905_v38, %v2904_v46  ;;  %v12963_v2 = vld [vmem:[#allocation10_spill] sm:$0xff] }
 0x1e4   :  { %v9425_v28 = vsub.f32 %v2907_v33, %v2908_v7  ;;  %v3069_v9 = vsel %vm2986_vm3, %v3068_v17, %v3067_v13  ;;  %v3861_v43 = vand.u32 31, %v3859_v21  ;;  %v9429_v44 = vadd.f32 %v2917_v30, %v2916_v10 }
 0x1e5   :  { %12956 = vst [vmem:[#allocation24_spill] sm:$0xff] %v9419_v27  ;;  %12957 = vst [vmem:[#allocation25_spill] sm:$0xff] %v9421_v8  ;;  %v2931_v20 = vmul.f32 %v9331_v5, %v12938_v48  ;;  %v2932_v18 = vmul.f32 %v9334_v56, %v12937_v6  ;;  %vm6522_vm12 = vcmp.lt.s32.totalorder %v6521_v62, 0  ;;  %v9435_v61 = vsub.f32 %v2919_v47, %v2920_v58  ;;  %v6803_v47 = vld [vmem:[%s12606_s2 + $0x18] sm:$0xff] }
 0x1e6   :  { %12958 = vst [vmem:[#allocation26_spill] sm:$0xff] %v9423_v19  ;;  %12959 = vst [vmem:[#allocation27_spill] sm:$0xff] %v9425_v28  ;;  %v9437_v50 = vadd.f32 %v2929_v29, %v2928_v11  ;;  %v9441_v42 = vmul.f32 %v9331_v5, %v9175_v23  ;;  %v3276_v13 = vsel %vm3193_vm6, %v3275_v1, %v3274_v63  ;;  %v3277_v6 = vsub.s32 4, %v12963_v2 }
 0x1e7   :  { %12960 = vst [vmem:[#allocation28_spill] sm:$0xff] %v9429_v44  ;;  %12961 = vst [vmem:[#allocation29_spill] sm:$0xff] %v9435_v61  ;;  %v3072_v48 = vsel %vm9360_vm8, %v8529_v16, %v3069_v9  ;;  %v3833_v4 = vstv %s185_s16  ;;  %v3835_v40 = vstv %s187_s17  ;;  %v9451_v46 = vmul.f32 %v9334_v56, %v9177_v24  ;;  %s10541_s16 = smul.f32 0.5, %s205_s15  ;;  %s11155_s17 = sld [smem:[#allocation2 + $0x16]] }
 0x1e8   :  { %12962 = vst [vmem:[#allocation30_spill] sm:$0xff] %v9437_v50  ;;  %v9455_v38 = vmul.f32 %v9331_v5, %v9177_v24  ;;  %v9457_v33 = vsel %vm6522_vm12, 0, %v6521_v62  ;;  %v9459_v7 = vsub.s32 32, %v3861_v43  ;;  %v9461_v63 = vsub.f32 %v2931_v20, %v2932_v18  ;;  %v6804_v62 = vld [vmem:[%s12606_s2 + $0x28] sm:$0xff] }
 0x1e9   :  { %v9465_v10 = vmul.f32 %v9334_v56, %v9175_v23  ;;  %v9469_v17 = vmul.f32 %v9331_v5, %v12942_v57  ;;  %v3279_v30 = vsel %vm9381_vm11, %v12948_v59, %v3276_v13  ;;  %v9478_v24 = vmul.f32 %v9334_v56, %v12943_v51 }
 0x1ea   :  { %12964 = vst [vmem:[#allocation10_spill] sm:$0xff] %v9461_v63  ;;  %6751 = vcosq.f32 %v3072_v48  ;;  %v9483_v23 = vmul.f32 %v6803_v47, %v3833_v4  ;;  %v9488_v58 = vmul.f32 %v6804_v62, %v3835_v40  ;;  %v3278_v11 = vsel %vm3193_vm6, %v3277_v6, %v12963_v2 }
 0x1eb   :  { %6753 = vsinq.f32 %v3072_v48  ;;  %v3474_v29 = vsub.s32 4294967266, %v9457_v33  ;;  %v3454_v9 = vadd.s32 %v9093_v32, %v9087_v25  ;;  %v12965_v20 = vmov 2102212464  }
 0x1ec   :  { %6755 = vcosq.f32 %v3279_v30  ;;  %v3873_v18 = vshll.u32 %v12965_v20, %v3861_v43  ;;  %v12966_v13 = vmov 920167782   ;;  %v9500_v40 = vshrl.u32 %v3859_v21, 5 }
 0x1ed   :  { %v3874_v4 = vshrl.u32 %v12966_v13, %v9459_v7  ;;  %6757 = vsinq.f32 %v3279_v30  ;;  %v3876_v48 = vshll.u32 %v12966_v13, %v3861_v43  ;;  %v12967_v2 = vmov 1326507024   ;;  %s214_s19 = smul.f32 0.5, %s11155_s17 }
 0x1ee   :  { %v3877_v6 = vshrl.u32 %v12967_v2, %v9459_v7  ;;  %v3864_v47 = vshll.u32 %v12851_v12, %v3861_v43  ;;  %v12968_v62 = vmov 2475754826   ;;  %v12969_v1 = vmov 2131351028  }
 0x1ef   :  { %v3865_v25 = vshrl.u32 %v12968_v62, %v9459_v7  ;;  %v3867_v32 = vshll.u32 %v12968_v62, %v3861_v43  ;;  %v3868_v30 = vshrl.u32 %v12969_v1, %v9459_v7  ;;  %v3470_v21 = vsub.s32 32, %v9457_v33 }
 0x1f0   :  { %v3475_v63 = vadd.s32 127, %v3474_v29  ;;  %v3870_v50 = vshll.u32 %v12969_v1, %v3861_v43  ;;  %v3871_v2 = vshrl.u32 %v12965_v20, %v9459_v7  ;;  %v9519_v13 = vmul.f32 %v9331_v5, %v12943_v51 }
 0x1f1   :  { %v9523_v28 = vmul.f32 %v9334_v56, %v12942_v57  ;;  %v3073_v19 = vsel %vm9360_vm8, 0, %v9367_v37  ;;  %v3875_v61 = vor.u32 %v3874_v4, %v3873_v18  ;;  %v3280_v29 = vsel %vm9381_vm11, 0, %v3278_v11 }
 0x1f2   :  { %v12970_v43 = vand.u32 2147483647, %v9248_v36  ;;  %v3878_v20 = vor.u32 %v3877_v6, %v3876_v48  ;;  %vm3882_vm13 = vcmp.lt.s32.totalorder %v9500_v40, 4  ;;  %v3841_v51 = vadd.f32 %v9488_v58, %v9483_v23 }
 0x1f3   :  { %v3842_v62 = vstv %s9505_s21  ;;  %v9536_v57 = vor.u32 %v3865_v25, %v3864_v47  ;;  %v9538_v44 = vor.u32 %v3868_v30, %v3867_v32  ;;  %v3471_v26 = vshll.u32 %v9293_v22, %v9457_v33  ;;  %s11321_s21 = sld [smem:[#allocation2 + $0x15]] }
 0x1f4   :  { %v3854_v1 = vand.u32 8388607, %v12970_v43  ;;  %v3472_v37 = vshrl.u32 %v3454_v9, %v3470_v21  ;;  %v3476_v53 = vshll.u32 %v3475_v63, 23  ;;  %v3872_v11 = vor.u32 %v3871_v2, %v3870_v50 }
 0x1f5   :  { %v3387_v18 = vadd.s32 3, %v3280_v29  ;;  %vm3879_vm10 = vcmp.lt.s32.totalorder %v9500_v40, 1  ;;  %vm3881_vm15 = vcmp.lt.s32.totalorder %v9500_v40, 3  ;;  %v3888_v4 = vsel %vm3882_vm13, %v3875_v61, 920167782 }
 0x1f6   :  { %v9548_v48 = vmul.f32 %v9331_v5, %v9179_v60  ;;  %v9550_v6 = vand.u32 3, %v3073_v19  ;;  %v3855_v47 = vor.u32 8388608, %v3854_v1  ;;  %v3892_v22 = vsel %vm3882_vm13, %v3878_v20, 1326507024 }
 0x1f7   :  { %v3180_v33 = vadd.s32 3, %v3073_v19  ;;  %v9554_v50 = vand.u32 3, %v3280_v29  ;;  %v9556_v63 = vadd.f32 %v3842_v62, %v3841_v51  ;;  %vm3880_vm7 = vcmp.lt.s32.totalorder %v9500_v40, 2  ;;  %v9559_v9 = vpop.eup %6751 }
 0x1f8   :  { %v3473_v2 = vor.u32 %v3472_v37, %v3471_v26  ;;  %v3477_v25 = vor.u32 4788187, %v3476_v53  ;;  %v3887_v32 = vsel %vm3879_vm10, %v9536_v57, %v9538_v44  ;;  %v3889_v1 = vsel %vm3881_vm15, %v3872_v11, %v3888_v4  ;;  %v9567_v20 = vpop.eup %6753  ;;  %v12972_v53 = vld [vmem:[#allocation9_spill] sm:$0xff] }
 0x1f9   :  { %12971 = vst [vmem:[#allocation31_spill] sm:$0xff] %v9556_v63  ;;  %v9571_v19 = vmul.f32 %v9334_v56, %v9181_v35  ;;  %v3388_v62 = vand.u32 3, %v3387_v18  ;;  %v3891_v30 = vsel %vm3879_vm10, %v9538_v44, %v3872_v11  ;;  %v3893_v21 = vsel %vm3881_vm15, %v3875_v61, %v3892_v22  ;;  %v6756_v29 = vpop.eup %6755 }
 0x1fa   :  { %v9580_v43 = vmul.f32 %v9331_v5, %v9181_v35  ;;  %vm3079_vm4 = vcmp.eq.s32.totalorder %v9550_v6, 0  ;;  %vm3082_vm1 = vcmp.eq.s32.totalorder %v9550_v6, 2  ;;  %v9584_v51 = vshll.u32 %v3855_v47, 8  ;;  %v6758_v26 = vpop.eup %6757 }
 0x1fb   :  { %v9586_v37 = vand.u32 3, %v3180_v33  ;;  %vm3286_vm14 = vcmp.eq.s32.totalorder %v9554_v50, 0  ;;  %vm3400_vm2 = vcmp.lt.s32.totalorder %v12972_v53, 0  ;;  %v3890_v61 = vsel %vm3880_vm7, %v3887_v32, %v3889_v1 }
 0x1fc   :  { %v4057_v18 = vand.u32 2139095040, %v9556_v63  ;;  %vm3289_vm5 = vcmp.eq.s32.totalorder %v9554_v50, 2  ;;  %v3478_v35 = vand.u32 2147483647, %v3477_v25  ;;  %v3480_v5 = vcvt.s32.f32 %v3473_v2 }
 0x1fd   :  { %v3894_v4 = vsel %vm3880_vm7, %v3891_v30, %v3893_v21  ;;  %vm3076_vm0 = vweird.f32 %v8529_v16  ;;  %v3080_v47 = vxor.u32 2147483648, %v9567_v20  ;;  %v3083_v22 = vxor.u32 2147483648, %v9559_v9 }
 0x1fe   :  { %vm3390_vm6 = vcmp.eq.s32.totalorder %v3388_v62, 0  ;;  %vm3393_vm8 = vcmp.eq.s32.totalorder %v3388_v62, 2  ;;  %v3287_v33 = vxor.u32 2147483648, %v6758_v26  ;;  %v3290_v32 = vxor.u32 2147483648, %v6756_v29 }
 0x1ff   :  { %v12973_v25 = vand.u32 2147483647, %v12972_v53  ;;  %v9607_v1 = vmul.u32.u64.low %v9584_v51, %v3890_v61  ;;  %v9608_v30 = vmul.u32.u64.high %v9584_v51, %v3890_v61, %v9607_v1  ;;  %v3863_v21 = vshrl.u32 %v12851_v12, %v9459_v7 }
 0x200   :  { %v9614_v36 = vmul.u32.u64.low %v9584_v51, %v3894_v4  ;;  %v9615_v34 = vmul.u32.u64.high %v9584_v51, %v3894_v4, %v9614_v36  ;;  %v4058_v15 = vshrl.u32 %v4057_v18, 23  ;;  %vm3078_vm9 = vcmp.lt.s32.totalorder %v9550_v6, 2 }
 0x201   :  { %vm9602_vm11 = vcmp.le.f32.partialorder %v12973_v25, 0.7853982  ;;  %v3481_v52 = vmul.f32 %v3480_v5, %v3478_v35  ;;  %v3484_v25 = vsub.s32 4, %v9240_v55  ;;  %v3884_v45 = vsel %vm3882_vm13, %v3872_v11, 2102212464 }
 0x202   :  { %v3081_v61 = vsel %vm3079_vm4, %v9559_v9, %v3080_v47  ;;  %v3084_v7 = vsel %vm3082_vm1, %v3083_v22, %v9567_v20  ;;  %vm3285_vm12 = vcmp.lt.s32.totalorder %v9554_v50, 2  ;;  %vm3389_vm3 = vcmp.lt.s32.totalorder %v3388_v62, 2 }
 0x203   :  { %v3288_v36 = vsel %vm3286_vm14, %v6756_v29, %v3287_v33  ;;  %v3291_v18 = vsel %vm3289_vm5, %v3290_v32, %v6758_v26  ;;  %v3392_v11 = vsel %vm3390_vm6, %v6756_v29, %v3287_v33  ;;  %v3395_v35 = vsel %vm3393_vm8, %v3290_v32, %v6758_v26 }
 0x204   :  { %vm3186_vm13 = vcmp.eq.s32.totalorder %v9586_v37, 2  ;;  %v3883_v5 = vsel %vm3879_vm10, %v3863_v21, %v9536_v57  ;;  %v3885_v4 = vsel %vm3881_vm15, %v9538_v44, %v3884_v45  ;;  %v6535_v12 = vadd.s32 4294967169, %v4058_v15 }
 0x205   :  { %vm3182_vm4 = vcmp.lt.s32.totalorder %v9586_v37, 2  ;;  %vm3183_vm1 = vcmp.eq.s32.totalorder %v9586_v37, 0  ;;  %v3482_v29 = vxor.u32 2147483648, %v3481_v52  ;;  %v3485_v26 = vsel %vm3400_vm2, %v3484_v25, %v9240_v55 }
 0x206   :  { %v3085_v57 = vsel %vm3078_vm9, %v3081_v61, %v3084_v7  ;;  %v3292_v45 = vsel %vm3285_vm12, %v3288_v36, %v3291_v18  ;;  %v3396_v44 = vsel %vm3389_vm3, %v3392_v11, %v3395_v35  ;;  %v12692_v15 = vand.u32 2147483647, %v9556_v63 }
 0x207   :  { %v3188_v33 = vsel %vm3186_vm13, %v3083_v22, %v9567_v20  ;;  %v3844_v32 = vsub.f32 %v9483_v23, %v9488_v58  ;;  %v3886_v55 = vsel %vm3880_vm7, %v3883_v5, %v3885_v4  ;;  %v3905_v21 = vadd.s32 1, %v9608_v30 }
 0x208   :  { %v3185_v6 = vsel %vm3183_vm1, %v9559_v9, %v3080_v47  ;;  %v3487_v50 = vsel %vm9602_vm11, 0, %v3485_v26  ;;  %vm3904_vm10 = vc.u32 %v9615_v34, %v9607_v1  ;;  %v4064_v62 = vadd.s32 1, %v6535_v12 }
 0x209   :  { %v3086_v20 = vsel %vm3076_vm0, nan, %v3085_v57  ;;  %vm12976_vm15 = vweird.f32 %v12948_v59  ;;  %v3483_v40 = vsel %vm3400_vm2, %v3482_v29, %v3481_v52  ;;  %v2968_v9 = vmul.f32 %v9334_v56, %v9179_v60 }
 0x20a   :  { %v3293_v23 = vsel %vm12976_vm15, nan, %v3292_v45  ;;  %vm12977_vm7 = vmmov %vm12976_vm15  ;;  %v3845_v47 = vstv %s9650_s24  ;;  %v3902_v22 = vmul.u32 %v9584_v51, %v3886_v55  ;;  %v4061_v12 = vand.u32 8388607, %v12692_v15  ;;  %s11358_s24 = sld [smem:[#allocation4 + $0x17]] }
 0x20b   :  { %v3397_v58 = vsel %vm12977_vm7, nan, %v3396_v44  ;;  %v9685_v25 = vadd.f32 %v9451_v46, %v9441_v42  ;;  %v3189_v59 = vsel %vm3182_vm4, %v3185_v6, %v3188_v33  ;;  %v3594_v61 = vadd.s32 3, %v3487_v50 }
 0x20c   :  { %v3906_v7 = vsel %vm3904_vm10, %v3905_v21, %v9608_v30  ;;  %v3486_v60 = vsel %vm9602_vm11, %v12972_v53, %v3483_v40  ;;  %v9693_v52 = vmul.f32 %v3293_v23, %v3086_v20  ;;  %v9695_v56 = vmul.f32 %v3397_v58, %v3086_v20 }
 0x20d   :  { %12978 = vst [vmem:[#allocation9_spill] sm:$0xff] %v9685_v25  ;;  %vm4065_vm14 = vcmp.gt.s32.totalorder %v4064_v62, 0  ;;  %v9700_v42 = vsub.f32 %v9455_v38, %v9465_v10  ;;  %v9704_v46 = vadd.f32 %v9478_v24, %v9469_v17  ;;  %v9708_v51 = vsub.f32 %v9519_v13, %v9523_v28 }
 0x20e   :  { %v9710_v37 = vadd.f32 %v3845_v47, %v3844_v32  ;;  %v9714_v2 = vadd.f32 %v9571_v19, %v9548_v48  ;;  %v9717_v30 = vsub.f32 %v9580_v43, %v2968_v9  ;;  %v9719_v36 = vadd.s32 %v3906_v7, %v3902_v22  ;;  %v13001_v19 = vld [vmem:[#allocation14_spill] sm:$0xff] }
 0x20f   :  { %12979 = vst [vmem:[#allocation32_spill] sm:$0xff] %v9700_v42  ;;  %v4062_v38 = vor.u32 8388608, %v4061_v12  ;;  %v9723_v10 = vsel %vm3076_vm0, nan, %v3189_v59  ;;  %6759 = vcosq.f32 %v3486_v60  ;;  %v9725_v17 = vand.u32 3, %v3487_v50 }
 0x210   :  { %12980 = vst [vmem:[#allocation33_spill] sm:$0xff] %v9710_v37  ;;  %12981 = vst [vmem:[#allocation34_spill] sm:$0xff] %v9714_v2  ;;  %v4066_v28 = vsel %vm4065_vm14, %v4064_v62, 0  ;;  %v9727_v24 = vand.u32 3, %v3594_v61  ;;  %v3609_v13 = vmul.f32 %v9693_v52, %v9231_v31  ;;  %v3610_v48 = vmul.f32 %v9695_v56, %v9233_v0  ;;  %s217_s27 = sadd.f32 %s11358_s24, %s11349_s23 }
 0x211   :  { %6761 = vsinq.f32 %v3486_v60  ;;  %v9736_v16 = vadd.s32 %v9607_v1, %v9615_v34  ;;  %v9739_v18 = vstv %s199_s25  ;;  %v9742_v11 = vadd.s32 536870912, %v9719_v36  ;;  %s213_s25 = smul.f32 0.5, %s11321_s21 }
 0x212   :  { %12983 = vst [vmem:[#allocation36_spill] sm:$0xff] %v9739_v18  ;;  %v9744_v35 = vshrl.u32 %v4066_v28, 5  ;;  %v9746_v5 = vand.u32 31, %v4066_v28  ;;  %v9748_v4 = vshll.u32 %v4062_v38, 8  ;;  %v9752_v29 = vmul.f32 %v9693_v52, %v9233_v0  ;;  %s11445_s5 = smul.f32 0.5, %s217_s27 }
 0x213   :  { %12982 = vst [vmem:[#allocation35_spill] sm:$0xff] %v9736_v16  ;;  %v9756_v34 = vmul.f32 %v9695_v56, %v9231_v31  ;;  %v3637_v1 = vmul.f32 %v9693_v52, %v9704_v46  ;;  %v3638_v26 = vmul.f32 %v9695_v56, %v9708_v51  ;;  %v9762_v57 = vadd.f32 %v3610_v48, %v3609_v13  ;;  %v12997_v48 = vld [vmem:[#allocation15_spill] sm:$0xff] }
 0x214   :  { %v9766_v45 = vmul.f32 %v9693_v52, %v9347_v14  ;;  %v9770_v44 = vmul.f32 %v9695_v56, %v9349_v39  ;;  %v9774_v33 = vmul.f32 %v9693_v52, %v9349_v39  ;;  %v9778_v32 = vmul.f32 %v9695_v56, %v9347_v14 }
 0x215   :  { %v9782_v55 = vmul.f32 %v9693_v52, %v9708_v51  ;;  %v3665_v21 = vmul.f32 %v9693_v52, %v9419_v27  ;;  %v3666_v6 = vmul.f32 %v9695_v56, %v9421_v8  ;;  %v9790_v50 = vmul.f32 %v9695_v56, %v9704_v46 }
 0x216   :  { %v9794_v62 = vmul.f32 %v9693_v52, %v9415_v54  ;;  %v9798_v20 = vmul.f32 %v9695_v56, %v9417_v3  ;;  %v9802_v23 = vmul.f32 %v9693_v52, %v9417_v3  ;;  %v9804_v58 = vadd.f32 %v3638_v26, %v3637_v1  ;;  %v12999_v26 = vld [vmem:[#allocation16_spill] sm:$0xff] }
 0x217   :  { %12984 = vst [vmem:[#allocation37_spill] sm:$0xff] %v9782_v55  ;;  %v9808_v40 = vmul.f32 %v9695_v56, %v9415_v54  ;;  %v9812_v9 = vmul.f32 %v9693_v52, %v9421_v8  ;;  %v9816_v47 = vmul.f32 %v9695_v56, %v9419_v27  ;;  %vm3496_vm2 = vcmp.eq.s32.totalorder %v9725_v17, 2  ;;  %v13036_v8 = vld [vmem:[#allocation10_spill] sm:$0xff] }
 0x218   :  { %12985 = vst [vmem:[#allocation38_spill] sm:$0xff] %v9794_v62  ;;  %12986 = vst [vmem:[#allocation39_spill] sm:$0xff] %v9798_v20  ;;  %v9821_v22 = vmul.f32 %v9693_v52, %v9714_v2  ;;  %v9825_v12 = vmul.f32 %v9695_v56, %v9717_v30  ;;  %v3693_v59 = vmul.f32 %v9693_v52, %v9351_v49  ;;  %vm3493_vm5 = vcmp.eq.s32.totalorder %v9725_v17, 0 }
 0x219   :  { %12987 = vst [vmem:[#allocation40_spill] sm:$0xff] %v9808_v40  ;;  %12988 = vst [vmem:[#allocation41_spill] sm:$0xff] %v9812_v9  ;;  %v3694_v61 = vmul.f32 %v9695_v56, %v9356_v41  ;;  %v9831_v7 = vadd.f32 %v3666_v6, %v3665_v21  ;;  %v9835_v60 = vmul.f32 %v9693_v52, %v9717_v30  ;;  %vm3600_vm0 = vcmp.eq.s32.totalorder %v9727_v24, 2  ;;  %v13000_v6 = vld [vmem:[#allocation12_spill] sm:$0xff] }
 0x21a   :  { %12989 = vst [vmem:[#allocation42_spill] sm:$0xff] %v9816_v47  ;;  %12990 = vst [vmem:[#allocation43_spill] sm:$0xff] %v9821_v22  ;;  %v9839_v38 = vmul.f32 %v9695_v56, %v9714_v2  ;;  %v9843_v28 = vmul.f32 %v9693_v52, %v9356_v41  ;;  %v9849_v13 = vmul.f32 %v9695_v56, %v9351_v49  ;;  %vm3597_vm3 = vcmp.eq.s32.totalorder %v9727_v24, 0 }
 0x21b   :  { %12991 = vst [vmem:[#allocation44_spill] sm:$0xff] %v9825_v12  ;;  %12992 = vst [vmem:[#allocation45_spill] sm:$0xff] %v9831_v7  ;;  %v9853_v1 = vmul.f32 %v9693_v52, %v12997_v48  ;;  %v3721_v21 = vmul.f32 %v9693_v52, %v12999_v26  ;;  %v3722_v15 = vmul.f32 %v9695_v56, %v13000_v6  ;;  %vm3492_vm6 = vcmp.lt.s32.totalorder %v9725_v17, 2 }
 0x21c   :  { %12993 = vst [vmem:[#allocation46_spill] sm:$0xff] %v9835_v60  ;;  %12994 = vst [vmem:[#allocation47_spill] sm:$0xff] %v9839_v38  ;;  %v9862_v43 = vmul.f32 %v9695_v56, %v13001_v19  ;;  %v9866_v18 = vmul.f32 %v9693_v52, %v13001_v19  ;;  %v9870_v63 = vmul.f32 %v9695_v56, %v12997_v48  ;;  %v13008_v38 = vld [vmem:[#allocation19_spill] sm:$0xff]  ;;  %vm3596_vm8 = vcmp.lt.s32.totalorder %v9727_v24, 2  ;;  %v13027_v48 = vld [vmem:[#allocation26_spill] sm:$0xff] }
 0x21d   :  { %12995 = vst [vmem:[#allocation48_spill] sm:$0xff] %v9843_v28  ;;  %12996 = vst [vmem:[#allocation49_spill] sm:$0xff] %v9849_v13  ;;  %v6760_v28 = vpop.eup %6759  ;;  %v9873_v16 = vadd.f32 %v3694_v61, %v3693_v59  ;;  %v9877_v12 = vmul.f32 %v9693_v52, %v13000_v6  ;;  %v3749_v61 = vmul.f32 %v9693_v52, %v9685_v25  ;;  %vm3490_vm11 = vweird.f32 %v12972_v53 }
 0x21e   :  { %12998 = vst [vmem:[#allocation50_spill] sm:$0xff] %v9853_v1  ;;  %13002 = vst [vmem:[#allocation51_spill] sm:$0xff] %v9862_v43  ;;  %v4069_v1 = vsub.s32 32, %v9746_v5  ;;  %v9881_v43 = vmul.f32 %v9695_v56, %v12999_v26  ;;  %v9905_v6 = vmul.f32 %v9695_v56, %v13008_v38  ;;  %v3497_v26 = vxor.u32 2147483648, %v6760_v28 }
 0x21f   :  { %13003 = vst [vmem:[#allocation52_spill] sm:$0xff] %v9866_v18  ;;  %13004 = vst [vmem:[#allocation53_spill] sm:$0xff] %v9870_v63  ;;  %v9885_v18 = vmul.f32 %v9693_v52, %v13008_v38  ;;  %v13010_v63 = vld [vmem:[#allocation22_spill] sm:$0xff]  ;;  %v13032_v55 = vmov 920167782   ;;  %vm4086_vm9 = vcmp.lt.s32.totalorder %v9744_v35, 1  ;;  %v9979_v27 = vmul.f32 %v9695_v56, %v13036_v8 }
 0x220   :  { %13005 = vst [vmem:[#allocation54_spill] sm:$0xff] %v9873_v16  ;;  %13006 = vst [vmem:[#allocation55_spill] sm:$0xff] %v9877_v12  ;;  %v9890_v9 = vmul.f32 %v9695_v56, %v13010_v63  ;;  %v9894_v59 = vmul.f32 %v9693_v52, %v13010_v63  ;;  %v3750_v12 = vmul.f32 %v9695_v56, %v9700_v42  ;;  %v13017_v63 = vld [vmem:[#allocation28_spill] sm:$0xff]  ;;  %v13033_v47 = vmov 1326507024  }
 0x221   :  { %13007 = vst [vmem:[#allocation56_spill] sm:$0xff] %v9881_v43  ;;  %13009 = vst [vmem:[#allocation57_spill] sm:$0xff] %v9885_v18  ;;  %v6762_v43 = vpop.eup %6761  ;;  %v9901_v18 = vadd.f32 %v3722_v15, %v3721_v21  ;;  %v9917_v41 = vmul.f32 %v9693_v52, %v13017_v63  ;;  %v13019_v15 = vmov 683565275   ;;  %v9938_v22 = vmul.f32 %v9695_v56, %v13017_v63 }
 0x222   :  { %13011 = vst [vmem:[#allocation58_spill] sm:$0xff] %v9890_v9  ;;  %13012 = vst [vmem:[#allocation59_spill] sm:$0xff] %v9894_v59  ;;  %v9909_v9 = vmul.f32 %v9693_v52, %v9700_v42  ;;  %v9913_v59 = vmul.f32 %v9695_v56, %v9685_v25  ;;  %v4071_v21 = vshll.u32 %v13019_v15, %v9746_v5  ;;  %v13024_v25 = vmov 2131351028  }
 0x223   :  { %13013 = vst [vmem:[#allocation60_spill] sm:$0xff] %v9901_v18  ;;  %13014 = vst [vmem:[#allocation61_spill] sm:$0xff] %v9905_v6  ;;  %v13020_v18 = vmov 2475754826   ;;  %v13021_v6 = vld [vmem:[#allocation29_spill] sm:$0xff]  ;;  %v3494_v38 = vxor.u32 2147483648, %v6762_v43  ;;  %v9934_v13 = vadd.f32 %v3750_v12, %v3749_v61  ;;  %v3777_v16 = vmul.f32 %v9693_v52, %v13027_v48 }
 0x224   :  { %13015 = vst [vmem:[#allocation62_spill] sm:$0xff] %v9909_v9  ;;  %13016 = vst [vmem:[#allocation63_spill] sm:$0xff] %v9913_v59  ;;  %v4072_v49 = vshrl.u32 %v13020_v18, %v4069_v1  ;;  %v9925_v42 = vmul.f32 %v9695_v56, %v13021_v6  ;;  %v9929_v9 = vmul.f32 %v9693_v52, %v13021_v6  ;;  %v13029_v6 = vmov 2102212464  }
 0x225   :  { %13018 = vst [vmem:[#allocation64_spill] sm:$0xff] %v9917_v41  ;;  %v4074_v59 = vshll.u32 %v13020_v18, %v9746_v5  ;;  %v4075_v41 = vshrl.u32 %v13024_v25, %v4069_v1  ;;  %13025 = vst [vmem:[#allocation67_spill] sm:$0xff] %v9934_v13  ;;  %v4078_v7 = vshrl.u32 %v13029_v6, %v4069_v1  ;;  %vm4088_vm12 = vcmp.lt.s32.totalorder %v9744_v35, 3 }
 0x226   :  { %13022 = vst [vmem:[#allocation65_spill] sm:$0xff] %v9925_v42  ;;  %13023 = vst [vmem:[#allocation66_spill] sm:$0xff] %v9929_v9  ;;  %v13028_v42 = vld [vmem:[#allocation27_spill] sm:$0xff]  ;;  %v4077_v9 = vshll.u32 %v13024_v25, %v9746_v5  ;;  %v4080_v20 = vshll.u32 %v13029_v6, %v9746_v5  ;;  %v3498_v12 = vsel %vm3496_vm2, %v3497_v26, %v6762_v43  ;;  %vm4087_vm13 = vcmp.lt.s32.totalorder %v9744_v35, 2 }
 0x227   :  { %13026 = vst [vmem:[#allocation68_spill] sm:$0xff] %v9938_v22  ;;  %v3778_v60 = vmul.f32 %v9695_v56, %v13028_v42  ;;  %v9953_v61 = vmul.f32 %v9693_v52, %v13028_v42  ;;  %v9957_v22 = vmul.f32 %v9695_v56, %v13027_v48  ;;  %v4073_v13 = vor.u32 %v4072_v49, %v4071_v21 }
 0x228   :  { %v4076_v63 = vor.u32 %v4075_v41, %v4074_v59  ;;  %v4081_v19 = vshrl.u32 %v13032_v55, %v4069_v1  ;;  %v4083_v2 = vshll.u32 %v13032_v55, %v9746_v5  ;;  %v4084_v40 = vshrl.u32 %v13033_v47, %v4069_v1  ;;  %v13034_v5 = vld [vmem:[#allocation30_spill] sm:$0xff]  ;;  %13037 = vst [vmem:[#allocation10_spill] sm:$0xff] %v9979_v27 }
 0x229   :  { %13030 = vst [vmem:[#allocation69_spill] sm:$0xff] %v9953_v61  ;;  %13031 = vst [vmem:[#allocation70_spill] sm:$0xff] %v9957_v22  ;;  %v3495_v62 = vsel %vm3493_vm5, %v6760_v28, %v3494_v38  ;;  %v3602_v42 = vsel %vm3600_vm0, %v3497_v26, %v6762_v43  ;;  %v4070_v61 = vshrl.u32 %v13019_v15, %v4069_v1  ;;  %vm4089_vm4 = vcmp.lt.s32.totalorder %v9744_v35, 4 }
 0x22a   :  { %v3599_v49 = vsel %vm3597_vm3, %v6760_v28, %v3494_v38  ;;  %v4079_v41 = vor.u32 %v4078_v7, %v4077_v9  ;;  %v4082_v59 = vor.u32 %v4081_v19, %v4080_v20  ;;  %v4085_v21 = vor.u32 %v4084_v40, %v4083_v2  ;;  %v13038_v28 = vld [vmem:[#allocation21_spill] sm:$0xff] }
 0x22b   :  { %v9971_v48 = vadd.f32 %v3778_v60, %v3777_v16  ;;  %v9975_v22 = vmul.f32 %v9693_v52, %v13034_v5  ;;  %v3499_v43 = vsel %vm3492_vm6, %v3495_v62, %v3498_v12  ;;  %v4094_v2 = vsel %vm4086_vm9, %v4073_v13, %v4076_v63 }
 0x22c   :  { %v3603_v19 = vsel %vm3596_vm8, %v3599_v49, %v3602_v42  ;;  %v4090_v16 = vsel %vm4086_vm9, %v4070_v61, %v4073_v13  ;;  %v4091_v20 = vsel %vm4089_vm4, %v4079_v41, 2102212464  ;;  %v4095_v40 = vsel %vm4089_vm4, %v4082_v59, 920167782 }
 0x22d   :  { %13035 = vst [vmem:[#allocation30_spill] sm:$0xff] %v9975_v22  ;;  %v4092_v9 = vsel %vm4088_vm12, %v4076_v63, %v4091_v20  ;;  %v4096_v17 = vsel %vm4088_vm12, %v4079_v41, %v4095_v40  ;;  %v4098_v62 = vsel %vm4086_vm9, %v4076_v63, %v4079_v41  ;;  %v4099_v7 = vsel %vm4089_vm4, %v4085_v21, 1326507024 }
 0x22e   :  { %v3500_v60 = vsel %vm3490_vm11, nan, %v3499_v43  ;;  %v10002_v42 = vmul.f32 %v9693_v52, %v13036_v8  ;;  %v10005_v24 = vshrl.u32 %v9742_v11, 30  ;;  %v4097_v38 = vsel %vm4087_vm13, %v4094_v2, %v4096_v17 }
 0x22f   :  { %v3805_v13 = vmul.f32 %v9693_v52, %v13038_v28  ;;  %v4100_v63 = vsel %vm4088_vm12, %v4082_v59, %v4099_v7  ;;  %v10014_v1 = vmul.u32.u64.low %v9748_v4, %v4097_v38  ;;  %v10015_v26 = vmul.u32.u64.high %v9748_v4, %v4097_v38, %v10014_v1  ;;  %v13040_v59 = vld [vmem:[#allocation18_spill] sm:$0xff]  ;;  %v13044_v7 = vld [vmem:[#allocation13_spill] sm:$0xff]  ;;  %v13046_v38 = vld [vmem:[#allocation20_spill] sm:$0xff] }
 0x230   :  { %v3604_v12 = vsel %vm3490_vm11, nan, %v3603_v19  ;;  %v4093_v11 = vsel %vm4087_vm13, %v4090_v16, %v4092_v9  ;;  %v4101_v61 = vsel %vm4087_vm13, %v4098_v62, %v4100_v63  ;;  %v13039_v49 = vand.u32 2139095040, %v9710_v37 }
 0x231   :  { %v10027_v21 = vmul.f32 %v3500_v60, %v9723_v10  ;;  %v3806_v43 = vmul.f32 %v9695_v56, %v13040_v59  ;;  %v10032_v2 = vmul.u32.u64.low %v9748_v4, %v4101_v61  ;;  %v10033_v20 = vmul.u32.u64.high %v9748_v4, %v4101_v61, %v10032_v2 }
 0x232   :  { %v4265_v41 = vshrl.u32 %v13039_v49, 23  ;;  %v10037_v53 = vmul.f32 %v9695_v56, %v13034_v5  ;;  %v10041_v35 = vmul.f32 %v9693_v52, %v13040_v59  ;;  %v3910_v19 = vshll.u32 %v10005_v24, 30 }
 0x233   :  { %v10045_v40 = vmul.f32 %v3604_v12, %v9723_v10  ;;  %v10049_v9 = vmul.f32 %v9695_v56, %v13038_v28  ;;  %v4109_v17 = vmul.u32 %v9748_v4, %v4093_v11  ;;  %v4112_v62 = vadd.s32 1, %v10015_v26 }
 0x234   :  { %13041 = vst [vmem:[#allocation71_spill] sm:$0xff] %v10037_v53  ;;  %13042 = vst [vmem:[#allocation72_spill] sm:$0xff] %v10041_v35  ;;  %v6543_v16 = vadd.s32 4294967169, %v4265_v41  ;;  %v10055_v60 = vmul.f32 %v9693_v52, %v13044_v7  ;;  %v10059_v63 = vmul.f32 %v9695_v56, %v13046_v38  ;;  %v10063_v10 = vmul.f32 %v9693_v52, %v13046_v38 }
 0x235   :  { %13043 = vst [vmem:[#allocation73_spill] sm:$0xff] %v10049_v9  ;;  %v3612_v61 = vmul.f32 %v10045_v40, %v9349_v39  ;;  %v3618_v4 = vmul.f32 %v10027_v21, %v9349_v39  ;;  %v10069_v11 = vadd.f32 %v3806_v43, %v3805_v13  ;;  %vm4111_vm1 = vc.u32 %v10033_v20, %v10014_v1 }
 0x236   :  { %13045 = vst [vmem:[#allocation13_spill] sm:$0xff] %v10055_v60  ;;  %13047 = vst [vmem:[#allocation20_spill] sm:$0xff] %v10059_v63  ;;  %v4271_v12 = vadd.s32 1, %v6543_v16  ;;  %v10075_v49 = vmul.f32 %v9695_v56, %v13044_v7  ;;  %v10078_v41 = vsub.s32 %v9719_v36, %v3910_v19  ;;  %v4113_v52 = vsel %vm4111_vm1, %v4112_v62, %v10015_v26 }
 0x237   :  { %13048 = vst [vmem:[#allocation74_spill] sm:$0xff] %v10063_v10  ;;  %13049 = vst [vmem:[#allocation75_spill] sm:$0xff] %v10069_v11  ;;  %v10083_v2 = vmul.f32 %v10027_v21, %v9347_v14  ;;  %v4114_v13 = vadd.s32 %v4113_v52, %v4109_v17  ;;  %v3620_v16 = vmul.f32 %v10045_v40, %v9347_v14  ;;  %v13053_v11 = vld [vmem:[#allocation17_spill] sm:$0xff] }
 0x238   :  { %13050 = vst [vmem:[#allocation76_spill] sm:$0xff] %v10075_v49  ;;  %vm4272_vm10 = vcmp.gt.s32.totalorder %v4271_v12, 0  ;;  %v3623_v56 = vmul.f32 %v10027_v21, %v9231_v31  ;;  %v3624_v36 = vmul.f32 %v10045_v40, %v9233_v0  ;;  %v10093_v26 = vadd.f32 %v3612_v61, %v9762_v57 }
 0x239   :  { %v4273_v43 = vsel %vm4272_vm10, %v4271_v12, 0  ;;  %v3619_v62 = vadd.f32 %v3618_v4, %v9756_v34  ;;  %v3630_v39 = vmul.f32 %v10027_v21, %v9233_v0  ;;  %v4115_v17 = vadd.s32 536870912, %v4114_v13 }
 0x23a   :  { %v4275_v19 = vand.u32 31, %v4273_v43  ;;  %v3913_v12 = vsub.s32 0, %v10078_v41  ;;  %v13052_v49 = vand.u32 2147483647, %v9710_v37  ;;  %v10105_v57 = vshrl.u32 %v4273_v43, 5 }
 0x23b   :  { %v10101_v35 = vshrl.u32 %v4115_v17, 30  ;;  %v3640_v27 = vmul.f32 %v10045_v40, %v9417_v3  ;;  %v3642_v43 = vmul.f32 %v10027_v21, %v9415_v54  ;;  %v3625_v59 = vadd.f32 %v3624_v36, %v3623_v56 }
 0x23c   :  { %v4276_v52 = vsub.s32 32, %v4275_v19  ;;  %v4278_v14 = vshll.u32 %v13019_v15, %v4275_v19  ;;  %v4281_v63 = vshll.u32 %v13020_v18, %v4275_v19  ;;  %v4268_v60 = vand.u32 8388607, %v13052_v49 }
 0x23d   :  { %13051 = vst [vmem:[#allocation77_spill] sm:$0xff] %v10101_v35  ;;  %v4287_v34 = vshll.u32 %v13029_v6, %v4275_v19  ;;  %v4284_v4 = vshll.u32 %v13024_v25, %v4275_v19  ;;  %v4117_v17 = vshll.u32 %v10101_v35, 30  ;;  %v4290_v49 = vshll.u32 %v13032_v55, %v4275_v19 }
 0x23e   :  { %v4279_v61 = vshrl.u32 %v13020_v18, %v4276_v52  ;;  %v4282_v0 = vshrl.u32 %v13024_v25, %v4276_v52  ;;  %v4285_v10 = vshrl.u32 %v13029_v6, %v4276_v52  ;;  %v4288_v37 = vshrl.u32 %v13032_v55, %v4276_v52 }
 0x23f   :  { %v4291_v53 = vshrl.u32 %v13033_v47, %v4276_v52  ;;  %v4269_v25 = vor.u32 8388608, %v4268_v60  ;;  %vm4293_vm15 = vcmp.lt.s32.totalorder %v10105_v57, 1  ;;  %v3632_v6 = vadd.f32 %v9774_v33, %v3630_v39 }
 0x240   :  { %v4280_v9 = vor.u32 %v4279_v61, %v4278_v14  ;;  %v4283_v18 = vor.u32 %v4282_v0, %v4281_v63  ;;  %v4289_v28 = vor.u32 %v4288_v37, %v4287_v34  ;;  %v3646_v35 = vmul.f32 %v10027_v21, %v9417_v3 }
 0x241   :  { %vm3849_vm7 = vcmp.lt.s32.totalorder %v13053_v11, 0  ;;  %v6528_v19 = vmin.u32 %v3913_v12, %v10078_v41  ;;  %v4286_v55 = vor.u32 %v4285_v10, %v4284_v4  ;;  %v10126_v22 = vsub.s32 %v4114_v13, %v4117_v17 }
 0x242   :  { %v4292_v63 = vor.u32 %v4291_v53, %v4290_v49  ;;  %vm4295_vm14 = vcmp.lt.s32.totalorder %v10105_v57, 3  ;;  %vm4296_vm2 = vcmp.lt.s32.totalorder %v10105_v57, 4  ;;  %v4277_v37 = vshrl.u32 %v13019_v15, %v4276_v52 }
 0x243   :  { %vm4294_vm5 = vcmp.lt.s32.totalorder %v10105_v57, 2  ;;  %v4301_v33 = vsel %vm4293_vm15, %v4280_v9, %v4283_v18  ;;  %v4302_v3 = vsel %vm4296_vm2, %v4289_v28, 920167782  ;;  %v3621_v60 = vadd.f32 %v3620_v16, %v3619_v62 }
 0x244   :  { %v3641_v10 = vadd.f32 %v3640_v27, %v9804_v58  ;;  %v3648_v53 = vmul.f32 %v10045_v40, %v9415_v54  ;;  %v4309_v39 = vshll.u32 %v4269_v25, 8  ;;  %v3651_v13 = vmul.f32 %v10027_v21, %v9704_v46 }
 0x245   :  { %v4298_v56 = vsel %vm4296_vm2, %v4286_v55, 2102212464  ;;  %v4303_v36 = vsel %vm4295_vm14, %v4286_v55, %v4302_v3  ;;  %v4305_v12 = vsel %vm4293_vm15, %v4283_v18, %v4286_v55  ;;  %v3652_v16 = vmul.f32 %v10045_v40, %v9708_v51 }
 0x246   :  { %v4120_v27 = vsub.s32 0, %v10126_v22  ;;  %v4304_v54 = vsel %vm4294_vm5, %v4301_v33, %v4303_v36  ;;  %v4306_v25 = vsel %vm4296_vm2, %v4292_v63, 1326507024  ;;  %v3658_v58 = vmul.f32 %v10027_v21, %v9708_v51  ;;  %v13061_v36 = vld [vmem:[#allocation42_spill] sm:$0xff] }
 0x247   :  { %v3915_v62 = vclz %v6528_v19  ;;  %v4297_v52 = vsel %vm4293_vm15, %v4277_v37, %v4280_v9  ;;  %v4307_v55 = vsel %vm4295_vm14, %v4289_v28, %v4306_v25  ;;  %v4299_v14 = vsel %vm4295_vm14, %v4283_v18, %v4298_v56  ;;  %v13063_v25 = vld [vmem:[#allocation14_spill] sm:$0xff] }
 0x248   :  { %v4308_v34 = vsel %vm4294_vm5, %v4305_v12, %v4307_v55  ;;  %v10164_v61 = vmul.u32.u64.low %v4309_v39, %v4304_v54  ;;  %v10165_v0 = vmul.u32.u64.high %v4309_v39, %v4304_v54, %v10164_v61  ;;  %v3627_v4 = vadd.f32 %v9766_v45, %v3625_v59 }
 0x249   :  { %v3647_v51 = vadd.f32 %v3646_v35, %v9790_v50  ;;  %v10170_v17 = vmul.u32.u64.low %v4309_v39, %v4308_v34  ;;  %v10171_v49 = vmul.u32.u64.high %v4309_v39, %v4308_v34, %v10170_v17  ;;  %v10177_v28 = vsub.f32 %v10093_v26, %v10083_v2  ;;  %v13064_v34 = vld [vmem:[#allocation37_spill] sm:$0xff] }
 0x24a   :  { %v3635_v18 = vmul.f32 %v10045_v40, %v9231_v31  ;;  %v13054_v9 = vsub.s32 4, %v10005_v24  ;;  %v6536_v50 = vmin.u32 %v4120_v27, %v10126_v22  ;;  %v3634_v59 = vadd.f32 %v9778_v32, %v3632_v6  ;;  %v13056_v6 = vld [vmem:[#allocation24_spill] sm:$0xff] }
 0x24b   :  { %v3653_v35 = vadd.f32 %v3652_v16, %v3651_v13  ;;  %v6529_v19 = vadd.s32 4294967294, %v3915_v62  ;;  %v4300_v2 = vsel %vm4294_vm5, %v4297_v52, %v4299_v14  ;;  %v10193_v26 = vsub.f32 %v9752_v29, %v3621_v60  ;;  %v13057_v29 = vld [vmem:[#allocation25_spill] sm:$0xff]  ;;  %v13060_v13 = vld [vmem:[#allocation40_spill] sm:$0xff]  ;;  %v13062_v16 = vld [vmem:[#allocation34_spill] sm:$0xff] }
 0x24c   :  { %v10186_v45 = vsel %vm3849_vm7, %v13054_v9, %v10005_v24  ;;  %v10195_v31 = vsub.f32 %v3641_v10, %v3642_v43  ;;  %v3660_v63 = vadd.f32 %v9802_v23, %v3658_v58  ;;  %v3674_v24 = vmul.f32 %v10027_v21, %v9717_v30 }
 0x24d   :  { %v10201_v37 = vsub.f32 %v3627_v4, %v9770_v44  ;;  %v3649_v33 = vadd.f32 %v3648_v53, %v3647_v51  ;;  %v3663_v32 = vmul.f32 %v10045_v40, %v9704_v46  ;;  %v3679_v57 = vmul.f32 %v10027_v21, %v13056_v6  ;;  %v13058_v44 = vld [vmem:[#allocation38_spill] sm:$0xff]  ;;  %v13065_v51 = vld [vmem:[#allocation39_spill] sm:$0xff] }
 0x24e   :  { %v3680_v43 = vmul.f32 %v10045_v40, %v13057_v29  ;;  %v4122_v23 = vclz %v6536_v50  ;;  %v4316_v3 = vmul.u32 %v4309_v39, %v4300_v2  ;;  %vm4318_vm0 = vc.u32 %v10171_v49, %v10164_v61  ;;  %v13069_v2 = vld [vmem:[#allocation46_spill] sm:$0xff] }
 0x24f   :  { %13055 = vst [vmem:[#allocation17_spill] sm:$0xff] %v10201_v37  ;;  %v3655_v60 = vadd.f32 %v13058_v44, %v3653_v35  ;;  %v3668_v10 = vmul.f32 %v10045_v40, %v9717_v30  ;;  %vm6530_vm3 = vcmp.lt.s32.totalorder %v6529_v19, 0  ;;  %v4319_v46 = vadd.s32 1, %v10165_v0  ;;  %v13104_v37 = vld [vmem:[#allocation28_spill] sm:$0xff] }
 0x250   :  { %v10217_v53 = vsub.f32 %v3634_v59, %v3635_v18  ;;  %v3662_v56 = vadd.f32 %v13060_v13, %v3660_v63  ;;  %v3675_v12 = vadd.f32 %v3674_v24, %v13061_v36  ;;  %v3676_v39 = vmul.f32 %v10045_v40, %v13062_v16  ;;  %v13067_v18 = vld [vmem:[#allocation45_spill] sm:$0xff]  ;;  %v13070_v24 = vld [vmem:[#allocation54_spill] sm:$0xff] }
 0x251   :  { %v3670_v27 = vmul.f32 %v10027_v21, %v13062_v16  ;;  %v3686_v54 = vmul.f32 %v10027_v21, %v13057_v29  ;;  %v3696_v30 = vmul.f32 %v10045_v40, %v13063_v25  ;;  %v4320_v58 = vsel %vm4318_vm0, %v4319_v46, %v10165_v0  ;;  %v13074_v46 = vld [vmem:[#allocation23_spill] sm:$0xff]  ;;  %v13077_v16 = vld [vmem:[#allocation41_spill] sm:$0xff] }
 0x252   :  { %13059 = vst [vmem:[#allocation24_spill] sm:$0xff] %v10217_v53  ;;  %v3681_v62 = vadd.f32 %v3680_v43, %v3679_v57  ;;  %v10231_v52 = vsel %vm6530_vm3, 0, %v6529_v19  ;;  %v6537_v55 = vadd.s32 4294967294, %v4122_v23  ;;  %v4321_v14 = vadd.s32 %v4320_v58, %v4316_v3  ;;  %v13071_v57 = vld [vmem:[#allocation15_spill] sm:$0xff] }
 0x253   :  { %v10234_v4 = vsub.f32 %v13064_v34, %v3649_v33  ;;  %v10237_v17 = vsub.f32 %v3655_v60, %v13065_v51  ;;  %v3669_v9 = vadd.f32 %v3668_v10, %v13067_v18  ;;  %v3702_v50 = vmul.f32 %v10027_v21, %v13063_v25  ;;  %v13072_v23 = vld [vmem:[#allocation43_spill] sm:$0xff]  ;;  %v13073_v60 = vld [vmem:[#allocation49_spill] sm:$0xff]  ;;  %v6805_v34 = vld [vmem:[%s12606_s2 + $0x38] sm:$0xff] }
 0x254   :  { %v10242_v59 = vsub.f32 %v3662_v56, %v3663_v32  ;;  %v3677_v0 = vadd.f32 %v3676_v39, %v3675_v12  ;;  %v3691_v35 = vmul.f32 %v10045_v40, %v13056_v6  ;;  %v4322_v19 = vadd.s32 536870912, %v4321_v14  ;;  %v13075_v56 = vld [vmem:[#allocation11_spill] sm:$0xff] }
 0x255   :  { %13066 = vst [vmem:[#allocation25_spill] sm:$0xff] %v10237_v17  ;;  %v3688_v63 = vadd.f32 %v13069_v2, %v3686_v54  ;;  %v3697_v33 = vadd.f32 %v3696_v30, %v13070_v24  ;;  %v3698_v29 = vmul.f32 %v10027_v21, %v13071_v57  ;;  %v3923_v43 = vsub.s32 4294967266, %v10231_v52  ;;  %v13082_v2 = vld [vmem:[#allocation44_spill] sm:$0xff]  ;;  %v13103_v17 = vld [vmem:[#allocation59_spill] sm:$0xff] }
 0x256   :  { %13068 = vst [vmem:[#allocation38_spill] sm:$0xff] %v10242_v59  ;;  %v3683_v3 = vadd.f32 %v13072_v23, %v3681_v62  ;;  %vm6538_vm6 = vcmp.lt.s32.totalorder %v6537_v55, 0  ;;  %v10253_v32 = vshrl.u32 %v4322_v19, 30  ;;  %v4700_v44 = vstv %s200_s28  ;;  %v13084_v23 = vld [vmem:[#allocation52_spill] sm:$0xff] }
 0x257   :  { %v3703_v10 = vadd.f32 %v3702_v50, %v13073_v60  ;;  %v3704_v6 = vmul.f32 %v10045_v40, %v13071_v57  ;;  %v3707_v13 = vmul.f32 %v10027_v21, %v13074_v46  ;;  %v3708_v36 = vmul.f32 %v10045_v40, %v13075_v56  ;;  %v13081_v50 = vld [vmem:[#allocation22_spill] sm:$0xff] }
 0x258   :  { %v10262_v12 = vsub.f32 %v3669_v9, %v3670_v27  ;;  %v10265_v39 = vsub.f32 %v13077_v16, %v3677_v0  ;;  %v3714_v54 = vmul.f32 %v10027_v21, %v13075_v56  ;;  %v4324_v25 = vshll.u32 %v10253_v32, 30  ;;  %v13079_v27 = vld [vmem:[#allocation47_spill] sm:$0xff] }
 0x259   :  { %v3919_v30 = vsub.s32 32, %v10231_v52  ;;  %v3924_v58 = vadd.s32 127, %v3923_v43  ;;  %v10271_v62 = vsel %vm6538_vm6, 0, %v6537_v55  ;;  %v4701_v51 = vmul.f32 %v6805_v34, %v4700_v44  ;;  %v13085_v56 = vld [vmem:[#allocation19_spill] sm:$0xff] }
 0x25a   :  { %13076 = vst [vmem:[#allocation40_spill] sm:$0xff] %v10262_v12  ;;  %13078 = vst [vmem:[#allocation42_spill] sm:$0xff] %v10265_v39  ;;  %v3690_v18 = vadd.f32 %v13079_v27, %v3688_v63  ;;  %v10277_v9 = vsub.f32 %v3697_v33, %v3698_v29  ;;  %v3724_v0 = vmul.f32 %v10045_v40, %v13081_v50  ;;  %v4702_v19 = vstv %s202_s29  ;;  %v13086_v16 = vld [vmem:[#allocation35_spill] sm:$0xff]  ;;  %v13090_v27 = vld [vmem:[#allocation12_spill] sm:$0xff] }
 0x25b   :  { %v10282_v24 = vsub.f32 %v3683_v3, %v13082_v2  ;;  %v3705_v57 = vadd.f32 %v3704_v6, %v3703_v10  ;;  %v3709_v43 = vadd.f32 %v3708_v36, %v3707_v13  ;;  %v3719_v55 = vmul.f32 %v10045_v40, %v13074_v46  ;;  %v13088_v6 = vld [vmem:[#allocation60_spill] sm:$0xff] }
 0x25c   :  { %13080 = vst [vmem:[#allocation34_spill] sm:$0xff] %v10277_v9  ;;  %v3716_v60 = vadd.f32 %v13084_v23, %v3714_v54  ;;  %v3726_v44 = vmul.f32 %v10027_v21, %v13085_v56  ;;  %v4130_v63 = vsub.s32 4294967266, %v10271_v62  ;;  %v10290_v33 = vsub.s32 %v4321_v14, %v4324_v25  ;;  %v13089_v36 = vld [vmem:[#allocation16_spill] sm:$0xff]  ;;  %v13095_v23 = vld [vmem:[#allocation53_spill] sm:$0xff] }
 0x25d   :  { %13083 = vst [vmem:[#allocation14_spill] sm:$0xff] %v10282_v24  ;;  %v3920_v29 = vshll.u32 %v10078_v41, %v10231_v52  ;;  %v3921_v3 = vshrl.u32 %v13086_v16, %v3919_v30  ;;  %v3925_v34 = vshll.u32 %v3924_v58, 23  ;;  %v10295_v10 = vadd.f32 %v4702_v19, %v4701_v51  ;;  %v13092_v2 = vld [vmem:[#allocation48_spill] sm:$0xff]  ;;  %v13094_v52 = vld [vmem:[#allocation50_spill] sm:$0xff]  ;;  %v13102_v24 = vld [vmem:[#allocation57_spill] sm:$0xff] }
 0x25e   :  { %v3725_v13 = vadd.f32 %v3724_v0, %v13088_v6  ;;  %v3730_v46 = vmul.f32 %v10027_v21, %v13081_v50  ;;  %v3735_v54 = vmul.f32 %v10027_v21, %v13089_v36  ;;  %v3736_v14 = vmul.f32 %v10045_v40, %v13090_v27 }
 0x25f   :  { %13087 = vst [vmem:[#allocation37_spill] sm:$0xff] %v10295_v10  ;;  %v10304_v25 = vsub.f32 %v3690_v18, %v3691_v35  ;;  %v10307_v41 = vsub.f32 %v13092_v2, %v3705_v57  ;;  %v3711_v30 = vadd.f32 %v13094_v52, %v3709_v43  ;;  %v3732_v58 = vmul.f32 %v10045_v40, %v13085_v56  ;;  %v13096_v43 = vld [vmem:[#allocation56_spill] sm:$0xff] }
 0x260   :  { %v4110_v51 = vadd.s32 %v10014_v1, %v10033_v20  ;;  %v4126_v50 = vsub.s32 32, %v10271_v62  ;;  %v4131_v0 = vadd.s32 127, %v4130_v63  ;;  %v4327_v19 = vsub.s32 0, %v10290_v33  ;;  %v13097_v1 = vld [vmem:[#allocation29_spill] sm:$0xff] }
 0x261   :  { %13091 = vst [vmem:[#allocation39_spill] sm:$0xff] %v10304_v25  ;;  %13093 = vst [vmem:[#allocation45_spill] sm:$0xff] %v10307_v41  ;;  %v3718_v16 = vadd.f32 %v13095_v23, %v3716_v60  ;;  %v3922_v35 = vor.u32 %v3921_v3, %v3920_v29  ;;  %v3926_v18 = vor.u32 4788187, %v3925_v34  ;;  %v4713_v57 = vand.u32 2139095040, %v10295_v10  ;;  %v13098_v25 = vld [vmem:[#allocation9_spill] sm:$0xff] }
 0x262   :  { %v10318_v6 = vsub.f32 %v3725_v13, %v3726_v44  ;;  %v3731_v2 = vadd.f32 %v3730_v46, %v13096_v43  ;;  %v3737_v52 = vadd.f32 %v3736_v14, %v3735_v54  ;;  %v3742_v56 = vmul.f32 %v10027_v21, %v13090_v27  ;;  %v13099_v29 = vld [vmem:[#allocation32_spill] sm:$0xff]  ;;  %v13100_v54 = vld [vmem:[#allocation51_spill] sm:$0xff] }
 0x263   :  { %v3752_v20 = vmul.f32 %v10045_v40, %v13097_v1  ;;  %v3758_v63 = vmul.f32 %v10027_v21, %v13097_v1  ;;  %v3763_v60 = vmul.f32 %v10027_v21, %v13098_v25  ;;  %v3764_v3 = vmul.f32 %v10045_v40, %v13099_v29 }
 0x264   :  { %v4127_v44 = vshll.u32 %v10126_v22, %v10271_v62  ;;  %v4128_v34 = vshrl.u32 %v4110_v51, %v4126_v50  ;;  %v4132_v13 = vshll.u32 %v4131_v0, 23  ;;  %v6544_v46 = vmin.u32 %v4327_v19, %v10290_v33  ;;  %v13105_v62 = vld [vmem:[#allocation67_spill] sm:$0xff] }
 0x265   :  { %v10337_v27 = vsub.f32 %v3711_v30, %v13100_v54  ;;  %v3927_v14 = vand.u32 2147483647, %v3926_v18  ;;  %v3929_v23 = vcvt.s32.f32 %v3922_v35  ;;  %v4714_v43 = vshrl.u32 %v4713_v57, 23  ;;  %v13106_v50 = vld [vmem:[#allocation63_spill] sm:$0xff]  ;;  %v13115_v54 = vld [vmem:[#allocation66_spill] sm:$0xff] }
 0x266   :  { %v3733_v1 = vadd.f32 %v3732_v58, %v3731_v2  ;;  %v3739_v59 = vadd.f32 %v13102_v24, %v3737_v52  ;;  %v3744_v53 = vadd.f32 %v13103_v17, %v3742_v56  ;;  %v3754_v22 = vmul.f32 %v10027_v21, %v13104_v37 }
 0x267   :  { %13101 = vst [vmem:[#allocation46_spill] sm:$0xff] %v10337_v27  ;;  %v3753_v51 = vadd.f32 %v3752_v20, %v13105_v62  ;;  %v3759_v0 = vadd.f32 %v3758_v63, %v13106_v50  ;;  %v3760_v19 = vmul.f32 %v10045_v40, %v13104_v37  ;;  %v3770_v30 = vmul.f32 %v10027_v21, %v13099_v29  ;;  %v13111_v63 = vld [vmem:[#allocation55_spill] sm:$0xff]  ;;  %v13112_v29 = vld [vmem:[#allocation61_spill] sm:$0xff] }
 0x268   :  { %v3765_v58 = vadd.f32 %v3764_v3, %v3763_v60  ;;  %v4129_v35 = vor.u32 %v4128_v34, %v4127_v44  ;;  %v4133_v24 = vor.u32 4788187, %v4132_v13  ;;  %v4329_v18 = vclz %v6544_v46  ;;  %v13113_v44 = vld [vmem:[#allocation58_spill] sm:$0xff] }
 0x269   :  { %v3747_v17 = vmul.f32 %v10045_v40, %v13089_v36  ;;  %v3786_v57 = vmul.f32 %v10027_v21, %v13036_v8  ;;  %v13107_v2 = vand.u32 2147483647, %v13053_v11  ;;  %v3930_v52 = vmul.f32 %v3929_v23, %v3927_v14  ;;  %v13116_v14 = vld [vmem:[#allocation64_spill] sm:$0xff] }
 0x26a   :  { %v6551_v56 = vadd.s32 4294967169, %v4714_v43  ;;  %v10363_v20 = vsub.f32 %v3718_v16, %v3719_v55  ;;  %v10366_v60 = vsub.f32 %v13111_v63, %v3733_v1  ;;  %v3746_v3 = vadd.f32 %v13112_v29, %v3744_v53  ;;  %v13117_v1 = vld [vmem:[#allocation70_spill] sm:$0xff] }
 0x26b   :  { %vm10359_vm8 = vcmp.le.f32.partialorder %v13107_v2, 0.7853982  ;;  %v3780_v36 = vmul.f32 %v10045_v40, %v13036_v8  ;;  %v10372_v34 = vsub.f32 %v3739_v59, %v13113_v44  ;;  %v10374_v13 = vsub.f32 %v3753_v51, %v3754_v22  ;;  %v13118_v2 = vld [vmem:[#allocation31_spill] sm:$0xff] }
 0x26c   :  { %13110 = vst [vmem:[#allocation54_spill] sm:$0xff] %v10363_v20  ;;  %v3761_v46 = vadd.f32 %v3760_v19, %v3759_v0  ;;  %v3772_v62 = vadd.f32 %v13115_v54, %v3770_v30  ;;  %v3767_v23 = vadd.f32 %v13116_v14, %v3765_v58  ;;  %v4134_v55 = vand.u32 2147483647, %v4133_v24  ;;  %v13119_v0 = vld [vmem:[#allocation26_spill] sm:$0xff]  ;;  %v13120_v30 = vld [vmem:[#allocation27_spill] sm:$0xff]  ;;  %v13122_v24 = vld [vmem:[#allocation68_spill] sm:$0xff] }
 0x26d   :  { %13114 = vst [vmem:[#allocation15_spill] sm:$0xff] %v10372_v34  ;;  %v4136_v16 = vcvt.s32.f32 %v4129_v35  ;;  %v6545_v43 = vadd.s32 4294967294, %v4329_v18  ;;  %v3787_v50 = vadd.f32 %v3786_v57, %v13117_v1  ;;  %v3788_v53 = vmul.f32 %v10045_v40, %v13034_v5  ;;  %v13139_v20 = vld [vmem:[#allocation10_spill] sm:$0xff] }
 0x26e   :  { %v3931_v8 = vxor.u32 2147483648, %v3930_v52  ;;  %vm4056_vm11 = vcmp.lt.s32.totalorder %v13118_v2, 0  ;;  %v4720_v59 = vadd.s32 1, %v6551_v56  ;;  %v3781_v22 = vadd.f32 %v3780_v36, %v9971_v48  ;;  %v13123_v48 = vld [vmem:[#allocation62_spill] sm:$0xff] }
 0x26f   :  { %v3782_v51 = vmul.f32 %v10027_v21, %v13034_v5  ;;  %v3791_v19 = vmul.f32 %v10027_v21, %v13119_v0  ;;  %v3792_v58 = vmul.f32 %v10045_v40, %v13120_v30  ;;  %v10390_v35 = vsub.f32 %v3746_v3, %v3747_v17  ;;  %v13124_v5 = vld [vmem:[#allocation65_spill] sm:$0xff] }
 0x270   :  { %v3774_v18 = vadd.f32 %v13122_v24, %v3772_v62  ;;  %v3775_v57 = vmul.f32 %v10045_v40, %v13098_v25  ;;  %v3798_v56 = vmul.f32 %v10027_v21, %v13120_v30  ;;  %v10398_v63 = vsub.f32 %v13123_v48, %v3761_v46 }
 0x271   :  { %13121 = vst [vmem:[#allocation43_spill] sm:$0xff] %v10390_v35  ;;  %v10401_v29 = vsub.f32 %v3767_v23, %v13124_v5  ;;  %v13126_v36 = vand.u32 2147483647, %v13118_v2  ;;  %v4137_v17 = vmul.f32 %v4136_v16, %v4134_v55  ;;  %vm6546_vm12 = vcmp.lt.s32.totalorder %v6545_v43, 0 }
 0x272   :  { %v3789_v3 = vadd.f32 %v3788_v53, %v3787_v50  ;;  %v3932_v25 = vsel %vm3849_vm7, %v3931_v8, %v3930_v52  ;;  %v4698_v54 = vstv %s201_s8  ;;  %vm4721_vm13 = vcmp.gt.s32.totalorder %v4720_v59, 0  ;;  %v6806_v52 = vld [vmem:[%s12606_s2 + $0x30] sm:$0xff]  ;;  %v13130_v50 = vld [vmem:[#allocation36_spill] sm:$0xff] }
 0x273   :  { %13125 = vst [vmem:[#allocation49_spill] sm:$0xff] %v10401_v29  ;;  %vm10405_vm9 = vcmp.le.f32.partialorder %v13126_v36, 0.7853982  ;;  %v10413_v46 = vsub.f32 %v3781_v22, %v3782_v51  ;;  %v3793_v62 = vadd.f32 %v3792_v58, %v3791_v19  ;;  %v10417_v14 = vmul.f32 %v10045_v40, %v13119_v0  ;;  %v6807_v51 = vld [vmem:[%s12606_s2 + $0x40] sm:$0xff] }
 0x274   :  { %v3808_v23 = vmul.f32 %v10045_v40, %v13046_v38  ;;  %v10421_v1 = vsub.f32 %v3774_v18, %v3775_v57  ;;  %v3800_v55 = vadd.f32 %v10002_v42, %v3798_v56  ;;  %v10424_v16 = vsel %vm6546_vm12, 0, %v6545_v43  ;;  %v13131_v43 = vld [vmem:[#allocation69_spill] sm:$0xff]  ;;  %v13132_v18 = vld [vmem:[#allocation30_spill] sm:$0xff]  ;;  %v13133_v56 = vld [vmem:[#allocation75_spill] sm:$0xff] }
 0x275   :  { %v10430_v53 = vmul.f32 %v6806_v52, %v13130_v50  ;;  %v3935_v8 = vsel %vm10359_vm8, %v13053_v11, %v3932_v25  ;;  %v4138_v22 = vxor.u32 2147483648, %v4137_v17  ;;  %v10438_v0 = vmul.f32 %v6807_v51, %v4698_v54  ;;  %v13134_v36 = vld [vmem:[#allocation21_spill] sm:$0xff]  ;;  %v13135_v25 = vld [vmem:[#allocation18_spill] sm:$0xff] }
 0x276   :  { %13129 = vst [vmem:[#allocation23_spill] sm:$0xff] %v10421_v1  ;;  %v4722_v42 = vsel %vm4721_vm13, %v4720_v59, 0  ;;  %v10443_v19 = vsub.f32 %v13131_v43, %v3789_v3  ;;  %v3810_v30 = vmul.f32 %v10027_v21, %v13044_v7  ;;  %v3814_v58 = vmul.f32 %v10027_v21, %v13046_v38 }
 0x277   :  { %v10451_v24 = vmul.f32 %v10045_v40, %v13044_v7  ;;  %v3795_v57 = vadd.f32 %v13132_v18, %v3793_v62  ;;  %v3809_v59 = vadd.f32 %v3808_v23, %v13133_v56  ;;  %v3936_v48 = vsel %vm10359_vm8, 0, %v10186_v45  ;;  %v13136_v62 = vld [vmem:[#allocation77_spill] sm:$0xff]  ;;  %v13137_v45 = vld [vmem:[#allocation71_spill] sm:$0xff] }
 0x278   :  { %v4337_v5 = vsub.s32 4294967266, %v10424_v16  ;;  %v3819_v3 = vmul.f32 %v10027_v21, %v13134_v36  ;;  %v3820_v38 = vmul.f32 %v10045_v40, %v13135_v25  ;;  %6763 = vcosq.f32 %v3935_v8  ;;  %v13138_v18 = vld [vmem:[#allocation73_spill] sm:$0xff] }
 0x279   :  { %v4724_v7 = vand.u32 31, %v4722_v42  ;;  %6765 = vsinq.f32 %v3935_v8  ;;  %v4139_v54 = vsel %vm4056_vm11, %v4138_v22, %v4137_v17  ;;  %v4140_v23 = vsub.s32 4, %v13136_v62 }
 0x27a   :  { %v4704_v37 = vadd.f32 %v10438_v0, %v10430_v53  ;;  %v10469_v52 = vadd.f32 %v13137_v45, %v3800_v55  ;;  %v3826_v50 = vmul.f32 %v10027_v21, %v13135_v25  ;;  %v4043_v51 = vadd.s32 3, %v3936_v48 }
 0x27b   :  { %v4705_v43 = vstv %s10440_s14  ;;  %v10475_v56 = vadd.f32 %v3814_v58, %v13138_v18  ;;  %v4317_v8 = vadd.s32 %v10164_v61, %v10171_v49  ;;  %v4333_v17 = vsub.s32 32, %v10424_v16 }
 0x27c   :  { %v4338_v22 = vadd.s32 127, %v4337_v5  ;;  %v10481_v27 = vsub.f32 %v3795_v57, %v13139_v20  ;;  %v10483_v1 = vsub.f32 %v3809_v59, %v3810_v30  ;;  %v4142_v21 = vsel %vm10405_vm9, %v13118_v2, %v4139_v54  ;;  %v13143_v20 = vld [vmem:[#allocation74_spill] sm:$0xff] }
 0x27d   :  { %v10488_v55 = vsub.s32 32, %v4724_v7  ;;  %v10490_v25 = vadd.f32 %v3820_v38, %v3819_v3  ;;  %v10494_v58 = vmul.f32 %v10045_v40, %v13134_v36  ;;  %v4141_v61 = vsel %vm4056_vm11, %v4140_v23, %v13136_v62 }
 0x27e   :  { %13140 = vst [vmem:[#allocation11_spill] sm:$0xff] %v10481_v27  ;;  %13141 = vst [vmem:[#allocation41_spill] sm:$0xff] %v10483_v1  ;;  %v10499_v49 = vadd.f32 %v4705_v43, %v4704_v37  ;;  %v10502_v30 = vadd.f32 %v13143_v20, %v3826_v50  ;;  %v10504_v57 = vand.u32 3, %v3936_v48  ;;  %v10506_v59 = vand.u32 3, %v4043_v51 }
 0x27f   :  { %6767 = vcosq.f32 %v4142_v21  ;;  %v4334_v40 = vshll.u32 %v10290_v33, %v10424_v16  ;;  %v4335_v36 = vshrl.u32 %v4317_v8, %v4333_v17  ;;  %v4339_v3 = vshll.u32 %v4338_v22, 23 }
 0x280   :  { %13142 = vst [vmem:[#allocation47_spill] sm:$0xff] %v10499_v49  ;;  %v4143_v38 = vsel %vm10405_vm9, 0, %v4141_v61  ;;  %6769 = vsinq.f32 %v4142_v21  ;;  %v13144_v54 = vmov 2102212464   ;;  %v13145_v23 = vmov 920167782  }
 0x281   :  { %v4736_v62 = vshll.u32 %v13144_v54, %v4724_v7  ;;  %v4737_v48 = vshrl.u32 %v13145_v23, %v10488_v55  ;;  %v10516_v37 = vshrl.u32 %v4722_v42, 5  ;;  %v4739_v45 = vshll.u32 %v13145_v23, %v4724_v7 }
 0x282   :  { %v4740_v50 = vshrl.u32 %v13033_v47, %v10488_v55  ;;  %v4920_v33 = vand.u32 2139095040, %v10499_v49  ;;  %vm3942_vm4 = vcmp.eq.s32.totalorder %v10504_v57, 0  ;;  %v4727_v44 = vshll.u32 %v13019_v15, %v4724_v7 }
 0x283   :  { %v13146_v16 = vmov 2475754826   ;;  %v13147_v42 = vmov 2131351028   ;;  %v4336_v8 = vor.u32 %v4335_v36, %v4334_v40  ;;  %v4340_v17 = vor.u32 4788187, %v4339_v3 }
 0x284   :  { %v4728_v51 = vshrl.u32 %v13146_v16, %v10488_v55  ;;  %v4730_v43 = vshll.u32 %v13146_v16, %v4724_v7  ;;  %v4731_v18 = vshrl.u32 %v13147_v42, %v10488_v55  ;;  %v4733_v22 = vshll.u32 %v13147_v42, %v4724_v7 }
 0x285   :  { %v4734_v21 = vshrl.u32 %v13144_v54, %v10488_v55  ;;  %vm3945_vm1 = vcmp.eq.s32.totalorder %v10504_v57, 2  ;;  %vm4046_vm10 = vcmp.eq.s32.totalorder %v10506_v59, 0  ;;  %v4250_v61 = vadd.s32 3, %v4143_v38  ;;  %v6764_v5 = vpop.eup %6763 }
 0x286   :  { %v4738_v20 = vor.u32 %v4737_v48, %v4736_v62  ;;  %vm3941_vm15 = vcmp.lt.s32.totalorder %v10504_v57, 2  ;;  %vm4049_vm7 = vcmp.eq.s32.totalorder %v10506_v59, 2  ;;  %v13148_v47 = vand.u32 2147483647, %v10295_v10  ;;  %v6766_v7 = vpop.eup %6765 }
 0x287   :  { %v4741_v36 = vor.u32 %v4740_v50, %v4739_v45  ;;  %vm4745_vm14 = vcmp.lt.s32.totalorder %v10516_v37, 4  ;;  %v10543_v3 = vand.u32 3, %v4143_v38  ;;  %v4707_v27 = vsub.f32 %v10430_v53, %v10438_v0  ;;  %v13149_v50 = vld [vmem:[#allocation33_spill] sm:$0xff] }
 0x288   :  { %v4717_v40 = vand.u32 8388607, %v13148_v47  ;;  %v10547_v62 = vor.u32 %v4728_v51, %v4727_v44  ;;  %v4921_v48 = vshrl.u32 %v4920_v33, 23  ;;  %v4341_v23 = vand.u32 2147483647, %v4340_v17 }
 0x289   :  { %v4343_v54 = vcvt.s32.f32 %v4336_v8  ;;  %v10549_v42 = vor.u32 %v4731_v18, %v4730_v43  ;;  %v4735_v47 = vor.u32 %v4734_v21, %v4733_v22  ;;  %v10551_v45 = vand.u32 3, %v4250_v61 }
 0x28a   :  { %vm4263_vm2 = vcmp.lt.s32.totalorder %v13149_v50, 0  ;;  %vm4742_vm5 = vcmp.lt.s32.totalorder %v10516_v37, 1  ;;  %vm4744_vm0 = vcmp.lt.s32.totalorder %v10516_v37, 3  ;;  %v4751_v53 = vsel %vm4745_vm14, %v4738_v20, 920167782 }
 0x28b   :  { %v3943_v0 = vxor.u32 2147483648, %v6766_v7  ;;  %v3946_v38 = vxor.u32 2147483648, %v6764_v5  ;;  %v4718_v33 = vor.u32 8388608, %v4717_v40  ;;  %v4755_v44 = vsel %vm4745_vm14, %v4741_v36, 1326507024 }
 0x28c   :  { %v4708_v51 = vstv %s10541_s16  ;;  %v6559_v43 = vadd.s32 4294967169, %v4921_v48  ;;  %v13150_v18 = vand.u32 2147483647, %v13149_v50  ;;  %v4344_v17 = vmul.f32 %v4343_v54, %v4341_v23  ;;  %v6768_v61 = vpop.eup %6767 }
 0x28d   :  { %vm4743_vm11 = vcmp.lt.s32.totalorder %v10516_v37, 2  ;;  %v4750_v22 = vsel %vm4742_vm5, %v10547_v62, %v10549_v42  ;;  %v4752_v21 = vsel %vm4744_vm0, %v4735_v47, %v4751_v53  ;;  %vm3939_vm9 = vweird.f32 %v13053_v11  ;;  %v6770_v40 = vpop.eup %6769  ;;  %v13164_v37 = vld [vmem:[#allocation20_spill] sm:$0xff] }
 0x28e   :  { %vm10565_vm8 = vcmp.le.f32.partialorder %v13150_v18, 0.7853982  ;;  %vm4045_vm12 = vcmp.lt.s32.totalorder %v10506_v59, 2  ;;  %vm4252_vm6 = vcmp.lt.s32.totalorder %v10551_v45, 2  ;;  %vm4253_vm3 = vcmp.eq.s32.totalorder %v10551_v45, 0 }
 0x28f   :  { %v4754_v54 = vsel %vm4742_vm5, %v10549_v42, %v4735_v47  ;;  %v4756_v23 = vsel %vm4744_vm0, %v4738_v20, %v4755_v44  ;;  %v3944_v36 = vsel %vm3942_vm4, %v6764_v5, %v3943_v0  ;;  %v3947_v48 = vsel %vm3945_vm1, %v3946_v38, %v6766_v7 }
 0x290   :  { %v10590_v53 = vshll.u32 %v4718_v33, 8  ;;  %v4051_v10 = vsel %vm4049_vm7, %v3946_v38, %v6766_v7  ;;  %vm4256_vm13 = vcmp.eq.s32.totalorder %v10551_v45, 2  ;;  %v10596_v29 = vadd.f32 %v4708_v51, %v4707_v27 }
 0x291   :  { %v4753_v20 = vsel %vm4743_vm11, %v4750_v22, %v4752_v21  ;;  %v4048_v44 = vsel %vm4046_vm10, %v6764_v5, %v3943_v0  ;;  %vm4146_vm4 = vweird.f32 %v13118_v2  ;;  %v4345_v35 = vxor.u32 2147483648, %v4344_v17 }
 0x292   :  { %13153 = vst [vmem:[#allocation22_spill] sm:$0xff] %v10596_v29  ;;  %v4757_v33 = vsel %vm4743_vm11, %v4754_v54, %v4756_v23  ;;  %v4927_v18 = vadd.s32 1, %v6559_v43  ;;  %v3948_v7 = vsel %vm3941_vm15, %v3944_v36, %v3947_v48  ;;  %v4150_v38 = vxor.u32 2147483648, %v6770_v40  ;;  %v13158_v48 = vld [vmem:[#allocation76_spill] sm:$0xff] }
 0x293   :  { %v4153_v34 = vxor.u32 2147483648, %v6768_v61  ;;  %v4347_v27 = vsub.s32 4, %v10253_v32  ;;  %v4726_v51 = vshrl.u32 %v13019_v15, %v10488_v55  ;;  %v13154_v0 = vand.u32 2147483647, %v10499_v49 }
 0x294   :  { %v10611_v22 = vmul.u32.u64.low %v10590_v53, %v4753_v20  ;;  %v10612_v5 = vmul.u32.u64.high %v10590_v53, %v4753_v20, %v10611_v22  ;;  %v4255_v43 = vsel %vm4253_vm3, %v6768_v61, %v4150_v38  ;;  %v4346_v55 = vsel %vm4263_vm2, %v4345_v35, %v4344_v17 }
 0x295   :  { %v4924_v21 = vand.u32 8388607, %v13154_v0  ;;  %v4258_v57 = vsel %vm4256_vm13, %v4153_v34, %v6770_v40  ;;  %v10621_v54 = vmul.u32.u64.low %v10590_v53, %v4757_v33  ;;  %v10622_v23 = vmul.u32.u64.high %v10590_v53, %v4757_v33, %v10621_v54 }
 0x296   :  { %v4747_v36 = vsel %vm4745_vm14, %v4735_v47, 2102212464  ;;  %vm4928_vm1 = vcmp.gt.s32.totalorder %v4927_v18, 0  ;;  %vm13155_vm10 = vcmp.eq.s32.totalorder %v10543_v3, 0  ;;  %vm13156_vm15 = vcmp.eq.s32.totalorder %v10543_v3, 2  ;;  %v13157_v47 = vld [vmem:[#allocation13_spill] sm:$0xff] }
 0x297   :  { %v4151_v20 = vsel %vm13155_vm10, %v6768_v61, %v4150_v38  ;;  %v4154_v0 = vsel %vm13156_vm15, %v4153_v34, %v6770_v40  ;;  %v4348_v33 = vsel %vm4263_vm2, %v4347_v27, %v10253_v32  ;;  %v5127_v54 = vand.u32 2139095040, %v10596_v29 }
 0x298   :  { %v3817_v35 = vadd.f32 %v10451_v24, %v10475_v56  ;;  %v3823_v17 = vadd.f32 %v13157_v47, %v10490_v25  ;;  %v3830_v49 = vadd.f32 %v13158_v48, %v10502_v30  ;;  %v4259_v61 = vsel %vm4252_vm6, %v4255_v43, %v4258_v57 }
 0x299   :  { %v4349_v34 = vsel %vm10565_vm8, %v13149_v50, %v4346_v55  ;;  %v4746_v32 = vsel %vm4742_vm5, %v4726_v51, %v10547_v62  ;;  %v4748_v24 = vsel %vm4744_vm0, %v10549_v42, %v4747_v36  ;;  %v4929_v56 = vsel %vm4928_vm1, %v4927_v18, 0  ;;  %v13162_v51 = vld [vmem:[#allocation72_spill] sm:$0xff] }
 0x29a   :  { %v3949_v25 = vsel %vm3939_vm9, nan, %v3948_v7  ;;  %v4052_v30 = vsel %vm4045_vm12, %v4048_v44, %v4051_v10  ;;  %vm13159_vm7 = vcmp.lt.s32.totalorder %v10543_v3, 2  ;;  %v4350_v40 = vsel %vm10565_vm8, 0, %v4348_v33 }
 0x29b   :  { %v4155_v45 = vsel %vm13159_vm7, %v4151_v20, %v4154_v0  ;;  %v4260_v62 = vsel %vm4146_vm4, nan, %v4259_v61  ;;  %v4925_v38 = vor.u32 8388608, %v4924_v21  ;;  %v5128_v27 = vshrl.u32 %v5127_v54, 23 }
 0x29c   :  { %v13160_v42 = vand.u32 2147483647, %v10596_v29  ;;  %6771 = vcosq.f32 %v4349_v34  ;;  %v4749_v59 = vsel %vm4743_vm11, %v4746_v32, %v4748_v24  ;;  %v4768_v10 = vadd.s32 1, %v10612_v5 }
 0x29d   :  { %v10671_v3 = vand.u32 31, %v4929_v56  ;;  %v4156_v8 = vsel %vm4146_vm4, nan, %v4155_v45  ;;  %6773 = vsinq.f32 %v4349_v34  ;;  %v4457_v44 = vadd.s32 3, %v4350_v40 }
 0x29e   :  { %v10666_v18 = vand.u32 8388607, %v13160_v42  ;;  %vm4767_vm14 = vc.u32 %v10622_v23, %v10611_v22  ;;  %v10678_v7 = vsub.f32 %v10469_v52, %v10417_v14  ;;  %v10681_v21 = vsub.f32 %v13162_v51, %v3817_v35 }
 0x29f   :  { %v10684_v43 = vsub.f32 %v3823_v17, %v13164_v37  ;;  %v10686_v57 = vmul.f32 %v4260_v62, %v3949_v25  ;;  %v10689_v55 = vsub.f32 %v3830_v49, %v10494_v58  ;;  %v10693_v2 = vsel %vm3939_vm9, nan, %v4052_v30 }
 0x2a0   :  { %13161 = vst [vmem:[#allocation44_spill] sm:$0xff] %v10678_v7  ;;  %13163 = vst [vmem:[#allocation52_spill] sm:$0xff] %v10681_v21  ;;  %v4765_v36 = vmul.u32 %v10590_v53, %v4749_v59  ;;  %v10696_v48 = vshll.u32 %v4925_v38, 8  ;;  %v10698_v14 = vmul.f32 %v4156_v8, %v3949_v25  ;;  %v4769_v52 = vsel %vm4767_vm14, %v4768_v10, %v10612_v5 }
 0x2a1   :  { %v10702_v20 = vsub.s32 32, %v10671_v3  ;;  %v10704_v0 = vadd.s32 4294967169, %v5128_v27  ;;  %v10706_v33 = vand.u32 3, %v4350_v40  ;;  %v10708_v58 = vand.u32 3, %v4457_v44 }
 0x2a2   :  { %v10710_v11 = vshrl.u32 %v4929_v56, 5  ;;  %v4472_v53 = vmul.f32 %v10698_v14, %v10177_v28  ;;  %v4473_v54 = vmul.f32 %v10686_v57, %v10193_v26  ;;  %v10718_v5 = vadd.s32 %v10611_v22, %v10622_v23 }
 0x2a3   :  { %v10722_v35 = vshll.u32 %v13019_v15, %v10671_v3  ;;  %v4500_v47 = vmul.f32 %v10698_v14, %v10195_v31  ;;  %v4501_v17 = vmul.f32 %v10686_v57, %v10234_v4  ;;  %v10728_v61 = vadd.s32 %v4769_v52, %v4765_v36 }
 0x2a4   :  { %13165 = vst [vmem:[#allocation19_spill] sm:$0xff] %v10718_v5  ;;  %v10732_v34 = vshrl.u32 %v13019_v15, %v10702_v20  ;;  %v10736_v22 = vmul.f32 %v10698_v14, %v10193_v26  ;;  %v10740_v23 = vmul.f32 %v10686_v57, %v10177_v28  ;;  %v10744_v32 = vmul.f32 %v10698_v14, %v10318_v6 }
 0x2a5   :  { %v10748_v24 = vshrl.u32 %v13146_v16, %v10702_v20  ;;  %v10752_v56 = vmul.f32 %v10686_v57, %v10366_v60  ;;  %v10756_v25 = vmul.f32 %v10698_v14, %v10366_v60  ;;  %v4528_v30 = vmul.f32 %v10698_v14, %v10262_v12 }
 0x2a6   :  { %v4529_v45 = vmul.f32 %v10686_v57, %v10265_v39  ;;  %vm4356_vm2 = vcmp.eq.s32.totalorder %v10706_v33, 0  ;;  %vm4359_vm5 = vcmp.eq.s32.totalorder %v10706_v33, 2  ;;  %v10764_v40 = vadd.f32 %v4473_v54, %v4472_v53 }
 0x2a7   :  { %v10768_v62 = vmul.f32 %v10686_v57, %v10318_v6  ;;  %v10772_v38 = vmul.f32 %v10698_v14, %v10234_v4  ;;  %v10776_v27 = vmul.f32 %v10686_v57, %v10195_v31  ;;  %vm4460_vm0 = vcmp.eq.s32.totalorder %v10708_v58, 0 }
 0x2a8   :  { %vm4463_vm3 = vcmp.eq.s32.totalorder %v10708_v58, 2  ;;  %v10780_v42 = vadd.f32 %v4501_v17, %v4500_v47  ;;  %v10784_v59 = vmul.f32 %v10698_v14, %v10374_v13  ;;  %v10788_v10 = vmul.f32 %v10686_v57, %v10398_v63 }
 0x2a9   :  { %13166 = vst [vmem:[#allocation35_spill] sm:$0xff] %v10772_v38  ;;  %v10792_v8 = vmul.f32 %v10698_v14, %v10398_v63  ;;  %v10796_v44 = vmul.f32 %v10686_v57, %v10374_v13  ;;  %v10800_v51 = vmul.f32 %v10698_v14, %v10265_v39  ;;  %v10804_v37 = vmul.f32 %v10686_v57, %v10262_v12  ;;  %v6772_v52 = vpop.eup %6771 }
 0x2aa   :  { %13167 = vst [vmem:[#allocation60_spill] sm:$0xff] %v10788_v10  ;;  %v10808_v36 = vmul.f32 %v10698_v14, %v10413_v46  ;;  %vm4355_vm6 = vcmp.lt.s32.totalorder %v10706_v33, 2  ;;  %v10811_v53 = vadd.f32 %v4529_v45, %v4528_v30  ;;  %v10815_v54 = vmul.f32 %v10686_v57, %v10443_v19  ;;  %v6774_v49 = vpop.eup %6773 }
 0x2ab   :  { %13168 = vst [vmem:[#allocation16_spill] sm:$0xff] %v10800_v51  ;;  %13169 = vst [vmem:[#allocation12_spill] sm:$0xff] %v10804_v37  ;;  %v4556_v47 = vmul.f32 %v10698_v14, %v10277_v9  ;;  %v4557_v17 = vmul.f32 %v10686_v57, %v10307_v41  ;;  %vm4459_vm8 = vcmp.lt.s32.totalorder %v10708_v58, 2  ;;  %v10824_v29 = vmul.f32 %v10698_v14, %v10443_v19 }
 0x2ac   :  { %13170 = vst [vmem:[#allocation48_spill] sm:$0xff] %v10808_v36  ;;  %13171 = vst [vmem:[#allocation50_spill] sm:$0xff] %v10811_v53  ;;  %v10828_v30 = vmul.f32 %v10686_v57, %v10413_v46  ;;  %v10832_v45 = vmul.f32 %v10698_v14, %v10307_v41  ;;  %v10836_v5 = vmul.f32 %v10686_v57, %v10277_v9  ;;  %v13179_v36 = vld [vmem:[#allocation17_spill] sm:$0xff]  ;;  %vm4353_vm11 = vweird.f32 %v13149_v50 }
 0x2ad   :  { %13172 = vst [vmem:[#allocation53_spill] sm:$0xff] %v10815_v54  ;;  %13173 = vst [vmem:[#allocation56_spill] sm:$0xff] %v10824_v29  ;;  %v10840_v54 = vmul.f32 %v10698_v14, %v10483_v1  ;;  %v10844_v51 = vmul.f32 %v10686_v57, %v10681_v21  ;;  %v4584_v29 = vmul.f32 %v10698_v14, %v13179_v36  ;;  %v4357_v38 = vxor.u32 2147483648, %v6774_v49 }
 0x2ae   :  { %13174 = vst [vmem:[#allocation29_spill] sm:$0xff] %v10828_v30  ;;  %13175 = vst [vmem:[#allocation9_spill] sm:$0xff] %v10832_v45  ;;  %v13180_v30 = vld [vmem:[#allocation24_spill] sm:$0xff]  ;;  %v10853_v45 = vmul.f32 %v10698_v14, %v10681_v21  ;;  %v4360_v53 = vxor.u32 2147483648, %v6772_v52  ;;  %v10863_v37 = vadd.f32 %v4557_v17, %v4556_v47  ;;  %v13190_v21 = vld [vmem:[#allocation43_spill] sm:$0xff]  ;;  %vm4949_vm9 = vcmp.lt.s32.totalorder %v10710_v11, 1 }
 0x2af   :  { %13176 = vst [vmem:[#allocation32_spill] sm:$0xff] %v10836_v5  ;;  %13177 = vst [vmem:[#allocation51_spill] sm:$0xff] %v10840_v54  ;;  %v4585_v10 = vmul.f32 %v10686_v57, %v13180_v30  ;;  %v10857_v5 = vmul.f32 %v10686_v57, %v10483_v1  ;;  %v13183_v54 = vld [vmem:[#allocation25_spill] sm:$0xff]  ;;  %v10867_v39 = vmul.f32 %v10698_v14, %v13180_v30  ;;  %v13188_v1 = vld [vmem:[#allocation15_spill] sm:$0xff]  ;;  %vm4950_vm12 = vcmp.lt.s32.totalorder %v10710_v11, 2 }
 0x2b0   :  { %13178 = vst [vmem:[#allocation57_spill] sm:$0xff] %v10844_v51  ;;  %13181 = vst [vmem:[#allocation59_spill] sm:$0xff] %v10853_v45  ;;  %v4612_v41 = vmul.f32 %v10698_v14, %v13183_v54  ;;  %v13184_v51 = vld [vmem:[#allocation38_spill] sm:$0xff]  ;;  %v10871_v45 = vmul.f32 %v10686_v57, %v13179_v36  ;;  %v10879_v12 = vmul.f32 %v10686_v57, %v13190_v21  ;;  %vm4951_vm13 = vcmp.lt.s32.totalorder %v10710_v11, 3 }
 0x2b1   :  { %13182 = vst [vmem:[#allocation28_spill] sm:$0xff] %v10857_v5  ;;  %v4613_v9 = vmul.f32 %v10686_v57, %v13184_v51  ;;  %13185 = vst [vmem:[#allocation67_spill] sm:$0xff] %v10863_v37  ;;  %v10875_v5 = vmul.f32 %v10698_v14, %v13188_v1  ;;  %v10883_v47 = vmul.f32 %v10698_v14, %v13190_v21  ;;  %vm4952_vm4 = vcmp.lt.s32.totalorder %v10710_v11, 4 }
 0x2b2   :  { %13186 = vst [vmem:[#allocation63_spill] sm:$0xff] %v10867_v39  ;;  %13187 = vst [vmem:[#allocation55_spill] sm:$0xff] %v10871_v45  ;;  %v10885_v17 = vadd.f32 %v4585_v10, %v4584_v29  ;;  %v10889_v39 = vmul.f32 %v10686_v57, %v13188_v1  ;;  %v10893_v45 = vmul.f32 %v10698_v14, %v13184_v51  ;;  %v13200_v29 = vld [vmem:[#allocation23_spill] sm:$0xff]  ;;  %v13208_v1 = vmov 2102212464  }
 0x2b3   :  { %13189 = vst [vmem:[#allocation61_spill] sm:$0xff] %v10875_v5  ;;  %13191 = vst [vmem:[#allocation58_spill] sm:$0xff] %v10879_v12  ;;  %v10897_v5 = vmul.f32 %v10686_v57, %v13183_v54  ;;  %v10899_v30 = vadd.f32 %v4613_v9, %v4612_v41  ;;  %v13198_v12 = vld [vmem:[#allocation49_spill] sm:$0xff]  ;;  %v10907_v10 = vmul.f32 %v10686_v57, %v13200_v29  ;;  %v13203_v41 = vld [vmem:[#allocation14_spill] sm:$0xff] }
 0x2b4   :  { %13192 = vst [vmem:[#allocation66_spill] sm:$0xff] %v10883_v47  ;;  %13193 = vst [vmem:[#allocation64_spill] sm:$0xff] %v10885_v17  ;;  %v10903_v36 = vmul.f32 %v10698_v14, %v13198_v12  ;;  %v4361_v9 = vsel %vm4359_vm5, %v4360_v53, %v6774_v49  ;;  %v10928_v51 = vmul.f32 %v10686_v57, %v13198_v12 }
 0x2b5   :  { %13194 = vst [vmem:[#allocation70_spill] sm:$0xff] %v10889_v39  ;;  %13195 = vst [vmem:[#allocation31_spill] sm:$0xff] %v10893_v45  ;;  %v10911_v39 = vmul.f32 %v10698_v14, %v13200_v29  ;;  %v4358_v45 = vsel %vm4356_vm2, %v6772_v52, %v4357_v38  ;;  %v4937_v47 = vshll.u32 %v13146_v16, %v10671_v3  ;;  %v13207_v29 = vmov 2131351028  }
 0x2b6   :  { %13196 = vst [vmem:[#allocation26_spill] sm:$0xff] %v10897_v5  ;;  %13197 = vst [vmem:[#allocation27_spill] sm:$0xff] %v10899_v30  ;;  %v4640_v30 = vmul.f32 %v10698_v14, %v13203_v41  ;;  %v4938_v17 = vshrl.u32 %v13207_v29, %v10702_v20  ;;  %v10955_v12 = vmul.f32 %v10686_v57, %v10678_v7 }
 0x2b7   :  { %13199 = vst [vmem:[#allocation68_spill] sm:$0xff] %v10903_v36  ;;  %13201 = vst [vmem:[#allocation62_spill] sm:$0xff] %v10907_v10  ;;  %v13204_v36 = vld [vmem:[#allocation39_spill] sm:$0xff]  ;;  %v4462_v10 = vsel %vm4460_vm0, %v6772_v52, %v4357_v38  ;;  %v4943_v38 = vshll.u32 %v13208_v1, %v10671_v3  ;;  %v13209_v52 = vmov 920167782   ;;  %v4940_v33 = vshll.u32 %v13207_v29, %v10671_v3 }
 0x2b8   :  { %13202 = vst [vmem:[#allocation65_spill] sm:$0xff] %v10911_v39  ;;  %v4641_v5 = vmul.f32 %v10686_v57, %v13204_v36  ;;  %v4465_v39 = vsel %vm4463_vm3, %v4360_v53, %v6774_v49  ;;  %13205 = vst [vmem:[#allocation36_spill] sm:$0xff] %v10928_v51  ;;  %v10932_v54 = vmul.f32 %v10698_v14, %v13204_v36  ;;  %v13211_v51 = vld [vmem:[#allocation11_spill] sm:$0xff] }
 0x2b9   :  { %v4944_v49 = vshrl.u32 %v13209_v52, %v10702_v20  ;;  %v4362_v53 = vsel %vm4355_vm6, %v4358_v45, %v4361_v9  ;;  %v10951_v36 = vmul.f32 %v10698_v14, %v13211_v51  ;;  %13213 = vst [vmem:[#allocation21_spill] sm:$0xff] %v10955_v12  ;;  %v4466_v21 = vsel %vm4459_vm8, %v4462_v10, %v4465_v39  ;;  %v13217_v12 = vld [vmem:[#allocation46_spill] sm:$0xff] }
 0x2ba   :  { %13206 = vst [vmem:[#allocation69_spill] sm:$0xff] %v10932_v54  ;;  %v10947_v54 = vmul.f32 %v10686_v57, %v13203_v41  ;;  %v10959_v37 = vadd.f32 %v4641_v5, %v4640_v30  ;;  %v4941_v45 = vshrl.u32 %v13208_v1, %v10702_v20  ;;  %v10967_v9 = vmul.f32 %v10698_v14, %v10678_v7  ;;  %v13218_v41 = vld [vmem:[#allocation54_spill] sm:$0xff] }
 0x2bb   :  { %13212 = vst [vmem:[#allocation75_spill] sm:$0xff] %v10951_v36  ;;  %v10971_v36 = vmul.f32 %v10686_v57, %v13211_v51  ;;  %v4668_v58 = vmul.f32 %v10698_v14, %v13217_v12  ;;  %v4936_v39 = vor.u32 %v10748_v24, %v10722_v35  ;;  %v4363_v5 = vsel %vm4353_vm11, nan, %v4362_v53 }
 0x2bc   :  { %13210 = vst [vmem:[#allocation30_spill] sm:$0xff] %v10947_v54  ;;  %13214 = vst [vmem:[#allocation18_spill] sm:$0xff] %v10959_v37  ;;  %v4939_v30 = vor.u32 %v4938_v17, %v4937_v47  ;;  %v4945_v10 = vor.u32 %v4944_v49, %v4943_v38  ;;  %v4946_v37 = vshll.u32 %v13209_v52, %v10671_v3  ;;  %v4771_v54 = vadd.s32 536870912, %v10728_v61 }
 0x2bd   :  { %13215 = vst [vmem:[#allocation77_spill] sm:$0xff] %v10967_v9  ;;  %13216 = vst [vmem:[#allocation71_spill] sm:$0xff] %v10971_v36  ;;  %v4467_v9 = vsel %vm4353_vm11, nan, %v4466_v21  ;;  %v4669_v36 = vmul.f32 %v10686_v57, %v13218_v41  ;;  %v13219_v51 = vmov 1326507024   ;;  %v10990_v35 = vmul.f32 %v10698_v14, %v13218_v41 }
 0x2be   :  { %v4947_v7 = vshrl.u32 %v13219_v51, %v10702_v20  ;;  %v10994_v24 = vmul.f32 %v10686_v57, %v13217_v12  ;;  %v10998_v50 = vmul.f32 %v10698_v14, %v10684_v43  ;;  %v4942_v3 = vor.u32 %v4941_v45, %v4940_v33 }
 0x2bf   :  { %13220 = vst [vmem:[#allocation73_spill] sm:$0xff] %v10990_v35  ;;  %v11001_v21 = vmul.f32 %v4363_v5, %v10693_v2  ;;  %v11006_v20 = vmul.f32 %v4467_v9, %v10693_v2  ;;  %v4957_v38 = vsel %vm4949_vm9, %v4936_v39, %v4939_v30  ;;  %v4958_v49 = vsel %vm4952_vm4, %v4945_v10, 920167782 }
 0x2c0   :  { %13221 = vst [vmem:[#allocation10_spill] sm:$0xff] %v10998_v50  ;;  %v4948_v47 = vor.u32 %v4947_v7, %v4946_v37  ;;  %v4954_v17 = vsel %vm4952_vm4, %v4942_v3, 2102212464  ;;  %v11014_v53 = vadd.f32 %v4669_v36, %v4668_v58  ;;  %v11018_v7 = vmul.f32 %v10686_v57, %v10689_v55 }
 0x2c1   :  { %v11022_v37 = vmul.f32 %v10698_v14, %v10689_v55  ;;  %v11024_v2 = vshrl.u32 %v4771_v54, 30  ;;  %v4953_v33 = vsel %vm4949_vm9, %v10732_v34, %v4936_v39  ;;  %v4955_v45 = vsel %vm4951_vm13, %v4939_v30, %v4954_v17 }
 0x2c2   :  { %13222 = vst [vmem:[#allocation74_spill] sm:$0xff] %v11018_v7  ;;  %v4959_v36 = vsel %vm4951_vm13, %v4942_v3, %v4958_v49  ;;  %v4961_v9 = vsel %vm4949_vm9, %v4939_v30, %v4942_v3  ;;  %v4475_v58 = vmul.f32 %v11006_v20, %v10366_v60  ;;  %v4481_v14 = vmul.f32 %v11001_v21, %v10366_v60 }
 0x2c3   :  { %v4960_v54 = vsel %vm4950_vm12, %v4957_v38, %v4959_v36  ;;  %v4962_v34 = vsel %vm4952_vm4, %v4948_v47, 1326507024  ;;  %v4486_v39 = vmul.f32 %v11001_v21, %v10177_v28  ;;  %v4487_v5 = vmul.f32 %v11006_v20, %v10193_v26 }
 0x2c4   :  { %v4493_v30 = vmul.f32 %v11001_v21, %v10193_v26  ;;  %v4963_v3 = vsel %vm4951_vm13, %v4945_v10, %v4962_v34  ;;  %v4956_v60 = vsel %vm4950_vm12, %v4953_v33, %v4955_v45  ;;  %v11062_v49 = vmul.f32 %v10686_v57, %v10684_v43 }
 0x2c5   :  { %v4964_v17 = vsel %vm4950_vm12, %v4961_v9, %v4963_v3  ;;  %v11056_v47 = vmul.u32.u64.low %v10696_v48, %v4960_v54  ;;  %v11057_v38 = vmul.u32.u64.high %v10696_v48, %v4960_v54, %v11056_v47  ;;  %v4773_v26 = vshll.u32 %v11024_v2, 30 }
 0x2c6   :  { %13223 = vst [vmem:[#allocation33_spill] sm:$0xff] %v11062_v49  ;;  %v11066_v36 = vmul.u32.u64.low %v10696_v48, %v4964_v17  ;;  %v11067_v10 = vmul.u32.u64.high %v10696_v48, %v4964_v17, %v11066_v36  ;;  %v4482_v33 = vadd.f32 %v4481_v14, %v10740_v23  ;;  %v4483_v11 = vmul.f32 %v11006_v20, %v10318_v6 }
 0x2c7   :  { %v5134_v9 = vadd.s32 1, %v10704_v0  ;;  %v4476_v54 = vadd.f32 %v4475_v58, %v10764_v40  ;;  %v4477_v57 = vmul.f32 %v11001_v21, %v10318_v6  ;;  %v4503_v34 = vmul.f32 %v11006_v20, %v10398_v63 }
 0x2c8   :  { %v4972_v3 = vmul.u32 %v10696_v48, %v4956_v60  ;;  %v4488_v17 = vadd.f32 %v4487_v5, %v4486_v39  ;;  %v4495_v23 = vadd.f32 %v10756_v25, %v4493_v30  ;;  %v4975_v14 = vadd.s32 1, %v11057_v38 }
 0x2c9   :  { %vm5135_vm1 = vcmp.gt.s32.totalorder %v5134_v9, 0  ;;  %v11084_v36 = vmul.f32 %v11006_v20, %v10177_v28  ;;  %v4505_v0 = vmul.f32 %v11001_v21, %v10374_v13  ;;  %v4509_v6 = vmul.f32 %v11001_v21, %v10398_v63 }
 0x2ca   :  { %vm4974_vm10 = vc.u32 %v11067_v10, %v11056_v47  ;;  %v4484_v48 = vadd.f32 %v4483_v11, %v4482_v33  ;;  %v11093_v40 = vsub.s32 %v10728_v61, %v4773_v26  ;;  %v5136_v58 = vsel %vm5135_vm1, %v5134_v9, 0 }
 0x2cb   :  { %v4976_v25 = vsel %vm4974_vm10, %v4975_v14, %v11057_v38  ;;  %v11096_v39 = vsub.f32 %v4476_v54, %v4477_v57  ;;  %v4511_v28 = vmul.f32 %v11006_v20, %v10374_v13  ;;  %v5138_v30 = vand.u32 31, %v5136_v58 }
 0x2cc   :  { %v4977_v5 = vadd.s32 %v4976_v25, %v4972_v3  ;;  %v4490_v60 = vadd.f32 %v10744_v32, %v4488_v17  ;;  %v11102_v63 = vadd.f32 %v10768_v62, %v4495_v23  ;;  %v4504_v33 = vadd.f32 %v4503_v34, %v10780_v42 }
 0x2cd   :  { %13224 = vst [vmem:[#allocation13_spill] sm:$0xff] %v11096_v39  ;;  %v4514_v61 = vmul.f32 %v11001_v21, %v10195_v31  ;;  %v4510_v38 = vadd.f32 %v4509_v6, %v10776_v27  ;;  %v4515_v26 = vmul.f32 %v11006_v20, %v10234_v4  ;;  %v5139_v9 = vsub.s32 32, %v5138_v30 }
 0x2ce   :  { %v4978_v11 = vadd.s32 536870912, %v4977_v5  ;;  %v11111_v13 = vsub.f32 %v10736_v22, %v4484_v48  ;;  %v4521_v32 = vmul.f32 %v11001_v21, %v10234_v4  ;;  %v4776_v62 = vsub.s32 0, %v11093_v40 }
 0x2cf   :  { %v11116_v54 = vshrl.u32 %v5136_v58, 5  ;;  %v5141_v57 = vshll.u32 %v13019_v15, %v5138_v30  ;;  %v5144_v27 = vshll.u32 %v13146_v16, %v5138_v30  ;;  %v5147_v34 = vshll.u32 %v13207_v29, %v5138_v30 }
 0x2d0   :  { %13225 = vst [vmem:[#allocation76_spill] sm:$0xff] %v11111_v13  ;;  %v11118_v42 = vshrl.u32 %v4978_v11, 30  ;;  %v5142_v3 = vshrl.u32 %v13146_v16, %v5139_v9  ;;  %v5145_v22 = vshrl.u32 %v13207_v29, %v5139_v9  ;;  %v5150_v17 = vshll.u32 %v13208_v1, %v5138_v30 }
 0x2d1   :  { %v5151_v4 = vshrl.u32 %v13209_v52, %v5139_v9  ;;  %v5148_v14 = vshrl.u32 %v13208_v1, %v5139_v9  ;;  %v5153_v6 = vshll.u32 %v13209_v52, %v5138_v30  ;;  %v5154_v48 = vshrl.u32 %v13219_v51, %v5139_v9 }
 0x2d2   :  { %v4980_v23 = vshll.u32 %v11118_v42, 30  ;;  %v11132_v25 = vsub.f32 %v4490_v60, %v10752_v56  ;;  %v11134_v58 = vsub.f32 %v4504_v33, %v4505_v0  ;;  %v4526_v11 = vmul.f32 %v11006_v20, %v10195_v31 }
 0x2d3   :  { %v6552_v45 = vmin.u32 %v4776_v62, %v11093_v40  ;;  %v4512_v13 = vadd.f32 %v4511_v28, %v4510_v38  ;;  %v4516_v39 = vadd.f32 %v4515_v26, %v4514_v61  ;;  %v4523_v7 = vadd.f32 %v10792_v8, %v4521_v32 }
 0x2d4   :  { %13226 = vst [vmem:[#allocation72_spill] sm:$0xff] %v11132_v25  ;;  %v11140_v35 = vsub.s32 %v4977_v5, %v4980_v23  ;;  %v4531_v30 = vmul.f32 %v11006_v20, %v10443_v19  ;;  %v5143_v49 = vor.u32 %v5142_v3, %v5141_v57  ;;  %v5146_v50 = vor.u32 %v5145_v22, %v5144_v27  ;;  %v13228_v27 = vld [vmem:[#allocation40_spill] sm:$0xff]  ;;  %v13229_v3 = vld [vmem:[#allocation42_spill] sm:$0xff] }
 0x2d5   :  { %v5152_v56 = vor.u32 %v5151_v4, %v5150_v17  ;;  %v5149_v60 = vor.u32 %v5148_v14, %v5147_v34  ;;  %v5155_v33 = vor.u32 %v5154_v48, %v5153_v6  ;;  %vm5156_vm15 = vcmp.lt.s32.totalorder %v11116_v54, 1 }
 0x2d6   :  { %v4983_v0 = vsub.s32 0, %v11140_v35  ;;  %v4537_v31 = vmul.f32 %v11001_v21, %v10443_v19  ;;  %v4778_v28 = vclz %v6552_v45  ;;  %vm5158_vm7 = vcmp.lt.s32.totalorder %v11116_v54, 3 }
 0x2d7   :  { %vm5159_vm14 = vcmp.lt.s32.totalorder %v11116_v54, 4  ;;  %v4518_v8 = vadd.f32 %v10784_v59, %v4516_v39  ;;  %v4539_v5 = vmul.f32 %v11006_v20, %v10413_v46  ;;  %v5140_v38 = vshrl.u32 %v13019_v15, %v5139_v9 }
 0x2d8   :  { %v6560_v61 = vmin.u32 %v4983_v0, %v11140_v35  ;;  %vm5157_vm2 = vcmp.lt.s32.totalorder %v11116_v54, 2  ;;  %v5164_v19 = vsel %vm5156_vm15, %v5143_v49, %v5146_v50  ;;  %v5165_v45 = vsel %vm5159_vm14, %v5152_v56, 920167782 }
 0x2d9   :  { %v13227_v26 = vor.u32 8388608, %v10666_v18  ;;  %v5161_v62 = vsel %vm5159_vm14, %v5149_v60, 2102212464  ;;  %v5166_v59 = vsel %vm5158_vm7, %v5149_v60, %v5165_v45  ;;  %v5168_v39 = vsel %vm5156_vm15, %v5146_v50, %v5149_v60 }
 0x2da   :  { %v5169_v57 = vsel %vm5159_vm14, %v5155_v33, 1326507024  ;;  %v4525_v9 = vadd.f32 %v10796_v44, %v4523_v7  ;;  %v4542_v34 = vmul.f32 %v11001_v21, %v13228_v27  ;;  %v4543_v22 = vmul.f32 %v11006_v20, %v13229_v3 }
 0x2db   :  { %v5172_v32 = vshll.u32 %v13227_v26, 8  ;;  %v6553_v17 = vadd.s32 4294967294, %v4778_v28  ;;  %v4985_v4 = vclz %v6560_v61  ;;  %v5160_v18 = vsel %vm5156_vm15, %v5140_v38, %v5143_v49  ;;  %v13230_v49 = vld [vmem:[#allocation12_spill] sm:$0xff]  ;;  %v13234_v26 = vld [vmem:[#allocation35_spill] sm:$0xff] }
 0x2dc   :  { %v5167_v23 = vsel %vm5157_vm2, %v5164_v19, %v5166_v59  ;;  %v5170_v14 = vsel %vm5158_vm7, %v5152_v56, %v5169_v57  ;;  %v5162_v44 = vsel %vm5158_vm7, %v5146_v50, %v5161_v62  ;;  %v4538_v0 = vadd.f32 %v4537_v31, %v13230_v49  ;;  %v13232_v50 = vld [vmem:[#allocation50_spill] sm:$0xff]  ;;  %v13233_v19 = vld [vmem:[#allocation52_spill] sm:$0xff] }
 0x2dd   :  { %v5171_v7 = vsel %vm5157_vm2, %v5168_v39, %v5170_v14  ;;  %v11183_v6 = vmul.u32.u64.low %v5172_v32, %v5167_v23  ;;  %v11184_v48 = vmul.u32.u64.high %v5172_v32, %v5167_v23, %v11183_v6  ;;  %v4549_v60 = vmul.f32 %v11001_v21, %v13229_v3  ;;  %v13235_v57 = vld [vmem:[#allocation60_spill] sm:$0xff]  ;;  %v13241_v14 = vld [vmem:[#allocation41_spill] sm:$0xff] }
 0x2de   :  { %v11190_v33 = vmul.u32.u64.low %v5172_v32, %v5171_v7  ;;  %v11191_v56 = vmul.u32.u64.high %v5172_v32, %v5171_v7, %v11190_v33  ;;  %v11195_v28 = vsub.f32 %v11102_v63, %v11084_v36  ;;  %v4532_v61 = vadd.f32 %v4531_v30, %v13232_v50  ;;  %v13238_v3 = vld [vmem:[#allocation56_spill] sm:$0xff]  ;;  %v13243_v7 = vld [vmem:[#allocation45_spill] sm:$0xff] }
 0x2df   :  { %v4533_v38 = vmul.f32 %v11001_v21, %v10413_v46  ;;  %v4559_v45 = vmul.f32 %v11006_v20, %v13233_v19  ;;  %v11203_v31 = vsub.f32 %v13234_v26, %v4512_v13  ;;  %v4544_v62 = vadd.f32 %v4543_v22, %v4542_v34  ;;  %v13245_v50 = vld [vmem:[#allocation29_spill] sm:$0xff] }
 0x2e0   :  { %13231 = vst [vmem:[#allocation20_spill] sm:$0xff] %v11195_v28  ;;  %v6561_v59 = vadd.s32 4294967294, %v4985_v4  ;;  %v5163_v39 = vsel %vm5157_vm2, %v5160_v18, %v5162_v44  ;;  %v11209_v36 = vsub.f32 %v4518_v8, %v13235_v57  ;;  %v4554_v63 = vmul.f32 %v11006_v20, %v13228_v27  ;;  %v13239_v4 = vld [vmem:[#allocation67_spill] sm:$0xff]  ;;  %v13240_v27 = vld [vmem:[#allocation48_spill] sm:$0xff]  ;;  %v13247_v57 = vld [vmem:[#allocation53_spill] sm:$0xff] }
 0x2e1   :  { %vm6554_vm5 = vcmp.lt.s32.totalorder %v6553_v17, 0  ;;  %v5182_v46 = vadd.s32 1, %v11184_v48  ;;  %v11214_v30 = vsub.f32 %v4525_v9, %v4526_v11  ;;  %v4540_v13 = vadd.f32 %v4539_v5, %v4538_v0  ;;  %v13242_v5 = vld [vmem:[#allocation34_spill] sm:$0xff] }
 0x2e2   :  { %13236 = vst [vmem:[#allocation46_spill] sm:$0xff] %v11209_v36  ;;  %v4551_v34 = vadd.f32 %v13238_v3, %v4549_v60  ;;  %v4565_v54 = vmul.f32 %v11001_v21, %v13233_v19  ;;  %v11219_v22 = vsub.f32 %v4532_v61, %v4533_v38  ;;  %v4560_v8 = vadd.f32 %v4559_v45, %v13239_v4  ;;  %v13244_v60 = vld [vmem:[#allocation16_spill] sm:$0xff] }
 0x2e3   :  { %13237 = vst [vmem:[#allocation54_spill] sm:$0xff] %v11214_v30  ;;  %v5179_v18 = vmul.u32 %v5172_v32, %v5163_v39  ;;  %vm5181_vm0 = vc.u32 %v11191_v56, %v11183_v6  ;;  %v4546_v23 = vadd.f32 %v13240_v27, %v4544_v62  ;;  %v4561_v11 = vmul.f32 %v11001_v21, %v13241_v14  ;;  %v13246_v38 = vld [vmem:[#allocation32_spill] sm:$0xff] }
 0x2e4   :  { %v4781_v9 = vsel %vm6554_vm5, 0, %v6553_v17  ;;  %vm6562_vm3 = vcmp.lt.s32.totalorder %v6561_v59, 0  ;;  %v4570_v44 = vmul.f32 %v11001_v21, %v13242_v5  ;;  %v4571_v49 = vmul.f32 %v11006_v20, %v13243_v7  ;;  %v13261_v30 = vld [vmem:[#allocation28_spill] sm:$0xff] }
 0x2e5   :  { %v5183_v0 = vsel %vm5181_vm0, %v5182_v46, %v11184_v48  ;;  %v5563_v32 = vstv %s214_s19  ;;  %v11234_v33 = vsub.f32 %v13244_v60, %v4540_v13  ;;  %v4553_v61 = vadd.f32 %v13245_v50, %v4551_v34  ;;  %v13250_v46 = vld [vmem:[#allocation43_spill] sm:$0xff] }
 0x2e6   :  { %v4566_v19 = vadd.f32 %v4565_v54, %v13246_v38  ;;  %v4567_v17 = vmul.f32 %v11006_v20, %v13241_v14  ;;  %v4577_v45 = vmul.f32 %v11001_v21, %v13243_v7  ;;  %v4786_v26 = vsub.s32 4294967266, %v4781_v9  ;;  %v6808_v34 = vld [vmem:[%s12606_s2 + $0x50] sm:$0xff] }
 0x2e7   :  { %v4988_v62 = vsel %vm6562_vm3, 0, %v6561_v59  ;;  %v5184_v39 = vadd.s32 %v5183_v0, %v5179_v18  ;;  %v11243_v3 = vsub.f32 %v4546_v23, %v13247_v57  ;;  %v11245_v48 = vsub.f32 %v4560_v8, %v4561_v11  ;;  %v13252_v7 = vld [vmem:[#allocation15_spill] sm:$0xff] }
 0x2e8   :  { %v4587_v13 = vmul.f32 %v11006_v20, %v13250_v46  ;;  %v5564_v54 = vmul.f32 %v6808_v34, %v5563_v32  ;;  %v4572_v4 = vadd.f32 %v4571_v49, %v4570_v44  ;;  %v4582_v27 = vmul.f32 %v11006_v20, %v13242_v5  ;;  %v13253_v0 = vld [vmem:[#allocation59_spill] sm:$0xff]  ;;  %v13254_v32 = vld [vmem:[#allocation64_spill] sm:$0xff] }
 0x2e9   :  { %13248 = vst [vmem:[#allocation40_spill] sm:$0xff] %v11243_v3  ;;  %13249 = vst [vmem:[#allocation42_spill] sm:$0xff] %v11245_v48  ;;  %v5185_v14 = vadd.s32 536870912, %v5184_v39  ;;  %v5565_v59 = vstv %s216_s20  ;;  %v11254_v18 = vsub.f32 %v4553_v61, %v4554_v63  ;;  %v4568_v23 = vadd.f32 %v4567_v17, %v4566_v19  ;;  %v13255_v61 = vld [vmem:[#allocation51_spill] sm:$0xff]  ;;  %v13256_v17 = vld [vmem:[#allocation17_spill] sm:$0xff] }
 0x2ea   :  { %v4589_v8 = vmul.f32 %v11001_v21, %v13252_v7  ;;  %v4993_v11 = vsub.s32 4294967266, %v4988_v62  ;;  %v4579_v60 = vadd.f32 %v13253_v0, %v4577_v45  ;;  %v4782_v50 = vsub.s32 32, %v4781_v9  ;;  %v13257_v45 = vld [vmem:[#allocation24_spill] sm:$0xff]  ;;  %v13258_v0 = vld [vmem:[#allocation9_spill] sm:$0xff]  ;;  %v13262_v48 = vld [vmem:[#allocation55_spill] sm:$0xff] }
 0x2eb   :  { %13251 = vst [vmem:[#allocation12_spill] sm:$0xff] %v11254_v18  ;;  %v4787_v38 = vadd.s32 127, %v4786_v26  ;;  %v11259_v57 = vshrl.u32 %v5185_v14, 30  ;;  %v4588_v44 = vadd.f32 %v4587_v13, %v13254_v32  ;;  %v4593_v5 = vmul.f32 %v11001_v21, %v13250_v46 }
 0x2ec   :  { %v4595_v63 = vmul.f32 %v11006_v20, %v13252_v7  ;;  %v11266_v49 = vadd.f32 %v5565_v59, %v5564_v54  ;;  %v4574_v19 = vadd.f32 %v13255_v61, %v4572_v4  ;;  %v4598_v34 = vmul.f32 %v11001_v21, %v13256_v17  ;;  %v13260_v59 = vld [vmem:[#allocation19_spill] sm:$0xff] }
 0x2ed   :  { %v4599_v26 = vmul.f32 %v11006_v20, %v13257_v45  ;;  %v5187_v14 = vshll.u32 %v11259_v57, 30  ;;  %v11275_v13 = vsub.f32 %v13258_v0, %v4568_v23  ;;  %v4973_v46 = vadd.s32 %v11056_v47, %v11067_v10  ;;  %v13263_v0 = vld [vmem:[#allocation57_spill] sm:$0xff] }
 0x2ee   :  { %v4989_v32 = vsub.s32 32, %v4988_v62  ;;  %v4994_v7 = vadd.s32 127, %v4993_v11  ;;  %v4783_v54 = vshll.u32 %v11093_v40, %v4781_v9  ;;  %v4784_v4 = vshrl.u32 %v13260_v59, %v4782_v50  ;;  %v13265_v11 = vld [vmem:[#allocation23_spill] sm:$0xff]  ;;  %v13272_v59 = vld [vmem:[#allocation49_spill] sm:$0xff] }
 0x2ef   :  { %13259 = vst [vmem:[#allocation50_spill] sm:$0xff] %v11275_v13  ;;  %v4788_v61 = vshll.u32 %v4787_v38, 23  ;;  %v11281_v18 = vsub.s32 %v5184_v39, %v5187_v14  ;;  %v4581_v36 = vadd.f32 %v13261_v30, %v4579_v60  ;;  %v11284_v3 = vsub.f32 %v4588_v44, %v4589_v8 }
 0x2f0   :  { %v4594_v28 = vadd.f32 %v4593_v5, %v13262_v48  ;;  %v5576_v23 = vand.u32 2139095040, %v11266_v49  ;;  %v11289_v13 = vsub.f32 %v4574_v19, %v13263_v0  ;;  %v4600_v47 = vadd.f32 %v4599_v26, %v4598_v34  ;;  %v13268_v26 = vld [vmem:[#allocation66_spill] sm:$0xff]  ;;  %v13273_v0 = vld [vmem:[#allocation27_spill] sm:$0xff] }
 0x2f1   :  { %v4605_v10 = vmul.f32 %v11001_v21, %v13257_v45  ;;  %v5190_v40 = vsub.s32 0, %v11281_v18  ;;  %v4610_v9 = vmul.f32 %v11006_v20, %v13256_v17  ;;  %v4990_v30 = vshll.u32 %v11140_v35, %v4988_v62  ;;  %v13267_v45 = vld [vmem:[#allocation61_spill] sm:$0xff] }
 0x2f2   :  { %13264 = vst [vmem:[#allocation52_spill] sm:$0xff] %v11289_v13  ;;  %v4991_v39 = vshrl.u32 %v4973_v46, %v4989_v32  ;;  %v4995_v8 = vshll.u32 %v4994_v7, 23  ;;  %v4621_v48 = vmul.f32 %v11001_v21, %v13265_v11  ;;  %v4785_v60 = vor.u32 %v4784_v4, %v4783_v54  ;;  %v13269_v62 = vld [vmem:[#allocation25_spill] sm:$0xff]  ;;  %v13270_v46 = vld [vmem:[#allocation38_spill] sm:$0xff]  ;;  %v13282_v13 = vld [vmem:[#allocation11_spill] sm:$0xff] }
 0x2f3   :  { %v4789_v50 = vor.u32 4788187, %v4788_v61  ;;  %v6568_v38 = vmin.u32 %v5190_v40, %v11281_v18  ;;  %v11300_v44 = vsub.f32 %v4581_v36, %v4582_v27  ;;  %v4596_v5 = vadd.f32 %v4595_v63, %v4594_v28  ;;  %v13271_v63 = vld [vmem:[#allocation26_spill] sm:$0xff]  ;;  %v13274_v40 = vld [vmem:[#allocation44_spill] sm:$0xff] }
 0x2f4   :  { %v4615_v19 = vmul.f32 %v11006_v20, %v13265_v11  ;;  %v5577_v34 = vshrl.u32 %v5576_v23, 23  ;;  %v4602_v17 = vadd.f32 %v13267_v45, %v4600_v47  ;;  %v4607_v35 = vadd.f32 %v13268_v26, %v4605_v10  ;;  %v13275_v45 = vld [vmem:[#allocation37_spill] sm:$0xff] }
 0x2f5   :  { %13266 = vst [vmem:[#allocation35_spill] sm:$0xff] %v11300_v44  ;;  %v4626_v14 = vmul.f32 %v11001_v21, %v13269_v62  ;;  %v4627_v32 = vmul.f32 %v11006_v20, %v13270_v46  ;;  %v4633_v7 = vmul.f32 %v11001_v21, %v13270_v46  ;;  %v4992_v36 = vor.u32 %v4991_v39, %v4990_v30  ;;  %v13276_v39 = vld [vmem:[#allocation63_spill] sm:$0xff] }
 0x2f6   :  { %v4996_v27 = vor.u32 4788187, %v4995_v8  ;;  %v5192_v28 = vclz %v6568_v38  ;;  %v4622_v54 = vadd.f32 %v4621_v48, %v13271_v63  ;;  %v4623_v4 = vmul.f32 %v11006_v20, %v13272_v59  ;;  %v13278_v48 = vld [vmem:[#allocation70_spill] sm:$0xff] }
 0x2f7   :  { %v4790_v61 = vand.u32 2147483647, %v4789_v50  ;;  %v4792_v23 = vcvt.s32.f32 %v4785_v60  ;;  %v4616_v47 = vadd.f32 %v4615_v19, %v13273_v0  ;;  %v4617_v10 = vmul.f32 %v11001_v21, %v13272_v59  ;;  %v13279_v19 = vld [vmem:[#allocation65_spill] sm:$0xff]  ;;  %v13280_v0 = vld [vmem:[#allocation58_spill] sm:$0xff] }
 0x2f8   :  { %v4649_v11 = vmul.f32 %v11001_v21, %v13274_v40  ;;  %vm4712_vm6 = vcmp.lt.s32.totalorder %v13275_v45, 0  ;;  %v6575_v30 = vadd.s32 4294967169, %v5577_v34  ;;  %v11324_v8 = vsub.f32 %v13276_v39, %v4596_v5  ;;  %v13290_v39 = vld [vmem:[#allocation68_spill] sm:$0xff] }
 0x2f9   :  { %v4609_v38 = vadd.f32 %v13278_v48, %v4607_v35  ;;  %v4628_v50 = vadd.f32 %v4627_v32, %v4626_v14  ;;  %v4643_v60 = vmul.f32 %v11006_v20, %v13274_v40  ;;  %v4635_v26 = vadd.f32 %v13279_v19, %v4633_v7  ;;  %v13286_v40 = vld [vmem:[#allocation47_spill] sm:$0xff]  ;;  %v13287_v7 = vld [vmem:[#allocation30_spill] sm:$0xff] }
 0x2fa   :  { %13277 = vst [vmem:[#allocation60_spill] sm:$0xff] %v11324_v8  ;;  %v4997_v46 = vand.u32 2147483647, %v4996_v27  ;;  %v4999_v63 = vcvt.s32.f32 %v4992_v36  ;;  %v6569_v59 = vadd.s32 4294967294, %v5192_v28  ;;  %v11333_v34 = vsub.f32 %v4602_v17, %v13280_v0  ;;  %v13288_v36 = vld [vmem:[#allocation14_spill] sm:$0xff]  ;;  %v13289_v17 = vld [vmem:[#allocation39_spill] sm:$0xff] }
 0x2fb   :  { %v4624_v44 = vadd.f32 %v4623_v4, %v4622_v54  ;;  %v4651_v5 = vmul.f32 %v11006_v20, %v13282_v13  ;;  %v13283_v35 = vand.u32 2147483647, %v13275_v45  ;;  %v4793_v32 = vmul.f32 %v4792_v23, %v4790_v61 }
 0x2fc   :  { %13281 = vst [vmem:[#allocation56_spill] sm:$0xff] %v11333_v34  ;;  %vm4919_vm11 = vcmp.lt.s32.totalorder %v13286_v40, 0  ;;  %v4650_v27 = vadd.f32 %v4649_v11, %v13287_v7  ;;  %v4654_v28 = vmul.f32 %v11001_v21, %v13288_v36  ;;  %v4655_v54 = vmul.f32 %v11006_v20, %v13289_v17  ;;  %v13291_v11 = vld [vmem:[#allocation36_spill] sm:$0xff] }
 0x2fd   :  { %vm11339_vm8 = vcmp.le.f32.partialorder %v13283_v35, 0.7853982  ;;  %v5583_v4 = vadd.s32 1, %v6575_v30  ;;  %v4630_v48 = vadd.f32 %v13290_v39, %v4628_v50  ;;  %v4638_v19 = vmul.f32 %v11006_v20, %v13269_v62  ;;  %v13292_v35 = vld [vmem:[#allocation18_spill] sm:$0xff] }
 0x2fe   :  { %v4645_v61 = vmul.f32 %v11001_v21, %v13282_v13  ;;  %v4661_v23 = vmul.f32 %v11001_v21, %v13289_v17  ;;  %v4637_v0 = vadd.f32 %v13291_v11, %v4635_v26  ;;  %v4644_v30 = vadd.f32 %v4643_v60, %v13292_v35  ;;  %v13298_v17 = vld [vmem:[#allocation31_spill] sm:$0xff]  ;;  %v13300_v35 = vld [vmem:[#allocation62_spill] sm:$0xff] }
 0x2ff   :  { %v13293_v7 = vand.u32 2147483647, %v13286_v40  ;;  %v5000_v62 = vmul.f32 %v4999_v63, %v4997_v46  ;;  %vm6570_vm12 = vcmp.lt.s32.totalorder %v6569_v59, 0  ;;  %v11368_v13 = vsub.f32 %v4609_v38, %v4610_v9  ;;  %v13302_v46 = vld [vmem:[#allocation77_spill] sm:$0xff] }
 0x300   :  { %v11370_v39 = vsub.f32 %v4616_v47, %v4617_v10  ;;  %v11373_v34 = vsub.f32 %v13298_v17, %v4624_v44  ;;  %v4794_v8 = vxor.u32 2147483648, %v4793_v32  ;;  %v4652_v26 = vadd.f32 %v4651_v5, %v4650_v27 }
 0x301   :  { %vm11364_vm9 = vcmp.le.f32.partialorder %v13293_v7, 0.7853982  ;;  %13296 = vst [vmem:[#allocation67_spill] sm:$0xff] %v11368_v13  ;;  %v4656_v11 = vadd.f32 %v4655_v54, %v4654_v28  ;;  %v4671_v60 = vmul.f32 %v11006_v20, %v10689_v55  ;;  %vm5584_vm13 = vcmp.gt.s32.totalorder %v5583_v4, 0  ;;  %v13305_v54 = vld [vmem:[#allocation69_spill] sm:$0xff] }
 0x302   :  { %13297 = vst [vmem:[#allocation48_spill] sm:$0xff] %v11370_v39  ;;  %13299 = vst [vmem:[#allocation41_spill] sm:$0xff] %v11373_v34  ;;  %v11379_v7 = vsub.f32 %v4630_v48, %v13300_v35  ;;  %v4663_v63 = vadd.f32 %v13302_v46, %v4661_v23  ;;  %v4677_v9 = vmul.f32 %v11001_v21, %v10689_v55  ;;  %v11384_v47 = vsel %vm6570_vm12, 0, %v6569_v59 }
 0x303   :  { %v11387_v44 = vsub.f32 %v4637_v0, %v4638_v19  ;;  %v11389_v10 = vsub.f32 %v4644_v30, %v4645_v61  ;;  %v4666_v38 = vmul.f32 %v11006_v20, %v13288_v36  ;;  %v5001_v5 = vxor.u32 2147483648, %v5000_v62  ;;  %v13306_v19 = vld [vmem:[#allocation75_spill] sm:$0xff] }
 0x304   :  { %13301 = vst [vmem:[#allocation34_spill] sm:$0xff] %v11379_v7  ;;  %v4673_v27 = vmul.f32 %v11001_v21, %v10684_v43  ;;  %v4679_v28 = vmul.f32 %v11006_v20, %v10684_v43  ;;  %v4795_v55 = vsel %vm4712_vm6, %v4794_v8, %v4793_v32  ;;  %v5585_v59 = vsel %vm5584_vm13, %v5583_v4, 0  ;;  %v13307_v0 = vld [vmem:[#allocation71_spill] sm:$0xff] }
 0x305   :  { %13303 = vst [vmem:[#allocation45_spill] sm:$0xff] %v11387_v44  ;;  %13304 = vst [vmem:[#allocation16_spill] sm:$0xff] %v11389_v10  ;;  %v11400_v48 = vsub.f32 %v13305_v54, %v4652_v26  ;;  %v4658_v61 = vadd.f32 %v13306_v19, %v4656_v11  ;;  %v4672_v23 = vadd.f32 %v4671_v60, %v11014_v53  ;;  %v5200_v36 = vsub.s32 4294967266, %v11384_v47  ;;  %v6810_v54 = vld [vmem:[%s12606_s2 + $0x58] sm:$0xff] }
 0x306   :  { %v4665_v30 = vadd.f32 %v13307_v0, %v4663_v63  ;;  %v4678_v17 = vadd.f32 %v4677_v9, %v10994_v24  ;;  %v4682_v43 = vmul.f32 %v11001_v21, %v13217_v12  ;;  %v5559_v35 = vstv %s213_s25  ;;  %v13309_v63 = vld [vmem:[#allocation21_spill] sm:$0xff] }
 0x307   :  { %v4798_v8 = vsel %vm11339_vm8, %v13275_v45, %v4795_v55  ;;  %v5002_v32 = vsel %vm4919_vm11, %v5001_v5, %v5000_v62  ;;  %v5561_v4 = vstv %s215_s26  ;;  %v5587_v53 = vand.u32 31, %v5585_v59 }
 0x308   :  { %v4683_v26 = vmul.f32 %v11006_v20, %v13218_v41  ;;  %v4689_v24 = vmul.f32 %v11001_v21, %v13218_v41  ;;  %v13308_v11 = vsub.s32 4, %v11024_v2  ;;  %v5003_v46 = vsub.s32 4, %v11118_v42  ;;  %v6809_v21 = vld [vmem:[%s12606_s2 + $0x48] sm:$0xff]  ;;  %s219_s2 = ssub.f32 %s11349_s23, %s11358_s24 }
 0x309   :  { %v11427_v9 = vsub.f32 %v4658_v61, %v13309_v63  ;;  %v5180_v62 = vadd.s32 %v11183_v6, %v11191_v56  ;;  %v5196_v5 = vsub.s32 32, %v11384_v47  ;;  %v5201_v55 = vadd.s32 127, %v5200_v36 }
 0x30a   :  { %v4797_v60 = vsel %vm4712_vm6, %v13308_v11, %v11024_v2  ;;  %6775 = vcosq.f32 %v4798_v8  ;;  %v5005_v41 = vsel %vm11364_vm9, %v13286_v40, %v5002_v32  ;;  %v11438_v2 = vmul.f32 %v6809_v21, %v5559_v35  ;;  %s11556_s6 = smul.f32 0.5, %s219_s2 }
 0x30b   :  { %13310 = vst [vmem:[#allocation29_spill] sm:$0xff] %v11427_v9  ;;  %v11443_v19 = vmul.f32 %v6810_v54, %v5561_v4  ;;  %v11447_v6 = vsub.f32 %v4672_v23, %v4673_v27  ;;  %v4799_v56 = vsel %vm11339_vm8, 0, %v4797_v60  ;;  %6777 = vsinq.f32 %v4798_v8 }
 0x30c   :  { %v11451_v61 = vsub.s32 32, %v5587_v53  ;;  %v11453_v36 = vsub.f32 %v4665_v30, %v4666_v38  ;;  %v11455_v0 = vadd.f32 %v4679_v28, %v4678_v17  ;;  %v11459_v35 = vmul.f32 %v11006_v20, %v13217_v12 }
 0x30d   :  { %v5004_v27 = vsel %vm4919_vm11, %v5003_v46, %v11118_v42  ;;  %6779 = vcosq.f32 %v5005_v41  ;;  %v5197_v14 = vshll.u32 %v11281_v18, %v11384_v47  ;;  %v5198_v23 = vshrl.u32 %v5180_v62, %v5196_v5 }
 0x30e   :  { %13311 = vst [vmem:[#allocation32_spill] sm:$0xff] %v11453_v36  ;;  %v5202_v8 = vshll.u32 %v5201_v55, 23  ;;  %v11466_v32 = vand.u32 3, %v4799_v56  ;;  %v4906_v38 = vadd.s32 3, %v4799_v56  ;;  %6781 = vsinq.f32 %v5005_v41 }
 0x30f   :  { %v5567_v28 = vadd.f32 %v11443_v19, %v11438_v2  ;;  %v5006_v12 = vsel %vm11364_vm9, 0, %v5004_v27  ;;  %v5568_v20 = vstv %s11445_s5  ;;  %v5599_v30 = vshll.u32 %v13208_v1, %v5587_v53 }
 0x310   :  { %v5600_v42 = vshrl.u32 %v13209_v52, %v11451_v61  ;;  %v12790_v18 = vand.u32 2147483647, %v11266_v49  ;;  %v11477_v47 = vshrl.u32 %v5585_v59, 5  ;;  %v5602_v17 = vshll.u32 %v13209_v52, %v5587_v53 }
 0x311   :  { %v5603_v4 = vshrl.u32 %v13219_v51, %v11451_v61  ;;  %v5199_v11 = vor.u32 %v5198_v23, %v5197_v14  ;;  %v5203_v60 = vor.u32 4788187, %v5202_v8  ;;  %v5590_v50 = vshll.u32 %v13019_v15, %v5587_v53 }
 0x312   :  { %v5593_v46 = vshll.u32 %v13146_v16, %v5587_v53  ;;  %v5591_v63 = vshrl.u32 %v13146_v16, %v11451_v61  ;;  %v5594_v62 = vshrl.u32 %v13207_v29, %v11451_v61  ;;  %v5596_v59 = vshll.u32 %v13207_v29, %v5587_v53 }
 0x313   :  { %v5597_v5 = vshrl.u32 %v13208_v1, %v11451_v61  ;;  %v11491_v55 = vadd.f32 %v4683_v26, %v4682_v43  ;;  %v11494_v41 = vadd.f32 %v11022_v37, %v4689_v24  ;;  %v11496_v21 = vand.u32 3, %v4906_v38 }
 0x314   :  { %v5601_v54 = vor.u32 %v5600_v42, %v5599_v30  ;;  %v5113_v56 = vadd.s32 3, %v5006_v12  ;;  %v5580_v27 = vand.u32 8388607, %v12790_v18  ;;  %v5604_v14 = vor.u32 %v5603_v4, %v5602_v17  ;;  %v13313_v17 = vld [vmem:[#allocation22_spill] sm:$0xff] }
 0x315   :  { %vm5608_vm4 = vcmp.lt.s32.totalorder %v11477_v47, 4  ;;  %vm4805_vm1 = vcmp.eq.s32.totalorder %v11466_v32, 0  ;;  %v5204_v53 = vand.u32 2147483647, %v5203_v60  ;;  %v5206_v23 = vcvt.s32.f32 %v5199_v11 }
 0x316   :  { %v11502_v8 = vadd.f32 %v5568_v20, %v5567_v28  ;;  %v11504_v43 = vand.u32 3, %v5006_v12  ;;  %v11506_v37 = vor.u32 %v5591_v63, %v5590_v50  ;;  %v11508_v26 = vor.u32 %v5594_v62, %v5593_v46 }
 0x317   :  { %v5598_v24 = vor.u32 %v5597_v5, %v5596_v59  ;;  %v6776_v38 = vpop.eup %6775  ;;  %vm4808_vm10 = vcmp.eq.s32.totalorder %v11466_v32, 2  ;;  %vm5605_vm15 = vcmp.lt.s32.totalorder %v11477_v47, 1  ;;  %vm5607_vm7 = vcmp.lt.s32.totalorder %v11477_v47, 3 }
 0x318   :  { %13312 = vst [vmem:[#allocation53_spill] sm:$0xff] %v11502_v8  ;;  %v5614_v30 = vsel %vm5608_vm4, %v5601_v54, 920167782  ;;  %v6778_v42 = vpop.eup %6777  ;;  %v5114_v28 = vand.u32 3, %v5113_v56  ;;  %v5581_v12 = vor.u32 8388608, %v5580_v27  ;;  %vm5126_vm3 = vcmp.lt.s32.totalorder %v13313_v17, 0 }
 0x319   :  { %v5618_v20 = vsel %vm5608_vm4, %v5604_v14, 1326507024  ;;  %v13314_v4 = vand.u32 2147483647, %v13313_v17  ;;  %v5207_v60 = vmul.f32 %v5206_v23, %v5204_v53  ;;  %v5783_v50 = vand.u32 2139095040, %v11502_v8 }
 0x31a   :  { %v6780_v46 = vpop.eup %6779  ;;  %vm5012_vm8 = vcmp.eq.s32.totalorder %v11504_v43, 0  ;;  %vm5606_vm11 = vcmp.lt.s32.totalorder %v11477_v47, 2  ;;  %v5613_v63 = vsel %vm5605_vm15, %v11506_v37, %v11508_v26  ;;  %v5615_v62 = vsel %vm5607_vm7, %v5598_v24, %v5614_v30  ;;  %v13325_v47 = vld [vmem:[#allocation74_spill] sm:$0xff] }
 0x31b   :  { %vm11522_vm0 = vcmp.le.f32.partialorder %v13314_v4, 0.7853982  ;;  %v6782_v59 = vpop.eup %6781  ;;  %v4806_v5 = vxor.u32 2147483648, %v6778_v42  ;;  %v4809_v56 = vxor.u32 2147483648, %v6776_v38  ;;  %v5617_v27 = vsel %vm5605_vm15, %v11508_v26, %v5598_v24 }
 0x31c   :  { %v5619_v14 = vsel %vm5607_vm7, %v5601_v54, %v5618_v20  ;;  %vm4802_vm9 = vweird.f32 %v13275_v45  ;;  %vm4908_vm12 = vcmp.lt.s32.totalorder %v11496_v21, 2  ;;  %vm5015_vm13 = vcmp.eq.s32.totalorder %v11504_v43, 2  ;;  %v13328_v45 = vld [vmem:[#allocation13_spill] sm:$0xff] }
 0x31d   :  { %vm5115_vm6 = vcmp.lt.s32.totalorder %v5114_v28, 2  ;;  %vm5116_vm5 = vcmp.eq.s32.totalorder %v5114_v28, 0  ;;  %v11547_v53 = vshll.u32 %v5581_v12, 8  ;;  %vm5009_vm2 = vweird.f32 %v13286_v40 }
 0x31e   :  { %vm5119_vm14 = vcmp.eq.s32.totalorder %v5114_v28, 2  ;;  %v5208_v23 = vxor.u32 2147483648, %v5207_v60  ;;  %v5616_v30 = vsel %vm5606_vm11, %v5613_v63, %v5615_v62  ;;  %v5784_v4 = vshrl.u32 %v5783_v50, 23 }
 0x31f   :  { %v5013_v18 = vxor.u32 2147483648, %v6782_v59  ;;  %v5016_v54 = vxor.u32 2147483648, %v6780_v46  ;;  %v5570_v20 = vsub.f32 %v11438_v2, %v11443_v19  ;;  %v5620_v51 = vsel %vm5606_vm11, %v5617_v27, %v5619_v14 }
 0x320   :  { %v4807_v12 = vsel %vm4805_vm1, %v6776_v38, %v4806_v5  ;;  %v4810_v52 = vsel %vm4808_vm10, %v4809_v56, %v6778_v42  ;;  %v5210_v63 = vsub.s32 4, %v11259_v57  ;;  %v5589_v62 = vshrl.u32 %v13019_v15, %v11451_v61 }
 0x321   :  { %v5610_v2 = vsel %vm5608_vm4, %v5598_v24, 2102212464  ;;  %v11569_v19 = vmul.u32.u64.low %v11547_v53, %v5616_v30  ;;  %v11570_v27 = vmul.u32.u64.high %v11547_v53, %v5616_v30, %v11569_v19  ;;  %v5209_v14 = vsel %vm5126_vm3, %v5208_v23, %v5207_v60 }
 0x322   :  { %v11575_v1 = vmul.u32.u64.low %v11547_v53, %v5620_v51  ;;  %v11576_v29 = vmul.u32.u64.high %v11547_v53, %v5620_v51, %v11575_v1  ;;  %v6583_v16 = vadd.s32 4294967169, %v5784_v4  ;;  %v5014_v50 = vsel %vm5012_vm8, %v6780_v46, %v5013_v18  ;;  %v13323_v4 = vld [vmem:[#allocation33_spill] sm:$0xff] }
 0x323   :  { %v5017_v61 = vsel %vm5015_vm13, %v5016_v54, %v6782_v59  ;;  %v5118_v24 = vsel %vm5116_vm5, %v6780_v46, %v5013_v18  ;;  %v5121_v15 = vsel %vm5119_vm14, %v5016_v54, %v6782_v59  ;;  %vm13317_vm4 = vcmp.eq.s32.totalorder %v11496_v21, 0 }
 0x324   :  { %v4911_v30 = vsel %vm13317_vm4, %v6776_v38, %v4806_v5  ;;  %vm13318_vm1 = vcmp.eq.s32.totalorder %v11496_v21, 2  ;;  %v5211_v1 = vsel %vm5126_vm3, %v5210_v63, %v11259_v57  ;;  %v5571_v51 = vstv %s11556_s6  ;;  %v13322_v5 = vld [vmem:[#allocation10_spill] sm:$0xff]  ;;  %v13324_v21 = vld [vmem:[#allocation73_spill] sm:$0xff] }
 0x325   :  { %v4914_v60 = vsel %vm13318_vm1, %v4809_v56, %v6778_v42  ;;  %vm13319_vm10 = vcmp.lt.s32.totalorder %v11466_v32, 2  ;;  %v5212_v18 = vsel %vm11522_vm0, %v13313_v17, %v5209_v14  ;;  %v5609_v46 = vsel %vm5605_vm15, %v5589_v62, %v11506_v37 }
 0x326   :  { %v4811_v23 = vsel %vm13319_vm10, %v4807_v12, %v4810_v52  ;;  %v5611_v38 = vsel %vm5607_vm7, %v11508_v26, %v5610_v2  ;;  %vm13320_vm14 = vcmp.lt.s32.totalorder %v11504_v43, 2  ;;  %v5122_v57 = vsel %vm5115_vm6, %v5118_v24, %v5121_v15 }
 0x327   :  { %v5018_v42 = vsel %vm13320_vm14, %v5014_v50, %v5017_v61  ;;  %v13321_v32 = vand.u32 2147483647, %v11502_v8  ;;  %v5790_v59 = vadd.s32 1, %v6583_v16  ;;  %v4686_v56 = vadd.f32 %v13322_v5, %v11491_v55  ;;  %v13331_v5 = vld [vmem:[#allocation20_spill] sm:$0xff]  ;;  %v13343_v61 = vld [vmem:[#allocation54_spill] sm:$0xff] }
 0x328   :  { %v4693_v54 = vadd.f32 %v13323_v4, %v11494_v41  ;;  %v5213_v37 = vsel %vm11522_vm0, 0, %v5211_v1  ;;  %v11614_v12 = vadd.f32 %v5571_v51, %v5570_v20  ;;  %v4812_v43 = vsel %vm4802_vm9, nan, %v4811_v23  ;;  %v13329_v51 = vld [vmem:[#allocation76_spill] sm:$0xff] }
 0x329   :  { %v5787_v52 = vand.u32 8388607, %v13321_v32  ;;  %v4915_v15 = vsel %vm4908_vm12, %v4911_v30, %v4914_v60  ;;  %6783 = vcosq.f32 %v5212_v18  ;;  %v5612_v16 = vsel %vm5606_vm11, %v5609_v46, %v5611_v38  ;;  %v13344_v8 = vld [vmem:[#allocation12_spill] sm:$0xff] }
 0x32a   :  { %v5019_v55 = vsel %vm5009_vm2, nan, %v5018_v42  ;;  %v5123_v41 = vsel %vm5009_vm2, nan, %v5122_v57  ;;  %6785 = vsinq.f32 %v5212_v18  ;;  %v5631_v26 = vadd.s32 1, %v11570_v27 }
 0x32b   :  { %v5320_v28 = vadd.s32 3, %v5213_v37  ;;  %vm5630_vm15 = vc.u32 %v11576_v29, %v11569_v19  ;;  %v5788_v11 = vor.u32 8388608, %v5787_v52  ;;  %vm5791_vm7 = vcmp.gt.s32.totalorder %v5790_v59, 0 }
 0x32c   :  { %v11630_v20 = vsub.f32 %v13324_v21, %v11455_v0  ;;  %v11633_v63 = vsub.f32 %v4686_v56, %v13325_v47  ;;  %v11636_v50 = vsub.f32 %v4693_v54, %v11459_v35  ;;  %v11640_v40 = vsel %vm4802_vm9, nan, %v4915_v15 }
 0x32d   :  { %v11642_v62 = vmul.f32 %v5019_v55, %v4812_v43  ;;  %v11644_v2 = vmul.f32 %v5123_v41, %v4812_v43  ;;  %v5628_v14 = vmul.u32 %v11547_v53, %v5612_v16  ;;  %v11648_v0 = vand.u32 3, %v5213_v37  ;;  %v13332_v55 = vld [vmem:[#allocation42_spill] sm:$0xff] }
 0x32e   :  { %13326 = vst [vmem:[#allocation43_spill] sm:$0xff] %v11633_v63  ;;  %13327 = vst [vmem:[#allocation15_spill] sm:$0xff] %v11636_v50  ;;  %v5632_v24 = vsel %vm5630_vm15, %v5631_v26, %v11570_v27  ;;  %v5792_v30 = vsel %vm5791_vm7, %v5790_v59, 0  ;;  %v11652_v60 = vand.u32 3, %v5320_v28  ;;  %v11658_v18 = vshll.u32 %v5788_v11, 8  ;;  %v13334_v26 = vld [vmem:[#allocation50_spill] sm:$0xff] }
 0x32f   :  { %v5335_v1 = vmul.f32 %v11642_v62, %v13328_v45  ;;  %v5336_v23 = vmul.f32 %v11644_v2, %v13329_v51  ;;  %v5363_v53 = vmul.f32 %v11642_v62, %v11134_v58  ;;  %v5364_v46 = vmul.f32 %v11644_v2, %v11203_v31 }
 0x330   :  { %v11665_v27 = vadd.s32 %v11569_v19, %v11576_v29  ;;  %v11667_v38 = vshrl.u32 %v5792_v30, 5  ;;  %v11671_v42 = vmul.f32 %v11642_v62, %v13329_v51  ;;  %v11675_v57 = vmul.f32 %v11644_v2, %v13328_v45 }
 0x331   :  { %v11677_v32 = vadd.s32 %v5632_v24, %v5628_v14  ;;  %v11679_v52 = vand.u32 31, %v5792_v30  ;;  %v11683_v59 = vmul.f32 %v11642_v62, %v11219_v22  ;;  %v11687_v29 = vmul.f32 %v11644_v2, %v11234_v33 }
 0x332   :  { %13330 = vst [vmem:[#allocation59_spill] sm:$0xff] %v11665_v27  ;;  %v5391_v19 = vmul.f32 %v11642_v62, %v11132_v25  ;;  %v5392_v56 = vmul.f32 %v11644_v2, %v13331_v5  ;;  %vm5219_vm2 = vcmp.eq.s32.totalorder %v11648_v0, 0  ;;  %vm5222_vm5 = vcmp.eq.s32.totalorder %v11648_v0, 2  ;;  %v13351_v27 = vld [vmem:[#allocation52_spill] sm:$0xff] }
 0x333   :  { %v11695_v4 = vadd.f32 %v5336_v23, %v5335_v1  ;;  %v11699_v54 = vmul.f32 %v11642_v62, %v11234_v33  ;;  %v11703_v37 = vmul.f32 %v11644_v2, %v11219_v22  ;;  %v11707_v43 = vmul.f32 %v11642_v62, %v11203_v31  ;;  %v13340_v1 = vld [vmem:[#allocation40_spill] sm:$0xff] }
 0x334   :  { %vm5323_vm0 = vcmp.eq.s32.totalorder %v11652_v60, 0  ;;  %vm5326_vm3 = vcmp.eq.s32.totalorder %v11652_v60, 2  ;;  %v11711_v15 = vadd.f32 %v5364_v46, %v5363_v53  ;;  %v11715_v16 = vmul.f32 %v11644_v2, %v11134_v58  ;;  %v13342_v53 = vld [vmem:[#allocation46_spill] sm:$0xff] }
 0x335   :  { %v11719_v41 = vmul.f32 %v11642_v62, %v13332_v55  ;;  %v11723_v28 = vmul.f32 %v11644_v2, %v13334_v26  ;;  %v11727_v11 = vmul.f32 %v11642_v62, %v13334_v26  ;;  %v11731_v21 = vmul.f32 %v11644_v2, %v13332_v55 }
 0x336   :  { %v11735_v47 = vmul.f32 %v11642_v62, %v13331_v5  ;;  %v11739_v14 = vmul.f32 %v11644_v2, %v11132_v25  ;;  %v6784_v24 = vpop.eup %6783  ;;  %vm5218_vm6 = vcmp.lt.s32.totalorder %v11648_v0, 2  ;;  %v11742_v30 = vadd.f32 %v5392_v56, %v5391_v19 }
 0x337   :  { %13333 = vst [vmem:[#allocation64_spill] sm:$0xff] %v11719_v41  ;;  %13335 = vst [vmem:[#allocation51_spill] sm:$0xff] %v11723_v28  ;;  %v11746_v23 = vmul.f32 %v11642_v62, %v13340_v1  ;;  %v5419_v46 = vmul.f32 %v11642_v62, %v13342_v53  ;;  %v5420_v35 = vmul.f32 %v11644_v2, %v13343_v61  ;;  %vm5322_vm8 = vcmp.lt.s32.totalorder %v11652_v60, 2 }
 0x338   :  { %13336 = vst [vmem:[#allocation17_spill] sm:$0xff] %v11731_v21  ;;  %13337 = vst [vmem:[#allocation24_spill] sm:$0xff] %v11735_v47  ;;  %v6786_v47 = vpop.eup %6785  ;;  %v11755_v28 = vmul.f32 %v11644_v2, %v13344_v8  ;;  %v11759_v19 = vmul.f32 %v11642_v62, %v13344_v8  ;;  %v11763_v56 = vmul.f32 %v11644_v2, %v13340_v1  ;;  %vm5216_vm11 = vweird.f32 %v13313_v17  ;;  %v13353_v21 = vld [vmem:[#allocation35_spill] sm:$0xff] }
 0x339   :  { %13338 = vst [vmem:[#allocation9_spill] sm:$0xff] %v11739_v14  ;;  %13339 = vst [vmem:[#allocation19_spill] sm:$0xff] %v11742_v30  ;;  %v11768_v5 = vmul.f32 %v11642_v62, %v13343_v61  ;;  %v11772_v14 = vmul.f32 %v11644_v2, %v13342_v53  ;;  %v13350_v30 = vld [vmem:[#allocation60_spill] sm:$0xff]  ;;  %v11785_v61 = vmul.f32 %v11644_v2, %v13353_v21  ;;  %v5220_v53 = vxor.u32 2147483648, %v6786_v47 }
 0x33a   :  { %13341 = vst [vmem:[#allocation28_spill] sm:$0xff] %v11746_v23  ;;  %13345 = vst [vmem:[#allocation55_spill] sm:$0xff] %v11755_v28  ;;  %v5634_v23 = vadd.s32 536870912, %v11677_v32  ;;  %v5447_v28 = vmul.f32 %v11642_v62, %v11284_v3  ;;  %v5223_v25 = vxor.u32 2147483648, %v6784_v24  ;;  %v11795_v41 = vadd.f32 %v5420_v35, %v5419_v46 }
 0x33b   :  { %13346 = vst [vmem:[#allocation57_spill] sm:$0xff] %v11759_v19  ;;  %13347 = vst [vmem:[#allocation23_spill] sm:$0xff] %v11763_v56  ;;  %v5448_v19 = vmul.f32 %v11644_v2, %v13350_v30  ;;  %v11781_v56 = vmul.f32 %v11642_v62, %v13351_v27  ;;  %v11799_v1 = vmul.f32 %v11642_v62, %v13350_v30  ;;  %vm5575_vm9 = vcmp.lt.s32.totalorder %v11266_v49, 0 }
 0x33c   :  { %13348 = vst [vmem:[#allocation61_spill] sm:$0xff] %v11768_v5  ;;  %13349 = vst [vmem:[#allocation66_spill] sm:$0xff] %v11772_v14  ;;  %v11789_v5 = vmul.f32 %v11642_v62, %v13353_v21  ;;  %v11793_v14 = vmul.f32 %v11644_v2, %v13351_v27  ;;  %v11817_v35 = vmul.f32 %v11642_v62, %v11400_v48  ;;  %vm5812_vm13 = vcmp.lt.s32.totalorder %v11667_v38, 1 }
 0x33d   :  { %13352 = vst [vmem:[#allocation25_spill] sm:$0xff] %v11781_v56  ;;  %13354 = vst [vmem:[#allocation38_spill] sm:$0xff] %v11785_v61  ;;  %v11803_v56 = vmul.f32 %v11644_v2, %v11284_v3  ;;  %v11807_v61 = vmul.f32 %v11642_v62, %v11389_v10  ;;  %v11813_v27 = vadd.f32 %v5448_v19, %v5447_v28  ;;  %vm5814_vm4 = vcmp.lt.s32.totalorder %v11667_v38, 3 }
 0x33e   :  { %13355 = vst [vmem:[#allocation26_spill] sm:$0xff] %v11789_v5  ;;  %13356 = vst [vmem:[#allocation49_spill] sm:$0xff] %v11793_v14  ;;  %v11811_v5 = vmul.f32 %v11644_v2, %v11400_v48  ;;  %v5635_v14 = vshrl.u32 %v5634_v23, 30  ;;  %v5475_v46 = vmul.f32 %v11642_v62, %v11370_v39  ;;  %v11833_v28 = vmul.f32 %v11644_v2, %v11370_v39 }
 0x33f   :  { %13357 = vst [vmem:[#allocation27_spill] sm:$0xff] %v11799_v1  ;;  %13358 = vst [vmem:[#allocation44_spill] sm:$0xff] %v11803_v56  ;;  %v5476_v1 = vmul.f32 %v11644_v2, %v11373_v34  ;;  %v11837_v23 = vmul.f32 %v11642_v62, %v11447_v6  ;;  %v5221_v19 = vsel %vm5219_vm2, %v6784_v24, %v5220_v53  ;;  %vm5815_vm1 = vcmp.lt.s32.totalorder %v11667_v38, 4 }
 0x340   :  { %13359 = vst [vmem:[#allocation37_spill] sm:$0xff] %v11807_v61  ;;  %13360 = vst [vmem:[#allocation63_spill] sm:$0xff] %v11811_v5  ;;  %v11825_v61 = vmul.f32 %v11644_v2, %v11389_v10  ;;  %v11829_v5 = vmul.f32 %v11642_v62, %v11373_v34  ;;  %v13368_v34 = vld [vmem:[#allocation56_spill] sm:$0xff]  ;;  %v5328_v39 = vsel %vm5326_vm3, %v5223_v25, %v6786_v47  ;;  %vm5813_vm10 = vcmp.lt.s32.totalorder %v11667_v38, 2 }
 0x341   :  { %13361 = vst [vmem:[#allocation70_spill] sm:$0xff] %v11813_v27  ;;  %13362 = vst [vmem:[#allocation65_spill] sm:$0xff] %v11817_v35  ;;  %v5224_v27 = vsel %vm5222_vm5, %v5223_v25, %v6786_v47  ;;  %v5636_v35 = vshll.u32 %v5635_v14, 30  ;;  %v11856_v10 = vadd.f32 %v5476_v1, %v5475_v46  ;;  %v11864_v56 = vmul.f32 %v11644_v2, %v11447_v6 }
 0x342   :  { %13363 = vst [vmem:[#allocation58_spill] sm:$0xff] %v11825_v61  ;;  %13364 = vst [vmem:[#allocation11_spill] sm:$0xff] %v11829_v5  ;;  %v11845_v61 = vmul.f32 %v11644_v2, %v11630_v20  ;;  %v5503_v5 = vmul.f32 %v11642_v62, %v13368_v34  ;;  %v5225_v25 = vsel %vm5218_vm6, %v5221_v19, %v5224_v27  ;;  %v13377_v19 = vand.u32 2147483647, %v11266_v49 }
 0x343   :  { %13365 = vst [vmem:[#allocation47_spill] sm:$0xff] %v11833_v28  ;;  %13366 = vst [vmem:[#allocation30_spill] sm:$0xff] %v11837_v23  ;;  %v5325_v28 = vsel %vm5323_vm0, %v6784_v24, %v5220_v53  ;;  %v5504_v23 = vmul.f32 %v11644_v2, %v11368_v13  ;;  %v11868_v24 = vmul.f32 %v11642_v62, %v11368_v13  ;;  %v5795_v53 = vsub.s32 32, %v11679_v52 }
 0x344   :  { %13367 = vst [vmem:[#allocation14_spill] sm:$0xff] %v11845_v61  ;;  %v11860_v61 = vmul.f32 %v11642_v62, %v11630_v20  ;;  %13370 = vst [vmem:[#allocation68_spill] sm:$0xff] %v11864_v56  ;;  %v11874_v47 = vmul.f32 %v11644_v2, %v13368_v34  ;;  %v11878_v1 = vmul.f32 %v11642_v62, %v11427_v9  ;;  %vm11897_vm12 = vcmp.le.f32.partialorder %v13377_v19, 0.7853982 }
 0x345   :  { %13371 = vst [vmem:[#allocation36_spill] sm:$0xff] %v11868_v24  ;;  %v5329_v46 = vsel %vm5322_vm8, %v5325_v28, %v5328_v39  ;;  %v11885_v56 = vmul.f32 %v11644_v2, %v11453_v36  ;;  %v11889_v0 = vmul.f32 %v11642_v62, %v11453_v36  ;;  %v11893_v27 = vmul.f32 %v11644_v2, %v11427_v9 }
 0x346   :  { %13369 = vst [vmem:[#allocation39_spill] sm:$0xff] %v11860_v61  ;;  %13372 = vst [vmem:[#allocation18_spill] sm:$0xff] %v11874_v47  ;;  %v11901_v60 = vadd.f32 %v5504_v23, %v5503_v5  ;;  %v5531_v39 = vmul.f32 %v11642_v62, %v11379_v7  ;;  %v5532_v28 = vmul.f32 %v11644_v2, %v11387_v44  ;;  %v5659_v23 = vsub.s32 4, %v5635_v14 }
 0x347   :  { %13373 = vst [vmem:[#allocation31_spill] sm:$0xff] %v11878_v1  ;;  %13374 = vst [vmem:[#allocation62_spill] sm:$0xff] %v11885_v56  ;;  %v11908_v56 = vsub.s32 %v11677_v32, %v5636_v35  ;;  %v11914_v19 = vmul.f32 %v11642_v62, %v11387_v44  ;;  %v11918_v5 = vmul.f32 %v11644_v2, %v11379_v7  ;;  %v5330_v1 = vsel %vm5216_vm11, nan, %v5329_v46 }
 0x348   :  { %13375 = vst [vmem:[#allocation77_spill] sm:$0xff] %v11889_v0  ;;  %13376 = vst [vmem:[#allocation69_spill] sm:$0xff] %v11893_v27  ;;  %v5226_v27 = vsel %vm5216_vm11, nan, %v5225_v25  ;;  %v11924_v0 = vmul.f32 %v11642_v62, %v11633_v63  ;;  %v13384_v32 = vmov 683565275   ;;  %v11943_v7 = vadd.f32 %v5532_v28, %v5531_v39 }
 0x349   :  { %13380 = vst [vmem:[#allocation75_spill] sm:$0xff] %v11901_v60  ;;  %13381 = vst [vmem:[#allocation71_spill] sm:$0xff] %v11914_v19  ;;  %v5797_v35 = vshll.u32 %v13384_v32, %v11679_v52  ;;  %v13385_v25 = vmov 2475754826   ;;  %v11931_v19 = vmul.f32 %v11644_v2, %v11636_v50  ;;  %v13388_v46 = vmov 2131351028  }
 0x34a   :  { %13382 = vst [vmem:[#allocation21_spill] sm:$0xff] %v11918_v5  ;;  %13383 = vst [vmem:[#allocation22_spill] sm:$0xff] %v11924_v0  ;;  %v5798_v47 = vshrl.u32 %v13385_v25, %v5795_v53  ;;  %v11935_v5 = vmul.f32 %v11642_v62, %v11636_v50  ;;  %v5800_v17 = vshll.u32 %v13385_v25, %v11679_v52  ;;  %v13392_v34 = vmov 920167782  }
 0x34b   :  { %13386 = vst [vmem:[#allocation10_spill] sm:$0xff] %v11931_v19  ;;  %v5801_v44 = vshrl.u32 %v13388_v46, %v5795_v53  ;;  %v11941_v0 = vmul.f32 %v5226_v27, %v11640_v40  ;;  %13389 = vst [vmem:[#allocation73_spill] sm:$0xff] %v11943_v7  ;;  %v11947_v60 = vmul.f32 %v11644_v2, %v11633_v63  ;;  %v5639_v19 = vsub.s32 0, %v11908_v56 }
 0x34c   :  { %13387 = vst [vmem:[#allocation33_spill] sm:$0xff] %v11935_v5  ;;  %v11951_v13 = vmul.f32 %v5330_v1, %v11640_v40  ;;  %v5660_v62 = vsel %vm5575_vm9, %v5659_v23, %v5635_v14  ;;  %v13391_v5 = vmov 2102212464   ;;  %v5807_v27 = vshrl.u32 %v13392_v34, %v5795_v53 }
 0x34d   :  { %13390 = vst [vmem:[#allocation74_spill] sm:$0xff] %v11947_v60  ;;  %v5806_v50 = vshll.u32 %v13391_v5, %v11679_v52  ;;  %v6576_v39 = vmin.u32 %v5639_v19, %v11908_v56  ;;  %v5796_v28 = vshrl.u32 %v13384_v32, %v5795_v53  ;;  %v5799_v7 = vor.u32 %v5798_v47, %v5797_v35 }
 0x34e   :  { %v5803_v2 = vshll.u32 %v13388_v46, %v11679_v52  ;;  %v5338_v40 = vmul.f32 %v11951_v13, %v11234_v33  ;;  %v5344_v1 = vmul.f32 %v11941_v0, %v11234_v33  ;;  %v5802_v14 = vor.u32 %v5801_v44, %v5800_v17 }
 0x34f   :  { %v5804_v23 = vshrl.u32 %v13391_v5, %v5795_v53  ;;  %v5340_v60 = vmul.f32 %v11941_v0, %v11219_v22  ;;  %v5346_v19 = vmul.f32 %v11951_v13, %v11219_v22  ;;  %v5641_v63 = vclz %v6576_v39 }
 0x350   :  { %v11973_v47 = vsel %vm11897_vm12, 0, %v5660_v62  ;;  %v5349_v35 = vmul.f32 %v11941_v0, %v13328_v45  ;;  %v5350_v33 = vmul.f32 %v11951_v13, %v13329_v51  ;;  %v5808_v44 = vor.u32 %v5807_v27, %v5806_v50 }
 0x351   :  { %13393 = vst [vmem:[#allocation13_spill] sm:$0xff] %v11973_v47  ;;  %v5809_v17 = vshll.u32 %v13392_v34, %v11679_v52  ;;  %v5356_v9 = vmul.f32 %v11941_v0, %v13329_v51  ;;  %v5361_v22 = vmul.f32 %v11951_v13, %v13328_v45  ;;  %v13394_v39 = vmov 1326507024  }
 0x352   :  { %v5810_v61 = vshrl.u32 %v13394_v39, %v5795_v53  ;;  %v5339_v62 = vadd.f32 %v5338_v40, %v11695_v4  ;;  %v5345_v47 = vadd.f32 %v5344_v1, %v11675_v57  ;;  %v5366_v50 = vmul.f32 %v11951_v13, %v13334_v26 }
 0x353   :  { %v5805_v27 = vor.u32 %v5804_v23, %v5803_v2  ;;  %v6577_v36 = vadd.s32 4294967294, %v5641_v63  ;;  %v5820_v51 = vsel %vm5812_vm13, %v5799_v7, %v5802_v14  ;;  %v5821_v53 = vsel %vm5815_vm1, %v5808_v44, 920167782 }
 0x354   :  { %v5811_v52 = vor.u32 %v5810_v61, %v5809_v17  ;;  %v5351_v4 = vadd.f32 %v5350_v33, %v5349_v35  ;;  %v5368_v57 = vmul.f32 %v11941_v0, %v13332_v55  ;;  %v5816_v2 = vsel %vm5812_vm13, %v5796_v28, %v5799_v7 }
 0x355   :  { %v5817_v45 = vsel %vm5815_vm1, %v5805_v27, 2102212464  ;;  %v5372_v61 = vmul.f32 %v11941_v0, %v13334_v26  ;;  %v5822_v40 = vsel %vm5814_vm4, %v5805_v27, %v5821_v53  ;;  %v5824_v1 = vsel %vm5812_vm13, %v5802_v14, %v5805_v27 }
 0x356   :  { %v5818_v63 = vsel %vm5814_vm4, %v5802_v14, %v5817_v45  ;;  %v5825_v23 = vsel %vm5815_vm1, %v5811_v52, 1326507024  ;;  %v5358_v35 = vadd.f32 %v11699_v54, %v5356_v9  ;;  %vm6578_vm14 = vcmp.lt.s32.totalorder %v6577_v36, 0 }
 0x357   :  { %v5823_v33 = vsel %vm5813_vm10, %v5820_v51, %v5822_v40  ;;  %v5826_v7 = vsel %vm5814_vm4, %v5808_v44, %v5825_v23  ;;  %v5819_v28 = vsel %vm5813_vm10, %v5816_v2, %v5818_v63  ;;  %v5347_v14 = vadd.f32 %v5346_v19, %v5345_v47 }
 0x358   :  { %v5827_v26 = vsel %vm5813_vm10, %v5824_v1, %v5826_v7  ;;  %v12018_v17 = vmul.u32.u64.low %v11658_v18, %v5823_v33  ;;  %v12019_v45 = vmul.u32.u64.high %v11658_v18, %v5823_v33, %v12018_v17  ;;  %v5374_v9 = vmul.f32 %v11951_v13, %v13332_v55 }
 0x359   :  { %v12025_v54 = vmul.u32.u64.low %v11658_v18, %v5827_v26  ;;  %v12026_v27 = vmul.u32.u64.high %v11658_v18, %v5827_v26, %v12025_v54  ;;  %v5367_v44 = vadd.f32 %v5366_v50, %v11711_v15  ;;  %v5373_v52 = vadd.f32 %v5372_v61, %v11715_v16  ;;  %v13398_v26 = vld [vmem:[#allocation40_spill] sm:$0xff] }
 0x35a   :  { %v5644_v51 = vsel %vm6578_vm14, 0, %v6577_v36  ;;  %v13395_v38 = vand.u32 2139095040, %v11614_v12  ;;  %v5353_v2 = vadd.f32 %v11683_v59, %v5351_v4  ;;  %v5377_v19 = vmul.f32 %v11941_v0, %v11134_v58  ;;  %v13400_v54 = vld [vmem:[#allocation72_spill] sm:$0xff] }
 0x35b   :  { %v5378_v55 = vmul.f32 %v11951_v13, %v11203_v31  ;;  %v5835_v47 = vmul.u32 %v11658_v18, %v5819_v28  ;;  %v5360_v63 = vadd.f32 %v11703_v37, %v5358_v35  ;;  %v5384_v15 = vmul.f32 %v11941_v0, %v11203_v31 }
 0x35c   :  { %v5991_v53 = vshrl.u32 %v13395_v38, 23  ;;  %v5838_v36 = vadd.s32 1, %v12019_v45  ;;  %v12042_v50 = vsub.f32 %v5339_v62, %v5340_v60  ;;  %v12045_v59 = vsub.f32 %v11671_v42, %v5347_v14 }
 0x35d   :  { %v5649_v4 = vsub.s32 4294967266, %v5644_v51  ;;  %vm5837_vm15 = vc.u32 %v12026_v27, %v12018_v17  ;;  %v12049_v61 = vsub.f32 %v5367_v44, %v5368_v57  ;;  %v5375_v18 = vadd.f32 %v5374_v9, %v5373_v52  ;;  %v13401_v52 = vld [vmem:[#allocation17_spill] sm:$0xff] }
 0x35e   :  { %v6591_v16 = vadd.s32 4294967169, %v5991_v53  ;;  %13396 = vst [vmem:[#allocation76_spill] sm:$0xff] %v12042_v50  ;;  %13397 = vst [vmem:[#allocation42_spill] sm:$0xff] %v12045_v59  ;;  %v5839_v37 = vsel %vm5837_vm15, %v5838_v36, %v12019_v45  ;;  %v12053_v31 = vsub.f32 %v5353_v2, %v11687_v29  ;;  %v5379_v1 = vadd.f32 %v5378_v55, %v5377_v19  ;;  %v13402_v2 = vld [vmem:[#allocation59_spill] sm:$0xff]  ;;  %v13468_v50 = vld [vmem:[#allocation33_spill] sm:$0xff] }
 0x35f   :  { %v12057_v60 = vmul.f32 %v11951_v13, %v11134_v58  ;;  %v5840_v42 = vadd.s32 %v5839_v37, %v5835_v47  ;;  %v12059_v62 = vsub.f32 %v5360_v63, %v5361_v22  ;;  %v5386_v23 = vadd.f32 %v11727_v11, %v5384_v15  ;;  %v13399_v11 = vld [vmem:[#allocation64_spill] sm:$0xff] }
 0x360   :  { %v5997_v40 = vadd.s32 1, %v6591_v16  ;;  %v5645_v35 = vsub.s32 32, %v5644_v51  ;;  %v5394_v57 = vmul.f32 %v11951_v13, %v13344_v8  ;;  %v5650_v33 = vadd.s32 127, %v5649_v4 }
 0x361   :  { %v5841_v7 = vadd.s32 536870912, %v5840_v42  ;;  %v12065_v29 = vsub.f32 %v11707_v43, %v5375_v18  ;;  %v12069_v58 = vmul.f32 %v11941_v0, %v13398_v26  ;;  %v5400_v22 = vmul.f32 %v11941_v0, %v13344_v8 }
 0x362   :  { %vm5998_vm7 = vcmp.gt.s32.totalorder %v5997_v40, 0  ;;  %v5381_v14 = vadd.f32 %v13399_v11, %v5379_v1  ;;  %v12076_v9 = vmul.f32 %v11951_v13, %v13398_v26  ;;  %v12080_v44 = vmul.f32 %v11941_v0, %v13400_v54 }
 0x363   :  { %v5999_v28 = vsel %vm5998_vm7, %v5997_v40, 0  ;;  %v12082_v43 = vshrl.u32 %v5841_v7, 30  ;;  %v12085_v38 = vadd.f32 %v13401_v52, %v5386_v23  ;;  %v5646_v53 = vshll.u32 %v11908_v56, %v5644_v51  ;;  %v13404_v23 = vld [vmem:[#allocation19_spill] sm:$0xff] }
 0x364   :  { %v6001_v45 = vand.u32 31, %v5999_v28  ;;  %v5647_v8 = vshrl.u32 %v13402_v2, %v5645_v35  ;;  %v5651_v55 = vshll.u32 %v5650_v33, 23  ;;  %v13403_v63 = vand.u32 2147483647, %v11614_v12  ;;  %v13405_v33 = vld [vmem:[#allocation9_spill] sm:$0xff] }
 0x365   :  { %v5843_v47 = vshll.u32 %v12082_v43, 30  ;;  %v6000_v36 = vshrl.u32 %v5999_v28, 5  ;;  %v5395_v35 = vadd.f32 %v5394_v57, %v13404_v23  ;;  %v5401_v7 = vadd.f32 %v5400_v22, %v13405_v33  ;;  %v13406_v28 = vld [vmem:[#allocation20_spill] sm:$0xff]  ;;  %v13407_v33 = vld [vmem:[#allocation51_spill] sm:$0xff] }
 0x366   :  { %v6002_v19 = vsub.s32 32, %v6001_v45  ;;  %v5994_v15 = vand.u32 8388607, %v13403_v63  ;;  %v6004_v16 = vshll.u32 %v13384_v32, %v6001_v45  ;;  %v6007_v18 = vshll.u32 %v13385_v25, %v6001_v45 }
 0x367   :  { %v12096_v40 = vsub.s32 %v5840_v42, %v5843_v47  ;;  %v6010_v56 = vshll.u32 %v13388_v46, %v6001_v45  ;;  %v6013_v1 = vshll.u32 %v13391_v5, %v6001_v45  ;;  %v5406_v26 = vmul.f32 %v11951_v13, %v13406_v28 }
 0x368   :  { %v6005_v4 = vshrl.u32 %v13385_v25, %v6002_v19  ;;  %v6008_v37 = vshrl.u32 %v13388_v46, %v6002_v19  ;;  %v6011_v51 = vshrl.u32 %v13391_v5, %v6002_v19  ;;  %v6014_v11 = vshrl.u32 %v13392_v34, %v6002_v19 }
 0x369   :  { %v5648_v25 = vor.u32 %v5647_v8, %v5646_v53  ;;  %v5652_v52 = vor.u32 4788187, %v5651_v55  ;;  %v5846_v42 = vsub.s32 0, %v12096_v40  ;;  %v5995_v2 = vor.u32 8388608, %v5994_v15 }
 0x36a   :  { %v6006_v47 = vor.u32 %v6005_v4, %v6004_v16  ;;  %v6009_v46 = vor.u32 %v6008_v37, %v6007_v18  ;;  %v6016_v63 = vshll.u32 %v13392_v34, %v6001_v45  ;;  %v6017_v5 = vshrl.u32 %v13394_v39, %v6002_v19 }
 0x36b   :  { %v6584_v57 = vmin.u32 %v5846_v42, %v12096_v40  ;;  %v6012_v23 = vor.u32 %v6011_v51, %v6010_v56  ;;  %v6015_v22 = vor.u32 %v6014_v11, %v6013_v1  ;;  %vm6019_vm2 = vcmp.lt.s32.totalorder %v6000_v36, 1 }
 0x36c   :  { %v12111_v59 = vsub.f32 %v5381_v14, %v13407_v33  ;;  %v5412_v53 = vmul.f32 %v11941_v0, %v13406_v28  ;;  %v6003_v8 = vshrl.u32 %v13384_v32, %v6002_v19  ;;  %v6018_v55 = vor.u32 %v6017_v5, %v6016_v63 }
 0x36d   :  { %v5655_v15 = vcvt.s32.f32 %v5648_v25  ;;  %v5848_v16 = vclz %v6584_v57  ;;  %vm6021_vm5 = vcmp.lt.s32.totalorder %v6000_v36, 3  ;;  %vm6022_vm0 = vcmp.lt.s32.totalorder %v6000_v36, 4 }
 0x36e   :  { %13408 = vst [vmem:[#allocation50_spill] sm:$0xff] %v12111_v59  ;;  %vm6020_vm3 = vcmp.lt.s32.totalorder %v6000_v36, 2  ;;  %v6024_v34 = vsel %vm6022_vm0, %v6012_v23, 2102212464  ;;  %v6027_v39 = vsel %vm6019_vm2, %v6006_v47, %v6009_v46  ;;  %v6035_v45 = vshll.u32 %v5995_v2, 8 }
 0x36f   :  { %v5653_v4 = vand.u32 2147483647, %v5652_v52  ;;  %v6585_v18 = vadd.s32 4294967294, %v5848_v16  ;;  %v6028_v37 = vsel %vm6022_vm0, %v6015_v22, 920167782  ;;  %v6031_v14 = vsel %vm6019_vm2, %v6009_v46, %v6012_v23 }
 0x370   :  { %v6023_v56 = vsel %vm6019_vm2, %v6003_v8, %v6006_v47  ;;  %v6025_v51 = vsel %vm6021_vm5, %v6009_v46, %v6024_v34  ;;  %v6029_v32 = vsel %vm6021_vm5, %v6012_v23, %v6028_v37  ;;  %v6032_v19 = vsel %vm6022_vm0, %v6018_v55, 1326507024 }
 0x371   :  { %v5836_v1 = vadd.s32 %v12018_v17, %v12026_v27  ;;  %vm6586_vm6 = vcmp.lt.s32.totalorder %v6585_v18, 0  ;;  %v6030_v28 = vsel %vm6020_vm3, %v6027_v39, %v6029_v32  ;;  %v6033_v11 = vsel %vm6021_vm5, %v6015_v22, %v6032_v19  ;;  %v13411_v39 = vld [vmem:[#allocation57_spill] sm:$0xff] }
 0x372   :  { %v5851_v25 = vsel %vm6586_vm6, 0, %v6585_v18  ;;  %v6034_v52 = vsel %vm6020_vm3, %v6031_v14, %v6033_v11  ;;  %v12126_v42 = vmul.u32.u64.low %v6035_v45, %v6030_v28  ;;  %v12127_v2 = vmul.u32.u64.high %v6035_v45, %v6030_v28, %v12126_v42 }
 0x373   :  { %v5852_v47 = vsub.s32 32, %v5851_v25  ;;  %v5853_v46 = vshll.u32 %v12096_v40, %v5851_v25  ;;  %v5856_v63 = vsub.s32 4294967266, %v5851_v25  ;;  %v6026_v5 = vsel %vm6020_vm3, %v6023_v56, %v6025_v51  ;;  %v13418_v51 = vld [vmem:[#allocation46_spill] sm:$0xff] }
 0x374   :  { %v5417_v17 = vmul.f32 %v11951_v13, %v13400_v54  ;;  %v5422_v27 = vmul.f32 %v11951_v13, %v13353_v21  ;;  %v12136_v57 = vmul.u32.u64.low %v6035_v45, %v6034_v52  ;;  %v12137_v23 = vmul.u32.u64.high %v6035_v45, %v6034_v52, %v12136_v57  ;;  %v13410_v54 = vld [vmem:[#allocation53_spill] sm:$0xff] }
 0x375   :  { %v12141_v22 = vsub.f32 %v12085_v38, %v12057_v60  ;;  %v5403_v33 = vadd.f32 %v12076_v9, %v5401_v7  ;;  %v5854_v8 = vshrl.u32 %v5836_v1, %v5852_v47  ;;  %v5857_v40 = vadd.s32 127, %v5856_v63  ;;  %v13412_v9 = vld [vmem:[#allocation52_spill] sm:$0xff]  ;;  %v13419_v1 = vld [vmem:[#allocation54_spill] sm:$0xff]  ;;  %v13420_v47 = vld [vmem:[#allocation23_spill] sm:$0xff] }
 0x376   :  { %v12145_v36 = vsub.f32 %v5395_v35, %v12069_v58  ;;  %v5407_v55 = vadd.f32 %v5406_v26, %v12080_v44  ;;  %vm5782_vm8 = vcmp.lt.s32.totalorder %v13410_v54, 0  ;;  %v6042_v16 = vmul.u32 %v6035_v45, %v6026_v5  ;;  %v13413_v44 = vld [vmem:[#allocation24_spill] sm:$0xff] }
 0x377   :  { %13409 = vst [vmem:[#allocation12_spill] sm:$0xff] %v12141_v22  ;;  %v6045_v34 = vadd.s32 1, %v12127_v2  ;;  %v5414_v18 = vadd.f32 %v13411_v39, %v5412_v53  ;;  %v5656_v37 = vmul.f32 %v5655_v15, %v5653_v4  ;;  %v5855_v14 = vor.u32 %v5854_v8, %v5853_v46  ;;  %v13417_v4 = vld [vmem:[#allocation28_spill] sm:$0xff] }
 0x378   :  { %v5858_v60 = vshll.u32 %v5857_v40, 23  ;;  %v5423_v38 = vadd.f32 %v5422_v27, %v11795_v41  ;;  %v5424_v7 = vmul.f32 %v11941_v0, %v13412_v9  ;;  %v5428_v58 = vmul.f32 %v11941_v0, %v13353_v21  ;;  %v13422_v27 = vld [vmem:[#allocation66_spill] sm:$0xff] }
 0x379   :  { %vm6044_vm11 = vc.u32 %v12137_v23, %v12126_v42  ;;  %v12159_v35 = vsub.f32 %v13413_v44, %v5403_v33  ;;  %v13414_v26 = vand.u32 2147483647, %v13410_v54  ;;  %v5862_v41 = vcvt.s32.f32 %v5855_v14  ;;  %v13426_v44 = vld [vmem:[#allocation44_spill] sm:$0xff] }
 0x37a   :  { %v5859_v15 = vor.u32 4788187, %v5858_v60  ;;  %v6046_v45 = vsel %vm6044_vm11, %v6045_v34, %v12127_v2  ;;  %v5409_v56 = vadd.f32 %v13417_v4, %v5407_v55  ;;  %v5430_v21 = vmul.f32 %v11951_v13, %v13412_v9  ;;  %v13423_v55 = vld [vmem:[#allocation55_spill] sm:$0xff]  ;;  %v13425_v60 = vld [vmem:[#allocation26_spill] sm:$0xff] }
 0x37b   :  { %vm12163_vm13 = vcmp.le.f32.partialorder %v13414_v26, 0.7853982  ;;  %v5433_v32 = vmul.f32 %v11941_v0, %v13418_v51  ;;  %v6047_v19 = vadd.s32 %v6046_v45, %v6042_v16  ;;  %v5434_v28 = vmul.f32 %v11951_v13, %v13419_v1 }
 0x37c   :  { %v5440_v11 = vmul.f32 %v11941_v0, %v13419_v1  ;;  %v5657_v25 = vxor.u32 2147483648, %v5656_v37  ;;  %v5860_v52 = vand.u32 2147483647, %v5859_v15  ;;  %v5416_v46 = vadd.f32 %v13420_v47, %v5414_v18  ;;  %v13427_v15 = vld [vmem:[#allocation16_spill] sm:$0xff] }
 0x37d   :  { %v12178_v2 = vsub.f32 %v5423_v38, %v5424_v7  ;;  %v5456_v63 = vmul.f32 %v11941_v0, %v11400_v48  ;;  %v6048_v5 = vadd.s32 536870912, %v6047_v19  ;;  %v5429_v57 = vadd.f32 %v5428_v58, %v13422_v27  ;;  %v13433_v27 = vld [vmem:[#allocation37_spill] sm:$0xff] }
 0x37e   :  { %v5461_v33 = vmul.f32 %v11941_v0, %v11284_v3  ;;  %v5462_v8 = vmul.f32 %v11951_v13, %v13350_v30  ;;  %v5863_v40 = vmul.f32 %v5862_v41, %v5860_v52  ;;  %v12188_v16 = vsub.f32 %v5409_v56, %v13423_v55 }
 0x37f   :  { %13421 = vst [vmem:[#allocation60_spill] sm:$0xff] %v12178_v2  ;;  %v5450_v34 = vmul.f32 %v11951_v13, %v11400_v48  ;;  %v5468_v39 = vmul.f32 %v11941_v0, %v13350_v30  ;;  %v12194_v18 = vshrl.u32 %v6048_v5, 30  ;;  %v5435_v14 = vadd.f32 %v5434_v28, %v5433_v32  ;;  %v13429_v32 = vld [vmem:[#allocation65_spill] sm:$0xff] }
 0x380   :  { %13424 = vst [vmem:[#allocation35_spill] sm:$0xff] %v12188_v16  ;;  %v5442_v38 = vadd.f32 %v13425_v60, %v5440_v11  ;;  %v5658_v9 = vsel %vm5575_vm9, %v5657_v25, %v5656_v37  ;;  %v5864_v7 = vxor.u32 2147483648, %v5863_v40  ;;  %v5445_v58 = vmul.f32 %v11951_v13, %v13418_v51  ;;  %v13430_v11 = vld [vmem:[#allocation25_spill] sm:$0xff] }
 0x381   :  { %v5457_v26 = vadd.f32 %v5456_v63, %v13426_v44  ;;  %v5458_v48 = vmul.f32 %v11951_v13, %v13427_v15  ;;  %v6050_v41 = vshll.u32 %v12194_v18, 30  ;;  %v12205_v30 = vsub.f32 %v5416_v46, %v5417_v17  ;;  %v13431_v17 = vld [vmem:[#allocation49_spill] sm:$0xff] }
 0x382   :  { %v5431_v45 = vadd.f32 %v5430_v21, %v5429_v57  ;;  %v5463_v4 = vadd.f32 %v5462_v8, %v5461_v33  ;;  %v5865_v56 = vsel %vm5782_vm8, %v5864_v7, %v5863_v40  ;;  %v5470_v37 = vadd.f32 %v13429_v32, %v5468_v39  ;;  %v13432_v21 = vld [vmem:[#allocation70_spill] sm:$0xff]  ;;  %v13435_v39 = vld [vmem:[#allocation48_spill] sm:$0xff]  ;;  %v13436_v60 = vld [vmem:[#allocation41_spill] sm:$0xff] }
 0x383   :  { %13428 = vst [vmem:[#allocation40_spill] sm:$0xff] %v12205_v30  ;;  %v5478_v1 = vmul.f32 %v11951_v13, %v11630_v20  ;;  %v5661_v51 = vsel %vm11897_vm12, %v11266_v49, %v5658_v9  ;;  %v12215_v28 = vsub.s32 %v6047_v19, %v6050_v41  ;;  %v5437_v25 = vadd.f32 %v13430_v11, %v5435_v14  ;;  %v13434_v40 = vld [vmem:[#allocation58_spill] sm:$0xff]  ;;  %v13437_v7 = vld [vmem:[#allocation61_spill] sm:$0xff] }
 0x384   :  { %v5444_v52 = vadd.f32 %v13431_v17, %v5442_v38  ;;  %v5451_v47 = vadd.f32 %v5450_v34, %v13432_v21  ;;  %v5452_v46 = vmul.f32 %v11941_v0, %v13427_v15  ;;  %v5459_v63 = vadd.f32 %v5458_v48, %v5457_v26  ;;  %v13441_v48 = vld [vmem:[#allocation47_spill] sm:$0xff] }
 0x385   :  { %v5473_v5 = vmul.f32 %v11951_v13, %v11284_v3  ;;  %v5868_v24 = vsel %vm12163_vm13, %v13410_v54, %v5865_v56  ;;  %v6053_v19 = vsub.s32 0, %v12215_v28  ;;  %v5465_v57 = vadd.f32 %v13433_v27, %v5463_v4 }
 0x386   :  { %v5480_v33 = vmul.f32 %v11941_v0, %v11447_v6  ;;  %v5484_v8 = vmul.f32 %v11941_v0, %v11630_v20  ;;  %6787 = vcosq.f32 %v5661_v51  ;;  %v5472_v55 = vadd.f32 %v13434_v40, %v5470_v37  ;;  %v13442_v37 = vld [vmem:[#allocation27_spill] sm:$0xff]  ;;  %v13449_v40 = vld [vmem:[#allocation29_spill] sm:$0xff] }
 0x387   :  { %v5479_v34 = vadd.f32 %v5478_v1, %v11856_v10  ;;  %6789 = vsinq.f32 %v5661_v51  ;;  %v6592_v3 = vmin.u32 %v6053_v19, %v12215_v28  ;;  %v5489_v14 = vmul.f32 %v11941_v0, %v13435_v39  ;;  %v13440_v10 = vld [vmem:[#allocation38_spill] sm:$0xff]  ;;  %v13444_v1 = vld [vmem:[#allocation63_spill] sm:$0xff] }
 0x388   :  { %v5490_v38 = vmul.f32 %v11951_v13, %v13436_v60  ;;  %v5866_v9 = vsub.s32 4, %v12082_v43  ;;  %6791 = vcosq.f32 %v5868_v24  ;;  %v12242_v44 = vsub.f32 %v13437_v7, %v5431_v45  ;;  %v13454_v7 = vld [vmem:[#allocation11_spill] sm:$0xff] }
 0x389   :  { %v12244_v20 = vsub.f32 %v5451_v47, %v5452_v46  ;;  %6793 = vsinq.f32 %v5868_v24  ;;  %v6055_v26 = vclz %v6592_v3  ;;  %v12247_v15 = vsub.f32 %v5437_v25, %v13440_v10  ;;  %v13456_v10 = vld [vmem:[#allocation68_spill] sm:$0xff] }
 0x38a   :  { %13438 = vst [vmem:[#allocation64_spill] sm:$0xff] %v12242_v44  ;;  %v5485_v41 = vadd.f32 %v5484_v8, %v13441_v48  ;;  %v5486_v4 = vmul.f32 %v11951_v13, %v11447_v6  ;;  %v5496_v56 = vmul.f32 %v11941_v0, %v13436_v60  ;;  %v12254_v32 = vsub.f32 %v5444_v52, %v5445_v58  ;;  %v13447_v52 = vld [vmem:[#allocation32_spill] sm:$0xff]  ;;  %v13453_v60 = vld [vmem:[#allocation75_spill] sm:$0xff] }
 0x38b   :  { %13439 = vst [vmem:[#allocation72_spill] sm:$0xff] %v12244_v20  ;;  %v12257_v45 = vsub.f32 %v13442_v37, %v5459_v63  ;;  %v12260_v51 = vsub.f32 %v5465_v57, %v13444_v1  ;;  %v6593_v11 = vadd.s32 4294967294, %v6055_v26  ;;  %v12262_v17 = vsub.f32 %v5472_v55, %v5473_v5  ;;  %v13448_v5 = vld [vmem:[#allocation39_spill] sm:$0xff]  ;;  %v13457_v37 = vld [vmem:[#allocation18_spill] sm:$0xff] }
 0x38c   :  { %v12264_v25 = vsub.f32 %v5479_v34, %v5480_v33  ;;  %v5491_v21 = vadd.f32 %v5490_v38, %v5489_v14  ;;  %v5867_v6 = vsel %vm5782_vm8, %v5866_v9, %v12082_v43  ;;  %v12271_v58 = vmul.f32 %v11951_v13, %v13435_v39  ;;  %v13451_v34 = vld [vmem:[#allocation67_spill] sm:$0xff]  ;;  %v13452_v14 = vld [vmem:[#allocation30_spill] sm:$0xff] }
 0x38d   :  { %13443 = vst [vmem:[#allocation17_spill] sm:$0xff] %v12257_v45  ;;  %13445 = vst [vmem:[#allocation59_spill] sm:$0xff] %v12260_v51  ;;  %v5506_v47 = vmul.f32 %v11951_v13, %v13447_v52  ;;  %v6043_v46 = vadd.s32 %v12126_v42, %v12137_v23  ;;  %vm6594_vm9 = vcmp.lt.s32.totalorder %v6593_v11, 0  ;;  %v5487_v63 = vadd.f32 %v5486_v4, %v5485_v41  ;;  %v13450_v42 = vld [vmem:[#allocation56_spill] sm:$0xff] }
 0x38e   :  { %13446 = vst [vmem:[#allocation19_spill] sm:$0xff] %v12262_v17  ;;  %v5498_v24 = vadd.f32 %v13448_v5, %v5496_v56  ;;  %v5512_v19 = vmul.f32 %v11941_v0, %v13447_v52  ;;  %v6058_v27 = vsel %vm6594_vm9, 0, %v6593_v11  ;;  %v5869_v43 = vsel %vm12163_vm13, 0, %v5867_v6  ;;  %v13458_v11 = vld [vmem:[#allocation13_spill] sm:$0xff] }
 0x38f   :  { %v6059_v57 = vsub.s32 32, %v6058_v27  ;;  %v6060_v33 = vshll.u32 %v12215_v28, %v6058_v27  ;;  %v6063_v8 = vsub.s32 4294967266, %v6058_v27  ;;  %v12285_v55 = vmul.f32 %v11941_v0, %v13449_v40 }
 0x390   :  { %v5517_v23 = vmul.f32 %v11941_v0, %v13450_v42  ;;  %v5518_v3 = vmul.f32 %v11951_v13, %v13451_v34  ;;  %v5524_v39 = vmul.f32 %v11941_v0, %v13451_v34  ;;  %v12294_v53 = vadd.f32 %v13452_v14, %v5491_v21 }
 0x391   :  { %v12297_v38 = vadd.f32 %v5506_v47, %v13453_v60  ;;  %v6061_v28 = vshrl.u32 %v6043_v46, %v6059_v57  ;;  %v6064_v9 = vadd.s32 127, %v6063_v8  ;;  %v12300_v26 = vsub.f32 %v13454_v7, %v5487_v63  ;;  %v13466_v7 = vld [vmem:[#allocation45_spill] sm:$0xff] }
 0x392   :  { %v12303_v48 = vadd.f32 %v13456_v10, %v5498_v24  ;;  %v12307_v41 = vmul.f32 %v11951_v13, %v13449_v40  ;;  %v5976_v4 = vadd.s32 3, %v5869_v43  ;;  %vm5989_vm12 = vcmp.lt.s32.totalorder %v11614_v12, 0  ;;  %v13462_v24 = vld [vmem:[#allocation77_spill] sm:$0xff] }
 0x393   :  { %13455 = vst [vmem:[#allocation9_spill] sm:$0xff] %v12300_v26  ;;  %v12310_v56 = vpop.eup %6787  ;;  %v5513_v1 = vadd.f32 %v5512_v19, %v13457_v37  ;;  %v5666_v21 = vand.u32 3, %v13458_v11  ;;  %v13459_v6 = vand.u32 2147483647, %v11614_v12  ;;  %v6062_v47 = vor.u32 %v6061_v28, %v6060_v33  ;;  %v13463_v19 = vld [vmem:[#allocation15_spill] sm:$0xff] }
 0x394   :  { %v6065_v46 = vshll.u32 %v6064_v9, 23  ;;  %v12320_v63 = vpop.eup %6789  ;;  %v5519_v5 = vadd.f32 %v5518_v3, %v5517_v23  ;;  %v5526_v27 = vadd.f32 %v13462_v24, %v5524_v39  ;;  %v12325_v57 = vmul.f32 %v11951_v13, %v13450_v42  ;;  %v13464_v9 = vld [vmem:[#allocation43_spill] sm:$0xff]  ;;  %v13465_v3 = vld [vmem:[#allocation34_spill] sm:$0xff] }
 0x395   :  { %vm12316_vm4 = vcmp.le.f32.partialorder %v13459_v6, 0.7853982  ;;  %v5534_v8 = vmul.f32 %v11951_v13, %v13463_v19  ;;  %v6792_v40 = vpop.eup %6791  ;;  %v5540_v34 = vmul.f32 %v11941_v0, %v13463_v19  ;;  %v5873_v14 = vand.u32 3, %v5869_v43 }
 0x396   :  { %v6066_v60 = vor.u32 4788187, %v6065_v46  ;;  %v6069_v33 = vcvt.s32.f32 %v6062_v47  ;;  %v6794_v28 = vpop.eup %6793  ;;  %v5542_v23 = vmul.f32 %v11951_v13, %v13464_v9  ;;  %v5545_v39 = vmul.f32 %v11941_v0, %v13465_v3 }
 0x397   :  { %v5546_v42 = vmul.f32 %v11951_v13, %v13466_v7  ;;  %v5977_v10 = vand.u32 3, %v5976_v4  ;;  %v5552_v37 = vmul.f32 %v11941_v0, %v13466_v7  ;;  %vm5668_vm1 = vcmp.eq.s32.totalorder %v5666_v21, 0 }
 0x398   :  { %v5769_v6 = vadd.s32 3, %v13458_v11  ;;  %v6067_v43 = vand.u32 2147483647, %v6066_v60  ;;  %vm5665_vm10 = vweird.f32 %v11266_v49  ;;  %v5669_v47 = vxor.u32 2147483648, %v12320_v63 }
 0x399   :  { %v5672_v46 = vxor.u32 2147483648, %v12310_v56  ;;  %vm5872_vm14 = vweird.f32 %v13410_v54  ;;  %v5879_v24 = vxor.u32 2147483648, %v6792_v40  ;;  %v6073_v19 = vsub.s32 4, %v12194_v18 }
 0x39a   :  { %vm5671_vm15 = vcmp.eq.s32.totalorder %v5666_v21, 2  ;;  %v5876_v4 = vxor.u32 2147483648, %v6794_v28  ;;  %vm5878_vm7 = vcmp.eq.s32.totalorder %v5873_v14, 2  ;;  %v6070_v45 = vmul.f32 %v6069_v33, %v6067_v43 }
 0x39b   :  { %vm5667_vm2 = vcmp.lt.s32.totalorder %v5666_v21, 2  ;;  %vm5875_vm5 = vcmp.eq.s32.totalorder %v5873_v14, 0  ;;  %vm5979_vm0 = vcmp.eq.s32.totalorder %v5977_v10, 0  ;;  %vm5982_vm3 = vcmp.eq.s32.totalorder %v5977_v10, 2 }
 0x39c   :  { %v5770_v11 = vand.u32 3, %v5769_v6  ;;  %vm5874_vm6 = vcmp.lt.s32.totalorder %v5873_v14, 2  ;;  %vm5978_vm8 = vcmp.lt.s32.totalorder %v5977_v10, 2  ;;  %v6071_v60 = vxor.u32 2147483648, %v6070_v45  ;;  %v13467_v6 = vld [vmem:[#allocation21_spill] sm:$0xff]  ;;  %v13474_v14 = vld [vmem:[#allocation14_spill] sm:$0xff] }
 0x39d   :  { %v5670_v7 = vsel %vm5668_vm1, %v12310_v56, %v5669_v47  ;;  %v5673_v20 = vsel %vm5671_vm15, %v5672_v46, %v12320_v63  ;;  %v5880_v30 = vsel %vm5878_vm7, %v5879_v24, %v6794_v28  ;;  %v6074_v16 = vsel %vm5989_vm12, %v6073_v19, %v12194_v18 }
 0x39e   :  { %v5877_v2 = vsel %vm5875_vm5, %v6792_v40, %v5876_v4  ;;  %v5981_v33 = vsel %vm5979_vm0, %v6792_v40, %v5876_v4  ;;  %v5984_v43 = vsel %vm5982_vm3, %v5879_v24, %v6794_v28  ;;  %v6072_v44 = vsel %vm5989_vm12, %v6071_v60, %v6070_v45 }
 0x39f   :  { %v5541_v59 = vadd.f32 %v5540_v34, %v13467_v6  ;;  %v5547_v22 = vadd.f32 %v5546_v42, %v5545_v39  ;;  %v5554_v17 = vadd.f32 %v13468_v50, %v5552_v37  ;;  %v6075_v51 = vsel %vm12316_vm4, %v11614_v12, %v6072_v44  ;;  %v13469_v50 = vld [vmem:[#allocation31_spill] sm:$0xff]  ;;  %v13470_v39 = vld [vmem:[#allocation73_spill] sm:$0xff]  ;;  %v13478_v37 = vld [vmem:[#allocation10_spill] sm:$0xff] }
 0x3a0   :  { %v5674_v26 = vsel %vm5667_vm2, %v5670_v7, %v5673_v20  ;;  %vm5772_vm11 = vcmp.eq.s32.totalorder %v5770_v11, 0  ;;  %vm5775_vm13 = vcmp.eq.s32.totalorder %v5770_v11, 2  ;;  %6795 = vcosq.f32 %v6075_v51  ;;  %v13471_v20 = vld [vmem:[#allocation69_spill] sm:$0xff] }
 0x3a1   :  { %v5881_v18 = vsel %vm5874_vm6, %v5877_v2, %v5880_v30  ;;  %v5985_v40 = vsel %vm5978_vm8, %v5981_v33, %v5984_v43  ;;  %v6076_v45 = vsel %vm12316_vm4, 0, %v6074_v16  ;;  %6797 = vsinq.f32 %v6075_v51 }
 0x3a2   :  { %v5515_v34 = vadd.f32 %v12307_v41, %v5513_v1  ;;  %v5521_v28 = vadd.f32 %v13469_v50, %v5519_v5  ;;  %v5535_v42 = vadd.f32 %v5534_v8, %v13470_v39  ;;  %v5536_v44 = vmul.f32 %v11941_v0, %v13464_v9  ;;  %v13472_v5 = vld [vmem:[#allocation22_spill] sm:$0xff]  ;;  %v13475_v9 = vld [vmem:[#allocation36_spill] sm:$0xff] }
 0x3a3   :  { %v5528_v21 = vadd.f32 %v13471_v20, %v5526_v27  ;;  %vm5771_vm9 = vcmp.lt.s32.totalorder %v5770_v11, 2  ;;  %v5774_v2 = vsel %vm5772_vm11, %v12310_v56, %v5669_v47  ;;  %v5777_v30 = vsel %vm5775_vm13, %v5672_v46, %v12320_v63  ;;  %v13473_v8 = vld [vmem:[#allocation74_spill] sm:$0xff] }
 0x3a4   :  { %v5675_v16 = vsel %vm5665_vm10, nan, %v5674_v26  ;;  %v5882_v51 = vsel %vm5872_vm14, nan, %v5881_v18  ;;  %v5986_v41 = vsel %vm5872_vm14, nan, %v5985_v40  ;;  %v6183_v1 = vadd.s32 3, %v6076_v45 }
 0x3a5   :  { %v5543_v52 = vadd.f32 %v5542_v23, %v5541_v59  ;;  %v5549_v0 = vadd.f32 %v13472_v5, %v5547_v22  ;;  %v5556_v27 = vadd.f32 %v13473_v8, %v5554_v17  ;;  %v5557_v56 = vmul.f32 %v11951_v13, %v13465_v3  ;;  %v13476_v3 = vld [vmem:[#allocation62_spill] sm:$0xff]  ;;  %v13481_v5 = vld [vmem:[#allocation19_spill] sm:$0xff] }
 0x3a6   :  { %v12383_v63 = vsub.f32 %v12294_v53, %v13474_v14  ;;  %v12387_v26 = vsub.f32 %v12303_v48, %v12271_v58  ;;  %v12391_v54 = vsub.f32 %v12297_v38, %v12285_v55  ;;  %v6080_v59 = vand.u32 3, %v6076_v45  ;;  %v13477_v55 = vld [vmem:[#allocation71_spill] sm:$0xff] }
 0x3a7   :  { %v5516_v22 = vsub.f32 %v13475_v9, %v5515_v34  ;;  %v5778_v17 = vsel %vm5771_vm9, %v5774_v2, %v5777_v30  ;;  %v12395_v23 = vmul.f32 %v5882_v51, %v5675_v16  ;;  %v12397_v13 = vmul.f32 %v5986_v41, %v5675_v16  ;;  %v13479_v16 = vld [vmem:[#allocation9_spill] sm:$0xff] }
 0x3a8   :  { %v12400_v53 = vsub.f32 %v5521_v28, %v13476_v3  ;;  %v12403_v10 = vsub.f32 %v5528_v21, %v12325_v57  ;;  %v12405_v58 = vsub.f32 %v5535_v42, %v5536_v44  ;;  %v6184_v48 = vand.u32 3, %v6183_v1  ;;  %v13480_v1 = vld [vmem:[#allocation59_spill] sm:$0xff]  ;;  %v13482_v3 = vld [vmem:[#allocation76_spill] sm:$0xff] }
 0x3a9   :  { %v12408_v38 = vsub.f32 %v13477_v55, %v5543_v52  ;;  %v12411_v47 = vsub.f32 %v5549_v0, %v13478_v37  ;;  %v12413_v46 = vsub.f32 %v5556_v27, %v5557_v56  ;;  %vm6079_vm12 = vweird.f32 %v11614_v12  ;;  %v13483_v55 = vld [vmem:[#allocation42_spill] sm:$0xff] }
 0x3aa   :  { %v5779_v24 = vsel %vm5665_vm10, nan, %v5778_v17  ;;  %vm6081_vm4 = vcmp.lt.s32.totalorder %v6080_v59, 2  ;;  %v6212_v57 = vmul.f32 %v12395_v23, %v12053_v31  ;;  %v6213_v19 = vmul.f32 %v12397_v13, %v12059_v62 }
 0x3ab   :  { %vm6082_vm1 = vcmp.eq.s32.totalorder %v6080_v59, 0  ;;  %vm6085_vm14 = vcmp.eq.s32.totalorder %v6080_v59, 2  ;;  %v6226_v4 = vmul.f32 %v12395_v23, %v12145_v36  ;;  %v6227_v11 = vmul.f32 %v12397_v13, %v12159_v35 }
 0x3ac   :  { %vm6185_vm15 = vcmp.lt.s32.totalorder %v6184_v48, 2  ;;  %vm6186_vm7 = vcmp.eq.s32.totalorder %v6184_v48, 0  ;;  %vm6189_vm2 = vcmp.eq.s32.totalorder %v6184_v48, 2  ;;  %v6201_v49 = vmul.f32 %v12395_v23, %v12049_v61 }
 0x3ad   :  { %v6796_v60 = vpop.eup %6795  ;;  %v12430_v7 = vmul.f32 %v12397_v13, %v12065_v29  ;;  %v6206_v33 = vmul.f32 %v12395_v23, %v12065_v29  ;;  %v6208_v43 = vmul.f32 %v12397_v13, %v12049_v61  ;;  %v12438_v6 = vmul.f32 %v12395_v23, %v12059_v62 }
 0x3ae   :  { %v6798_v18 = vpop.eup %6797  ;;  %v6086_v40 = vxor.u32 2147483648, %v6796_v60  ;;  %v6214_v45 = vadd.f32 %v6213_v19, %v6212_v57  ;;  %v6220_v34 = vmul.f32 %v12397_v13, %v12053_v31  ;;  %v12444_v50 = vmul.f32 %v12395_v23, %v12159_v35  ;;  %v13484_v57 = vld [vmem:[#allocation12_spill] sm:$0xff] }
 0x3af   :  { %v6083_v28 = vxor.u32 2147483648, %v6798_v18  ;;  %v6228_v39 = vadd.f32 %v6227_v11, %v6226_v4  ;;  %v6234_v29 = vmul.f32 %v12397_v13, %v12145_v36  ;;  %v12450_v61 = vmul.f32 %v12395_v23, %v12247_v15 }
 0x3b0   :  { %v6087_v62 = vsel %vm6085_vm14, %v6086_v40, %v6798_v18  ;;  %v6191_v42 = vsel %vm6189_vm2, %v6086_v40, %v6798_v18  ;;  %v12456_v31 = vmul.f32 %v12397_v13, %v12254_v32  ;;  %v12460_v35 = vmul.f32 %v12395_v23, %v12254_v32  ;;  %v13485_v40 = vld [vmem:[#allocation50_spill] sm:$0xff] }
 0x3b1   :  { %v6084_v44 = vsel %vm6082_vm1, %v6796_v60, %v6083_v28  ;;  %v6188_v36 = vsel %vm6186_vm7, %v6796_v60, %v6083_v28  ;;  %v12466_v20 = vmul.f32 %v12397_v13, %v12247_v15  ;;  %v12470_v21 = vmul.f32 %v12395_v23, %v12264_v25 }
 0x3b2   :  { %v6088_v2 = vsel %vm6081_vm4, %v6084_v44, %v6087_v62  ;;  %v6192_v30 = vsel %vm6185_vm15, %v6188_v36, %v6191_v42  ;;  %v12476_v32 = vmul.f32 %v12397_v13, %v13479_v16  ;;  %v6262_v51 = vmul.f32 %v12395_v23, %v13479_v16  ;;  %v13486_v62 = vld [vmem:[#allocation64_spill] sm:$0xff] }
 0x3b3   :  { %v6089_v41 = vsel %vm6079_vm12, nan, %v6088_v2  ;;  %v6193_v15 = vsel %vm6079_vm12, nan, %v6192_v30  ;;  %v6268_v52 = vmul.f32 %v12395_v23, %v13480_v1  ;;  %v6269_v0 = vmul.f32 %v12397_v13, %v13481_v5 }
 0x3b4   :  { %v12488_v8 = vmul.f32 %v6089_v41, %v5779_v24  ;;  %v12490_v27 = vmul.f32 %v6193_v15, %v5779_v24  ;;  %v6264_v56 = vmul.f32 %v12397_v13, %v12264_v25  ;;  %v12496_v14 = vmul.f32 %v12395_v23, %v13481_v5 }
 0x3b5   :  { %v6276_v12 = vmul.f32 %v12397_v13, %v13480_v1  ;;  %v6282_v59 = vmul.f32 %v12395_v23, %v12391_v54  ;;  %v6283_v9 = vmul.f32 %v12397_v13, %v5516_v22  ;;  %v12504_v17 = vmul.f32 %v12395_v23, %v5516_v22  ;;  %v13487_v1 = vld [vmem:[#allocation60_spill] sm:$0xff] }
 0x3b6   :  { %v6198_v48 = vmul.f32 %v12488_v8, %v13482_v3  ;;  %v6199_v25 = vmul.f32 %v12490_v27, %v13483_v55  ;;  %v6205_v37 = vmul.f32 %v12488_v8, %v13483_v55  ;;  %v6290_v24 = vmul.f32 %v12397_v13, %v12391_v54 }
 0x3b7   :  { %v6215_v19 = vmul.f32 %v12490_v27, %v13484_v57  ;;  %v6221_v4 = vmul.f32 %v12488_v8, %v13484_v57  ;;  %v6270_v22 = vadd.f32 %v6269_v0, %v6268_v52  ;;  %v12520_v11 = vmul.f32 %v12395_v23, %v12411_v47  ;;  %v13490_v57 = vld [vmem:[#allocation72_spill] sm:$0xff] }
 0x3b8   :  { %v6200_v60 = vadd.f32 %v6199_v25, %v6198_v48  ;;  %v6207_v18 = vadd.f32 %v6206_v33, %v6205_v37  ;;  %v6223_v28 = vmul.f32 %v12490_v27, %v13485_v40  ;;  %v6229_v42 = vmul.f32 %v12490_v27, %v13486_v62  ;;  %v13489_v25 = vld [vmem:[#allocation40_spill] sm:$0xff] }
 0x3b9   :  { %v6216_v54 = vadd.f32 %v6215_v19, %v6214_v45  ;;  %v6217_v44 = vmul.f32 %v12488_v8, %v13485_v40  ;;  %v6222_v36 = vadd.f32 %v6221_v4, %v6220_v34  ;;  %v6235_v2 = vmul.f32 %v12488_v8, %v13486_v62 }
 0x3ba   :  { %v6202_v30 = vadd.f32 %v6201_v49, %v6200_v60  ;;  %v6209_v16 = vadd.f32 %v6208_v43, %v6207_v18  ;;  %v6210_v41 = vmul.f32 %v12490_v27, %v13482_v3  ;;  %v12534_v33 = vmul.f32 %v12397_v13, %v12413_v46 }
 0x3bb   :  { %v6230_v15 = vadd.f32 %v6229_v42, %v6228_v39  ;;  %v6231_v45 = vmul.f32 %v12488_v8, %v13487_v1  ;;  %v6236_v52 = vadd.f32 %v6235_v2, %v6234_v29  ;;  %v6237_v34 = vmul.f32 %v12490_v27, %v13487_v1  ;;  %v13488_v39 = vld [vmem:[#allocation35_spill] sm:$0xff] }
 0x3bc   :  { %v6224_v5 = vadd.f32 %v6223_v28, %v6222_v36  ;;  %v6284_v0 = vadd.f32 %v6283_v9, %v6282_v59  ;;  %v6304_v49 = vmul.f32 %v12395_v23, %v12413_v46  ;;  %v6306_v43 = vmul.f32 %v12397_v13, %v12411_v47  ;;  %v13491_v9 = vld [vmem:[#allocation17_spill] sm:$0xff] }
 0x3bd   :  { %v6204_v3 = vsub.f32 %v6202_v30, %v12430_v7  ;;  %v12545_v48 = vsub.f32 %v6216_v54, %v6217_v44  ;;  %v6240_v55 = vmul.f32 %v12488_v8, %v13488_v39  ;;  %v6241_v29 = vmul.f32 %v12490_v27, %v13489_v25 }
 0x3be   :  { %v6211_v37 = vsub.f32 %v6209_v16, %v6210_v41  ;;  %v6254_v59 = vmul.f32 %v12488_v8, %v13490_v57  ;;  %v6255_v23 = vmul.f32 %v12490_v27, %v13491_v9  ;;  %v6261_v13 = vmul.f32 %v12488_v8, %v13491_v9 }
 0x3bf   :  { %v6232_v47 = vsub.f32 %v6230_v15, %v6231_v45  ;;  %v6238_v46 = vadd.f32 %v6237_v34, %v6236_v52  ;;  %v6247_v7 = vmul.f32 %v12488_v8, %v13489_v25  ;;  %v6271_v19 = vmul.f32 %v12490_v27, %v12387_v26 }
 0x3c0   :  { %v6225_v4 = vsub.f32 %v12438_v6, %v6224_v5  ;;  %v6256_v60 = vadd.f32 %v6255_v23, %v6254_v59  ;;  %v6263_v18 = vadd.f32 %v6262_v51, %v6261_v13  ;;  %v6273_v40 = vmul.f32 %v12488_v8, %v12383_v63 }
 0x3c1   :  { %v6242_v28 = vadd.f32 %v6241_v29, %v6240_v55  ;;  %v6272_v62 = vadd.f32 %v6271_v19, %v6270_v22  ;;  %v6277_v42 = vmul.f32 %v12488_v8, %v12387_v26  ;;  %v6279_v54 = vmul.f32 %v12490_v27, %v12383_v63 }
 0x3c2   :  { %v6258_v44 = vadd.f32 %v12470_v21, %v6256_v60  ;;  %v6265_v36 = vadd.f32 %v6264_v56, %v6263_v18  ;;  %v6266_v2 = vmul.f32 %v12490_v27, %v13490_v57  ;;  %v6285_v6 = vmul.f32 %v12490_v27, %v12408_v38 }
 0x3c3   :  { %v6239_v51 = vsub.f32 %v12444_v50, %v6238_v46  ;;  %v6278_v30 = vadd.f32 %v6277_v42, %v6276_v12  ;;  %v6287_v22 = vmul.f32 %v12488_v8, %v12405_v58  ;;  %v6291_v26 = vmul.f32 %v12488_v8, %v12408_v38 }
 0x3c4   :  { %v6249_v63 = vadd.f32 %v12460_v35, %v6247_v7  ;;  %v6274_v16 = vsub.f32 %v6272_v62, %v6273_v40  ;;  %v6286_v21 = vadd.f32 %v6285_v6, %v6284_v0  ;;  %v6293_v56 = vmul.f32 %v12490_v27, %v12405_v58 }
 0x3c5   :  { %v6280_v41 = vadd.f32 %v6279_v54, %v6278_v30  ;;  %v6292_v15 = vadd.f32 %v6291_v26, %v6290_v24  ;;  %v6296_v1 = vmul.f32 %v12488_v8, %v12400_v53  ;;  %v6297_v50 = vmul.f32 %v12490_v27, %v12403_v10 }
 0x3c6   :  { %v6260_v12 = vsub.f32 %v6258_v44, %v12476_v32  ;;  %v6267_v45 = vsub.f32 %v6265_v36, %v6266_v2  ;;  %v6288_v52 = vsub.f32 %v6286_v21, %v6287_v22  ;;  %v6303_v38 = vmul.f32 %v12488_v8, %v12403_v10 }
 0x3c7   :  { %v6294_v35 = vadd.f32 %v6293_v56, %v6292_v15  ;;  %v6298_v34 = vadd.f32 %v6297_v50, %v6296_v1  ;;  %v6310_v5 = vmul.f32 %v6232_v47, %v6232_v47  ;;  %v6311_v0 = vmul.f32 %v6239_v51, %v6239_v51 }
 0x3c8   :  { %v6305_v58 = vadd.f32 %v6304_v49, %v6303_v38  ;;  %v6308_v24 = vmul.f32 %v12490_v27, %v12400_v53  ;;  %v6317_v55 = vmul.f32 %v6204_v3, %v6204_v3  ;;  %v6318_v25 = vmul.f32 %v6211_v37, %v6211_v37 }
 0x3c9   :  { %v6281_v29 = vsub.f32 %v12496_v14, %v6280_v41  ;;  %v6295_v57 = vsub.f32 %v12504_v17, %v6294_v35  ;;  %v6300_v32 = vadd.f32 %v12520_v11, %v6298_v34  ;;  %v6313_v59 = vmul.f32 %v6288_v52, %v6288_v52 }
 0x3ca   :  { %v6244_v9 = vadd.f32 %v12450_v61, %v6242_v28  ;;  %v6251_v10 = vadd.f32 %v12466_v20, %v6249_v63  ;;  %v6252_v8 = vmul.f32 %v12490_v27, %v13488_v39  ;;  %v6307_v49 = vadd.f32 %v6306_v43, %v6305_v58 }
 0x3cb   :  { %v6312_v23 = vadd.f32 %v6311_v0, %v6310_v5  ;;  %v6314_v13 = vmul.f32 %v6295_v57, %v6295_v57  ;;  %v6321_v53 = vmul.f32 %v6260_v12, %v6260_v12  ;;  %v6322_v3 = vmul.f32 %v6267_v45, %v6267_v45 }
 0x3cc   :  { %v6319_v37 = vadd.f32 %v6318_v25, %v6317_v55  ;;  %v6325_v47 = vmul.f32 %v6274_v16, %v6274_v16  ;;  %v6302_v14 = vsub.f32 %v6300_v32, %v12534_v33  ;;  %v6309_v17 = vsub.f32 %v6307_v49, %v6308_v24 }
 0x3cd   :  { %v6315_v46 = vadd.f32 %v6314_v13, %v6313_v59  ;;  %v6326_v11 = vmul.f32 %v6281_v29, %v6281_v29  ;;  %v6246_v7 = vsub.f32 %v6244_v9, %v12456_v31  ;;  %v6253_v61 = vsub.f32 %v6251_v10, %v6252_v8 }
 0x3ce   :  { %v6323_v20 = vadd.f32 %v6322_v3, %v6321_v53  ;;  %v6329_v27 = vmul.f32 %v12545_v48, %v12545_v48  ;;  %v6330_v43 = vmul.f32 %v6225_v4, %v6225_v4  ;;  %v6333_v18 = vmul.f32 %v6302_v14, %v6302_v14 }
 0x3cf   :  { %v6316_v19 = vadd.f32 %v6315_v46, %v6312_v23  ;;  %v6327_v60 = vadd.f32 %v6326_v11, %v6325_v47  ;;  %v6334_v40 = vmul.f32 %v6309_v17, %v6309_v17  ;;  %v6337_v42 = vmul.f32 %v6246_v7, %v6246_v7 }
 0x3d0   :  { %v6331_v62 = vadd.f32 %v6330_v43, %v6329_v27  ;;  %v6338_v33 = vmul.f32 %v6253_v61, %v6253_v61 }
 0x3d1   :  { %v6320_v39 = vadd.f32 %v6319_v37, %v6316_v19  ;;  %v6335_v44 = vadd.f32 %v6334_v40, %v6333_v18 }
 0x3d2   :  { %v6339_v2 = vadd.f32 %v6338_v33, %v6337_v42 }
 0x3d3   :  { %v6324_v28 = vadd.f32 %v6323_v20, %v6320_v39 }
 0x3d5   :  { %v6328_v54 = vadd.f32 %v6327_v60, %v6324_v28 }
 0x3d7   :  { %v6332_v36 = vadd.f32 %v6331_v62, %v6328_v54 }
 0x3d9   :  { %v6336_v31 = vadd.f32 %v6335_v44, %v6332_v36 }
 0x3db   :  { %v6340_v6 = vadd.f32 %v6339_v2, %v6336_v31 }
 0x3dd   :  { %v6341_v51 = vmul.f32 2.0, %v6340_v6 }
 0x3df   :  { %v6342_v30 = vsub.f32 1.0, %v6341_v51 }
 0x3e1   :  { %6343 = vst [vmem:[%s12607_s3] sm:$0xff] %v6342_v30 }
 0x3e2   :  { %6348 = vsyncpa [#allocation3], 1 }
 0x3e3   :  { %6349 = vsyncpa [#allocation5], 1 }

</bundles_post_ra>
